<compile_context>
chip_gen: v7x
topology: tpu7x:2x2x1
jax: 0.10.0
libtpu: 0.0.40
codegen_flags: <defaults>
</compile_context>

<pallas_src>
import functools
import numpy as np
import jax
import jax.numpy as jnp
from jax.experimental import pallas as pl
from jax.experimental.pallas import tpu as pltpu

# ----------------------------- configuration --------------------------------
C = 8            # in_channels (VAE latent dim); x is (B, C, 1, 1) in torch
CH = C // 2      # half channels for the coupling split
DC = 16          # conditioning dim
E = 16           # flow conditioning-embedding dim
HE = 32          # embedder hidden dim
DEPTH_E = 2      # embedder hidden depth
H = 32           # coupling-net hidden dim
DEPTH = 2        # coupling-net hidden depth
NF = 4           # number of flow blocks
NPASS = NF * 2   # coupling passes total
ALPHA = 0.9      # InvLeakyRelu alpha
LRELU_SLOPE = 0.01  # nn.LeakyReLU default slope inside the MLPs

HW = 128         # fused per-pass hidden width: [s-hidden | t-hidden | 1 | 0-pad]
ONE_COL = 2 * H  # lane carrying the constant 1.0 that folds all biases
OUT_LANES = 128  # merged output slab: zz in lanes 0..C-1, logdet in lane C
TB = 128         # batch tile per grid step (multiple of 8; matches v5e MXU
                 # height — raise to 256..1024 on v6e/v7x for more throughput)

# TODO(synk): ActNorm data-dependent initialization (training-time side effect)
# is not modeled; the kernel implements the eval-time forward semantics.
# TODO(synk): bf16 weight/activation casts (2-3x MXU on v6e/v7x) left out to
# keep the exp(s) chain within the 2e-3 validation tolerance; math stays f32.


def _lrelu(v):
    return jnp.where(v >= 0, v, LRELU_SLOPE * v)


# -------------------- host-side parameter folding / packing ------------------
class _Packer:
    """Packs many small f32 matrices into one (rows, 128) slab (one DMA)."""

    def __init__(self, lanes=128):
        self.lanes = lanes
        self._chunks = []
        self.offsets = {}
        self._n = 0

    def add(self, name, arr):
        arr = np.asarray(arr, np.float32)
        if arr.ndim == 1:
            arr = arr[None, :]
        r, c = arr.shape
        assert c <= self.lanes, (name, arr.shape)
        buf = np.zeros((r, self.lanes), np.float32)
        buf[:, :c] = arr
        self.offsets[name] = (self._n, r, c)
        self._chunks.append(buf)
        self._n += r
        pad = (-self._n) % 8                       # keep blocks 8-row aligned
        if pad:
            self._chunks.append(np.zeros((pad, self.lanes), np.float32))
            self._n += pad

    def finalize(self):
        return np.concatenate(self._chunks, axis=0), self.offsets


def prepare_params(params):
    """Folds shuffles / half-swaps / biases into weights, packs into 2 slabs."""
    (we0, be0, weh, beh, weo, beo, an_loc, an_scale,
     w0x, w0c, b0, wh, bh, wo, bo, P) = [np.asarray(p, np.float32) for p in params]

    # static shuffle permutations recovered from the permutation matrices
    perms = [np.argmax(P[f], axis=0) for f in range(NF)]
    tau = (np.arange(C) + CH) % C          # half-swap done by the double coupling
    # carried-basis maps: true x_f[:, j] == y[:, sigma_f[j]]
    sigmas = [np.arange(C)]
    for f in range(NF):
        sigmas.append(sigmas[-1][tau[perms[f]]])

    pk = _Packer(128)

    # ---- embedder weights; its 4 biases share one small block ----
    pk.add("emb_w0", we0)
    for d in range(DEPTH_E):
        pk.add("emb_wh%d" % d, weh[d])
    pk.add("emb_wo", weo)
    emb_b = np.zeros((2 + DEPTH_E, 128), np.float32)
    emb_b[0, :HE] = be0
    for d in range(DEPTH_E):
        emb_b[1 + d, :HE] = beh[d]
    emb_b[1 + DEPTH_E, :E] = beo
    pk.add("emb_b", emb_b)

    # ---- ActNorm params permuted into the carried basis ----
    an = np.zeros((2 * NF, C), np.float32)
    for f in range(NF):
        sig = sigmas[f]
        an[f, sig] = an_loc[f, 0]
        an[NF + f, sig] = an_scale[f, 0]
    pk.add("an", an)

    # ---- coupling nets: fused block-diagonal MLPs, 128-lane groups ----
    NW = NPASS * HW                        # total conditioning-proj width (1024)
    wc_mat = np.zeros((E + 1, NW), np.float32)

    for f in range(NF):
        sig = sigmas[f]
        for i in range(2):
            n = f * 2 + i
            si = f * 4 + 2 * i             # s-net index in raw params
            ti = si + 1                    # t-net index
            cond = sig[:CH] if i == 0 else sig[CH:]   # conditioner carried cols
            upd = sig[CH:] if i == 0 else sig[:CH]    # updated carried cols
            base = n * HW

            # fused first layer (x part): cols 0..H-1 s-net, H..2H-1 t-net
            w0x_f = np.zeros((C, HW), np.float32)
            w0x_f[cond, :H] = w0x[si]
            w0x_f[cond, H:2 * H] = w0x[ti]
            pk.add("w0x_%d" % n, w0x_f)

            # conditioning part of the first layer -> single global slab;
            # bias row fused; lane ONE_COL carries a constant 1.0
            wc_mat[:E, base:base + H] = w0c[si]
            wc_mat[:E, base + H:base + 2 * H] = w0c[ti]
            wc_mat[E, base:base + H] = b0[si, 0]
            wc_mat[E, base + H:base + 2 * H] = b0[ti, 0]
            wc_mat[E, base + ONE_COL] = 1.0

            # fused hidden layers: block-diagonal (s | t), biases folded via
            # the constant-1 lane; lane ONE_COL propagates the 1.0
            for d in range(DEPTH):
                wh_f = np.zeros((HW, HW), np.float32)
                wh_f[:H, :H] = wh[si * DEPTH + d]
                wh_f[H:2 * H, H:2 * H] = wh[ti * DEPTH + d]
                wh_f[ONE_COL, :H] = bh[si * DEPTH + d, 0]
                wh_f[ONE_COL, H:2 * H] = bh[ti * DEPTH + d, 0]
                wh_f[ONE_COL, ONE_COL] = 1.0
                pk.add("wh_%d_%d" % (n, d), wh_f)

            # output heads (separate s / t so both land at lanes 0..C-1),
            # scattered onto the updated carried channels; untouched channels
            # stay 0 (tanh(0)=0 -> exp=1, t=0)
            wos_f = np.zeros((HW, C), np.float32)
            wos_f[:H, upd] = wo[si]
            wos_f[ONE_COL, upd] = bo[si, 0]
            pk.add("wos_%d" % n, wos_f)

            wot_f = np.zeros((HW, C), np.float32)
            wot_f[H:2 * H, upd] = wo[ti]
            wot_f[ONE_COL, upd] = bo[ti, 0]
            pk.add("wot_%d" % n, wot_f)

    # single final permutation: carried basis -> true channel order, lane-dense
    pfin = np.zeros((C, OUT_LANES), np.float32)
    pfin[sigmas[NF], np.arange(C)] = 1.0
    pk.add("pfin", pfin)

    # one-hot lane selector: log-det goes to output lane C
    ldhot = np.zeros((1, OUT_LANES), np.float32)
    ldhot[0, C] = 1.0
    pk.add("ldhot", ldhot)

    slab, offsets = pk.finalize()

    wc_rows = -(-(E + 1) // 8) * 8
    wc_slab = np.zeros((wc_rows, NW), np.float32)
    wc_slab[:E + 1] = wc_mat

    # input-independent ActNorm log-det (H*W = 1)
    ld_const = float(np.sum(np.log(np.abs(an_scale))))

    return jnp.asarray(slab), jnp.asarray(wc_slab), offsets, ld_const


# ------------------------------ Pallas kernel --------------------------------
def _make_kernel(offsets, ld_const):
    ld_const = float(ld_const)

    def kernel(x_ref, c_ref, slab_ref, wc_ref, out_ref):
        f32 = jnp.float32

        def rd(name):
            off, r, cc = offsets[name]
            return slab_ref[off:off + r, :cc]

        y = x_ref[...]                     # (TB, C) carried state
        cnd = c_ref[...]                   # (TB, DC)

        # ---- conditioning embedder MLP ----
        embb = rd("emb_b")
        h = _lrelu(jnp.dot(cnd, rd("emb_w0"), preferred_element_type=f32)
                   + embb[0:1, :HE])
        for d in range(DEPTH_E):
            h = _lrelu(jnp.dot(h, rd("emb_wh%d" % d), preferred_element_type=f32)
                       + embb[1 + d:2 + d, :HE])
        emb = (jnp.dot(h, rd("emb_wo"), preferred_element_type=f32)
               + embb[1 + DEPTH_E:2 + DEPTH_E, :E])

        # ---- loop-invariant conditioning projection for ALL coupling nets:
        # one lane-dense (TB, E) @ (E, NPASS*128) matmul; per-pass blocks start
        # at 128-lane boundaries; first-layer bias AND the constant-1 lane are
        # fused into the bias row of wc.
        emb_proj = (jnp.dot(emb, wc_ref[0:E, :], preferred_element_type=f32)
                    + wc_ref[E:E + 1, :])                     # (TB, 1024)

        an = rd("an")                      # (2*NF, C): loc rows then scale rows
        s_acc = jnp.zeros_like(y)          # deferred log-det accumulator (TB, C)

        for f in range(NF):
            # ---- ActNorm (params pre-permuted into the carried basis) ----
            y = an[NF + f:NF + f + 1, :] * (y + an[f:f + 1, :])
            # ---- InvLeakyRelu(alpha), zero log-det (as in reference) ----
            y = y * jnp.where(y >= 0, f32(1.0), f32(ALPHA))

            # ---- ConditionalDoubleVectorCouplingBlock: two passes; the s/t
            # nets fused into one block-diagonal MLP; channel select/scatter,
            # biases, and the trailing Shuffle are folded into the weights. ----
            for i in range(2):
                n = f * 2 + i
                base = n * HW
                hh = _lrelu(jnp.dot(y, rd("w0x_%d" % n),
                                    preferred_element_type=f32)
                            + emb_proj[:, base:base + HW])
                for d in range(DEPTH):
                    hh = _lrelu(jnp.dot(hh, rd("wh_%d_%d" % (n, d)),
                                        preferred_element_type=f32))
                s = jnp.tanh(jnp.dot(hh, rd("wos_%d" % n),
                                     preferred_element_type=f32))   # (TB, C)
                t = jnp.dot(hh, rd("wot_%d" % n), preferred_element_type=f32)
                s_acc = s_acc + s           # VPU add; reduce once after loop
                y = y * jnp.exp(s) + t

        # ---- single cross-lane reduction for the data-dependent log-det;
        # the ActNorm contribution is the precomputed constant. ----
        ld = jnp.sum(s_acc, axis=1, keepdims=True) + f32(ld_const)   # (TB, 1)

        # ---- merged lane-dense output: permutation back to the true channel
        # order in lanes 0..C-1, per-sample log-det in lane C. ----
        out_ref[...] = (jnp.dot(y, rd("pfin"), preferred_element_type=f32)
                        + ld * rd("ldhot"))

    return kernel


# ------------------------------- wrapper --------------------------------------
def build_flow_forward(params, batch_tile=TB):
    slab, wc, offsets, ld_const = prepare_params(params)
    kernel = _make_kernel(offsets, ld_const)
    slab_shape, wc_shape = slab.shape, wc.shape

    @jax.jit
    def fwd(x_nchw, c):
        """x_nchw: (N, C, 1, 1) float32; c: (N, DC) float32."""
        n = x_nchw.shape[0]
        x2d = x_nchw.reshape(n, C)
        npad = -(-n // batch_tile) * batch_tile
        if npad != n:
            x2d = jnp.pad(x2d, ((0, npad - n), (0, 0)))
            c_p = jnp.pad(c, ((0, npad - n), (0, 0)))
        else:
            c_p = c

        out = pl.pallas_call(
            kernel,
            out_shape=jax.ShapeDtypeStruct((npad, OUT_LANES), jnp.float32),
            grid=(npad // batch_tile,),
            in_specs=[
                pl.BlockSpec((batch_tile, C), lambda b: (b, 0)),
                pl.BlockSpec((batch_tile, DC), lambda b: (b, 0)),
                # constant index maps: weight slabs DMA'd once, stay resident
                pl.BlockSpec(slab_shape, lambda b: (0, 0)),
                pl.BlockSpec(wc_shape, lambda b: (0, 0)),
            ],
            out_specs=pl.BlockSpec((batch_tile, OUT_LANES), lambda b: (b, 0)),
            compiler_params=pltpu.CompilerParams(
                dimension_semantics=("parallel",)),
        )(x2d, c_p, slab, wc)

        zz = out[:n, :C].reshape(n, C, 1, 1)
        ld = out[:n, C]
        return zz, ld

    return fwd


# -------------------------- deterministic parameters ---------------------------
def init_params(seed=0):
    rng = np.random.RandomState(seed)

    def w(*shape, scale=0.1):
        return jnp.asarray(rng.normal(0.0, scale, size=shape), jnp.float32)

    # embedder MLP: DC -> HE -> (DEPTH_E x HE) -> E
    we0 = w(DC, HE);              be0 = w(1, HE, scale=0.01)
    weh = w(DEPTH_E, HE, HE);     beh = w(DEPTH_E, 1, HE, scale=0.01)
    weo = w(HE, E);               beo = w(1, E, scale=0.01)

    # ActNorm per flow
    an_loc = w(NF, 1, C, scale=0.1)
    an_scale = jnp.asarray(0.5 + rng.uniform(0.25, 1.0, size=(NF, 1, C)), jnp.float32)

    # coupling MLPs: per flow 4 nets in order [s0, t0, s1, t1]
    w0x = w(NF * 4, CH, H);       w0c = w(NF * 4, E, H)
    b0 = w(NF * 4, 1, H, scale=0.01)
    wh = w(NF * 4 * DEPTH, H, H); bh = w(NF * 4 * DEPTH, 1, H, scale=0.01)
    wo = w(NF * 4, H, CH);        bo = w(NF * 4, 1, CH, scale=0.01)

    # Shuffle permutations: out[:, j] = x[:, perm[j]]  =>  P[perm[j], j] = 1
    P = np.zeros((NF, C, C), np.float32)
    for f in range(NF):
        perm = rng.permutation(C)
        P[f, perm, np.arange(C)] = 1.0

    return (we0, be0, weh, beh, weo, beo, an_loc, an_scale,
            w0x, w0c, b0, wh, bh, wo, bo, jnp.asarray(P))


# --------------------------- pure-JAX reference --------------------------------
def flow_forward_ref(x_nchw, c, params):
    (we0, be0, weh, beh, weo, beo, an_loc, an_scale,
     w0x, w0c, b0, wh, bh, wo, bo, P) = params
    dot = functools.partial(jnp.dot, precision=jax.lax.Precision.HIGHEST)
    lrelu = lambda v: jnp.where(v >= 0, v, LRELU_SLOPE * v)

    n = x_nchw.shape[0]
    x = x_nchw.reshape(n, C)
    h = lrelu(dot(c, we0) + be0)
    for d in range(DEPTH_E):
        h = lrelu(dot(h, weh[d]) + beh[d])
    emb = dot(h, weo) + beo
    ld = jnp.zeros((n,), jnp.float32)

    def mlp(m, xin, use_tanh):
        hh = lrelu(dot(xin, w0x[m]) + dot(emb, w0c[m]) + b0[m])
        for d in range(DEPTH):
            hh = lrelu(dot(hh, wh[m * DEPTH + d]) + bh[m * DEPTH + d])
        out = dot(hh, wo[m]) + bo[m]
        return jnp.tanh(out) if use_tanh else out

    for f in range(NF):
        x = an_scale[f] * (x + an_loc[f])
        ld = ld + jnp.sum(jnp.log(jnp.abs(an_scale[f])))
        x = x * jnp.where(x >= 0, 1.0, ALPHA)
        xa, xb = x[:, :CH], x[:, CH:]
        for i in range(2):
            if i == 1:
                xa, xb = xb, xa
            s = mlp(f * 4 + 2 * i, xa, True)
            t = mlp(f * 4 + 2 * i + 1, xa, False)
            xb = xb * jnp.exp(s) + t
            ld = ld + jnp.sum(s, axis=1)
        x = dot(jnp.concatenate([xa, xb], axis=1), P[f])
    return x.reshape(n, C, 1, 1), ld


# ----------------------------------- main --------------------------------------
if __name__ == "__main__":
    N = 256                                     # two batch tiles of TB=128
    key = jax.random.PRNGKey(0)
    kx, kc = jax.random.split(key)
    # x: VAE latent from self.encode(...), torch shape (N, z_dim, 1, 1) NCHW
    x = jax.random.normal(kx, (N, C, 1, 1), jnp.float32)
    # c: conditioning embedding, (N, DC)
    c = jax.random.normal(kc, (N, DC), jnp.float32)

    params = init_params(0)
    fwd = build_flow_forward(params)

    zz, logdet = fwd(x, c)
    jax.block_until_ready((zz, logdet))

    zz_ref, ld_ref = flow_forward_ref(x, c, params)
    np.testing.assert_allclose(np.asarray(zz), np.asarray(zz_ref), rtol=2e-3, atol=2e-3)
    np.testing.assert_allclose(np.asarray(logdet), np.asarray(ld_ref), rtol=2e-3, atol=2e-3)

    print("KERNEL_OK")
</pallas_src>

<mosaic_0001>
module attributes {stable_mosaic.version = 11 : i64} {
  func.func @kernel(%arg0: i32, %arg1: memref<128x8xf32, #tpu.memory_space<vmem>>, %arg2: memref<128x16xf32, #tpu.memory_space<vmem>>, %arg3: memref<4304x128xf32, #tpu.memory_space<vmem>>, %arg4: memref<24x1024xf32, #tpu.memory_space<vmem>>, %arg5: memref<128x128xf32, #tpu.memory_space<vmem>>) attributes {dimension_semantics = [#tpu.dimension_semantics<parallel>], iteration_bounds = array<i64: 2>, scalar_prefetch = 0 : i64, scratch_operands = 0 : i64, tpu.core_type = #tpu.core_type<tc>, window_params = [{transform_indices = @transform_0, window_bounds = array<i64: 128, 8>}, {transform_indices = @transform_1, window_bounds = array<i64: 128, 16>}, {pipeline_mode = #tpu.pipeline_mode<synchronous>, transform_indices = @transform_2, window_bounds = array<i64: 4304, 128>}, {pipeline_mode = #tpu.pipeline_mode<synchronous>, transform_indices = @transform_3, window_bounds = array<i64: 24, 1024>}, {transform_indices = @transform_4, window_bounds = array<i64: 128, 128>}]} {
    %c0 = arith.constant 0 : index
    %c0_0 = arith.constant 0 : index
    %0 = vector.load %arg1[%c0, %c0_0] : memref<128x8xf32, #tpu.memory_space<vmem>>, vector<128x8xf32>
    %c0_1 = arith.constant 0 : index
    %c0_2 = arith.constant 0 : index
    %1 = vector.load %arg2[%c0_1, %c0_2] : memref<128x16xf32, #tpu.memory_space<vmem>>, vector<128x16xf32>
    %c112 = arith.constant 112 : index
    %c0_3 = arith.constant 0 : index
    %2 = vector.load %arg3[%c112, %c0_3] : memref<4304x128xf32, #tpu.memory_space<vmem>>, vector<4x128xf32>
    %c0_4 = arith.constant 0 : index
    %c0_5 = arith.constant 0 : index
    %3 = vector.load %arg3[%c0_4, %c0_5] : memref<4304x128xf32, #tpu.memory_space<vmem>>, vector<16x32xf32>
    %cst = arith.constant dense<0.000000e+00> : vector<128x32xf32>
    %4 = tpu.matmul %1, %3, %cst {dimension_numbers = #tpu.dot_dimension_numbers<[1], [0], [0], [1], [0, 0, 1, 1], [], []>} : vector<128x16xf32>, vector<16x32xf32>, vector<128x32xf32> -> vector<128x32xf32>
    %5 = vector.extract_strided_slice %2 {offsets = [0, 0], sizes = [1, 32], strides = [1, 1]} : vector<4x128xf32> to vector<1x32xf32>
    %6 = vector.broadcast %5 : vector<1x32xf32> to vector<128x32xf32>
    %7 = arith.addf %4, %6 : vector<128x32xf32>
    %cst_6 = arith.constant 0.000000e+00 : f32
    %8 = vector.broadcast %cst_6 : f32 to vector<128x32xf32>
    %9 = arith.cmpf oge, %7, %8 : vector<128x32xf32>
    %cst_7 = arith.constant 0.00999999977 : f32
    %10 = vector.broadcast %cst_7 : f32 to vector<128x32xf32>
    %11 = arith.mulf %10, %7 : vector<128x32xf32>
    %12 = arith.select %9, %7, %11 : vector<128x32xi1>, vector<128x32xf32>
    %c16 = arith.constant 16 : index
    %c0_8 = arith.constant 0 : index
    %13 = vector.load %arg3[%c16, %c0_8] : memref<4304x128xf32, #tpu.memory_space<vmem>>, vector<32x32xf32>
    %cst_9 = arith.constant dense<0.000000e+00> : vector<128x32xf32>
    %14 = tpu.matmul %12, %13, %cst_9 {dimension_numbers = #tpu.dot_dimension_numbers<[1], [0], [0], [1], [0, 0, 1, 1], [], []>} : vector<128x32xf32>, vector<32x32xf32>, vector<128x32xf32> -> vector<128x32xf32>
    %15 = vector.extract_strided_slice %2 {offsets = [1, 0], sizes = [1, 32], strides = [1, 1]} : vector<4x128xf32> to vector<1x32xf32>
    %16 = vector.broadcast %15 : vector<1x32xf32> to vector<128x32xf32>
    %17 = arith.addf %14, %16 : vector<128x32xf32>
    %cst_10 = arith.constant 0.000000e+00 : f32
    %18 = vector.broadcast %cst_10 : f32 to vector<128x32xf32>
    %19 = arith.cmpf oge, %17, %18 : vector<128x32xf32>
    %cst_11 = arith.constant 0.00999999977 : f32
    %20 = vector.broadcast %cst_11 : f32 to vector<128x32xf32>
    %21 = arith.mulf %20, %17 : vector<128x32xf32>
    %22 = arith.select %19, %17, %21 : vector<128x32xi1>, vector<128x32xf32>
    %c48 = arith.constant 48 : index
    %c0_12 = arith.constant 0 : index
    %23 = vector.load %arg3[%c48, %c0_12] : memref<4304x128xf32, #tpu.memory_space<vmem>>, vector<32x32xf32>
    %cst_13 = arith.constant dense<0.000000e+00> : vector<128x32xf32>
    %24 = tpu.matmul %22, %23, %cst_13 {dimension_numbers = #tpu.dot_dimension_numbers<[1], [0], [0], [1], [0, 0, 1, 1], [], []>} : vector<128x32xf32>, vector<32x32xf32>, vector<128x32xf32> -> vector<128x32xf32>
    %25 = vector.extract_strided_slice %2 {offsets = [2, 0], sizes = [1, 32], strides = [1, 1]} : vector<4x128xf32> to vector<1x32xf32>
    %26 = vector.broadcast %25 : vector<1x32xf32> to vector<128x32xf32>
    %27 = arith.addf %24, %26 : vector<128x32xf32>
    %cst_14 = arith.constant 0.000000e+00 : f32
    %28 = vector.broadcast %cst_14 : f32 to vector<128x32xf32>
    %29 = arith.cmpf oge, %27, %28 : vector<128x32xf32>
    %cst_15 = arith.constant 0.00999999977 : f32
    %30 = vector.broadcast %cst_15 : f32 to vector<128x32xf32>
    %31 = arith.mulf %30, %27 : vector<128x32xf32>
    %32 = arith.select %29, %27, %31 : vector<128x32xi1>, vector<128x32xf32>
    %c80 = arith.constant 80 : index
    %c0_16 = arith.constant 0 : index
    %33 = vector.load %arg3[%c80, %c0_16] : memref<4304x128xf32, #tpu.memory_space<vmem>>, vector<32x16xf32>
    %cst_17 = arith.constant dense<0.000000e+00> : vector<128x16xf32>
    %34 = tpu.matmul %32, %33, %cst_17 {dimension_numbers = #tpu.dot_dimension_numbers<[1], [0], [0], [1], [0, 0, 1, 1], [], []>} : vector<128x32xf32>, vector<32x16xf32>, vector<128x16xf32> -> vector<128x16xf32>
    %35 = vector.extract_strided_slice %2 {offsets = [3, 0], sizes = [1, 16], strides = [1, 1]} : vector<4x128xf32> to vector<1x16xf32>
    %36 = vector.broadcast %35 : vector<1x16xf32> to vector<128x16xf32>
    %37 = arith.addf %34, %36 : vector<128x16xf32>
    %c0_18 = arith.constant 0 : index
    %c0_19 = arith.constant 0 : index
    %38 = vector.load %arg4[%c0_18, %c0_19] : memref<24x1024xf32, #tpu.memory_space<vmem>>, vector<16x1024xf32>
    %cst_20 = arith.constant dense<0.000000e+00> : vector<128x1024xf32>
    %39 = tpu.matmul %37, %38, %cst_20 {dimension_numbers = #tpu.dot_dimension_numbers<[1], [0], [0], [1], [0, 0, 1, 1], [], []>} : vector<128x16xf32>, vector<16x1024xf32>, vector<128x1024xf32> -> vector<128x1024xf32>
    %c16_21 = arith.constant 16 : index
    %c0_22 = arith.constant 0 : index
    %40 = vector.load %arg4[%c16_21, %c0_22] : memref<24x1024xf32, #tpu.memory_space<vmem>>, vector<1x1024xf32>
    %41 = vector.broadcast %40 : vector<1x1024xf32> to vector<128x1024xf32>
    %42 = arith.addf %39, %41 : vector<128x1024xf32>
    %c120 = arith.constant 120 : index
    %c0_23 = arith.constant 0 : index
    %43 = vector.load %arg3[%c120, %c0_23] : memref<4304x128xf32, #tpu.memory_space<vmem>>, vector<8x8xf32>
    %cst_24 = arith.constant 0.000000e+00 : f32
    %44 = vector.broadcast %cst_24 : f32 to vector<128x8xf32>
    %45 = vector.extract_strided_slice %43 {offsets = [4, 0], sizes = [1, 8], strides = [1, 1]} : vector<8x8xf32> to vector<1x8xf32>
    %46 = vector.extract_strided_slice %43 {offsets = [0, 0], sizes = [1, 8], strides = [1, 1]} : vector<8x8xf32> to vector<1x8xf32>
    %47 = vector.broadcast %46 : vector<1x8xf32> to vector<128x8xf32>
    %48 = arith.addf %0, %47 : vector<128x8xf32>
    %49 = vector.broadcast %45 : vector<1x8xf32> to vector<128x8xf32>
    %50 = arith.mulf %49, %48 : vector<128x8xf32>
    %cst_25 = arith.constant 0.000000e+00 : f32
    %51 = vector.broadcast %cst_25 : f32 to vector<128x8xf32>
    %52 = arith.cmpf oge, %50, %51 : vector<128x8xf32>
    %cst_26 = arith.constant 1.000000e+00 : f32
    %cst_27 = arith.constant 0.899999976 : f32
    %53 = vector.broadcast %cst_26 : f32 to vector<128x8xf32>
    %54 = vector.broadcast %cst_27 : f32 to vector<128x8xf32>
    %55 = arith.select %52, %53, %54 : vector<128x8xi1>, vector<128x8xf32>
    %56 = arith.mulf %50, %55 : vector<128x8xf32>
    %c128 = arith.constant 128 : index
    %c0_28 = arith.constant 0 : index
    %57 = vector.load %arg3[%c128, %c0_28] : memref<4304x128xf32, #tpu.memory_space<vmem>>, vector<8x128xf32>
    %cst_29 = arith.constant dense<0.000000e+00> : vector<128x128xf32>
    %58 = tpu.matmul %56, %57, %cst_29 {dimension_numbers = #tpu.dot_dimension_numbers<[1], [0], [0], [1], [0, 0, 1, 1], [], []>} : vector<128x8xf32>, vector<8x128xf32>, vector<128x128xf32> -> vector<128x128xf32>
    %59 = vector.extract_strided_slice %42 {offsets = [0, 0], sizes = [128, 128], strides = [1, 1]} : vector<128x1024xf32> to vector<128x128xf32>
    %60 = arith.addf %58, %59 : vector<128x128xf32>
    %cst_30 = arith.constant 0.000000e+00 : f32
    %61 = vector.broadcast %cst_30 : f32 to vector<128x128xf32>
    %62 = arith.cmpf oge, %60, %61 : vector<128x128xf32>
    %cst_31 = arith.constant 0.00999999977 : f32
    %63 = vector.broadcast %cst_31 : f32 to vector<128x128xf32>
    %64 = arith.mulf %63, %60 : vector<128x128xf32>
    %65 = arith.select %62, %60, %64 : vector<128x128xi1>, vector<128x128xf32>
    %c136 = arith.constant 136 : index
    %c0_32 = arith.constant 0 : index
    %66 = vector.load %arg3[%c136, %c0_32] : memref<4304x128xf32, #tpu.memory_space<vmem>>, vector<128x128xf32>
    %cst_33 = arith.constant dense<0.000000e+00> : vector<128x128xf32>
    %67 = tpu.matmul %65, %66, %cst_33 {dimension_numbers = #tpu.dot_dimension_numbers<[1], [0], [0], [1], [0, 0, 1, 1], [], []>} : vector<128x128xf32>, vector<128x128xf32>, vector<128x128xf32> -> vector<128x128xf32>
    %cst_34 = arith.constant 0.000000e+00 : f32
    %68 = vector.broadcast %cst_34 : f32 to vector<128x128xf32>
    %69 = arith.cmpf oge, %67, %68 : vector<128x128xf32>
    %cst_35 = arith.constant 0.00999999977 : f32
    %70 = vector.broadcast %cst_35 : f32 to vector<128x128xf32>
    %71 = arith.mulf %70, %67 : vector<128x128xf32>
    %72 = arith.select %69, %67, %71 : vector<128x128xi1>, vector<128x128xf32>
    %c264 = arith.constant 264 : index
    %c0_36 = arith.constant 0 : index
    %73 = vector.load %arg3[%c264, %c0_36] : memref<4304x128xf32, #tpu.memory_space<vmem>>, vector<128x128xf32>
    %cst_37 = arith.constant dense<0.000000e+00> : vector<128x128xf32>
    %74 = tpu.matmul %72, %73, %cst_37 {dimension_numbers = #tpu.dot_dimension_numbers<[1], [0], [0], [1], [0, 0, 1, 1], [], []>} : vector<128x128xf32>, vector<128x128xf32>, vector<128x128xf32> -> vector<128x128xf32>
    %cst_38 = arith.constant 0.000000e+00 : f32
    %75 = vector.broadcast %cst_38 : f32 to vector<128x128xf32>
    %76 = arith.cmpf oge, %74, %75 : vector<128x128xf32>
    %cst_39 = arith.constant 0.00999999977 : f32
    %77 = vector.broadcast %cst_39 : f32 to vector<128x128xf32>
    %78 = arith.mulf %77, %74 : vector<128x128xf32>
    %79 = arith.select %76, %74, %78 : vector<128x128xi1>, vector<128x128xf32>
    %c392 = arith.constant 392 : index
    %c0_40 = arith.constant 0 : index
    %80 = vector.load %arg3[%c392, %c0_40] : memref<4304x128xf32, #tpu.memory_space<vmem>>, vector<128x8xf32>
    %cst_41 = arith.constant dense<0.000000e+00> : vector<128x8xf32>
    %81 = tpu.matmul %79, %80, %cst_41 {dimension_numbers = #tpu.dot_dimension_numbers<[1], [0], [0], [1], [0, 0, 1, 1], [], []>} : vector<128x128xf32>, vector<128x8xf32>, vector<128x8xf32> -> vector<128x8xf32>
    %82 = math.tanh %81 : vector<128x8xf32>
    %c520 = arith.constant 520 : index
    %c0_42 = arith.constant 0 : index
    %83 = vector.load %arg3[%c520, %c0_42] : memref<4304x128xf32, #tpu.memory_space<vmem>>, vector<128x8xf32>
    %cst_43 = arith.constant dense<0.000000e+00> : vector<128x8xf32>
    %84 = tpu.matmul %79, %83, %cst_43 {dimension_numbers = #tpu.dot_dimension_numbers<[1], [0], [0], [1], [0, 0, 1, 1], [], []>} : vector<128x128xf32>, vector<128x8xf32>, vector<128x8xf32> -> vector<128x8xf32>
    %85 = arith.addf %44, %82 : vector<128x8xf32>
    %86 = math.exp %82 : vector<128x8xf32>
    %87 = arith.mulf %56, %86 : vector<128x8xf32>
    %88 = arith.addf %87, %84 : vector<128x8xf32>
    %c648 = arith.constant 648 : index
    %c0_44 = arith.constant 0 : index
    %89 = vector.load %arg3[%c648, %c0_44] : memref<4304x128xf32, #tpu.memory_space<vmem>>, vector<8x128xf32>
    %cst_45 = arith.constant dense<0.000000e+00> : vector<128x128xf32>
    %90 = tpu.matmul %88, %89, %cst_45 {dimension_numbers = #tpu.dot_dimension_numbers<[1], [0], [0], [1], [0, 0, 1, 1], [], []>} : vector<128x8xf32>, vector<8x128xf32>, vector<128x128xf32> -> vector<128x128xf32>
    %91 = vector.extract_strided_slice %42 {offsets = [0, 128], sizes = [128, 128], strides = [1, 1]} : vector<128x1024xf32> to vector<128x128xf32>
    %92 = arith.addf %90, %91 : vector<128x128xf32>
    %cst_46 = arith.constant 0.000000e+00 : f32
    %93 = vector.broadcast %cst_46 : f32 to vector<128x128xf32>
    %94 = arith.cmpf oge, %92, %93 : vector<128x128xf32>
    %cst_47 = arith.constant 0.00999999977 : f32
    %95 = vector.broadcast %cst_47 : f32 to vector<128x128xf32>
    %96 = arith.mulf %95, %92 : vector<128x128xf32>
    %97 = arith.select %94, %92, %96 : vector<128x128xi1>, vector<128x128xf32>
    %c656 = arith.constant 656 : index
    %c0_48 = arith.constant 0 : index
    %98 = vector.load %arg3[%c656, %c0_48] : memref<4304x128xf32, #tpu.memory_space<vmem>>, vector<128x128xf32>
    %cst_49 = arith.constant dense<0.000000e+00> : vector<128x128xf32>
    %99 = tpu.matmul %97, %98, %cst_49 {dimension_numbers = #tpu.dot_dimension_numbers<[1], [0], [0], [1], [0, 0, 1, 1], [], []>} : vector<128x128xf32>, vector<128x128xf32>, vector<128x128xf32> -> vector<128x128xf32>
    %cst_50 = arith.constant 0.000000e+00 : f32
    %100 = vector.broadcast %cst_50 : f32 to vector<128x128xf32>
    %101 = arith.cmpf oge, %99, %100 : vector<128x128xf32>
    %cst_51 = arith.constant 0.00999999977 : f32
    %102 = vector.broadcast %cst_51 : f32 to vector<128x128xf32>
    %103 = arith.mulf %102, %99 : vector<128x128xf32>
    %104 = arith.select %101, %99, %103 : vector<128x128xi1>, vector<128x128xf32>
    %c784 = arith.constant 784 : index
    %c0_52 = arith.constant 0 : index
    %105 = vector.load %arg3[%c784, %c0_52] : memref<4304x128xf32, #tpu.memory_space<vmem>>, vector<128x128xf32>
    %cst_53 = arith.constant dense<0.000000e+00> : vector<128x128xf32>
    %106 = tpu.matmul %104, %105, %cst_53 {dimension_numbers = #tpu.dot_dimension_numbers<[1], [0], [0], [1], [0, 0, 1, 1], [], []>} : vector<128x128xf32>, vector<128x128xf32>, vector<128x128xf32> -> vector<128x128xf32>
    %cst_54 = arith.constant 0.000000e+00 : f32
    %107 = vector.broadcast %cst_54 : f32 to vector<128x128xf32>
    %108 = arith.cmpf oge, %106, %107 : vector<128x128xf32>
    %cst_55 = arith.constant 0.00999999977 : f32
    %109 = vector.broadcast %cst_55 : f32 to vector<128x128xf32>
    %110 = arith.mulf %109, %106 : vector<128x128xf32>
    %111 = arith.select %108, %106, %110 : vector<128x128xi1>, vector<128x128xf32>
    %c912 = arith.constant 912 : index
    %c0_56 = arith.constant 0 : index
    %112 = vector.load %arg3[%c912, %c0_56] : memref<4304x128xf32, #tpu.memory_space<vmem>>, vector<128x8xf32>
    %cst_57 = arith.constant dense<0.000000e+00> : vector<128x8xf32>
    %113 = tpu.matmul %111, %112, %cst_57 {dimension_numbers = #tpu.dot_dimension_numbers<[1], [0], [0], [1], [0, 0, 1, 1], [], []>} : vector<128x128xf32>, vector<128x8xf32>, vector<128x8xf32> -> vector<128x8xf32>
    %114 = math.tanh %113 : vector<128x8xf32>
    %c1040 = arith.constant 1040 : index
    %c0_58 = arith.constant 0 : index
    %115 = vector.load %arg3[%c1040, %c0_58] : memref<4304x128xf32, #tpu.memory_space<vmem>>, vector<128x8xf32>
    %cst_59 = arith.constant dense<0.000000e+00> : vector<128x8xf32>
    %116 = tpu.matmul %111, %115, %cst_59 {dimension_numbers = #tpu.dot_dimension_numbers<[1], [0], [0], [1], [0, 0, 1, 1], [], []>} : vector<128x128xf32>, vector<128x8xf32>, vector<128x8xf32> -> vector<128x8xf32>
    %117 = arith.addf %85, %114 : vector<128x8xf32>
    %118 = math.exp %114 : vector<128x8xf32>
    %119 = arith.mulf %88, %118 : vector<128x8xf32>
    %120 = arith.addf %119, %116 : vector<128x8xf32>
    %121 = vector.extract_strided_slice %43 {offsets = [5, 0], sizes = [1, 8], strides = [1, 1]} : vector<8x8xf32> to vector<1x8xf32>
    %122 = vector.extract_strided_slice %43 {offsets = [1, 0], sizes = [1, 8], strides = [1, 1]} : vector<8x8xf32> to vector<1x8xf32>
    %123 = vector.broadcast %122 : vector<1x8xf32> to vector<128x8xf32>
    %124 = arith.addf %120, %123 : vector<128x8xf32>
    %125 = vector.broadcast %121 : vector<1x8xf32> to vector<128x8xf32>
    %126 = arith.mulf %125, %124 : vector<128x8xf32>
    %cst_60 = arith.constant 0.000000e+00 : f32
    %127 = vector.broadcast %cst_60 : f32 to vector<128x8xf32>
    %128 = arith.cmpf oge, %126, %127 : vector<128x8xf32>
    %cst_61 = arith.constant 1.000000e+00 : f32
    %cst_62 = arith.constant 0.899999976 : f32
    %129 = vector.broadcast %cst_61 : f32 to vector<128x8xf32>
    %130 = vector.broadcast %cst_62 : f32 to vector<128x8xf32>
    %131 = arith.select %128, %129, %130 : vector<128x8xi1>, vector<128x8xf32>
    %132 = arith.mulf %126, %131 : vector<128x8xf32>
    %c1168 = arith.constant 1168 : index
    %c0_63 = arith.constant 0 : index
    %133 = vector.load %arg3[%c1168, %c0_63] : memref<4304x128xf32, #tpu.memory_space<vmem>>, vector<8x128xf32>
    %cst_64 = arith.constant dense<0.000000e+00> : vector<128x128xf32>
    %134 = tpu.matmul %132, %133, %cst_64 {dimension_numbers = #tpu.dot_dimension_numbers<[1], [0], [0], [1], [0, 0, 1, 1], [], []>} : vector<128x8xf32>, vector<8x128xf32>, vector<128x128xf32> -> vector<128x128xf32>
    %135 = vector.extract_strided_slice %42 {offsets = [0, 256], sizes = [128, 128], strides = [1, 1]} : vector<128x1024xf32> to vector<128x128xf32>
    %136 = arith.addf %134, %135 : vector<128x128xf32>
    %cst_65 = arith.constant 0.000000e+00 : f32
    %137 = vector.broadcast %cst_65 : f32 to vector<128x128xf32>
    %138 = arith.cmpf oge, %136, %137 : vector<128x128xf32>
    %cst_66 = arith.constant 0.00999999977 : f32
    %139 = vector.broadcast %cst_66 : f32 to vector<128x128xf32>
    %140 = arith.mulf %139, %136 : vector<128x128xf32>
    %141 = arith.select %138, %136, %140 : vector<128x128xi1>, vector<128x128xf32>
    %c1176 = arith.constant 1176 : index
    %c0_67 = arith.constant 0 : index
    %142 = vector.load %arg3[%c1176, %c0_67] : memref<4304x128xf32, #tpu.memory_space<vmem>>, vector<128x128xf32>
    %cst_68 = arith.constant dense<0.000000e+00> : vector<128x128xf32>
    %143 = tpu.matmul %141, %142, %cst_68 {dimension_numbers = #tpu.dot_dimension_numbers<[1], [0], [0], [1], [0, 0, 1, 1], [], []>} : vector<128x128xf32>, vector<128x128xf32>, vector<128x128xf32> -> vector<128x128xf32>
    %cst_69 = arith.constant 0.000000e+00 : f32
    %144 = vector.broadcast %cst_69 : f32 to vector<128x128xf32>
    %145 = arith.cmpf oge, %143, %144 : vector<128x128xf32>
    %cst_70 = arith.constant 0.00999999977 : f32
    %146 = vector.broadcast %cst_70 : f32 to vector<128x128xf32>
    %147 = arith.mulf %146, %143 : vector<128x128xf32>
    %148 = arith.select %145, %143, %147 : vector<128x128xi1>, vector<128x128xf32>
    %c1304 = arith.constant 1304 : index
    %c0_71 = arith.constant 0 : index
    %149 = vector.load %arg3[%c1304, %c0_71] : memref<4304x128xf32, #tpu.memory_space<vmem>>, vector<128x128xf32>
    %cst_72 = arith.constant dense<0.000000e+00> : vector<128x128xf32>
    %150 = tpu.matmul %148, %149, %cst_72 {dimension_numbers = #tpu.dot_dimension_numbers<[1], [0], [0], [1], [0, 0, 1, 1], [], []>} : vector<128x128xf32>, vector<128x128xf32>, vector<128x128xf32> -> vector<128x128xf32>
    %cst_73 = arith.constant 0.000000e+00 : f32
    %151 = vector.broadcast %cst_73 : f32 to vector<128x128xf32>
    %152 = arith.cmpf oge, %150, %151 : vector<128x128xf32>
    %cst_74 = arith.constant 0.00999999977 : f32
    %153 = vector.broadcast %cst_74 : f32 to vector<128x128xf32>
    %154 = arith.mulf %153, %150 : vector<128x128xf32>
    %155 = arith.select %152, %150, %154 : vector<128x128xi1>, vector<128x128xf32>
    %c1432 = arith.constant 1432 : index
    %c0_75 = arith.constant 0 : index
    %156 = vector.load %arg3[%c1432, %c0_75] : memref<4304x128xf32, #tpu.memory_space<vmem>>, vector<128x8xf32>
    %cst_76 = arith.constant dense<0.000000e+00> : vector<128x8xf32>
    %157 = tpu.matmul %155, %156, %cst_76 {dimension_numbers = #tpu.dot_dimension_numbers<[1], [0], [0], [1], [0, 0, 1, 1], [], []>} : vector<128x128xf32>, vector<128x8xf32>, vector<128x8xf32> -> vector<128x8xf32>
    %158 = math.tanh %157 : vector<128x8xf32>
    %c1560 = arith.constant 1560 : index
    %c0_77 = arith.constant 0 : index
    %159 = vector.load %arg3[%c1560, %c0_77] : memref<4304x128xf32, #tpu.memory_space<vmem>>, vector<128x8xf32>
    %cst_78 = arith.constant dense<0.000000e+00> : vector<128x8xf32>
    %160 = tpu.matmul %155, %159, %cst_78 {dimension_numbers = #tpu.dot_dimension_numbers<[1], [0], [0], [1], [0, 0, 1, 1], [], []>} : vector<128x128xf32>, vector<128x8xf32>, vector<128x8xf32> -> vector<128x8xf32>
    %161 = arith.addf %117, %158 : vector<128x8xf32>
    %162 = math.exp %158 : vector<128x8xf32>
    %163 = arith.mulf %132, %162 : vector<128x8xf32>
    %164 = arith.addf %163, %160 : vector<128x8xf32>
    %c1688 = arith.constant 1688 : index
    %c0_79 = arith.constant 0 : index
    %165 = vector.load %arg3[%c1688, %c0_79] : memref<4304x128xf32, #tpu.memory_space<vmem>>, vector<8x128xf32>
    %cst_80 = arith.constant dense<0.000000e+00> : vector<128x128xf32>
    %166 = tpu.matmul %164, %165, %cst_80 {dimension_numbers = #tpu.dot_dimension_numbers<[1], [0], [0], [1], [0, 0, 1, 1], [], []>} : vector<128x8xf32>, vector<8x128xf32>, vector<128x128xf32> -> vector<128x128xf32>
    %167 = vector.extract_strided_slice %42 {offsets = [0, 384], sizes = [128, 128], strides = [1, 1]} : vector<128x1024xf32> to vector<128x128xf32>
    %168 = arith.addf %166, %167 : vector<128x128xf32>
    %cst_81 = arith.constant 0.000000e+00 : f32
    %169 = vector.broadcast %cst_81 : f32 to vector<128x128xf32>
    %170 = arith.cmpf oge, %168, %169 : vector<128x128xf32>
    %cst_82 = arith.constant 0.00999999977 : f32
    %171 = vector.broadcast %cst_82 : f32 to vector<128x128xf32>
    %172 = arith.mulf %171, %168 : vector<128x128xf32>
    %173 = arith.select %170, %168, %172 : vector<128x128xi1>, vector<128x128xf32>
    %c1696 = arith.constant 1696 : index
    %c0_83 = arith.constant 0 : index
    %174 = vector.load %arg3[%c1696, %c0_83] : memref<4304x128xf32, #tpu.memory_space<vmem>>, vector<128x128xf32>
    %cst_84 = arith.constant dense<0.000000e+00> : vector<128x128xf32>
    %175 = tpu.matmul %173, %174, %cst_84 {dimension_numbers = #tpu.dot_dimension_numbers<[1], [0], [0], [1], [0, 0, 1, 1], [], []>} : vector<128x128xf32>, vector<128x128xf32>, vector<128x128xf32> -> vector<128x128xf32>
    %cst_85 = arith.constant 0.000000e+00 : f32
    %176 = vector.broadcast %cst_85 : f32 to vector<128x128xf32>
    %177 = arith.cmpf oge, %175, %176 : vector<128x128xf32>
    %cst_86 = arith.constant 0.00999999977 : f32
    %178 = vector.broadcast %cst_86 : f32 to vector<128x128xf32>
    %179 = arith.mulf %178, %175 : vector<128x128xf32>
    %180 = arith.select %177, %175, %179 : vector<128x128xi1>, vector<128x128xf32>
    %c1824 = arith.constant 1824 : index
    %c0_87 = arith.constant 0 : index
    %181 = vector.load %arg3[%c1824, %c0_87] : memref<4304x128xf32, #tpu.memory_space<vmem>>, vector<128x128xf32>
    %cst_88 = arith.constant dense<0.000000e+00> : vector<128x128xf32>
    %182 = tpu.matmul %180, %181, %cst_88 {dimension_numbers = #tpu.dot_dimension_numbers<[1], [0], [0], [1], [0, 0, 1, 1], [], []>} : vector<128x128xf32>, vector<128x128xf32>, vector<128x128xf32> -> vector<128x128xf32>
    %cst_89 = arith.constant 0.000000e+00 : f32
    %183 = vector.broadcast %cst_89 : f32 to vector<128x128xf32>
    %184 = arith.cmpf oge, %182, %183 : vector<128x128xf32>
    %cst_90 = arith.constant 0.00999999977 : f32
    %185 = vector.broadcast %cst_90 : f32 to vector<128x128xf32>
    %186 = arith.mulf %185, %182 : vector<128x128xf32>
    %187 = arith.select %184, %182, %186 : vector<128x128xi1>, vector<128x128xf32>
    %c1952 = arith.constant 1952 : index
    %c0_91 = arith.constant 0 : index
    %188 = vector.load %arg3[%c1952, %c0_91] : memref<4304x128xf32, #tpu.memory_space<vmem>>, vector<128x8xf32>
    %cst_92 = arith.constant dense<0.000000e+00> : vector<128x8xf32>
    %189 = tpu.matmul %187, %188, %cst_92 {dimension_numbers = #tpu.dot_dimension_numbers<[1], [0], [0], [1], [0, 0, 1, 1], [], []>} : vector<128x128xf32>, vector<128x8xf32>, vector<128x8xf32> -> vector<128x8xf32>
    %190 = math.tanh %189 : vector<128x8xf32>
    %c2080 = arith.constant 2080 : index
    %c0_93 = arith.constant 0 : index
    %191 = vector.load %arg3[%c2080, %c0_93] : memref<4304x128xf32, #tpu.memory_space<vmem>>, vector<128x8xf32>
    %cst_94 = arith.constant dense<0.000000e+00> : vector<128x8xf32>
    %192 = tpu.matmul %187, %191, %cst_94 {dimension_numbers = #tpu.dot_dimension_numbers<[1], [0], [0], [1], [0, 0, 1, 1], [], []>} : vector<128x128xf32>, vector<128x8xf32>, vector<128x8xf32> -> vector<128x8xf32>
    %193 = arith.addf %161, %190 : vector<128x8xf32>
    %194 = math.exp %190 : vector<128x8xf32>
    %195 = arith.mulf %164, %194 : vector<128x8xf32>
    %196 = arith.addf %195, %192 : vector<128x8xf32>
    %197 = vector.extract_strided_slice %43 {offsets = [6, 0], sizes = [1, 8], strides = [1, 1]} : vector<8x8xf32> to vector<1x8xf32>
    %198 = vector.extract_strided_slice %43 {offsets = [2, 0], sizes = [1, 8], strides = [1, 1]} : vector<8x8xf32> to vector<1x8xf32>
    %199 = vector.broadcast %198 : vector<1x8xf32> to vector<128x8xf32>
    %200 = arith.addf %196, %199 : vector<128x8xf32>
    %201 = vector.broadcast %197 : vector<1x8xf32> to vector<128x8xf32>
    %202 = arith.mulf %201, %200 : vector<128x8xf32>
    %cst_95 = arith.constant 0.000000e+00 : f32
    %203 = vector.broadcast %cst_95 : f32 to vector<128x8xf32>
    %204 = arith.cmpf oge, %202, %203 : vector<128x8xf32>
    %cst_96 = arith.constant 1.000000e+00 : f32
    %cst_97 = arith.constant 0.899999976 : f32
    %205 = vector.broadcast %cst_96 : f32 to vector<128x8xf32>
    %206 = vector.broadcast %cst_97 : f32 to vector<128x8xf32>
    %207 = arith.select %204, %205, %206 : vector<128x8xi1>, vector<128x8xf32>
    %208 = arith.mulf %202, %207 : vector<128x8xf32>
    %c2208 = arith.constant 2208 : index
    %c0_98 = arith.constant 0 : index
    %209 = vector.load %arg3[%c2208, %c0_98] : memref<4304x128xf32, #tpu.memory_space<vmem>>, vector<8x128xf32>
    %cst_99 = arith.constant dense<0.000000e+00> : vector<128x128xf32>
    %210 = tpu.matmul %208, %209, %cst_99 {dimension_numbers = #tpu.dot_dimension_numbers<[1], [0], [0], [1], [0, 0, 1, 1], [], []>} : vector<128x8xf32>, vector<8x128xf32>, vector<128x128xf32> -> vector<128x128xf32>
    %211 = vector.extract_strided_slice %42 {offsets = [0, 512], sizes = [128, 128], strides = [1, 1]} : vector<128x1024xf32> to vector<128x128xf32>
    %212 = arith.addf %210, %211 : vector<128x128xf32>
    %cst_100 = arith.constant 0.000000e+00 : f32
    %213 = vector.broadcast %cst_100 : f32 to vector<128x128xf32>
    %214 = arith.cmpf oge, %212, %213 : vector<128x128xf32>
    %cst_101 = arith.constant 0.00999999977 : f32
    %215 = vector.broadcast %cst_101 : f32 to vector<128x128xf32>
    %216 = arith.mulf %215, %212 : vector<128x128xf32>
    %217 = arith.select %214, %212, %216 : vector<128x128xi1>, vector<128x128xf32>
    %c2216 = arith.constant 2216 : index
    %c0_102 = arith.constant 0 : index
    %218 = vector.load %arg3[%c2216, %c0_102] : memref<4304x128xf32, #tpu.memory_space<vmem>>, vector<128x128xf32>
    %cst_103 = arith.constant dense<0.000000e+00> : vector<128x128xf32>
    %219 = tpu.matmul %217, %218, %cst_103 {dimension_numbers = #tpu.dot_dimension_numbers<[1], [0], [0], [1], [0, 0, 1, 1], [], []>} : vector<128x128xf32>, vector<128x128xf32>, vector<128x128xf32> -> vector<128x128xf32>
    %cst_104 = arith.constant 0.000000e+00 : f32
    %220 = vector.broadcast %cst_104 : f32 to vector<128x128xf32>
    %221 = arith.cmpf oge, %219, %220 : vector<128x128xf32>
    %cst_105 = arith.constant 0.00999999977 : f32
    %222 = vector.broadcast %cst_105 : f32 to vector<128x128xf32>
    %223 = arith.mulf %222, %219 : vector<128x128xf32>
    %224 = arith.select %221, %219, %223 : vector<128x128xi1>, vector<128x128xf32>
    %c2344 = arith.constant 2344 : index
    %c0_106 = arith.constant 0 : index
    %225 = vector.load %arg3[%c2344, %c0_106] : memref<4304x128xf32, #tpu.memory_space<vmem>>, vector<128x128xf32>
    %cst_107 = arith.constant dense<0.000000e+00> : vector<128x128xf32>
    %226 = tpu.matmul %224, %225, %cst_107 {dimension_numbers = #tpu.dot_dimension_numbers<[1], [0], [0], [1], [0, 0, 1, 1], [], []>} : vector<128x128xf32>, vector<128x128xf32>, vector<128x128xf32> -> vector<128x128xf32>
    %cst_108 = arith.constant 0.000000e+00 : f32
    %227 = vector.broadcast %cst_108 : f32 to vector<128x128xf32>
    %228 = arith.cmpf oge, %226, %227 : vector<128x128xf32>
    %cst_109 = arith.constant 0.00999999977 : f32
    %229 = vector.broadcast %cst_109 : f32 to vector<128x128xf32>
    %230 = arith.mulf %229, %226 : vector<128x128xf32>
    %231 = arith.select %228, %226, %230 : vector<128x128xi1>, vector<128x128xf32>
    %c2472 = arith.constant 2472 : index
    %c0_110 = arith.constant 0 : index
    %232 = vector.load %arg3[%c2472, %c0_110] : memref<4304x128xf32, #tpu.memory_space<vmem>>, vector<128x8xf32>
    %cst_111 = arith.constant dense<0.000000e+00> : vector<128x8xf32>
    %233 = tpu.matmul %231, %232, %cst_111 {dimension_numbers = #tpu.dot_dimension_numbers<[1], [0], [0], [1], [0, 0, 1, 1], [], []>} : vector<128x128xf32>, vector<128x8xf32>, vector<128x8xf32> -> vector<128x8xf32>
    %234 = math.tanh %233 : vector<128x8xf32>
    %c2600 = arith.constant 2600 : index
    %c0_112 = arith.constant 0 : index
    %235 = vector.load %arg3[%c2600, %c0_112] : memref<4304x128xf32, #tpu.memory_space<vmem>>, vector<128x8xf32>
    %cst_113 = arith.constant dense<0.000000e+00> : vector<128x8xf32>
    %236 = tpu.matmul %231, %235, %cst_113 {dimension_numbers = #tpu.dot_dimension_numbers<[1], [0], [0], [1], [0, 0, 1, 1], [], []>} : vector<128x128xf32>, vector<128x8xf32>, vector<128x8xf32> -> vector<128x8xf32>
    %237 = arith.addf %193, %234 : vector<128x8xf32>
    %238 = math.exp %234 : vector<128x8xf32>
    %239 = arith.mulf %208, %238 : vector<128x8xf32>
    %240 = arith.addf %239, %236 : vector<128x8xf32>
    %c2728 = arith.constant 2728 : index
    %c0_114 = arith.constant 0 : index
    %241 = vector.load %arg3[%c2728, %c0_114] : memref<4304x128xf32, #tpu.memory_space<vmem>>, vector<8x128xf32>
    %cst_115 = arith.constant dense<0.000000e+00> : vector<128x128xf32>
    %242 = tpu.matmul %240, %241, %cst_115 {dimension_numbers = #tpu.dot_dimension_numbers<[1], [0], [0], [1], [0, 0, 1, 1], [], []>} : vector<128x8xf32>, vector<8x128xf32>, vector<128x128xf32> -> vector<128x128xf32>
    %243 = vector.extract_strided_slice %42 {offsets = [0, 640], sizes = [128, 128], strides = [1, 1]} : vector<128x1024xf32> to vector<128x128xf32>
    %244 = arith.addf %242, %243 : vector<128x128xf32>
    %cst_116 = arith.constant 0.000000e+00 : f32
    %245 = vector.broadcast %cst_116 : f32 to vector<128x128xf32>
    %246 = arith.cmpf oge, %244, %245 : vector<128x128xf32>
    %cst_117 = arith.constant 0.00999999977 : f32
    %247 = vector.broadcast %cst_117 : f32 to vector<128x128xf32>
    %248 = arith.mulf %247, %244 : vector<128x128xf32>
    %249 = arith.select %246, %244, %248 : vector<128x128xi1>, vector<128x128xf32>
    %c2736 = arith.constant 2736 : index
    %c0_118 = arith.constant 0 : index
    %250 = vector.load %arg3[%c2736, %c0_118] : memref<4304x128xf32, #tpu.memory_space<vmem>>, vector<128x128xf32>
    %cst_119 = arith.constant dense<0.000000e+00> : vector<128x128xf32>
    %251 = tpu.matmul %249, %250, %cst_119 {dimension_numbers = #tpu.dot_dimension_numbers<[1], [0], [0], [1], [0, 0, 1, 1], [], []>} : vector<128x128xf32>, vector<128x128xf32>, vector<128x128xf32> -> vector<128x128xf32>
    %cst_120 = arith.constant 0.000000e+00 : f32
    %252 = vector.broadcast %cst_120 : f32 to vector<128x128xf32>
    %253 = arith.cmpf oge, %251, %252 : vector<128x128xf32>
    %cst_121 = arith.constant 0.00999999977 : f32
    %254 = vector.broadcast %cst_121 : f32 to vector<128x128xf32>
    %255 = arith.mulf %254, %251 : vector<128x128xf32>
    %256 = arith.select %253, %251, %255 : vector<128x128xi1>, vector<128x128xf32>
    %c2864 = arith.constant 2864 : index
    %c0_122 = arith.constant 0 : index
    %257 = vector.load %arg3[%c2864, %c0_122] : memref<4304x128xf32, #tpu.memory_space<vmem>>, vector<128x128xf32>
    %cst_123 = arith.constant dense<0.000000e+00> : vector<128x128xf32>
    %258 = tpu.matmul %256, %257, %cst_123 {dimension_numbers = #tpu.dot_dimension_numbers<[1], [0], [0], [1], [0, 0, 1, 1], [], []>} : vector<128x128xf32>, vector<128x128xf32>, vector<128x128xf32> -> vector<128x128xf32>
    %cst_124 = arith.constant 0.000000e+00 : f32
    %259 = vector.broadcast %cst_124 : f32 to vector<128x128xf32>
    %260 = arith.cmpf oge, %258, %259 : vector<128x128xf32>
    %cst_125 = arith.constant 0.00999999977 : f32
    %261 = vector.broadcast %cst_125 : f32 to vector<128x128xf32>
    %262 = arith.mulf %261, %258 : vector<128x128xf32>
    %263 = arith.select %260, %258, %262 : vector<128x128xi1>, vector<128x128xf32>
    %c2992 = arith.constant 2992 : index
    %c0_126 = arith.constant 0 : index
    %264 = vector.load %arg3[%c2992, %c0_126] : memref<4304x128xf32, #tpu.memory_space<vmem>>, vector<128x8xf32>
    %cst_127 = arith.constant dense<0.000000e+00> : vector<128x8xf32>
    %265 = tpu.matmul %263, %264, %cst_127 {dimension_numbers = #tpu.dot_dimension_numbers<[1], [0], [0], [1], [0, 0, 1, 1], [], []>} : vector<128x128xf32>, vector<128x8xf32>, vector<128x8xf32> -> vector<128x8xf32>
    %266 = math.tanh %265 : vector<128x8xf32>
    %c3120 = arith.constant 3120 : index
    %c0_128 = arith.constant 0 : index
    %267 = vector.load %arg3[%c3120, %c0_128] : memref<4304x128xf32, #tpu.memory_space<vmem>>, vector<128x8xf32>
    %cst_129 = arith.constant dense<0.000000e+00> : vector<128x8xf32>
    %268 = tpu.matmul %263, %267, %cst_129 {dimension_numbers = #tpu.dot_dimension_numbers<[1], [0], [0], [1], [0, 0, 1, 1], [], []>} : vector<128x128xf32>, vector<128x8xf32>, vector<128x8xf32> -> vector<128x8xf32>
    %269 = arith.addf %237, %266 : vector<128x8xf32>
    %270 = math.exp %266 : vector<128x8xf32>
    %271 = arith.mulf %240, %270 : vector<128x8xf32>
    %272 = arith.addf %271, %268 : vector<128x8xf32>
    %273 = vector.extract_strided_slice %43 {offsets = [7, 0], sizes = [1, 8], strides = [1, 1]} : vector<8x8xf32> to vector<1x8xf32>
    %274 = vector.extract_strided_slice %43 {offsets = [3, 0], sizes = [1, 8], strides = [1, 1]} : vector<8x8xf32> to vector<1x8xf32>
    %275 = vector.broadcast %274 : vector<1x8xf32> to vector<128x8xf32>
    %276 = arith.addf %272, %275 : vector<128x8xf32>
    %277 = vector.broadcast %273 : vector<1x8xf32> to vector<128x8xf32>
    %278 = arith.mulf %277, %276 : vector<128x8xf32>
    %cst_130 = arith.constant 0.000000e+00 : f32
    %279 = vector.broadcast %cst_130 : f32 to vector<128x8xf32>
    %280 = arith.cmpf oge, %278, %279 : vector<128x8xf32>
    %cst_131 = arith.constant 1.000000e+00 : f32
    %cst_132 = arith.constant 0.899999976 : f32
    %281 = vector.broadcast %cst_131 : f32 to vector<128x8xf32>
    %282 = vector.broadcast %cst_132 : f32 to vector<128x8xf32>
    %283 = arith.select %280, %281, %282 : vector<128x8xi1>, vector<128x8xf32>
    %284 = arith.mulf %278, %283 : vector<128x8xf32>
    %c3248 = arith.constant 3248 : index
    %c0_133 = arith.constant 0 : index
    %285 = vector.load %arg3[%c3248, %c0_133] : memref<4304x128xf32, #tpu.memory_space<vmem>>, vector<8x128xf32>
    %cst_134 = arith.constant dense<0.000000e+00> : vector<128x128xf32>
    %286 = tpu.matmul %284, %285, %cst_134 {dimension_numbers = #tpu.dot_dimension_numbers<[1], [0], [0], [1], [0, 0, 1, 1], [], []>} : vector<128x8xf32>, vector<8x128xf32>, vector<128x128xf32> -> vector<128x128xf32>
    %287 = vector.extract_strided_slice %42 {offsets = [0, 768], sizes = [128, 128], strides = [1, 1]} : vector<128x1024xf32> to vector<128x128xf32>
    %288 = arith.addf %286, %287 : vector<128x128xf32>
    %cst_135 = arith.constant 0.000000e+00 : f32
    %289 = vector.broadcast %cst_135 : f32 to vector<128x128xf32>
    %290 = arith.cmpf oge, %288, %289 : vector<128x128xf32>
    %cst_136 = arith.constant 0.00999999977 : f32
    %291 = vector.broadcast %cst_136 : f32 to vector<128x128xf32>
    %292 = arith.mulf %291, %288 : vector<128x128xf32>
    %293 = arith.select %290, %288, %292 : vector<128x128xi1>, vector<128x128xf32>
    %c3256 = arith.constant 3256 : index
    %c0_137 = arith.constant 0 : index
    %294 = vector.load %arg3[%c3256, %c0_137] : memref<4304x128xf32, #tpu.memory_space<vmem>>, vector<128x128xf32>
    %cst_138 = arith.constant dense<0.000000e+00> : vector<128x128xf32>
    %295 = tpu.matmul %293, %294, %cst_138 {dimension_numbers = #tpu.dot_dimension_numbers<[1], [0], [0], [1], [0, 0, 1, 1], [], []>} : vector<128x128xf32>, vector<128x128xf32>, vector<128x128xf32> -> vector<128x128xf32>
    %cst_139 = arith.constant 0.000000e+00 : f32
    %296 = vector.broadcast %cst_139 : f32 to vector<128x128xf32>
    %297 = arith.cmpf oge, %295, %296 : vector<128x128xf32>
    %cst_140 = arith.constant 0.00999999977 : f32
    %298 = vector.broadcast %cst_140 : f32 to vector<128x128xf32>
    %299 = arith.mulf %298, %295 : vector<128x128xf32>
    %300 = arith.select %297, %295, %299 : vector<128x128xi1>, vector<128x128xf32>
    %c3384 = arith.constant 3384 : index
    %c0_141 = arith.constant 0 : index
    %301 = vector.load %arg3[%c3384, %c0_141] : memref<4304x128xf32, #tpu.memory_space<vmem>>, vector<128x128xf32>
    %cst_142 = arith.constant dense<0.000000e+00> : vector<128x128xf32>
    %302 = tpu.matmul %300, %301, %cst_142 {dimension_numbers = #tpu.dot_dimension_numbers<[1], [0], [0], [1], [0, 0, 1, 1], [], []>} : vector<128x128xf32>, vector<128x128xf32>, vector<128x128xf32> -> vector<128x128xf32>
    %cst_143 = arith.constant 0.000000e+00 : f32
    %303 = vector.broadcast %cst_143 : f32 to vector<128x128xf32>
    %304 = arith.cmpf oge, %302, %303 : vector<128x128xf32>
    %cst_144 = arith.constant 0.00999999977 : f32
    %305 = vector.broadcast %cst_144 : f32 to vector<128x128xf32>
    %306 = arith.mulf %305, %302 : vector<128x128xf32>
    %307 = arith.select %304, %302, %306 : vector<128x128xi1>, vector<128x128xf32>
    %c3512 = arith.constant 3512 : index
    %c0_145 = arith.constant 0 : index
    %308 = vector.load %arg3[%c3512, %c0_145] : memref<4304x128xf32, #tpu.memory_space<vmem>>, vector<128x8xf32>
    %cst_146 = arith.constant dense<0.000000e+00> : vector<128x8xf32>
    %309 = tpu.matmul %307, %308, %cst_146 {dimension_numbers = #tpu.dot_dimension_numbers<[1], [0], [0], [1], [0, 0, 1, 1], [], []>} : vector<128x128xf32>, vector<128x8xf32>, vector<128x8xf32> -> vector<128x8xf32>
    %310 = math.tanh %309 : vector<128x8xf32>
    %c3640 = arith.constant 3640 : index
    %c0_147 = arith.constant 0 : index
    %311 = vector.load %arg3[%c3640, %c0_147] : memref<4304x128xf32, #tpu.memory_space<vmem>>, vector<128x8xf32>
    %cst_148 = arith.constant dense<0.000000e+00> : vector<128x8xf32>
    %312 = tpu.matmul %307, %311, %cst_148 {dimension_numbers = #tpu.dot_dimension_numbers<[1], [0], [0], [1], [0, 0, 1, 1], [], []>} : vector<128x128xf32>, vector<128x8xf32>, vector<128x8xf32> -> vector<128x8xf32>
    %313 = arith.addf %269, %310 : vector<128x8xf32>
    %314 = math.exp %310 : vector<128x8xf32>
    %315 = arith.mulf %284, %314 : vector<128x8xf32>
    %316 = arith.addf %315, %312 : vector<128x8xf32>
    %c3768 = arith.constant 3768 : index
    %c0_149 = arith.constant 0 : index
    %317 = vector.load %arg3[%c3768, %c0_149] : memref<4304x128xf32, #tpu.memory_space<vmem>>, vector<8x128xf32>
    %cst_150 = arith.constant dense<0.000000e+00> : vector<128x128xf32>
    %318 = tpu.matmul %316, %317, %cst_150 {dimension_numbers = #tpu.dot_dimension_numbers<[1], [0], [0], [1], [0, 0, 1, 1], [], []>} : vector<128x8xf32>, vector<8x128xf32>, vector<128x128xf32> -> vector<128x128xf32>
    %319 = vector.extract_strided_slice %42 {offsets = [0, 896], sizes = [128, 128], strides = [1, 1]} : vector<128x1024xf32> to vector<128x128xf32>
    %320 = arith.addf %318, %319 : vector<128x128xf32>
    %cst_151 = arith.constant 0.000000e+00 : f32
    %321 = vector.broadcast %cst_151 : f32 to vector<128x128xf32>
    %322 = arith.cmpf oge, %320, %321 : vector<128x128xf32>
    %cst_152 = arith.constant 0.00999999977 : f32
    %323 = vector.broadcast %cst_152 : f32 to vector<128x128xf32>
    %324 = arith.mulf %323, %320 : vector<128x128xf32>
    %325 = arith.select %322, %320, %324 : vector<128x128xi1>, vector<128x128xf32>
    %c3776 = arith.constant 3776 : index
    %c0_153 = arith.constant 0 : index
    %326 = vector.load %arg3[%c3776, %c0_153] : memref<4304x128xf32, #tpu.memory_space<vmem>>, vector<128x128xf32>
    %cst_154 = arith.constant dense<0.000000e+00> : vector<128x128xf32>
    %327 = tpu.matmul %325, %326, %cst_154 {dimension_numbers = #tpu.dot_dimension_numbers<[1], [0], [0], [1], [0, 0, 1, 1], [], []>} : vector<128x128xf32>, vector<128x128xf32>, vector<128x128xf32> -> vector<128x128xf32>
    %cst_155 = arith.constant 0.000000e+00 : f32
    %328 = vector.broadcast %cst_155 : f32 to vector<128x128xf32>
    %329 = arith.cmpf oge, %327, %328 : vector<128x128xf32>
    %cst_156 = arith.constant 0.00999999977 : f32
    %330 = vector.broadcast %cst_156 : f32 to vector<128x128xf32>
    %331 = arith.mulf %330, %327 : vector<128x128xf32>
    %332 = arith.select %329, %327, %331 : vector<128x128xi1>, vector<128x128xf32>
    %c3904 = arith.constant 3904 : index
    %c0_157 = arith.constant 0 : index
    %333 = vector.load %arg3[%c3904, %c0_157] : memref<4304x128xf32, #tpu.memory_space<vmem>>, vector<128x128xf32>
    %cst_158 = arith.constant dense<0.000000e+00> : vector<128x128xf32>
    %334 = tpu.matmul %332, %333, %cst_158 {dimension_numbers = #tpu.dot_dimension_numbers<[1], [0], [0], [1], [0, 0, 1, 1], [], []>} : vector<128x128xf32>, vector<128x128xf32>, vector<128x128xf32> -> vector<128x128xf32>
    %cst_159 = arith.constant 0.000000e+00 : f32
    %335 = vector.broadcast %cst_159 : f32 to vector<128x128xf32>
    %336 = arith.cmpf oge, %334, %335 : vector<128x128xf32>
    %cst_160 = arith.constant 0.00999999977 : f32
    %337 = vector.broadcast %cst_160 : f32 to vector<128x128xf32>
    %338 = arith.mulf %337, %334 : vector<128x128xf32>
    %339 = arith.select %336, %334, %338 : vector<128x128xi1>, vector<128x128xf32>
    %c4032 = arith.constant 4032 : index
    %c0_161 = arith.constant 0 : index
    %340 = vector.load %arg3[%c4032, %c0_161] : memref<4304x128xf32, #tpu.memory_space<vmem>>, vector<128x8xf32>
    %cst_162 = arith.constant dense<0.000000e+00> : vector<128x8xf32>
    %341 = tpu.matmul %339, %340, %cst_162 {dimension_numbers = #tpu.dot_dimension_numbers<[1], [0], [0], [1], [0, 0, 1, 1], [], []>} : vector<128x128xf32>, vector<128x8xf32>, vector<128x8xf32> -> vector<128x8xf32>
    %342 = math.tanh %341 : vector<128x8xf32>
    %c4160 = arith.constant 4160 : index
    %c0_163 = arith.constant 0 : index
    %343 = vector.load %arg3[%c4160, %c0_163] : memref<4304x128xf32, #tpu.memory_space<vmem>>, vector<128x8xf32>
    %cst_164 = arith.constant dense<0.000000e+00> : vector<128x8xf32>
    %344 = tpu.matmul %339, %343, %cst_164 {dimension_numbers = #tpu.dot_dimension_numbers<[1], [0], [0], [1], [0, 0, 1, 1], [], []>} : vector<128x128xf32>, vector<128x8xf32>, vector<128x8xf32> -> vector<128x8xf32>
    %345 = arith.addf %313, %342 : vector<128x8xf32>
    %346 = math.exp %342 : vector<128x8xf32>
    %347 = arith.mulf %316, %346 : vector<128x8xf32>
    %348 = arith.addf %347, %344 : vector<128x8xf32>
    %cst_165 = arith.constant dense<0.000000e+00> : vector<128xf32>
    %349 = vector.multi_reduction <add>, %345, %cst_165 [1] : vector<128x8xf32> to vector<128xf32>
    %350 = vector.shape_cast %349 : vector<128xf32> to vector<128x1xf32>
    %cst_166 = arith.constant 2.91032314 : f32
    %351 = vector.broadcast %cst_166 : f32 to vector<128x1xf32>
    %352 = arith.addf %350, %351 : vector<128x1xf32>
    %c4288 = arith.constant 4288 : index
    %c0_167 = arith.constant 0 : index
    %353 = vector.load %arg3[%c4288, %c0_167] : memref<4304x128xf32, #tpu.memory_space<vmem>>, vector<8x128xf32>
    %cst_168 = arith.constant dense<0.000000e+00> : vector<128x128xf32>
    %354 = tpu.matmul %348, %353, %cst_168 {dimension_numbers = #tpu.dot_dimension_numbers<[1], [0], [0], [1], [0, 0, 1, 1], [], []>} : vector<128x8xf32>, vector<8x128xf32>, vector<128x128xf32> -> vector<128x128xf32>
    %c4296 = arith.constant 4296 : index
    %c0_169 = arith.constant 0 : index
    %355 = vector.load %arg3[%c4296, %c0_169] : memref<4304x128xf32, #tpu.memory_space<vmem>>, vector<1x128xf32>
    %356 = vector.broadcast %352 : vector<128x1xf32> to vector<128x128xf32>
    %357 = vector.broadcast %355 : vector<1x128xf32> to vector<128x128xf32>
    %358 = arith.mulf %356, %357 : vector<128x128xf32>
    %359 = arith.addf %354, %358 : vector<128x128xf32>
    %c0_170 = arith.constant 0 : index
    %c0_171 = arith.constant 0 : index
    %360 = vector.load %arg5[%c0_170, %c0_171] : memref<128x128xf32, #tpu.memory_space<vmem>>, vector<128x128xf32>
    tpu.vector_store %arg5[%c0_170, %c0_171], %359 {strides = array<i32>} : memref<128x128xf32, #tpu.memory_space<vmem>>, vector<128x128xf32>,
    return
  }
  func.func @transform_0(%arg0: i32) -> (i32, i32) {
    %c0_i32 = arith.constant 0 : i32
    %c0_i32_0 = arith.constant 0 : i32
    return %arg0, %c0_i32 : i32, i32
  }
  func.func @transform_1(%arg0: i32) -> (i32, i32) {
    %c0_i32 = arith.constant 0 : i32
    %c0_i32_0 = arith.constant 0 : i32
    return %arg0, %c0_i32 : i32, i32
  }
  func.func @transform_2(%arg0: i32) -> (i32, i32) {
    %c0_i32 = arith.constant 0 : i32
    %c0_i32_0 = arith.constant 0 : i32
    %c0_i32_1 = arith.constant 0 : i32
    return %c0_i32, %c0_i32_0 : i32, i32
  }
  func.func @transform_3(%arg0: i32) -> (i32, i32) {
    %c0_i32 = arith.constant 0 : i32
    %c0_i32_0 = arith.constant 0 : i32
    %c0_i32_1 = arith.constant 0 : i32
    return %c0_i32, %c0_i32_0 : i32, i32
  }
  func.func @transform_4(%arg0: i32) -> (i32, i32) {
    %c0_i32 = arith.constant 0 : i32
    %c0_i32_0 = arith.constant 0 : i32
    return %arg0, %c0_i32 : i32, i32
  }
}

</mosaic_0001>

<bundles_post_ra>
// kernel: fwd.1
= control target key start
LH: loop header
LB: loop body
LE: loop exit
PB: predicated region body
PF: predicated region fallthrough
CT: control target
= control target key end

     0   :  { %9 = vsyncpa [#allocation3], 0  ;;  %s19496_s0 = inlined_call_operand.vmem [shape: f32[256,8], index: 0, kind: input, shape index: {}]   ;;  %s19497_s1 = inlined_call_operand.vmem [shape: f32[256,16], index: 1, kind: input, shape index: {}]   ;;  %s19498_s2 = inlined_call_operand.hbm [shape: f32[4304,128], index: 2, kind: input, shape index: {}]   ;;  %s19499_s3 = inlined_call_operand.hbm [shape: f32[24,1024], index: 3, kind: input, shape index: {}]   ;;  %s19500_s4 = inlined_call_operand.vmem [shape: f32[256,128], index: 4, kind: output, shape index: {}]  }
   0x1   :  { %10 = vsyncpa [#allocation5], 0  ;;  %s16770_s15 = smov 0  }
   0x2 LB: > { %s16737_s16 = smov [#allocation2]   ;;  %s11350_s18 = sadd.s32 4294967295, %s16735_s15   ;;  %s16735_s15 = sphi %s16770_s15, %s16_s15  }
   0x3   : > { %s153_s17 = sshll.u32 %s16737_s16, 4  ;;  %p11352_p0 = scmp.ge.s32.totalorder %s16735_s15, 1  ;;  %s154_s17 = int_to_ptr.vmem [resolvable:$true] %s153_s17 }
   0x4   : > { %p141_p1 = scmp.lt.s32.totalorder %s16735_s15, 3  ;;  %p16784_p3 = scmp.eq.s32.totalorder %s11350_s18, 0 }
   0x5   : > { %s16738_s21 = smov [#allocation4]   ;;  %s16665_s26 = scalar_lea.hbm %s19498_s2, 68864 }
   0x6   : > { %p16778_p2 = pnand %p11352_p0, %p141_p1  ;;  %s166_s22 = sshll.u32 %s16738_s21, 4  ;;  %s16796_s22 = int_to_ptr.vmem [resolvable:$true] %s166_s22 }
   0x7   : > { %s19527_s20 = scalar_select %p16784_p3, 1, 0 }
   0x8   : > { %s19526_s19 = scalar_select %p16778_p2, 1, 0 }
   0x9   : > { %p16123_p4 = pneg %p16778_p2  ;;  %p16666_p6 = scmp.ne.s32.totalorder %s19498_s2, %s16665_s26 }
   0xa   : > { %p16672_p10 = scmp.lt.u32.totalorder %s16665_s26, %s19498_s2 }
   0xb   : > { %p16792_p5 = pnand %p16784_p3, %p16123_p4 }
   0xd   : > { %p16667_p7 = pneg %p16792_p5 }
   0xf   : > { %p16668_p8 = pnand %p16667_p7, %p16666_p6 }
  0x11   : > { %p16669_p9 = pneg %p16668_p8 }
  0x13   : > { %p16674_p11 = pnand %p16672_p10, %p16669_p9 }
  0x15   : > { %16677 = shalt.err (!%p16674_p11)
}
  0x16   : > { %s16678_s5 = scalar_lea.vmem %s154_s17, 68864  ;;  %p16686_p1 = scmp.lt.s32.totalorder %s154_s17, %s154_s17 }
  0x17   : > { %p16679_p12 = scmp.ne.s32.totalorder %s154_s17, %s16678_s5  ;;  %p16687_p4 = scmp.lt.s32.totalorder %s16678_s5, %s16678_s5 }
  0x19   : > { %p16681_p13 = pnand %p16679_p12, %p16667_p7  ;;  %p16688_p3 = por %p16687_p4, %p16686_p1 }
  0x1b   : > { %p16682_p0 = pneg %p16681_p13 }
  0x1d   : > { %p16689_p2 = pnand %p16688_p3, %p16682_p0 }
  0x1f   : > { %16692 = shalt.err (!%p16689_p2)
}
  0x20   : > { %s16739_s6 = smov 128   ;;  %s16740_s7 = smov 8  }
  0x21   : > { %16126 = dma.hbm_to_vmem [thread:$0]  (!%p16792_p5), %s19498_s2, 68864, %s154_s17, [#allocation3], %s16739_s6, %s16739_s6, %s16740_s7  }
  0x22   : > { %s16693_s12 = scalar_lea.hbm %s19499_s3, 3072 }
  0x23   : > { %p16694_p6 = scmp.ne.s32.totalorder %s19499_s3, %s16693_s12  ;;  %p16700_p8 = scmp.lt.u32.totalorder %s16693_s12, %s19499_s3 }
  0x25   : > { %p16696_p2 = pnand %p16694_p6, %p16667_p7 }
  0x27   : > { %p16697_p3 = pneg %p16696_p2 }
  0x29   : > { %p16702_p9 = pnand %p16700_p8, %p16697_p3 }
  0x2b   : > { %16705 = shalt.err (!%p16702_p9)
}
  0x2c   : > { %s16706_s17 = scalar_lea.vmem %s16796_s22, 3072  ;;  %p16714_p13 = scmp.lt.s32.totalorder %s16796_s22, %s16796_s22 }
  0x2d   : > { %p16707_p10 = scmp.ne.s32.totalorder %s16796_s22, %s16706_s17  ;;  %p16715_p0 = scmp.lt.s32.totalorder %s16706_s17, %s16706_s17 }
  0x2f   : > { %p16709_p11 = pnand %p16707_p10, %p16667_p7  ;;  %p16716_p1 = por %p16715_p0, %p16714_p13 }
  0x31   : > { %p16710_p12 = pneg %p16709_p11 }
  0x33   : > { %p16717_p4 = pnand %p16716_p1, %p16710_p12 }
  0x35   : > { %16720 = shalt.err (!%p16717_p4)
}
  0x36   : > { %s16741_s24 = smov 1024   ;;  %s16742_s25 = smov 64  }
  0x37   : > { %16129 = dma.hbm_to_vmem [thread:$0]  (!%p16792_p5), %s19499_s3, 3072, %s16796_s22, [#allocation5], %s16741_s24, %s16741_s24, %s16742_s25  }
  0x38   : > { %p19529_p6 = scmp.ne.s32.totalorder %s19526_s19, 0 }
  0x3a   : > { %200 = sbr.rel (%p19529_p6) target bundleno = 8531 (0x2153), region = 36 }
  0x41   : > { %p19530_p7 = scmp.ne.s32.totalorder %s19527_s20, 0 }
  0x43   : > { %16726 = dma.done.wait (%p19530_p7), [#allocation3], 68864  }
  0x44   : > { %16728 = vsyncadd (%p19530_p7), [#allocation3], 4294898432 }
  0x45   : > { %16730 = dma.done.wait (%p19530_p7), [#allocation5], 3072  }
  0x46   : > { %16732 = vsyncadd (%p19530_p7), [#allocation5], 4294964224  ;;  %s11359_s23 = sshll.u32 %s11350_s18, 4  ;;  %vm292_vm0 = vcmask 130048   ;;  %v286_v0 = vld [vmem:[#allocation2] sm:$0xff]  ;;  %v287_v1 = vld [vmem:[#allocation2 + $0x8] sm:$0xff]  ;;  %v288_v31 = vlaneseq }
  0x47   : > { %p236_p2 = scmp.lt.s32.totalorder %s11359_s23, 31  ;;  %v15045_v3 = vpack.c.bf16 %v287_v1, %v286_v0  ;;  %v534_v9 = vld [vmem:[#allocation2 + $0x10] sm:$0xff]  ;;  %v535_v10 = vld [vmem:[#allocation2 + $0x18] sm:$0xff]  ;;  %v536_v11 = vld [vmem:[#allocation2 + $0x20] sm:$0xff]  ;;  %vm542_vm1 = vcmask 261120  }
  0x48   : > { %v15049_v12 = vpack.c.bf16 %v535_v10, %v534_v9  ;;  %v537_v13 = vld [vmem:[#allocation2 + $0x28] sm:$0xff]  ;;  %v784_v25 = vld [vmem:[#allocation2 + $0x30] sm:$0xff]  ;;  %v785_v26 = vld [vmem:[#allocation2 + $0x38] sm:$0xff]  ;;  %v16897_v32 = vshrl.u32 %v288_v31, 7 }
  0x49   : > { %s19759_s23 = smov (!%p236_p2, %s11359_s23), 31  ;;  %15046 = vmatprep.subr.bf16.mxu0 %v15045_v3  ;;  %16113 = vmatprep.subr.bf16.mxu1 %v15045_v3  ;;  %v15053_v18 = vpack.c.bf16 %v537_v13, %v536_v11  ;;  %v786_v27 = vld [vmem:[#allocation2 + $0x40] sm:$0xff]  ;;  %v15057_v28 = vpack.c.bf16 %v785_v26, %v784_v25  ;;  %v787_v29 = vld [vmem:[#allocation2 + $0x48] sm:$0xff]  ;;  %v16902_v34 = vld [vmem:[#allocation2 + $0x70] sm:$0xf] }
  0x4a   : > { %s16857_s22 = sshll.u32 %s19759_s23, 3  ;;  %15048 = vmatpush3.bf16.msra.mxu0 %v15045_v3  ;;  %16114 = vmatpush3.bf16.msra.mxu1 %v15045_v3  ;;  %v15061_v30 = vpack.c.bf16 %v787_v29, %v786_v27  ;;  %19531 = vst [vmem:[#allocation8_spill] sm:$0xff] %v16897_v32  ;;  %v16900_v33 = vsub.s32 0, %v16897_v32 }
  0x4b   : > { %s16863_s29 = scalar_lea.vmem %s19497_s1, %s16857_s22  ;;  %15050 = vmatprep.subr.bf16.mxu1 %v15049_v12  ;;  %15058 = vmatprep.subr.bf16.mxu0 %v15057_v28  ;;  %s17237_s30 = scalar_lea.vmem %s19496_s0, %s16857_s22 }
  0x4c   : > { %v269_v2 = vld [vmem:[%s16863_s29] sm:$0xff]  ;;  %v270_v5 = vld [vmem:[%s16863_s29 + $0x8] sm:$0xff]  ;;  %v271_v7 = vld [vmem:[%s16863_s29 + $0x10] sm:$0xff]  ;;  %v16906_v35 = vrot.slane %v16902_v34, %v16900_v33  ;;  %s19460_s7 = scalar_lea.vmem %s19500_s4, %s16857_s22 }
  0x4d   : > { %12899 = vmatprep.mubr.msk.f32.mxu0 %vm292_vm0, %v269_v2  ;;  %v277_v4 = vld [vmem:[%s16863_s29 + $0x40] sm:$0xff]  ;;  %v278_v6 = vld [vmem:[%s16863_s29 + $0x48] sm:$0xff]  ;;  %v279_v8 = vld [vmem:[%s16863_s29 + $0x50] sm:$0xff] }
  0x4e   : > { %12911 = vmatprep.mubr.msk.f32.mxu1 %vm292_vm0, %v277_v4  ;;  %12900 = vmatmul.mubr.msk.f32.vlgmr.msra.gmra.mrb[0].mxu0 %vm292_vm0, %v270_v5  ;;  %v272_v14 = vld [vmem:[%s16863_s29 + $0x18] sm:$0xff]  ;;  %v273_v16 = vld [vmem:[%s16863_s29 + $0x20] sm:$0xff]  ;;  %v274_v19 = vld [vmem:[%s16863_s29 + $0x28] sm:$0xff] }
  0x4f   : > { %12912 = vmatmul.mubr.msk.f32.vlgmr.msra.gmra.mrb[0].mxu1 %vm292_vm0, %v278_v6  ;;  %12902 = vmatprep.mubr.msk.f32.mxu0 %vm292_vm0, %v271_v7  ;;  %v280_v15 = vld [vmem:[%s16863_s29 + $0x58] sm:$0xff]  ;;  %v281_v17 = vld [vmem:[%s16863_s29 + $0x60] sm:$0xff]  ;;  %v282_v20 = vld [vmem:[%s16863_s29 + $0x68] sm:$0xff] }
  0x50   : > { %12914 = vmatprep.mubr.msk.f32.mxu1 %vm292_vm0, %v279_v8  ;;  %15052 = vmatpush3.bf16.msra.mxu1 %v15049_v12  ;;  %v275_v21 = vld [vmem:[%s16863_s29 + $0x30] sm:$0xff]  ;;  %v276_v23 = vld [vmem:[%s16863_s29 + $0x38] sm:$0xff] }
  0x51   : > { %v283_v22 = vld [vmem:[%s16863_s29 + $0x70] sm:$0xff]  ;;  %15054 = vmatprep.subr.bf16.mxu1 %v15053_v18  ;;  %v284_v24 = vld [vmem:[%s16863_s29 + $0x78] sm:$0xff]  ;;  %15060 = vmatpush3.bf16.msra.mxu0 %v15057_v28 }
  0x52   : > { %12903 = vmatmul.mubr.msk.f32.gmra.mrb[2].mxu0 %vm292_vm0, %v272_v14  ;;  %15062 = vmatprep.subr.bf16.mxu0 %v15061_v30 }
  0x53   : > { %12915 = vmatmul.mubr.msk.f32.gmra.mrb[2].mxu1 %vm292_vm0, %v280_v15  ;;  %12905 = vmatprep.mubr.msk.f32.mxu0 %vm292_vm0, %v273_v16 }
  0x54   : > { %12917 = vmatprep.mubr.msk.f32.mxu1 %vm292_vm0, %v281_v17  ;;  %15056 = vmatpush3.bf16.msra.mxu1 %v15053_v18 }
  0x55   : > { %15064 = vmatpush3.bf16.msra.mxu0 %v15061_v30 }
  0x56   : > { %12906 = vmatmul.mubr.msk.f32.gmra.mrb[4].mxu0 %vm292_vm0, %v274_v19 }
  0x57   : > { %12918 = vmatmul.mubr.msk.f32.gmra.mrb[4].mxu1 %vm292_vm0, %v282_v20  ;;  %12908 = vmatprep.mubr.msk.f32.mxu0 %vm292_vm0, %v275_v21 }
  0x58   : > { %12920 = vmatprep.mubr.msk.f32.mxu1 %vm292_vm0, %v283_v22 }
  0x5a   : > { %12909 = vmatmul.mubr.msk.f32.gmra.mrb[6].mxu0 %vm292_vm0, %v276_v23 }
  0x5b   : > { %12921 = vmatmul.mubr.msk.f32.gmra.mrb[6].mxu1 %vm292_vm0, %v284_v24 }
 0x121   : > { %v12901_v36 = vpop.f32.mrb[0].mxu0 }
 0x122   : > { %v12913_v37 = vpop.f32.mrb[0].mxu1  ;;  %v413_v38 = vadd.f32 %v12901_v36, %v16906_v35  ;;  %v407_v39 = vpop.f32.mrb[1].mxu0 }
 0x123   : > { %v447_v40 = vpop.f32.mrb[1].mxu1  ;;  %v408_v41 = vadd.f32 %v407_v39, %v16906_v35  ;;  %v453_v6 = vadd.f32 %v12913_v37, %v16906_v35 }
 0x124   : > { %v503_v42 = vmul.f32 0.01, %v413_v38  ;;  %vm487_vm2 = vcmp.ge.f32.partialorder %v413_v38, 0.0  ;;  %v448_v62 = vadd.f32 %v447_v40, %v16906_v35  ;;  %v1034_v40 = vld [vmem:[#allocation2 + $0x58] sm:$0xff] }
 0x125   : > { %v12904_v43 = vpop.f32.mrb[2].mxu0  ;;  %vm486_vm3 = vcmp.ge.f32.partialorder %v408_v41, 0.0  ;;  %v502_v44 = vmul.f32 0.01, %v408_v41  ;;  %vm495_vm11 = vcmp.ge.f32.partialorder %v453_v6, 0.0 }
 0x126   : > { %v12916_v45 = vpop.f32.mrb[2].mxu1  ;;  %v423_v46 = vadd.f32 %v12904_v43, %v16906_v35  ;;  %v417_v47 = vpop.f32.mrb[3].mxu0  ;;  %v519_v51 = vsel %vm487_vm2, %v413_v38, %v503_v42  ;;  %v510_v10 = vmul.f32 0.01, %v448_v62  ;;  %vm494_vm9 = vcmp.ge.f32.partialorder %v448_v62, 0.0  ;;  %v1036_v43 = vld [vmem:[#allocation2 + $0x68] sm:$0xff] }
 0x127   : > { %v457_v48 = vpop.f32.mrb[3].mxu1  ;;  %v418_v49 = vadd.f32 %v417_v47, %v16906_v35  ;;  %v518_v50 = vsel %vm486_vm3, %v408_v41, %v502_v44  ;;  %v463_v15 = vadd.f32 %v12916_v45, %v16906_v35  ;;  %v511_v16 = vmul.f32 0.01, %v453_v6  ;;  %v1035_v41 = vld [vmem:[#allocation2 + $0x60] sm:$0xff] }
 0x128   : > { %12931 = vmatprep.mubr.msk.f32.mxu1 %vm542_vm1, %v518_v50  ;;  %vm489_vm4 = vcmp.ge.f32.partialorder %v423_v46, 0.0  ;;  %v505_v52 = vmul.f32 0.01, %v423_v46  ;;  %v458_v11 = vadd.f32 %v457_v48, %v16906_v35  ;;  %v526_v18 = vsel %vm494_vm9, %v448_v62, %v510_v10 }
 0x129   : > { %v12907_v53 = vpop.f32.mrb[4].mxu0  ;;  %12932 = vmatmul.mubr.msk.f32.vlgmr.msra.gmra.mrb[8].mxu1 %vm542_vm1, %v519_v51  ;;  %vm488_vm5 = vcmp.ge.f32.partialorder %v418_v49, 0.0  ;;  %v504_v54 = vmul.f32 0.01, %v418_v49  ;;  %v527_v21 = vsel %vm495_vm11, %v453_v6, %v511_v16  ;;  %v513_v23 = vmul.f32 0.01, %v463_v15 }
 0x12a   : > { %v12919_v55 = vpop.f32.mrb[4].mxu1  ;;  %v433_v56 = vadd.f32 %v12907_v53, %v16906_v35  ;;  %v427_v57 = vpop.f32.mrb[5].mxu0  ;;  %v521_v58 = vsel %vm489_vm4, %v423_v46, %v505_v52  ;;  %v512_v19 = vmul.f32 0.01, %v458_v11  ;;  %vm496_vm12 = vcmp.ge.f32.partialorder %v458_v11, 0.0 }
 0x12b   : > { %v467_v59 = vpop.f32.mrb[5].mxu1  ;;  %v428_v60 = vadd.f32 %v427_v57, %v16906_v35  ;;  %v520_v61 = vsel %vm488_vm5, %v418_v49, %v504_v54  ;;  %v473_v22 = vadd.f32 %v12919_v55, %v16906_v35  ;;  %vm497_vm13 = vcmp.ge.f32.partialorder %v463_v15, 0.0 }
 0x12c   : > { %12934 = vmatprep.mubr.msk.f32.mxu1 %vm542_vm1, %v520_v61  ;;  %vm491_vm6 = vcmp.ge.f32.partialorder %v433_v56, 0.0  ;;  %v507_v63 = vmul.f32 0.01, %v433_v56  ;;  %v468_v20 = vadd.f32 %v467_v59, %v16906_v35  ;;  %v528_v24 = vsel %vm496_vm12, %v458_v11, %v512_v19 }
 0x12d   : > { %v12910_v0 = vpop.f32.mrb[6].mxu0  ;;  %12935 = vmatmul.mubr.msk.f32.gmra.mrb[10].mxu1 %vm542_vm1, %v521_v58  ;;  %vm490_vm7 = vcmp.ge.f32.partialorder %v428_v60, 0.0  ;;  %v506_v1 = vmul.f32 0.01, %v428_v60  ;;  %v529_v27 = vsel %vm497_vm13, %v463_v15, %v513_v23  ;;  %v515_v29 = vmul.f32 0.01, %v473_v22 }
 0x12e   : > { %v12922_v2 = vpop.f32.mrb[6].mxu1  ;;  %v443_v3 = vadd.f32 %v12910_v0, %v16906_v35  ;;  %v437_v4 = vpop.f32.mrb[7].mxu0  ;;  %v523_v5 = vsel %vm491_vm6, %v433_v56, %v507_v63  ;;  %v514_v25 = vmul.f32 0.01, %v468_v20  ;;  %vm498_vm14 = vcmp.ge.f32.partialorder %v468_v20, 0.0 }
 0x12f   : > { %v477_v7 = vpop.f32.mrb[7].mxu1  ;;  %v438_v8 = vadd.f32 %v437_v4, %v16906_v35  ;;  %v522_v9 = vsel %vm490_vm7, %v428_v60, %v506_v1  ;;  %v483_v28 = vadd.f32 %v12922_v2, %v16906_v35  ;;  %vm499_vm15 = vcmp.ge.f32.partialorder %v473_v22, 0.0 }
 0x130   : > { %12937 = vmatprep.mubr.msk.f32.mxu1 %vm542_vm1, %v522_v9  ;;  %vm493_vm8 = vcmp.ge.f32.partialorder %v443_v3, 0.0  ;;  %v509_v12 = vmul.f32 0.01, %v443_v3  ;;  %v478_v26 = vadd.f32 %v477_v7, %v16906_v35  ;;  %v530_v30 = vsel %vm498_vm14, %v468_v20, %v514_v25  ;;  %v1033_v35 = vld [vmem:[#allocation2 + $0x50] sm:$0xff] }
 0x131   : > { %12938 = vmatmul.mubr.msk.f32.gmra.mrb[12].mxu1 %vm542_vm1, %v523_v5  ;;  %vm492_vm10 = vcmp.ge.f32.partialorder %v438_v8, 0.0  ;;  %v508_v13 = vmul.f32 0.01, %v438_v8  ;;  %v531_v36 = vsel %vm499_vm15, %v473_v22, %v515_v29  ;;  %v517_v37 = vmul.f32 0.01, %v483_v28 }
 0x132   : > { %v525_v14 = vsel %vm493_vm8, %v443_v3, %v509_v12  ;;  %v516_v31 = vmul.f32 0.01, %v478_v26  ;;  %vm500_vm2 = vcmp.ge.f32.partialorder %v478_v26, 0.0  ;;  %vm501_vm3 = vcmp.ge.f32.partialorder %v483_v28, 0.0 }
 0x133   : > { %v524_v17 = vsel %vm492_vm10, %v438_v8, %v508_v13  ;;  %v533_v39 = vsel %vm501_vm3, %v483_v28, %v517_v37  ;;  %v15065_v42 = vpack.c.bf16 %v1034_v40, %v1033_v35  ;;  %v15069_v44 = vpack.c.bf16 %v1036_v43, %v1035_v41 }
 0x134   : > { %12940 = vmatprep.mubr.msk.f32.mxu1 %vm542_vm1, %v524_v17  ;;  %v532_v38 = vsel %vm500_vm2, %v478_v26, %v516_v31  ;;  %v16941_v45 = vsub.s32 1, %v16897_v32 }
 0x135   : > { %12941 = vmatmul.mubr.msk.f32.gmra.mrb[14].mxu1 %vm542_vm1, %v525_v14  ;;  %15066 = vmatprep.subr.bf16.mxu1 %v15065_v42 }
 0x136   : > { %12943 = vmatprep.mubr.msk.f32.mxu1 %vm542_vm1, %v526_v18  ;;  %15068 = vmatpush3.bf16.msra.mxu1 %v15065_v42  ;;  %v16945_v46 = vrot.slane %v16902_v34, %v16941_v45 }
 0x137   : > { %15070 = vmatprep.subr.bf16.mxu1 %v15069_v44 }
 0x139   : > { %12944 = vmatmul.mubr.msk.f32.gmra.mrb[16].mxu1 %vm542_vm1, %v527_v21 }
 0x13a   : > { %12946 = vmatprep.mubr.msk.f32.mxu1 %vm542_vm1, %v528_v24  ;;  %15072 = vmatpush3.bf16.msra.mxu1 %v15069_v44 }
 0x13d   : > { %12947 = vmatmul.mubr.msk.f32.gmra.mrb[18].mxu1 %vm542_vm1, %v529_v27 }
 0x13e   : > { %12949 = vmatprep.mubr.msk.f32.mxu1 %vm542_vm1, %v530_v30 }
 0x141   : > { %12950 = vmatmul.mubr.msk.f32.gmra.mrb[20].mxu1 %vm542_vm1, %v531_v36 }
 0x142   : > { %12952 = vmatprep.mubr.msk.f32.mxu1 %vm542_vm1, %v532_v38 }
 0x145   : > { %12953 = vmatmul.mubr.msk.f32.gmra.mrb[22].mxu1 %vm542_vm1, %v533_v39 }
 0x1fc   : > { %v12933_v47 = vpop.f32.mrb[8].mxu1 }
 0x1fd   : > { %v663_v48 = vadd.f32 %v12933_v47, %v16945_v46  ;;  %v657_v49 = vpop.f32.mrb[9].mxu1 }
 0x1fe   : > { %v658_v50 = vadd.f32 %v657_v49, %v16945_v46 }
 0x1ff   : > { %v753_v51 = vmul.f32 0.01, %v663_v48  ;;  %vm737_vm4 = vcmp.ge.f32.partialorder %v663_v48, 0.0 }
 0x200   : > { %v12936_v52 = vpop.f32.mrb[10].mxu1  ;;  %vm736_vm5 = vcmp.ge.f32.partialorder %v658_v50, 0.0  ;;  %v752_v53 = vmul.f32 0.01, %v658_v50 }
 0x201   : > { %v673_v54 = vadd.f32 %v12936_v52, %v16945_v46  ;;  %v667_v55 = vpop.f32.mrb[11].mxu1  ;;  %v769_v58 = vsel %vm737_vm4, %v663_v48, %v753_v51  ;;  %v1235_v52 = vld [vmem:[#allocation4 + $0x8] sm:$0xff] }
 0x202   : > { %v668_v56 = vadd.f32 %v667_v55, %v16945_v46  ;;  %v768_v57 = vsel %vm736_vm5, %v658_v50, %v752_v53  ;;  %v1243_v53 = vld [vmem:[#allocation4 + $0x48] sm:$0xff] }
 0x203   : > { %12963 = vmatprep.mubr.msk.f32.mxu0 %vm542_vm1, %v768_v57  ;;  %v755_v59 = vmul.f32 0.01, %v673_v54  ;;  %vm739_vm7 = vcmp.ge.f32.partialorder %v673_v54, 0.0  ;;  %v15073_v55 = vpack.c.bf16 %v1243_v53, %v1235_v52  ;;  %v16980_v57 = vsub.s32 2, %v16897_v32 }
 0x204   : > { %v12939_v60 = vpop.f32.mrb[12].mxu1  ;;  %12964 = vmatmul.mubr.msk.f32.vlgmr.msra.gmra.mrb[8].mxu0 %vm542_vm1, %v769_v58  ;;  %vm738_vm6 = vcmp.ge.f32.partialorder %v668_v56, 0.0  ;;  %v754_v61 = vmul.f32 0.01, %v668_v56 }
 0x205   : > { %v683_v62 = vadd.f32 %v12939_v60, %v16945_v46  ;;  %v677_v63 = vpop.f32.mrb[13].mxu1  ;;  %v771_v2 = vsel %vm739_vm7, %v673_v54, %v755_v59  ;;  %v1234_v54 = vld [vmem:[#allocation4] sm:$0xff]  ;;  %15074 = vmatprep.subr.bf16.mxu0 %v15073_v55  ;;  %19532 = vst [vmem:[#allocation9_spill] sm:$0xff] %v16980_v57  ;;  %v16984_v58 = vrot.slane %v16902_v34, %v16980_v57 }
 0x206   : > { %v678_v0 = vadd.f32 %v677_v63, %v16945_v46  ;;  %v770_v1 = vsel %vm738_vm6, %v668_v56, %v754_v61  ;;  %v1242_v56 = vld [vmem:[#allocation4 + $0x40] sm:$0xff] }
 0x207   : > { %12966 = vmatprep.mubr.msk.f32.mxu0 %vm542_vm1, %v770_v1  ;;  %vm741_vm8 = vcmp.ge.f32.partialorder %v683_v62, 0.0  ;;  %v757_v3 = vmul.f32 0.01, %v683_v62 }
 0x208   : > { %v12942_v4 = vpop.f32.mrb[14].mxu1  ;;  %12967 = vmatmul.mubr.msk.f32.gmra.mrb[10].mxu0 %vm542_vm1, %v771_v2  ;;  %vm740_vm9 = vcmp.ge.f32.partialorder %v678_v0, 0.0  ;;  %v756_v5 = vmul.f32 0.01, %v678_v0 }
 0x209   : > { %v693_v6 = vadd.f32 %v12942_v4, %v16945_v46  ;;  %v687_v7 = vpop.f32.mrb[15].mxu1  ;;  %v773_v8 = vsel %vm741_vm8, %v683_v62, %v757_v3 }
 0x20a   : > { %v688_v9 = vadd.f32 %v687_v7, %v16945_v46  ;;  %v772_v10 = vsel %vm740_vm9, %v678_v0, %v756_v5 }
 0x20b   : > { %12969 = vmatprep.mubr.msk.f32.mxu0 %vm542_vm1, %v772_v10  ;;  %vm743_vm10 = vcmp.ge.f32.partialorder %v693_v6, 0.0  ;;  %v759_v11 = vmul.f32 0.01, %v693_v6 }
 0x20c   : > { %12970 = vmatmul.mubr.msk.f32.gmra.mrb[12].mxu0 %vm542_vm1, %v773_v8  ;;  %v12945_v12 = vpop.f32.mrb[16].mxu1  ;;  %vm742_vm11 = vcmp.ge.f32.partialorder %v688_v9, 0.0  ;;  %v758_v13 = vmul.f32 0.01, %v688_v9 }
 0x20d   : > { %v703_v14 = vadd.f32 %v12945_v12, %v16945_v46  ;;  %v697_v15 = vpop.f32.mrb[17].mxu1  ;;  %v775_v16 = vsel %vm743_vm10, %v693_v6, %v759_v11 }
 0x20e   : > { %v774_v17 = vsel %vm742_vm11, %v688_v9, %v758_v13  ;;  %v698_v18 = vadd.f32 %v697_v15, %v16945_v46 }
 0x20f   : > { %12972 = vmatprep.mubr.msk.f32.mxu0 %vm542_vm1, %v774_v17  ;;  %vm745_vm12 = vcmp.ge.f32.partialorder %v703_v14, 0.0  ;;  %v761_v19 = vmul.f32 0.01, %v703_v14 }
 0x210   : > { %12973 = vmatmul.mubr.msk.f32.gmra.mrb[14].mxu0 %vm542_vm1, %v775_v16  ;;  %vm744_vm13 = vcmp.ge.f32.partialorder %v698_v18, 0.0  ;;  %v760_v20 = vmul.f32 0.01, %v698_v18  ;;  %v12948_v21 = vpop.f32.mrb[18].mxu1 }
 0x211   : > { %v713_v22 = vadd.f32 %v12948_v21, %v16945_v46  ;;  %v777_v23 = vsel %vm745_vm12, %v703_v14, %v761_v19  ;;  %v707_v24 = vpop.f32.mrb[19].mxu1 }
 0x212   : > { %v776_v25 = vsel %vm744_vm13, %v698_v18, %v760_v20  ;;  %v708_v26 = vadd.f32 %v707_v24, %v16945_v46 }
 0x213   : > { %12975 = vmatprep.mubr.msk.f32.mxu0 %vm542_vm1, %v776_v25  ;;  %vm747_vm14 = vcmp.ge.f32.partialorder %v713_v22, 0.0  ;;  %v763_v27 = vmul.f32 0.01, %v713_v22 }
 0x214   : > { %12976 = vmatmul.mubr.msk.f32.gmra.mrb[16].mxu0 %vm542_vm1, %v777_v23  ;;  %vm746_vm15 = vcmp.ge.f32.partialorder %v708_v26, 0.0  ;;  %v762_v28 = vmul.f32 0.01, %v708_v26  ;;  %v12951_v29 = vpop.f32.mrb[20].mxu1 }
 0x215   : > { %v723_v30 = vadd.f32 %v12951_v29, %v16945_v46  ;;  %v779_v31 = vsel %vm747_vm14, %v713_v22, %v763_v27  ;;  %v717_v36 = vpop.f32.mrb[21].mxu1 }
 0x216   : > { %v778_v37 = vsel %vm746_vm15, %v708_v26, %v762_v28  ;;  %v718_v38 = vadd.f32 %v717_v36, %v16945_v46 }
 0x217   : > { %12978 = vmatprep.mubr.msk.f32.mxu0 %vm542_vm1, %v778_v37  ;;  %vm749_vm2 = vcmp.ge.f32.partialorder %v723_v30, 0.0  ;;  %v765_v39 = vmul.f32 0.01, %v723_v30 }
 0x218   : > { %12979 = vmatmul.mubr.msk.f32.gmra.mrb[18].mxu0 %vm542_vm1, %v779_v31  ;;  %vm748_vm3 = vcmp.ge.f32.partialorder %v718_v38, 0.0  ;;  %v764_v35 = vmul.f32 0.01, %v718_v38  ;;  %v12954_v40 = vpop.f32.mrb[22].mxu1 }
 0x219   : > { %v733_v41 = vadd.f32 %v12954_v40, %v16945_v46  ;;  %v781_v42 = vsel %vm749_vm2, %v723_v30, %v765_v39  ;;  %v727_v43 = vpop.f32.mrb[23].mxu1 }
 0x21a   : > { %v780_v44 = vsel %vm748_vm3, %v718_v38, %v764_v35  ;;  %v728_v47 = vadd.f32 %v727_v43, %v16945_v46  ;;  %v15075_v46 = vpack.c.bf16 %v1242_v56, %v1234_v54 }
 0x21b   : > { %12981 = vmatprep.mubr.msk.f32.mxu0 %vm542_vm1, %v780_v44  ;;  %vm751_vm4 = vcmp.ge.f32.partialorder %v733_v41, 0.0  ;;  %v767_v48 = vmul.f32 0.01, %v733_v41 }
 0x21c   : > { %12982 = vmatmul.mubr.msk.f32.gmra.mrb[20].mxu0 %vm542_vm1, %v781_v42  ;;  %vm750_vm5 = vcmp.ge.f32.partialorder %v728_v47, 0.0  ;;  %v766_v49 = vmul.f32 0.01, %v728_v47 }
 0x21d   : > { %v783_v50 = vsel %vm751_vm4, %v733_v41, %v767_v48  ;;  %15076 = vmatpush1.bf16.msra.mxu0 %v15075_v46 }
 0x21e   : > { %v782_v51 = vsel %vm750_vm5, %v728_v47, %v766_v49 }
 0x21f   : > { %12984 = vmatprep.mubr.msk.f32.mxu0 %vm542_vm1, %v782_v51 }
 0x220   : > { %12985 = vmatmul.mubr.msk.f32.gmra.mrb[22].mxu0 %vm542_vm1, %v783_v50 }
 0x2d7   : > { %v12965_v59 = vpop.f32.mrb[8].mxu0 }
 0x2d8   : > { %v912_v60 = vadd.f32 %v12965_v59, %v16984_v58  ;;  %v906_v61 = vpop.f32.mrb[9].mxu0 }
 0x2d9   : > { %v907_v62 = vadd.f32 %v906_v61, %v16984_v58 }
 0x2da   : > { %v1002_v63 = vmul.f32 0.01, %v912_v60  ;;  %vm986_vm6 = vcmp.ge.f32.partialorder %v912_v60, 0.0 }
 0x2db   : > { %v12968_v0 = vpop.f32.mrb[10].mxu0  ;;  %vm985_vm7 = vcmp.ge.f32.partialorder %v907_v62, 0.0  ;;  %v1001_v1 = vmul.f32 0.01, %v907_v62 }
 0x2dc   : > { %v922_v2 = vadd.f32 %v12968_v0, %v16984_v58  ;;  %v916_v3 = vpop.f32.mrb[11].mxu0  ;;  %v1018_v6 = vsel %vm986_vm6, %v912_v60, %v1002_v63 }
 0x2dd   : > { %v917_v4 = vadd.f32 %v916_v3, %v16984_v58  ;;  %v1017_v5 = vsel %vm985_vm7, %v907_v62, %v1001_v1  ;;  %v1237_v1 = vld [vmem:[#allocation4 + $0x18] sm:$0xff] }
 0x2de   : > { %12995 = vmatprep.mubr.msk.f32.mxu1 %vm542_vm1, %v1017_v5  ;;  %v1004_v7 = vmul.f32 0.01, %v922_v2  ;;  %vm988_vm9 = vcmp.ge.f32.partialorder %v922_v2, 0.0  ;;  %v1244_v5 = vld [vmem:[#allocation4 + $0x50] sm:$0xff] }
 0x2df   : > { %v12971_v8 = vpop.f32.mrb[12].mxu0  ;;  %12996 = vmatmul.mubr.msk.f32.vlgmr.msra.gmra.mrb[24].mxu1 %vm542_vm1, %v1018_v6  ;;  %vm987_vm8 = vcmp.ge.f32.partialorder %v917_v4, 0.0  ;;  %v1003_v9 = vmul.f32 0.01, %v917_v4  ;;  %v1239_v6 = vld [vmem:[#allocation4 + $0x28] sm:$0xff] }
 0x2e0   : > { %v932_v10 = vadd.f32 %v12971_v8, %v16984_v58  ;;  %v926_v11 = vpop.f32.mrb[13].mxu0  ;;  %v1020_v14 = vsel %vm988_vm9, %v922_v2, %v1004_v7  ;;  %v1245_v2 = vld [vmem:[#allocation4 + $0x58] sm:$0xff]  ;;  %v1247_v7 = vld [vmem:[#allocation4 + $0x68] sm:$0xff]  ;;  %v16743_v8 = vmov 0.0  }
 0x2e1   : > { %v927_v12 = vadd.f32 %v926_v11, %v16984_v58  ;;  %v1019_v13 = vsel %vm987_vm8, %v917_v4, %v1003_v9  ;;  %v15077_v3 = vpack.c.bf16 %v1245_v2, %v1237_v1  ;;  %v1236_v4 = vld [vmem:[#allocation4 + $0x10] sm:$0xff]  ;;  %1407 = vmatprep.mubr.f32.mxu0 %v16743_v8  ;;  %v15081_v9 = vpack.c.bf16 %v1247_v7, %v1239_v6  ;;  %v1249_v11 = vld [vmem:[#allocation4 + $0x78] sm:$0xff]  ;;  %v255_v2 = vld [vmem:[%s17237_s30 + $0x10] sm:$0xff] }
 0x2e2   : > { %12998 = vmatprep.mubr.msk.f32.mxu1 %vm542_vm1, %v1019_v13  ;;  %v1006_v15 = vmul.f32 0.01, %v932_v10  ;;  %vm990_vm11 = vcmp.ge.f32.partialorder %v932_v10, 0.0  ;;  %v17021_v13 = vsub.s32 3, %v16897_v32  ;;  %v254_v1 = vld [vmem:[%s17237_s30 + $0x8] sm:$0xff]  ;;  %v257_v6 = vld [vmem:[%s17237_s30 + $0x20] sm:$0xff] }
 0x2e3   : > { %v12974_v16 = vpop.f32.mrb[14].mxu0  ;;  %12999 = vmatmul.mubr.msk.f32.gmra.mrb[26].mxu1 %vm542_vm1, %v1020_v14  ;;  %vm989_vm10 = vcmp.ge.f32.partialorder %v927_v12, 0.0  ;;  %v1005_v17 = vmul.f32 0.01, %v927_v12  ;;  %15078 = vmatprep.subr.bf16.mxu1 %v15077_v3 }
 0x2e4   : > { %v942_v18 = vadd.f32 %v12974_v16, %v16984_v58  ;;  %v936_v19 = vpop.f32.mrb[15].mxu0  ;;  %v1022_v22 = vsel %vm990_vm11, %v932_v10, %v1006_v15  ;;  %15082 = vmatprep.subr.bf16.mxu0 %v15081_v9  ;;  %v1241_v10 = vld [vmem:[#allocation4 + $0x38] sm:$0xff]  ;;  %19533 = vst [vmem:[#allocation10_spill] sm:$0xff] %v17021_v13  ;;  %v17025_v14 = vrot.slane %v16902_v34, %v17021_v13  ;;  %v1238_v15 = vld [vmem:[#allocation4 + $0x20] sm:$0xff]  ;;  %v17034_v34 = vld [vmem:[#allocation2 + $0x80] sm:$0xff] }
 0x2e5   : > { %v937_v20 = vadd.f32 %v936_v19, %v16984_v58  ;;  %v1021_v21 = vsel %vm989_vm10, %v927_v12, %v1005_v17  ;;  %v15085_v12 = vpack.c.bf16 %v1249_v11, %v1241_v10  ;;  %v1246_v16 = vld [vmem:[#allocation4 + $0x60] sm:$0xff]  ;;  %v1240_v17 = vld [vmem:[#allocation4 + $0x30] sm:$0xff]  ;;  %vm2077_vm10 = vcmask 64512  }
 0x2e6   : > { %13001 = vmatprep.mubr.msk.f32.mxu1 %vm542_vm1, %v1021_v21  ;;  %vm992_vm12 = vcmp.ge.f32.partialorder %v942_v18, 0.0  ;;  %v1008_v23 = vmul.f32 0.01, %v942_v18  ;;  %v15083_v21 = vpack.c.bf16 %v1246_v16, %v1238_v15  ;;  %v19505_v15 = vmov 0.9  }
 0x2e7   : > { %13002 = vmatmul.mubr.msk.f32.gmra.mrb[28].mxu1 %vm542_vm1, %v1022_v22  ;;  %v12977_v24 = vpop.f32.mrb[16].mxu0  ;;  %vm991_vm13 = vcmp.ge.f32.partialorder %v937_v20, 0.0  ;;  %v1007_v25 = vmul.f32 0.01, %v937_v20 }
 0x2e8   : > { %v952_v26 = vadd.f32 %v12977_v24, %v16984_v58  ;;  %v946_v27 = vpop.f32.mrb[17].mxu0  ;;  %v1024_v28 = vsel %vm992_vm12, %v942_v18, %v1008_v23  ;;  %v1248_v18 = vld [vmem:[#allocation4 + $0x70] sm:$0xff] }
 0x2e9   : > { %v1023_v29 = vsel %vm991_vm13, %v937_v20, %v1007_v25  ;;  %v947_v30 = vadd.f32 %v946_v27, %v16984_v58  ;;  %v15087_v23 = vpack.c.bf16 %v1248_v18, %v1240_v17 }
 0x2ea   : > { %13004 = vmatprep.mubr.msk.f32.mxu1 %vm542_vm1, %v1023_v29  ;;  %vm994_vm14 = vcmp.ge.f32.partialorder %v952_v26, 0.0  ;;  %v1010_v31 = vmul.f32 0.01, %v952_v26 }
 0x2eb   : > { %13005 = vmatmul.mubr.msk.f32.gmra.mrb[30].mxu1 %vm542_vm1, %v1024_v28  ;;  %vm993_vm15 = vcmp.ge.f32.partialorder %v947_v30, 0.0  ;;  %v1009_v36 = vmul.f32 0.01, %v947_v30  ;;  %v12980_v37 = vpop.f32.mrb[18].mxu0 }
 0x2ec   : > { %v962_v38 = vadd.f32 %v12980_v37, %v16984_v58  ;;  %v1026_v39 = vsel %vm994_vm14, %v952_v26, %v1010_v31  ;;  %v956_v35 = vpop.f32.mrb[19].mxu0 }
 0x2ed   : > { %v1025_v40 = vsel %vm993_vm15, %v947_v30, %v1009_v36  ;;  %v957_v41 = vadd.f32 %v956_v35, %v16984_v58 }
 0x2ee   : > { %13007 = vmatprep.mubr.msk.f32.mxu1 %vm542_vm1, %v1025_v40  ;;  %vm996_vm2 = vcmp.ge.f32.partialorder %v962_v38, 0.0  ;;  %v1012_v42 = vmul.f32 0.01, %v962_v38 }
 0x2ef   : > { %13008 = vmatmul.mubr.msk.f32.gmra.mrb[32].mxu1 %vm542_vm1, %v1026_v39  ;;  %vm995_vm3 = vcmp.ge.f32.partialorder %v957_v41, 0.0  ;;  %v1011_v43 = vmul.f32 0.01, %v957_v41  ;;  %v12983_v44 = vpop.f32.mrb[20].mxu0 }
 0x2f0   : > { %v972_v47 = vadd.f32 %v12983_v44, %v16984_v58  ;;  %v1028_v48 = vsel %vm996_vm2, %v962_v38, %v1012_v42  ;;  %v966_v49 = vpop.f32.mrb[21].mxu0 }
 0x2f1   : > { %v1027_v50 = vsel %vm995_vm3, %v957_v41, %v1011_v43  ;;  %v967_v51 = vadd.f32 %v966_v49, %v16984_v58 }
 0x2f2   : > { %13010 = vmatprep.mubr.msk.f32.mxu1 %vm542_vm1, %v1027_v50  ;;  %vm998_vm4 = vcmp.ge.f32.partialorder %v972_v47, 0.0  ;;  %v1014_v52 = vmul.f32 0.01, %v972_v47 }
 0x2f3   : > { %13011 = vmatmul.mubr.msk.f32.gmra.mrb[34].mxu1 %vm542_vm1, %v1028_v48  ;;  %vm997_vm5 = vcmp.ge.f32.partialorder %v967_v51, 0.0  ;;  %v1013_v53 = vmul.f32 0.01, %v967_v51  ;;  %v12986_v54 = vpop.f32.mrb[22].mxu0 }
 0x2f4   : > { %v982_v55 = vadd.f32 %v12986_v54, %v16984_v58  ;;  %v1030_v56 = vsel %vm998_vm4, %v972_v47, %v1014_v52  ;;  %v976_v46 = vpop.f32.mrb[23].mxu0 }
 0x2f5   : > { %v1029_v59 = vsel %vm997_vm5, %v967_v51, %v1013_v53  ;;  %v977_v60 = vadd.f32 %v976_v46, %v16984_v58  ;;  %v15079_v58 = vpack.c.bf16 %v1244_v5, %v1236_v4 }
 0x2f6   : > { %13013 = vmatprep.mubr.msk.f32.mxu1 %vm542_vm1, %v1029_v59  ;;  %vm1000_vm6 = vcmp.ge.f32.partialorder %v982_v55, 0.0  ;;  %v1016_v61 = vmul.f32 0.01, %v982_v55  ;;  %v1987_v59 = vld [vmem:[#allocation2 + $0x78] sm:$0xff] }
 0x2f7   : > { %13014 = vmatmul.mubr.msk.f32.gmra.mrb[36].mxu1 %vm542_vm1, %v1030_v56  ;;  %vm999_vm7 = vcmp.ge.f32.partialorder %v977_v60, 0.0  ;;  %v1015_v62 = vmul.f32 0.01, %v977_v60 }
 0x2f8   : > { %v1032_v63 = vsel %vm1000_vm6, %v982_v55, %v1016_v61  ;;  %15080 = vmatpush1.bf16.msra.mxu1 %v15079_v58  ;;  %v17243_v61 = vrot.slane %v1987_v59, %v16900_v33  ;;  %v256_v58 = vld [vmem:[%s17237_s30 + $0x18] sm:$0xff] }
 0x2f9   : > { %v1031_v0 = vsel %vm999_vm7, %v977_v60, %v1015_v62  ;;  %15086 = vmatprep.subr.bf16.mxu1 %v15085_v12  ;;  %v19504_v60 = vsub.s32 4, %v16897_v32  ;;  %v253_v62 = vld [vmem:[%s17237_s30] sm:$0xff]  ;;  %v258_v12 = vld [vmem:[%s17237_s30 + $0x28] sm:$0xff] }
 0x2fa   : > { %13016 = vmatprep.mubr.msk.f32.mxu1 %vm542_vm1, %v1031_v0  ;;  %v1993_v3 = vadd.f32 %v17243_v61, %v254_v1  ;;  %v1994_v5 = vadd.f32 %v17243_v61, %v255_v2  ;;  %v1995_v9 = vadd.f32 %v17243_v61, %v256_v58  ;;  %v1996_v11 = vadd.f32 %v17243_v61, %v257_v6 }
 0x2fb   : > { %13017 = vmatmul.mubr.msk.f32.gmra.mrb[38].mxu1 %vm542_vm1, %v1032_v63  ;;  %v1992_v63 = vadd.f32 %v17243_v61, %v253_v62  ;;  %v17255_v0 = vrot.slane %v1987_v59, %v19504_v60  ;;  %v1997_v18 = vadd.f32 %v17243_v61, %v258_v12 }
 0x2fc   : > { %1568 = vmatprep.mubr.f32.mxu1 %v16743_v8 }
 0x2fd   : > { %v2012_v4 = vmul.f32 %v17255_v0, %v1992_v63  ;;  %v2013_v7 = vmul.f32 %v17255_v0, %v1993_v3  ;;  %v2014_v10 = vmul.f32 %v17255_v0, %v1994_v5  ;;  %v2015_v17 = vmul.f32 %v17255_v0, %v1995_v9  ;;  %v268_v3 = vld [vmem:[%s17237_s30 + $0x78] sm:$0xff] }
 0x2fe   : > { %v2007_v9 = vadd.f32 %v17243_v61, %v268_v3 }
 0x2ff   : > { %vm2028_vm1 = vcmp.ge.f32.partialorder %v2012_v4, 0.0  ;;  %vm2029_vm8 = vcmp.ge.f32.partialorder %v2013_v7, 0.0  ;;  %vm2030_vm9 = vcmp.ge.f32.partialorder %v2014_v10, 0.0  ;;  %vm2031_vm11 = vcmp.ge.f32.partialorder %v2015_v17, 0.0 }
 0x300   : > { %v2044_v16 = vsel %vm2028_vm1, 1.0, %v19505_v15 }
 0x3b2   : > { %v12997_v19 = vpop.f32.mrb[24].mxu1 }
 0x3b3   : > { %v1155_v20 = vpop.f32.mrb[25].mxu1  ;;  %v17038_v26 = vadd.f32 %v12997_v19, %v17025_v14  ;;  %v2016_v19 = vmul.f32 %v17255_v0, %v1996_v11 }
 0x3b4   : > { %v17028_v22 = vadd.f32 %v1155_v20, %v17025_v14 }
 0x3b5   : > { %vm2032_vm12 = vcmp.ge.f32.partialorder %v2016_v19, 0.0 }
 0x3b6   : > { %v13000_v24 = vpop.f32.mrb[26].mxu1  ;;  %11429 = vmatmul.mubr.msk.f32.vlgmr.msra.gmra.mrb[24].mxu0 %vm292_vm0, %v17028_v22  ;;  %11445 = vmatmul.mubr.msk.f32.vlgmr.msra.gmra.mrb[40].mxu1 %vm292_vm0, %v17028_v22 }
 0x3b7   : > { %15084 = vmatpush1.bf16.msra.mxu0 %v15083_v21  ;;  %v1165_v25 = vpop.f32.mrb[27].mxu1  ;;  %1413 = vmatprep.mubr.f32.mxu0 %v16743_v8  ;;  %v17058_v36 = vadd.f32 %v13000_v24, %v17025_v14  ;;  %v260_v21 = vld [vmem:[%s17237_s30 + $0x38] sm:$0xff]  ;;  %v2045_v24 = vsel %vm2029_vm8, 1.0, %v19505_v15 }
 0x3b8   : > { %1574 = vmatprep.mubr.f32.mxu1 %v16743_v8  ;;  %15088 = vmatpush1.bf16.msra.mxu1 %v15087_v23  ;;  %v17049_v29 = vadd.f32 %v1165_v25, %v17025_v14  ;;  %v17301_v23 = vmul.f32 %v2044_v16, %v2012_v4  ;;  %v2017_v25 = vmul.f32 %v17255_v0, %v1997_v18 }
 0x3b9   : > { %13019 = vmatprep.subr.mxu0 %v17034_v34 }
 0x3ba   : > { %v13003_v27 = vpop.f32.mrb[28].mxu1  ;;  %11430 = vmatmul.mubr.msk.f32.gmra.mrb[26].mxu0 %vm292_vm0, %v17038_v26  ;;  %11446 = vmatmul.mubr.msk.f32.gmra.mrb[42].mxu1 %vm292_vm0, %v17038_v26  ;;  %vm2033_vm13 = vcmp.ge.f32.partialorder %v2017_v25, 0.0 }
 0x3bb   : > { %v1175_v28 = vpop.f32.mrb[29].mxu1  ;;  %1419 = vmatprep.mubr.f32.mxu0 %v16743_v8  ;;  %1580 = vmatprep.mubr.f32.mxu1 %v16743_v8  ;;  %v17076_v41 = vadd.f32 %v13003_v27, %v17025_v14 }
 0x3bc   : > { %v17067_v39 = vadd.f32 %v1175_v28, %v17025_v14 }
 0x3be   : > { %v13006_v30 = vpop.f32.mrb[30].mxu1  ;;  %11431 = vmatmul.mubr.msk.f32.gmra.mrb[28].mxu0 %vm292_vm0, %v17049_v29  ;;  %11447 = vmatmul.mubr.msk.f32.gmra.mrb[44].mxu1 %vm292_vm0, %v17049_v29 }
 0x3bf   : > { %v1185_v31 = vpop.f32.mrb[31].mxu1  ;;  %1425 = vmatprep.mubr.f32.mxu0 %v16743_v8  ;;  %1586 = vmatprep.mubr.f32.mxu1 %v16743_v8  ;;  %v17094_v49 = vadd.f32 %v13006_v30, %v17025_v14  ;;  %v263_v30 = vld [vmem:[%s17237_s30 + $0x50] sm:$0xff] }
 0x3c0   : > { %v17085_v44 = vadd.f32 %v1185_v31, %v17025_v14 }
 0x3c2   : > { %11432 = vmatmul.mubr.msk.f32.gmra.mrb[30].mxu0 %vm292_vm0, %v17058_v36  ;;  %11448 = vmatmul.mubr.msk.f32.gmra.mrb[46].mxu1 %vm292_vm0, %v17058_v36  ;;  %v13009_v37 = vpop.f32.mrb[32].mxu1 }
 0x3c3   : > { %1431 = vmatprep.mubr.f32.mxu0 %v16743_v8  ;;  %1592 = vmatprep.mubr.f32.mxu1 %v16743_v8  ;;  %v1195_v38 = vpop.f32.mrb[33].mxu1  ;;  %v17112_v51 = vadd.f32 %v13009_v37, %v17025_v14  ;;  %v2048_v37 = vsel %vm2032_vm12, 1.0, %v19505_v15 }
 0x3c4   : > { %v17103_v50 = vadd.f32 %v1195_v38, %v17025_v14 }
 0x3c6   : > { %11433 = vmatmul.mubr.msk.f32.gmra.mrb[32].mxu0 %vm292_vm0, %v17067_v39  ;;  %11449 = vmatmul.mubr.msk.f32.gmra.mrb[48].mxu1 %vm292_vm0, %v17067_v39  ;;  %v13012_v35 = vpop.f32.mrb[34].mxu1 }
 0x3c7   : > { %1437 = vmatprep.mubr.f32.mxu0 %v16743_v8  ;;  %1598 = vmatprep.mubr.f32.mxu1 %v16743_v8  ;;  %v1205_v40 = vpop.f32.mrb[35].mxu1  ;;  %v17130_v53 = vadd.f32 %v13012_v35, %v17025_v14 }
 0x3c8   : > { %v17121_v52 = vadd.f32 %v1205_v40, %v17025_v14  ;;  %v2002_v40 = vadd.f32 %v17243_v61, %v263_v30  ;;  %v2323_v30 = vld [vmem:[#allocation2 + $0xa8] sm:$0xff] }
 0x3ca   : > { %11434 = vmatmul.mubr.msk.f32.gmra.mrb[34].mxu0 %vm292_vm0, %v17076_v41  ;;  %11450 = vmatmul.mubr.msk.f32.gmra.mrb[50].mxu1 %vm292_vm0, %v17076_v41  ;;  %v13015_v42 = vpop.f32.mrb[36].mxu1 }
 0x3cb   : > { %1443 = vmatprep.mubr.f32.mxu0 %v16743_v8  ;;  %1604 = vmatprep.mubr.f32.mxu1 %v16743_v8  ;;  %v1215_v43 = vpop.f32.mrb[37].mxu1  ;;  %v17148_v55 = vadd.f32 %v13015_v42, %v17025_v14 }
 0x3cc   : > { %v17139_v54 = vadd.f32 %v1215_v43, %v17025_v14  ;;  %v265_v43 = vld [vmem:[%s17237_s30 + $0x60] sm:$0xff] }
 0x3ce   : > { %11435 = vmatmul.mubr.msk.f32.gmra.mrb[36].mxu0 %vm292_vm0, %v17085_v44  ;;  %11451 = vmatmul.mubr.msk.f32.gmra.mrb[52].mxu1 %vm292_vm0, %v17085_v44  ;;  %v13018_v47 = vpop.f32.mrb[38].mxu1 }
 0x3cf   : > { %1449 = vmatprep.mubr.f32.mxu0 %v16743_v8  ;;  %1610 = vmatprep.mubr.f32.mxu1 %v16743_v8  ;;  %v1225_v48 = vpop.f32.mrb[39].mxu1  ;;  %v17166_v46 = vadd.f32 %v13018_v47, %v17025_v14  ;;  %v2049_v47 = vsel %vm2033_vm13, 1.0, %v19505_v15 }
 0x3d0   : > { %v17157_v56 = vadd.f32 %v1225_v48, %v17025_v14  ;;  %v259_v14 = vld [vmem:[%s17237_s30 + $0x30] sm:$0xff] }
 0x3d1   : > { %v1998_v20 = vadd.f32 %v17243_v61, %v259_v14 }
 0x3d2   : > { %11436 = vmatmul.mubr.msk.f32.gmra.mrb[38].mxu0 %vm292_vm0, %v17094_v49  ;;  %11452 = vmatmul.mubr.msk.f32.gmra.mrb[54].mxu1 %vm292_vm0, %v17094_v49 }
 0x3d3   : > { %1455 = vmatprep.mubr.f32.mxu0 %v16743_v8  ;;  %1616 = vmatprep.mubr.f32.mxu1 %v16743_v8  ;;  %v2018_v27 = vmul.f32 %v17255_v0, %v1998_v20 }
 0x3d5   : > { %vm2034_vm14 = vcmp.ge.f32.partialorder %v2018_v27, 0.0 }
 0x3d6   : > { %11437 = vmatmul.mubr.msk.f32.gmra.mrb[40].mxu0 %vm292_vm0, %v17103_v50  ;;  %11453 = vmatmul.mubr.msk.f32.gmra.mrb[56].mxu1 %vm292_vm0, %v17103_v50  ;;  %v2050_v48 = vsel %vm2034_vm14, 1.0, %v19505_v15 }
 0x3d7   : > { %1461 = vmatprep.mubr.f32.mxu0 %v16743_v8  ;;  %1622 = vmatprep.mubr.f32.mxu1 %v16743_v8 }
 0x3da   : > { %11438 = vmatmul.mubr.msk.f32.gmra.mrb[42].mxu0 %vm292_vm0, %v17112_v51  ;;  %11454 = vmatmul.mubr.msk.f32.gmra.mrb[58].mxu1 %vm292_vm0, %v17112_v51 }
 0x3db   : > { %1467 = vmatprep.mubr.f32.mxu0 %v16743_v8  ;;  %1628 = vmatprep.mubr.f32.mxu1 %v16743_v8 }
 0x3de   : > { %11439 = vmatmul.mubr.msk.f32.gmra.mrb[44].mxu0 %vm292_vm0, %v17121_v52  ;;  %11455 = vmatmul.mubr.msk.f32.gmra.mrb[60].mxu1 %vm292_vm0, %v17121_v52 }
 0x3df   : > { %1473 = vmatprep.mubr.f32.mxu0 %v16743_v8  ;;  %1634 = vmatprep.mubr.f32.mxu1 %v16743_v8 }
 0x3e2   : > { %11440 = vmatmul.mubr.msk.f32.gmra.mrb[46].mxu0 %vm292_vm0, %v17130_v53  ;;  %11456 = vmatmul.mubr.msk.f32.gmra.mrb[62].mxu1 %vm292_vm0, %v17130_v53 }
 0x3e3   : > { %1479 = vmatprep.mubr.f32.mxu0 %v16743_v8  ;;  %1640 = vmatprep.mubr.f32.mxu1 %v16743_v8 }
 0x3e6   : > { %11441 = vmatmul.mubr.msk.f32.gmra.mrb[48].mxu0 %vm292_vm0, %v17139_v54  ;;  %11457 = vmatmul.mubr.msk.f32.gmra.mrb[64].mxu1 %vm292_vm0, %v17139_v54 }
 0x3e7   : > { %1485 = vmatprep.mubr.f32.mxu0 %v16743_v8  ;;  %1646 = vmatprep.mubr.f32.mxu1 %v16743_v8 }
 0x3ea   : > { %11442 = vmatmul.mubr.msk.f32.gmra.mrb[50].mxu0 %vm292_vm0, %v17148_v55  ;;  %11458 = vmatmul.mubr.msk.f32.gmra.mrb[66].mxu1 %vm292_vm0, %v17148_v55 }
 0x3eb   : > { %1491 = vmatprep.mubr.f32.mxu0 %v16743_v8  ;;  %1652 = vmatprep.mubr.f32.mxu1 %v16743_v8 }
 0x3ee   : > { %11443 = vmatmul.mubr.msk.f32.gmra.mrb[52].mxu0 %vm292_vm0, %v17157_v56  ;;  %11459 = vmatmul.mubr.msk.f32.gmra.mrb[68].mxu1 %vm292_vm0, %v17157_v56 }
 0x3ef   : > { %1497 = vmatprep.mubr.f32.mxu0 %v16743_v8  ;;  %1658 = vmatprep.mubr.f32.mxu1 %v16743_v8 }
 0x3f2   : > { %11444 = vmatmul.mubr.msk.f32.gmra.mrb[54].mxu0 %vm292_vm0, %v17166_v46  ;;  %11460 = vmatmul.mubr.msk.f32.gmra.mrb[70].mxu1 %vm292_vm0, %v17166_v46 }
 0x3f3   : > { %1729 = vmatprep.mubr.f32.mxu0 %v16743_v8  ;;  %1890 = vmatprep.mubr.f32.mxu1 %v16743_v8 }
 0x3f6   : > { %11461 = vmatmul.mubr.msk.f32.vlgmr.msra.gmra.mrb[56].mxu0 %vm292_vm0, %v17028_v22  ;;  %11477 = vmatmul.mubr.msk.f32.vlgmr.msra.gmra.mrb[72].mxu1 %vm292_vm0, %v17028_v22  ;;  %v261_v22 = vld [vmem:[%s17237_s30 + $0x40] sm:$0xff] }
 0x3f7   : > { %13020 = vmatpush3.msra.mxu0 %v17034_v34  ;;  %1735 = vmatprep.mubr.f32.mxu0 %v16743_v8  ;;  %v2046_v34 = vsel %vm2030_vm9, 1.0, %v19505_v15  ;;  %v2000_v28 = vadd.f32 %v17243_v61, %v261_v22 }
 0x3f8   : > { %1896 = vmatprep.mubr.f32.mxu1 %v16743_v8  ;;  %v17319_v31 = vmul.f32 %v2046_v34, %v2014_v10  ;;  %v2319_v34 = vld [vmem:[#allocation2 + $0x88] sm:$0xff] }
 0x3f9   : > { %v2020_v35 = vmul.f32 %v17255_v0, %v2000_v28  ;;  %v2322_v28 = vld [vmem:[#allocation2 + $0xa0] sm:$0xff] }
 0x3fa   : > { %11462 = vmatmul.mubr.msk.f32.gmra.mrb[58].mxu0 %vm292_vm0, %v17038_v26  ;;  %11478 = vmatmul.mubr.msk.f32.gmra.mrb[74].mxu1 %vm292_vm0, %v17038_v26  ;;  %v1999_v26 = vadd.f32 %v17243_v61, %v260_v21 }
 0x3fb   : > { %1741 = vmatprep.mubr.f32.mxu0 %v16743_v8  ;;  %1902 = vmatprep.mubr.f32.mxu1 %v16743_v8  ;;  %vm2036_vm15 = vcmp.ge.f32.partialorder %v2020_v35, 0.0 }
 0x3fc   : > { %v2019_v38 = vmul.f32 %v17255_v0, %v1999_v26  ;;  %v2052_v59 = vsel %vm2036_vm15, 1.0, %v19505_v15 }
 0x3fd   : > { %v17366_v5 = vmul.f32 %v2052_v59, %v2020_v35 }
 0x3fe   : > { %11463 = vmatmul.mubr.msk.f32.gmra.mrb[60].mxu0 %vm292_vm0, %v17049_v29  ;;  %11479 = vmatmul.mubr.msk.f32.gmra.mrb[76].mxu1 %vm292_vm0, %v17049_v29  ;;  %v262_v29 = vld [vmem:[%s17237_s30 + $0x48] sm:$0xff] }
 0x3ff   : > { %1747 = vmatprep.mubr.f32.mxu0 %v16743_v8  ;;  %1908 = vmatprep.mubr.f32.mxu1 %v16743_v8 }
 0x402   : > { %11464 = vmatmul.mubr.msk.f32.gmra.mrb[62].mxu0 %vm292_vm0, %v17058_v36  ;;  %11480 = vmatmul.mubr.msk.f32.gmra.mrb[78].mxu1 %vm292_vm0, %v17058_v36  ;;  %v2047_v36 = vsel %vm2031_vm11, 1.0, %v19505_v15 }
 0x403   : > { %1753 = vmatprep.mubr.f32.mxu0 %v16743_v8  ;;  %1914 = vmatprep.mubr.f32.mxu1 %v16743_v8  ;;  %v17330_v42 = vmul.f32 %v2047_v36, %v2015_v17  ;;  %v2324_v36 = vld [vmem:[#allocation2 + $0xb0] sm:$0xff] }
 0x406   : > { %11465 = vmatmul.mubr.msk.f32.gmra.mrb[64].mxu0 %vm292_vm0, %v17067_v39  ;;  %11481 = vmatmul.mubr.msk.f32.gmra.mrb[80].mxu1 %vm292_vm0, %v17067_v39  ;;  %v2001_v39 = vadd.f32 %v17243_v61, %v262_v29 }
 0x407   : > { %1759 = vmatprep.mubr.f32.mxu0 %v16743_v8  ;;  %1920 = vmatprep.mubr.f32.mxu1 %v16743_v8 }
 0x40a   : > { %11466 = vmatmul.mubr.msk.f32.gmra.mrb[66].mxu0 %vm292_vm0, %v17076_v41  ;;  %11482 = vmatmul.mubr.msk.f32.gmra.mrb[82].mxu1 %vm292_vm0, %v17076_v41  ;;  %v264_v41 = vld [vmem:[%s17237_s30 + $0x58] sm:$0xff] }
 0x40b   : > { %1765 = vmatprep.mubr.f32.mxu0 %v16743_v8  ;;  %1926 = vmatprep.mubr.f32.mxu1 %v16743_v8 }
 0x40e   : > { %11467 = vmatmul.mubr.msk.f32.gmra.mrb[68].mxu0 %vm292_vm0, %v17085_v44  ;;  %11483 = vmatmul.mubr.msk.f32.gmra.mrb[84].mxu1 %vm292_vm0, %v17085_v44  ;;  %v17335_v44 = vmul.f32 %v2048_v37, %v2016_v19  ;;  %v15097_v37 = vpack.c.bf16 %v2324_v36, %v2323_v30 }
 0x40f   : > { %1771 = vmatprep.mubr.f32.mxu0 %v16743_v8  ;;  %1932 = vmatprep.mubr.f32.mxu1 %v16743_v8 }
 0x412   : > { %11468 = vmatmul.mubr.msk.f32.gmra.mrb[70].mxu0 %vm292_vm0, %v17094_v49  ;;  %11484 = vmatmul.mubr.msk.f32.gmra.mrb[86].mxu1 %vm292_vm0, %v17094_v49  ;;  %v2021_v49 = vmul.f32 %v17255_v0, %v2001_v39  ;;  %v2326_v39 = vld [vmem:[#allocation2 + $0xc0] sm:$0xff] }
 0x413   : > { %1777 = vmatprep.mubr.f32.mxu0 %v16743_v8  ;;  %1938 = vmatprep.mubr.f32.mxu1 %v16743_v8 }
 0x414   : > { %vm2037_vm2 = vcmp.ge.f32.partialorder %v2021_v49, 0.0 }
 0x415   : > { %v2053_v58 = vsel %vm2037_vm2, 1.0, %v19505_v15 }
 0x416   : > { %11469 = vmatmul.mubr.msk.f32.gmra.mrb[72].mxu0 %vm292_vm0, %v17103_v50  ;;  %11485 = vmatmul.mubr.msk.f32.gmra.mrb[88].mxu1 %vm292_vm0, %v17103_v50  ;;  %v2003_v50 = vadd.f32 %v17243_v61, %v264_v41  ;;  %v17375_v11 = vmul.f32 %v2053_v58, %v2021_v49  ;;  %v2328_v41 = vld [vmem:[#allocation2 + $0xd0] sm:$0xff] }
 0x417   : > { %1783 = vmatprep.mubr.f32.mxu0 %v16743_v8  ;;  %1944 = vmatprep.mubr.f32.mxu1 %v16743_v8 }
 0x418   : > { %v2023_v62 = vmul.f32 %v17255_v0, %v2003_v50  ;;  %v2331_v50 = vld [vmem:[#allocation2 + $0xe8] sm:$0xff] }
 0x41a   : > { %11470 = vmatmul.mubr.msk.f32.gmra.mrb[74].mxu0 %vm292_vm0, %v17112_v51  ;;  %11486 = vmatmul.mubr.msk.f32.gmra.mrb[90].mxu1 %vm292_vm0, %v17112_v51  ;;  %v2022_v51 = vmul.f32 %v17255_v0, %v2002_v40  ;;  %vm2039_vm4 = vcmp.ge.f32.partialorder %v2023_v62, 0.0  ;;  %v2327_v40 = vld [vmem:[#allocation2 + $0xc8] sm:$0xff] }
 0x41b   : > { %1789 = vmatprep.mubr.f32.mxu0 %v16743_v8  ;;  %1950 = vmatprep.mubr.f32.mxu1 %v16743_v8  ;;  %v2055_v14 = vsel %vm2039_vm4, 1.0, %v19505_v15 }
 0x41c   : > { %vm2038_vm3 = vcmp.ge.f32.partialorder %v2022_v51, 0.0  ;;  %v17386_v17 = vmul.f32 %v2055_v14, %v2023_v62 }
 0x41d   : > { %v2054_v6 = vsel %vm2038_vm3, 1.0, %v19505_v15 }
 0x41e   : > { %11471 = vmatmul.mubr.msk.f32.gmra.mrb[76].mxu0 %vm292_vm0, %v17121_v52  ;;  %11487 = vmatmul.mubr.msk.f32.gmra.mrb[92].mxu1 %vm292_vm0, %v17121_v52  ;;  %v2004_v52 = vadd.f32 %v17243_v61, %v265_v43  ;;  %v17379_v12 = vmul.f32 %v2054_v6, %v2022_v51  ;;  %v15105_v43 = vpack.c.bf16 %v2328_v41, %v2327_v40  ;;  %v2332_v51 = vld [vmem:[#allocation2 + $0xf0] sm:$0xff] }
 0x41f   : > { %1795 = vmatprep.mubr.f32.mxu0 %v16743_v8  ;;  %1956 = vmatprep.mubr.f32.mxu1 %v16743_v8 }
 0x420   : > { %v2024_v1 = vmul.f32 %v17255_v0, %v2004_v52  ;;  %v15113_v52 = vpack.c.bf16 %v2332_v51, %v2331_v50 }
 0x422   : > { %11472 = vmatmul.mubr.msk.f32.gmra.mrb[78].mxu0 %vm292_vm0, %v17130_v53  ;;  %11488 = vmatmul.mubr.msk.f32.gmra.mrb[94].mxu1 %vm292_vm0, %v17130_v53  ;;  %v266_v53 = vld [vmem:[%s17237_s30 + $0x68] sm:$0xff]  ;;  %vm2040_vm5 = vcmp.ge.f32.partialorder %v2024_v1, 0.0 }
 0x423   : > { %1801 = vmatprep.mubr.f32.mxu0 %v16743_v8  ;;  %1962 = vmatprep.mubr.f32.mxu1 %v16743_v8  ;;  %v2005_v63 = vadd.f32 %v17243_v61, %v266_v53  ;;  %v2056_v16 = vsel %vm2040_vm5, 1.0, %v19505_v15  ;;  %v2333_v53 = vld [vmem:[#allocation2 + $0xf8] sm:$0xff] }
 0x424   : > { %v17390_v18 = vmul.f32 %v2056_v16, %v2024_v1 }
 0x426   : > { %11473 = vmatmul.mubr.msk.f32.gmra.mrb[80].mxu0 %vm292_vm0, %v17139_v54  ;;  %11489 = vmatmul.mubr.msk.f32.gmra.mrb[96].mxu1 %vm292_vm0, %v17139_v54  ;;  %v17346_v54 = vmul.f32 %v2049_v47, %v2017_v25  ;;  %v2320_v25 = vld [vmem:[#allocation2 + $0x90] sm:$0xff]  ;;  %v2329_v47 = vld [vmem:[#allocation2 + $0xd8] sm:$0xff] }
 0x427   : > { %1807 = vmatprep.mubr.f32.mxu0 %v16743_v8  ;;  %1968 = vmatprep.mubr.f32.mxu1 %v16743_v8  ;;  %v15089_v26 = vpack.c.bf16 %v2320_v25, %v2319_v34 }
 0x429   : > { %15090 = vmatprep.subr.bf16.mxu1 %v15089_v26 }
 0x42a   : > { %11474 = vmatmul.mubr.msk.f32.gmra.mrb[82].mxu0 %vm292_vm0, %v17148_v55  ;;  %11490 = vmatmul.mubr.msk.f32.gmra.mrb[98].mxu1 %vm292_vm0, %v17148_v55  ;;  %v267_v55 = vld [vmem:[%s17237_s30 + $0x70] sm:$0xff] }
 0x42b   : > { %1813 = vmatprep.mubr.f32.mxu0 %v16743_v8  ;;  %1974 = vmatprep.mubr.f32.mxu1 %v16743_v8  ;;  %v2006_v2 = vadd.f32 %v17243_v61, %v267_v55  ;;  %v2027_v61 = vmul.f32 %v17255_v0, %v2007_v9  ;;  %v2334_v55 = vld [vmem:[#allocation2 + $0x100] sm:$0xff] }
 0x42c   : > { %15092 = vmatpush3.bf16.msra.mxu1 %v15089_v26 }
 0x42d   : > { %v2026_v10 = vmul.f32 %v17255_v0, %v2006_v2  ;;  %vm2043_vm1 = vcmp.ge.f32.partialorder %v2027_v61, 0.0 }
 0x42e   : > { %11475 = vmatmul.mubr.msk.f32.gmra.mrb[84].mxu0 %vm292_vm0, %v17157_v56  ;;  %11491 = vmatmul.mubr.msk.f32.gmra.mrb[100].mxu1 %vm292_vm0, %v17157_v56  ;;  %v17351_v56 = vmul.f32 %v2050_v48, %v2018_v27  ;;  %v2059_v22 = vsel %vm2043_vm1, 1.0, %v19505_v15  ;;  %v2321_v27 = vld [vmem:[#allocation2 + $0x98] sm:$0xff]  ;;  %v2330_v48 = vld [vmem:[#allocation2 + $0xe0] sm:$0xff] }
 0x42f   : > { %1819 = vmatprep.mubr.f32.mxu0 %v16743_v8  ;;  %1980 = vmatprep.mubr.f32.mxu1 %v16743_v8  ;;  %v17314_v8 = vmul.f32 %v2045_v24, %v2013_v7  ;;  %v2025_v7 = vmul.f32 %v17255_v0, %v2005_v63  ;;  %vm2042_vm7 = vcmp.ge.f32.partialorder %v2026_v10, 0.0  ;;  %v17405_v24 = vmul.f32 %v2059_v22, %v2027_v61 }
 0x430   : > { %v2058_v20 = vsel %vm2042_vm7, 1.0, %v19505_v15  ;;  %v15093_v29 = vpack.c.bf16 %v2322_v28, %v2321_v27  ;;  %v15109_v49 = vpack.c.bf16 %v2330_v48, %v2329_v47 }
 0x431   : > { %vm2041_vm6 = vcmp.ge.f32.partialorder %v2025_v7, 0.0  ;;  %v17400_v21 = vmul.f32 %v2058_v20, %v2026_v10 }
 0x432   : > { %11476 = vmatmul.mubr.msk.f32.gmra.mrb[86].mxu0 %vm292_vm0, %v17166_v46  ;;  %11492 = vmatmul.mubr.msk.f32.gmra.mrb[102].mxu1 %vm292_vm0, %v17166_v46  ;;  %vm2035_vm0 = vcmp.ge.f32.partialorder %v2019_v38, 0.0  ;;  %v2057_v19 = vsel %vm2041_vm6, 1.0, %v19505_v15 }
 0x433   : > { %13021 = vmatprep.mubr.msk.f32.mxu0 %vm2077_vm10, %v17301_v23  ;;  %v2051_v46 = vsel %vm2035_vm0, 1.0, %v19505_v15  ;;  %v17396_v0 = vmul.f32 %v2057_v19, %v2025_v7  ;;  %15094 = vmatprep.subr.bf16.mxu1 %v15093_v29 }
 0x434   : > { %v17362_v4 = vmul.f32 %v2051_v46, %v2019_v38  ;;  %15096 = vmatpush3.bf16.msra.mxu1 %v15093_v29  ;;  %v2325_v38 = vld [vmem:[#allocation2 + $0xb8] sm:$0xff]  ;;  %v15117_v46 = vpack.c.bf16 %v2334_v55, %v2333_v53  ;;  %v2528_v53 = vld [vmem:[#allocation2 + $0x108] sm:$0xff]  ;;  %v2529_v55 = vld [vmem:[#allocation2 + $0x110] sm:$0xff] }
 0x435   : > { %15098 = vmatprep.subr.bf16.mxu1 %v15097_v37  ;;  %v15101_v35 = vpack.c.bf16 %v2326_v39, %v2325_v38 }
 0x436   : > { %13022 = vmatmul.mubr.msk.f32.vlgmr.msra.gmra.mrb[88].mxu0 %vm2077_vm10, %v17314_v8 }
 0x437   : > { %13024 = vmatprep.mubr.msk.f32.mxu0 %vm2077_vm10, %v17319_v31 }
 0x438   : > { %15100 = vmatpush3.bf16.msra.mxu1 %v15097_v37 }
 0x439   : > { %15102 = vmatprep.subr.bf16.mxu1 %v15101_v35 }
 0x43a   : > { %13025 = vmatmul.mubr.msk.f32.gmra.mrb[90].mxu0 %vm2077_vm10, %v17330_v42 }
 0x43b   : > { %13027 = vmatprep.mubr.msk.f32.mxu0 %vm2077_vm10, %v17335_v44 }
 0x43c   : > { %15104 = vmatpush3.bf16.msra.mxu1 %v15101_v35 }
 0x43d   : > { %15106 = vmatprep.subr.bf16.mxu1 %v15105_v43 }
 0x43e   : > { %13028 = vmatmul.mubr.msk.f32.gmra.mrb[92].mxu0 %vm2077_vm10, %v17346_v54 }
 0x43f   : > { %13030 = vmatprep.mubr.msk.f32.mxu0 %vm2077_vm10, %v17351_v56 }
 0x440   : > { %15108 = vmatpush3.bf16.msra.mxu1 %v15105_v43 }
 0x441   : > { %15110 = vmatprep.subr.bf16.mxu1 %v15109_v49 }
 0x442   : > { %13031 = vmatmul.mubr.msk.f32.gmra.mrb[94].mxu0 %vm2077_vm10, %v17362_v4 }
 0x443   : > { %13033 = vmatprep.mubr.msk.f32.mxu0 %vm2077_vm10, %v17366_v5 }
 0x444   : > { %15112 = vmatpush3.bf16.msra.mxu1 %v15109_v49 }
 0x445   : > { %15114 = vmatprep.subr.bf16.mxu1 %v15113_v52 }
 0x446   : > { %13034 = vmatmul.mubr.msk.f32.gmra.mrb[96].mxu0 %vm2077_vm10, %v17375_v11 }
 0x447   : > { %13036 = vmatprep.mubr.msk.f32.mxu0 %vm2077_vm10, %v17379_v12 }
 0x448   : > { %15116 = vmatpush3.bf16.msra.mxu1 %v15113_v52 }
 0x449   : > { %15118 = vmatprep.subr.bf16.mxu1 %v15117_v46 }
 0x44a   : > { %13037 = vmatmul.mubr.msk.f32.gmra.mrb[98].mxu0 %vm2077_vm10, %v17386_v17 }
 0x44b   : > { %13039 = vmatprep.mubr.msk.f32.mxu0 %vm2077_vm10, %v17390_v18 }
 0x44c   : > { %15120 = vmatpush3.bf16.msra.mxu1 %v15117_v46  ;;  %v2530_v46 = vld [vmem:[#allocation2 + $0x118] sm:$0xff] }
 0x44e   : > { %13040 = vmatmul.mubr.msk.f32.gmra.mrb[100].mxu0 %vm2077_vm10, %v17396_v0 }
 0x44f   : > { %13042 = vmatprep.mubr.msk.f32.mxu0 %vm2077_vm10, %v17400_v21 }
 0x452   : > { %13043 = vmatmul.mubr.msk.f32.gmra.mrb[102].mxu0 %vm2077_vm10, %v17405_v24 }
 0x489   : > { %v17411_v59 = vpop.f32.mrb[24].mxu0  ;;  %v17413_v62 = vpop.f32.mrb[40].mxu1 }
 0x48a   : > { %19534 = vst [vmem:[#allocation11_spill] sm:$0xff] %v17413_v62  ;;  %v17415_v63 = vpop.f32.mrb[25].mxu0  ;;  %v17417_v1 = vpop.f32.mrb[41].mxu1 }
 0x48b   : > { %19535 = vst [vmem:[#allocation12_spill] sm:$0xff] %v17417_v1 }
 0x48d   : > { %v17419_v2 = vpop.f32.mrb[26].mxu0  ;;  %v17421_v3 = vpop.f32.mrb[42].mxu1 }
 0x48e   : > { %19536 = vst [vmem:[#allocation13_spill] sm:$0xff] %v17421_v3  ;;  %v17423_v58 = vpop.f32.mrb[27].mxu0  ;;  %v17425_v6 = vpop.f32.mrb[43].mxu1 }
 0x48f   : > { %19537 = vst [vmem:[#allocation14_spill] sm:$0xff] %v17425_v6 }
 0x491   : > { %v17427_v7 = vpop.f32.mrb[28].mxu0  ;;  %v17429_v9 = vpop.f32.mrb[44].mxu1 }
 0x492   : > { %19538 = vst [vmem:[#allocation15_spill] sm:$0xff] %v17429_v9  ;;  %v17431_v10 = vpop.f32.mrb[29].mxu0  ;;  %v17433_v14 = vpop.f32.mrb[45].mxu1 }
 0x493   : > { %19539 = vst [vmem:[#allocation16_spill] sm:$0xff] %v17433_v14  ;;  %v2533_v14 = vld [vmem:[#allocation2 + $0x130] sm:$0xff] }
 0x495   : > { %v17435_v16 = vpop.f32.mrb[30].mxu0  ;;  %v17437_v61 = vpop.f32.mrb[46].mxu1 }
 0x496   : > { %19540 = vst [vmem:[#allocation17_spill] sm:$0xff] %v17437_v61  ;;  %v17439_v19 = vpop.f32.mrb[31].mxu0  ;;  %v17441_v20 = vpop.f32.mrb[47].mxu1 }
 0x497   : > { %19541 = vst [vmem:[#allocation18_spill] sm:$0xff] %v17441_v20 }
 0x499   : > { %v17443_v22 = vpop.f32.mrb[32].mxu0  ;;  %v17445_v34 = vpop.f32.mrb[48].mxu1 }
 0x49a   : > { %19542 = vst [vmem:[#allocation19_spill] sm:$0xff] %v17445_v34  ;;  %v17447_v25 = vpop.f32.mrb[33].mxu0  ;;  %v17449_v26 = vpop.f32.mrb[49].mxu1 }
 0x49b   : > { %19543 = vst [vmem:[#allocation20_spill] sm:$0xff] %v17449_v26 }
 0x49d   : > { %v17451_v27 = vpop.f32.mrb[34].mxu0  ;;  %v17453_v28 = vpop.f32.mrb[50].mxu1 }
 0x49e   : > { %19544 = vst [vmem:[#allocation21_spill] sm:$0xff] %v17453_v28  ;;  %v17455_v29 = vpop.f32.mrb[35].mxu0  ;;  %v17457_v30 = vpop.f32.mrb[51].mxu1  ;;  %v2541_v28 = vld [vmem:[#allocation2 + $0x170] sm:$0xff] }
 0x49f   : > { %19545 = vst [vmem:[#allocation22_spill] sm:$0xff] %v17457_v30  ;;  %v2532_v30 = vld [vmem:[#allocation2 + $0x128] sm:$0xff] }
 0x4a0   : > { %v15129_v13 = vpack.c.bf16 %v2533_v14, %v2532_v30 }
 0x4a1   : > { %v17459_v36 = vpop.f32.mrb[36].mxu0  ;;  %v17461_v37 = vpop.f32.mrb[52].mxu1 }
 0x4a2   : > { %19546 = vst [vmem:[#allocation23_spill] sm:$0xff] %v17461_v37  ;;  %v17463_v38 = vpop.f32.mrb[37].mxu0  ;;  %v17465_v39 = vpop.f32.mrb[53].mxu1 }
 0x4a3   : > { %19547 = vst [vmem:[#allocation24_spill] sm:$0xff] %v17465_v39  ;;  %v15121_v39 = vpack.c.bf16 %v2529_v55, %v2528_v53 }
 0x4a5   : > { %v17467_v35 = vpop.f32.mrb[38].mxu0  ;;  %v17469_v40 = vpop.f32.mrb[54].mxu1  ;;  %15122 = vmatprep.subr.bf16.mxu0 %v15121_v39 }
 0x4a6   : > { %19548 = vst [vmem:[#allocation25_spill] sm:$0xff] %v17469_v40  ;;  %v17471_v41 = vpop.f32.mrb[39].mxu0  ;;  %v17473_v43 = vpop.f32.mrb[55].mxu1  ;;  %15124 = vmatpush3.bf16.msra.mxu0 %v15121_v39  ;;  %v2536_v39 = vld [vmem:[#allocation2 + $0x148] sm:$0xff]  ;;  %v2539_v40 = vld [vmem:[#allocation2 + $0x160] sm:$0xff] }
 0x4a7   : > { %19549 = vst [vmem:[#allocation26_spill] sm:$0xff] %v17473_v43  ;;  %v2531_v43 = vld [vmem:[#allocation2 + $0x120] sm:$0xff] }
 0x4a8   : > { %v15125_v26 = vpack.c.bf16 %v2531_v43, %v2530_v46 }
 0x4a9   : > { %v17475_v47 = vpop.f32.mrb[40].mxu0  ;;  %v17477_v48 = vpop.f32.mrb[56].mxu1 }
 0x4aa   : > { %19550 = vst [vmem:[#allocation27_spill] sm:$0xff] %v17477_v48  ;;  %v17479_v49 = vpop.f32.mrb[41].mxu0  ;;  %v17481_v50 = vpop.f32.mrb[57].mxu1  ;;  %15126 = vmatprep.subr.bf16.mxu0 %v15125_v26  ;;  %v2534_v48 = vld [vmem:[#allocation2 + $0x138] sm:$0xff] }
 0x4ab   : > { %19551 = vst [vmem:[#allocation28_spill] sm:$0xff] %v17481_v50  ;;  %15128 = vmatpush3.bf16.msra.mxu0 %v15125_v26  ;;  %v2538_v26 = vld [vmem:[#allocation2 + $0x158] sm:$0xff] }
 0x4ac   : > { %15130 = vmatprep.subr.bf16.mxu0 %v15129_v13 }
 0x4ad   : > { %v17483_v51 = vpop.f32.mrb[42].mxu0  ;;  %v17485_v52 = vpop.f32.mrb[58].mxu1 }
 0x4ae   : > { %19552 = vst [vmem:[#allocation29_spill] sm:$0xff] %v17485_v52  ;;  %v17487_v60 = vpop.f32.mrb[43].mxu0  ;;  %v17489_v15 = vpop.f32.mrb[59].mxu1  ;;  %v2535_v52 = vld [vmem:[#allocation2 + $0x140] sm:$0xff] }
 0x4af   : > { %19553 = vst [vmem:[#allocation30_spill] sm:$0xff] %v17489_v15  ;;  %v15133_v46 = vpack.c.bf16 %v2535_v52, %v2534_v48  ;;  %15132 = vmatpush3.bf16.msra.mxu0 %v15129_v13  ;;  %v2540_v13 = vld [vmem:[#allocation2 + $0x168] sm:$0xff] }
 0x4b1   : > { %v17491_v20 = vpop.f32.mrb[44].mxu0  ;;  %v17493_v50 = vpop.f32.mrb[60].mxu1  ;;  %15134 = vmatprep.subr.bf16.mxu0 %v15133_v46 }
 0x4b2   : > { %19554 = vst [vmem:[#allocation31_spill] sm:$0xff] %v17493_v50  ;;  %v17495_v1 = vpop.f32.mrb[45].mxu0  ;;  %v17497_v6 = vpop.f32.mrb[61].mxu1  ;;  %v2537_v50 = vld [vmem:[#allocation2 + $0x150] sm:$0xff] }
 0x4b3   : > { %19555 = vst [vmem:[#allocation32_spill] sm:$0xff] %v17497_v6  ;;  %15136 = vmatpush3.bf16.msra.mxu0 %v15133_v46 }
 0x4b5   : > { %v17499_v15 = vpop.f32.mrb[46].mxu0  ;;  %v17501_v53 = vpop.f32.mrb[62].mxu1 }
 0x4b6   : > { %19556 = vst [vmem:[#allocation33_spill] sm:$0xff] %v17501_v53  ;;  %v17503_v43 = vpop.f32.mrb[47].mxu0  ;;  %v17505_v55 = vpop.f32.mrb[63].mxu1  ;;  %v15137_v53 = vpack.c.bf16 %v2537_v50, %v2536_v39 }
 0x4b7   : > { %19557 = vst [vmem:[#allocation34_spill] sm:$0xff] %v17505_v55 }
 0x4b8   : > { %15138 = vmatprep.subr.bf16.mxu0 %v15137_v53 }
 0x4b9   : > { %v17507_v37 = vpop.f32.mrb[48].mxu0  ;;  %v17509_v6 = vpop.f32.mrb[64].mxu1  ;;  %15140 = vmatpush3.bf16.msra.mxu0 %v15137_v53 }
 0x4ba   : > { %19558 = vst [vmem:[#allocation35_spill] sm:$0xff] %v17509_v6  ;;  %v17511_v14 = vpop.f32.mrb[49].mxu0  ;;  %v17513_v30 = vpop.f32.mrb[65].mxu1  ;;  %v15141_v6 = vpack.c.bf16 %v2539_v40, %v2538_v26 }
 0x4bb   : > { %19559 = vst [vmem:[#allocation36_spill] sm:$0xff] %v17513_v30 }
 0x4bc   : > { %15142 = vmatprep.subr.bf16.mxu0 %v15141_v6 }
 0x4bd   : > { %v17515_v34 = vpop.f32.mrb[50].mxu0  ;;  %v17517_v55 = vpop.f32.mrb[66].mxu1  ;;  %15144 = vmatpush3.bf16.msra.mxu0 %v15141_v6 }
 0x4be   : > { %19560 = vst [vmem:[#allocation37_spill] sm:$0xff] %v17517_v55  ;;  %v17519_v48 = vpop.f32.mrb[51].mxu0  ;;  %v17521_v52 = vpop.f32.mrb[67].mxu1  ;;  %v15145_v55 = vpack.c.bf16 %v2541_v28, %v2540_v13 }
 0x4bf   : > { %19561 = vst [vmem:[#allocation38_spill] sm:$0xff] %v17521_v52 }
 0x4c0   : > { %15146 = vmatprep.subr.bf16.mxu0 %v15145_v55 }
 0x4c1   : > { %v17523_v9 = vpop.f32.mrb[52].mxu0  ;;  %v17525_v30 = vpop.f32.mrb[68].mxu1  ;;  %15148 = vmatpush3.bf16.msra.mxu0 %v15145_v55 }
 0x4c2   : > { %19562 = vst [vmem:[#allocation39_spill] sm:$0xff] %v17525_v30  ;;  %v17527_v50 = vpop.f32.mrb[53].mxu0  ;;  %v17529_v39 = vpop.f32.mrb[69].mxu1 }
 0x4c3   : > { %19563 = vst [vmem:[#allocation40_spill] sm:$0xff] %v17527_v50  ;;  %19564 = vst [vmem:[#allocation41_spill] sm:$0xff] %v17529_v39 }
 0x4c5   : > { %v17531_v46 = vpop.f32.mrb[54].mxu0  ;;  %v17533_v61 = vpop.f32.mrb[70].mxu1 }
 0x4c6   : > { %19565 = vst [vmem:[#allocation42_spill] sm:$0xff] %v17533_v61  ;;  %v17535_v52 = vpop.f32.mrb[55].mxu0  ;;  %v17537_v40 = vpop.f32.mrb[71].mxu1 }
 0x4c7   : > { %19566 = vst [vmem:[#allocation43_spill] sm:$0xff] %v17535_v52  ;;  %19567 = vst [vmem:[#allocation44_spill] sm:$0xff] %v17537_v40 }
 0x4c9   : > { %v17539_v26 = vpop.f32.mrb[56].mxu0  ;;  %v17541_v30 = vpop.f32.mrb[72].mxu1 }
 0x4ca   : > { %19568 = vst [vmem:[#allocation45_spill] sm:$0xff] %v17539_v26  ;;  %19569 = vst [vmem:[#allocation46_spill] sm:$0xff] %v17541_v30  ;;  %v17543_v53 = vpop.f32.mrb[57].mxu0  ;;  %v17545_v39 = vpop.f32.mrb[73].mxu1 }
 0x4cb   : > { %19570 = vst [vmem:[#allocation47_spill] sm:$0xff] %v17543_v53  ;;  %19571 = vst [vmem:[#allocation48_spill] sm:$0xff] %v17545_v39 }
 0x4cd   : > { %v17547_v28 = vpop.f32.mrb[58].mxu0  ;;  %v17549_v13 = vpop.f32.mrb[74].mxu1 }
 0x4ce   : > { %19572 = vst [vmem:[#allocation49_spill] sm:$0xff] %v17547_v28  ;;  %19573 = vst [vmem:[#allocation50_spill] sm:$0xff] %v17549_v13  ;;  %v17551_v61 = vpop.f32.mrb[59].mxu0  ;;  %v17553_v6 = vpop.f32.mrb[75].mxu1 }
 0x4cf   : > { %19574 = vst [vmem:[#allocation51_spill] sm:$0xff] %v17551_v61  ;;  %19575 = vst [vmem:[#allocation52_spill] sm:$0xff] %v17553_v6 }
 0x4d1   : > { %v17555_v62 = vpop.f32.mrb[60].mxu0  ;;  %v17557_v40 = vpop.f32.mrb[76].mxu1 }
 0x4d2   : > { %19576 = vst [vmem:[#allocation53_spill] sm:$0xff] %v17555_v62  ;;  %19577 = vst [vmem:[#allocation54_spill] sm:$0xff] %v17557_v40  ;;  %v17559_v26 = vpop.f32.mrb[61].mxu0  ;;  %v17561_v30 = vpop.f32.mrb[77].mxu1 }
 0x4d3   : > { %19578 = vst [vmem:[#allocation55_spill] sm:$0xff] %v17559_v26  ;;  %19579 = vst [vmem:[#allocation56_spill] sm:$0xff] %v17561_v30 }
 0x4d5   : > { %v17563_v55 = vpop.f32.mrb[62].mxu0  ;;  %v17565_v53 = vpop.f32.mrb[78].mxu1 }
 0x4d6   : > { %19580 = vst [vmem:[#allocation57_spill] sm:$0xff] %v17563_v55  ;;  %19581 = vst [vmem:[#allocation58_spill] sm:$0xff] %v17565_v53  ;;  %v17567_v39 = vpop.f32.mrb[63].mxu0  ;;  %v17569_v28 = vpop.f32.mrb[79].mxu1 }
 0x4d7   : > { %19582 = vst [vmem:[#allocation59_spill] sm:$0xff] %v17567_v39  ;;  %19583 = vst [vmem:[#allocation60_spill] sm:$0xff] %v17569_v28 }
 0x4d9   : > { %v17571_v13 = vpop.f32.mrb[64].mxu0  ;;  %v17573_v61 = vpop.f32.mrb[80].mxu1 }
 0x4da   : > { %19584 = vst [vmem:[#allocation61_spill] sm:$0xff] %v17571_v13  ;;  %19585 = vst [vmem:[#allocation62_spill] sm:$0xff] %v17573_v61  ;;  %v17575_v6 = vpop.f32.mrb[65].mxu0  ;;  %v17577_v62 = vpop.f32.mrb[81].mxu1 }
 0x4db   : > { %19586 = vst [vmem:[#allocation63_spill] sm:$0xff] %v17575_v6  ;;  %19587 = vst [vmem:[#allocation64_spill] sm:$0xff] %v17577_v62 }
 0x4dd   : > { %v17579_v40 = vpop.f32.mrb[66].mxu0  ;;  %v17581_v26 = vpop.f32.mrb[82].mxu1 }
 0x4de   : > { %19588 = vst [vmem:[#allocation65_spill] sm:$0xff] %v17579_v40  ;;  %19589 = vst [vmem:[#allocation66_spill] sm:$0xff] %v17581_v26  ;;  %v17583_v30 = vpop.f32.mrb[67].mxu0  ;;  %v17585_v55 = vpop.f32.mrb[83].mxu1 }
 0x4df   : > { %19590 = vst [vmem:[#allocation67_spill] sm:$0xff] %v17583_v30  ;;  %19591 = vst [vmem:[#allocation68_spill] sm:$0xff] %v17585_v55 }
 0x4e1   : > { %v17587_v53 = vpop.f32.mrb[68].mxu0  ;;  %v17589_v39 = vpop.f32.mrb[84].mxu1 }
 0x4e2   : > { %19592 = vst [vmem:[#allocation69_spill] sm:$0xff] %v17587_v53  ;;  %19593 = vst [vmem:[#allocation70_spill] sm:$0xff] %v17589_v39  ;;  %v17591_v28 = vpop.f32.mrb[69].mxu0  ;;  %v17593_v13 = vpop.f32.mrb[85].mxu1 }
 0x4e3   : > { %19594 = vst [vmem:[#allocation71_spill] sm:$0xff] %v17591_v28  ;;  %19595 = vst [vmem:[#allocation72_spill] sm:$0xff] %v17593_v13 }
 0x4e5   : > { %v17595_v61 = vpop.f32.mrb[70].mxu0  ;;  %v17597_v6 = vpop.f32.mrb[86].mxu1 }
 0x4e6   : > { %19596 = vst [vmem:[#allocation73_spill] sm:$0xff] %v17595_v61  ;;  %19597 = vst [vmem:[#allocation74_spill] sm:$0xff] %v17597_v6  ;;  %v17599_v62 = vpop.f32.mrb[71].mxu0  ;;  %v17601_v40 = vpop.f32.mrb[87].mxu1 }
 0x4e7   : > { %19598 = vst [vmem:[#allocation75_spill] sm:$0xff] %v17599_v62  ;;  %19599 = vst [vmem:[#allocation76_spill] sm:$0xff] %v17601_v40 }
 0x4e9   : > { %v17603_v26 = vpop.f32.mrb[72].mxu0  ;;  %v17605_v30 = vpop.f32.mrb[88].mxu1 }
 0x4ea   : > { %19600 = vst [vmem:[#allocation77_spill] sm:$0xff] %v17603_v26  ;;  %19601 = vst [vmem:[#allocation78_spill] sm:$0xff] %v17605_v30  ;;  %v17607_v55 = vpop.f32.mrb[73].mxu0  ;;  %v17609_v53 = vpop.f32.mrb[89].mxu1 }
 0x4eb   : > { %19602 = vst [vmem:[#allocation79_spill] sm:$0xff] %v17607_v55  ;;  %19603 = vst [vmem:[#allocation80_spill] sm:$0xff] %v17609_v53 }
 0x4ed   : > { %v17611_v39 = vpop.f32.mrb[74].mxu0  ;;  %v17613_v28 = vpop.f32.mrb[90].mxu1 }
 0x4ee   : > { %19604 = vst [vmem:[#allocation81_spill] sm:$0xff] %v17611_v39  ;;  %19605 = vst [vmem:[#allocation82_spill] sm:$0xff] %v17613_v28  ;;  %v17615_v13 = vpop.f32.mrb[75].mxu0  ;;  %v17617_v61 = vpop.f32.mrb[91].mxu1 }
 0x4ef   : > { %19606 = vst [vmem:[#allocation83_spill] sm:$0xff] %v17615_v13  ;;  %19607 = vst [vmem:[#allocation84_spill] sm:$0xff] %v17617_v61 }
 0x4f1   : > { %v17619_v6 = vpop.f32.mrb[76].mxu0  ;;  %v17621_v62 = vpop.f32.mrb[92].mxu1 }
 0x4f2   : > { %19608 = vst [vmem:[#allocation85_spill] sm:$0xff] %v17619_v6  ;;  %19609 = vst [vmem:[#allocation86_spill] sm:$0xff] %v17621_v62  ;;  %v17623_v40 = vpop.f32.mrb[77].mxu0  ;;  %v17625_v26 = vpop.f32.mrb[93].mxu1 }
 0x4f3   : > { %19610 = vst [vmem:[#allocation87_spill] sm:$0xff] %v17623_v40  ;;  %19611 = vst [vmem:[#allocation88_spill] sm:$0xff] %v17625_v26  ;;  %v1251_v62 = vld [vmem:[#allocation4 + $0x80] ss:$8 sm:$0xf] }
 0x4f5   : > { %v17627_v30 = vpop.f32.mrb[78].mxu0  ;;  %v17629_v55 = vpop.f32.mrb[94].mxu1 }
 0x4f6   : > { %19612 = vst [vmem:[#allocation89_spill] sm:$0xff] %v17627_v30  ;;  %19613 = vst [vmem:[#allocation90_spill] sm:$0xff] %v17629_v55  ;;  %v17631_v53 = vpop.f32.mrb[79].mxu0  ;;  %v17633_v39 = vpop.f32.mrb[95].mxu1 }
 0x4f7   : > { %19614 = vst [vmem:[#allocation91_spill] sm:$0xff] %v17631_v53  ;;  %19615 = vst [vmem:[#allocation92_spill] sm:$0xff] %v17633_v39  ;;  %v1252_v30 = vld [vmem:[#allocation4 + $0x80] ss:$8 sm:$0xf0] }
 0x4f8   : > { %v17651_v53 = vor.u32 %v1252_v30, %v1251_v62 }
 0x4f9   : > { %v17635_v28 = vpop.f32.mrb[80].mxu0  ;;  %v17637_v13 = vpop.f32.mrb[96].mxu1 }
 0x4fa   : > { %19616 = vst [vmem:[#allocation93_spill] sm:$0xff] %v17635_v28  ;;  %19617 = vst [vmem:[#allocation94_spill] sm:$0xff] %v17637_v13  ;;  %v17639_v61 = vpop.f32.mrb[81].mxu0  ;;  %v17641_v6 = vpop.f32.mrb[97].mxu1 }
 0x4fb   : > { %19618 = vst [vmem:[#allocation95_spill] sm:$0xff] %v17639_v61  ;;  %19619 = vst [vmem:[#allocation96_spill] sm:$0xff] %v17641_v6  ;;  %v17663_v6 = vrot.slane %v17651_v53, %v16900_v33 }
 0x4fd   : > { %v17643_v40 = vpop.f32.mrb[82].mxu0  ;;  %v17645_v26 = vpop.f32.mrb[98].mxu1  ;;  %v1416_v30 = vadd.f32 %v17419_v2, %v17663_v6  ;;  %v1428_v33 = vadd.f32 %v17435_v16, %v17663_v6  ;;  %v1434_v16 = vadd.f32 %v17443_v22, %v17663_v6 }
 0x4fe   : > { %19620 = vst [vmem:[#allocation97_spill] sm:$0xff] %v17643_v40  ;;  %19621 = vst [vmem:[#allocation98_spill] sm:$0xff] %v17645_v26  ;;  %v17647_v3 = vpop.f32.mrb[83].mxu0  ;;  %v17649_v55 = vpop.f32.mrb[99].mxu1 }
 0x4ff   : > { %19622 = vst [vmem:[#allocation99_spill] sm:$0xff] %v17647_v3  ;;  %19623 = vst [vmem:[#allocation100_spill] sm:$0xff] %v17649_v55  ;;  %v1410_v55 = vadd.f32 %v17411_v59, %v17663_v6  ;;  %v1440_v59 = vadd.f32 %v17451_v27, %v17663_v6 }
 0x501   : > { %v17653_v39 = vpop.f32.mrb[84].mxu0  ;;  %v17655_v28 = vpop.f32.mrb[100].mxu1 }
 0x502   : > { %19624 = vst [vmem:[#allocation101_spill] sm:$0xff] %v17653_v39  ;;  %19625 = vst [vmem:[#allocation102_spill] sm:$0xff] %v17655_v28  ;;  %v17657_v13 = vpop.f32.mrb[85].mxu0  ;;  %v17659_v61 = vpop.f32.mrb[101].mxu1 }
 0x503   : > { %19626 = vst [vmem:[#allocation103_spill] sm:$0xff] %v17657_v13  ;;  %19627 = vst [vmem:[#allocation104_spill] sm:$0xff] %v17659_v61 }
 0x505   : > { %v17665_v26 = vpop.f32.mrb[86].mxu0  ;;  %v17667_v40 = vpop.f32.mrb[102].mxu1 }
 0x506   : > { %19628 = vst [vmem:[#allocation105_spill] sm:$0xff] %v17665_v26  ;;  %19629 = vst [vmem:[#allocation106_spill] sm:$0xff] %v17667_v40  ;;  %v17669_v3 = vpop.f32.mrb[87].mxu0  ;;  %v17671_v62 = vpop.f32.mrb[103].mxu1  ;;  %v1422_v40 = vadd.f32 %v17427_v7, %v17663_v6 }
 0x507   : > { %19630 = vst [vmem:[#allocation107_spill] sm:$0xff] %v17669_v3  ;;  %19631 = vst [vmem:[#allocation108_spill] sm:$0xff] %v17671_v62 }
 0x509   : > { %v13023_v28 = vpop.f32.mrb[88].mxu0 }
 0x50a   : > { %v2198_v61 = vadd.f32 %v13023_v28, %v1416_v30  ;;  %v2192_v13 = vpop.f32.mrb[89].mxu0 }
 0x50b   : > { %v2193_v39 = vadd.f32 %v2192_v13, %v1410_v55 }
 0x50c   : > { %v2288_v26 = vmul.f32 0.01, %v2198_v61  ;;  %vm2272_vm9 = vcmp.ge.f32.partialorder %v2198_v61, 0.0 }
 0x50d   : > { %v13026_v3 = vpop.f32.mrb[90].mxu0  ;;  %vm2271_vm8 = vcmp.ge.f32.partialorder %v2193_v39, 0.0  ;;  %v2287_v62 = vmul.f32 0.01, %v2193_v39 }
 0x50e   : > { %v2208_v57 = vadd.f32 %v13026_v3, %v1428_v33  ;;  %v2202_v2 = vpop.f32.mrb[91].mxu0  ;;  %v2304_v28 = vsel %vm2272_vm9, %v2198_v61, %v2288_v26  ;;  %v1446_v61 = vadd.f32 %v17459_v36, %v17663_v6 }
 0x50f   : > { %v2203_v32 = vadd.f32 %v2202_v2, %v1422_v40  ;;  %v2303_v50 = vsel %vm2271_vm8, %v2193_v39, %v2287_v62  ;;  %v1452_v39 = vadd.f32 %v17467_v35, %v17663_v6 }
 0x510   : > { %13077 = vmatprep.mubr.f32.mxu1 %v2303_v50  ;;  %v2290_v13 = vmul.f32 0.01, %v2208_v57  ;;  %vm2274_vm12 = vcmp.ge.f32.partialorder %v2208_v57, 0.0 }
 0x511   : > { %v13029_v55 = vpop.f32.mrb[92].mxu0  ;;  %13078 = vmatmul.mubr.f32.vlgmr.msra.gmra.mrb[104].mxu1 %v2304_v28  ;;  %vm2273_vm11 = vcmp.ge.f32.partialorder %v2203_v32, 0.0  ;;  %v2289_v7 = vmul.f32 0.01, %v2203_v32 }
 0x512   : > { %v2218_v30 = vadd.f32 %v13029_v55, %v1440_v59  ;;  %v2212_v52 = vpop.f32.mrb[93].mxu0  ;;  %v2306_v27 = vsel %vm2274_vm12, %v2208_v57, %v2290_v13  ;;  %v1458_v57 = vadd.f32 %v17475_v47, %v17663_v6 }
 0x513   : > { %v2213_v3 = vadd.f32 %v2212_v52, %v1434_v16  ;;  %v2305_v33 = vsel %vm2273_vm11, %v2203_v32, %v2289_v7  ;;  %v1464_v32 = vadd.f32 %v17483_v51, %v17663_v6 }
 0x514   : > { %13080 = vmatprep.mubr.f32.mxu1 %v2305_v33  ;;  %v2292_v50 = vmul.f32 0.01, %v2218_v30  ;;  %vm2276_vm14 = vcmp.ge.f32.partialorder %v2218_v30, 0.0 }
 0x515   : > { %v13032_v40 = vpop.f32.mrb[94].mxu0  ;;  %13081 = vmatmul.mubr.f32.gmra.mrb[106].mxu1 %v2306_v27  ;;  %vm2275_vm13 = vcmp.ge.f32.partialorder %v2213_v3, 0.0  ;;  %v2291_v22 = vmul.f32 0.01, %v2213_v3 }
 0x516   : > { %v2228_v26 = vadd.f32 %v13032_v40, %v1452_v39  ;;  %v2222_v62 = vpop.f32.mrb[95].mxu0  ;;  %v2308_v35 = vsel %vm2276_vm14, %v2218_v30, %v2292_v50  ;;  %v1470_v30 = vadd.f32 %v17491_v20, %v17663_v6 }
 0x517   : > { %v2223_v2 = vadd.f32 %v2222_v62, %v1446_v61  ;;  %v2307_v59 = vsel %vm2275_vm13, %v2213_v3, %v2291_v22  ;;  %v1476_v3 = vadd.f32 %v17499_v15, %v17663_v6  ;;  %v1488_v22 = vadd.f32 %v17515_v34, %v17663_v6 }
 0x518   : > { %13083 = vmatprep.mubr.f32.mxu1 %v2307_v59  ;;  %v2294_v52 = vmul.f32 0.01, %v2228_v26  ;;  %vm2278_vm15 = vcmp.ge.f32.partialorder %v2228_v26, 0.0 }
 0x519   : > { %v13035_v28 = vpop.f32.mrb[96].mxu0  ;;  %13084 = vmatmul.mubr.f32.gmra.mrb[108].mxu1 %v2308_v35  ;;  %vm2277_vm0 = vcmp.ge.f32.partialorder %v2223_v2, 0.0  ;;  %v2293_v36 = vmul.f32 0.01, %v2223_v2 }
 0x51a   : > { %v2238_v13 = vadd.f32 %v13035_v28, %v1464_v32  ;;  %v2232_v16 = vpop.f32.mrb[97].mxu0  ;;  %v2310_v51 = vsel %vm2278_vm15, %v2228_v26, %v2294_v52  ;;  %v1482_v26 = vadd.f32 %v17507_v37, %v17663_v6 }
 0x51b   : > { %v2233_v55 = vadd.f32 %v2232_v16, %v1458_v57  ;;  %v2309_v7 = vsel %vm2277_vm0, %v2223_v2, %v2293_v36  ;;  %v1500_v57 = vadd.f32 %v17531_v46, %v17663_v6  ;;  %v1494_v36 = vadd.f32 %v17523_v9, %v17663_v6  ;;  %v2542_v9 = vld [vmem:[#allocation2 + $0x178] sm:$0xff]  ;;  %v2543_v6 = vld [vmem:[#allocation2 + $0x180] sm:$0xff] }
 0x51c   : > { %13086 = vmatprep.mubr.f32.mxu1 %v2309_v7  ;;  %v2296_v33 = vmul.f32 0.01, %v2238_v13  ;;  %vm2280_vm3 = vcmp.ge.f32.partialorder %v2238_v13, 0.0 }
 0x51d   : > { %v13038_v39 = vpop.f32.mrb[98].mxu0  ;;  %13087 = vmatmul.mubr.f32.gmra.mrb[110].mxu1 %v2310_v51  ;;  %vm2279_vm2 = vcmp.ge.f32.partialorder %v2233_v55, 0.0  ;;  %v2295_v47 = vmul.f32 0.01, %v2233_v55 }
 0x51e   : > { %v2248_v27 = vadd.f32 %v13038_v39, %v1476_v3  ;;  %v2242_v50 = vpop.f32.mrb[99].mxu0  ;;  %v2312_v15 = vsel %vm2280_vm3, %v2238_v13, %v2296_v33 }
 0x51f   : > { %v2243_v61 = vadd.f32 %v2242_v50, %v1470_v30  ;;  %v2311_v40 = vsel %vm2279_vm2, %v2233_v55, %v2295_v47  ;;  %v15149_v47 = vpack.c.bf16 %v2543_v6, %v2542_v9  ;;  %v2738_v50 = vld [vmem:[#allocation2 + $0x190] sm:$0xff] }
 0x520   : > { %13089 = vmatprep.mubr.f32.mxu1 %v2311_v40  ;;  %v2298_v62 = vmul.f32 0.01, %v2248_v27  ;;  %vm2282_vm5 = vcmp.ge.f32.partialorder %v2248_v27, 0.0 }
 0x521   : > { %v13041_v2 = vpop.f32.mrb[100].mxu0  ;;  %13090 = vmatmul.mubr.f32.gmra.mrb[112].mxu1 %v2312_v15  ;;  %vm2281_vm4 = vcmp.ge.f32.partialorder %v2243_v61, 0.0  ;;  %v2297_v20 = vmul.f32 0.01, %v2243_v61  ;;  %15150 = vmatprep.subr.bf16.mxu0 %v15149_v47  ;;  %v2739_v15 = vld [vmem:[#allocation2 + $0x198] sm:$0xff] }
 0x522   : > { %v2258_v59 = vadd.f32 %v13041_v2, %v1488_v22  ;;  %v2252_v32 = vpop.f32.mrb[101].mxu0  ;;  %v2314_v34 = vsel %vm2282_vm5, %v2248_v27, %v2298_v62  ;;  %15152 = vmatpush3.bf16.msra.mxu0 %v15149_v47  ;;  %v2737_v27 = vld [vmem:[#allocation2 + $0x188] sm:$0xff]  ;;  %v2915_v22 = vld [vmem:[#allocation2 + $0x210] sm:$0xff]  ;;  %v2740_v62 = vld [vmem:[#allocation2 + $0x1a0] sm:$0xff] }
 0x523   : > { %v2253_v35 = vadd.f32 %v2252_v32, %v1482_v26  ;;  %v2313_v52 = vsel %vm2281_vm4, %v2243_v61, %v2297_v20  ;;  %v2914_v61 = vld [vmem:[#allocation2 + $0x208] sm:$0xff]  ;;  %v15153_v40 = vpack.c.bf16 %v2738_v50, %v2737_v27  ;;  %v15157_v2 = vpack.c.bf16 %v2740_v62, %v2739_v15  ;;  %v2919_v15 = vld [vmem:[#allocation2 + $0x230] sm:$0xff] }
 0x524   : > { %13092 = vmatprep.mubr.f32.mxu1 %v2313_v52  ;;  %v2300_v28 = vmul.f32 0.01, %v2258_v59  ;;  %vm2284_vm7 = vcmp.ge.f32.partialorder %v2258_v59, 0.0  ;;  %v15185_v26 = vpack.c.bf16 %v2915_v22, %v2914_v61  ;;  %v2741_v20 = vld [vmem:[#allocation2 + $0x1a8] sm:$0xff]  ;;  %v2744_v52 = vld [vmem:[#allocation2 + $0x1c0] sm:$0xff] }
 0x525   : > { %v13044_v13 = vpop.f32.mrb[102].mxu0  ;;  %13093 = vmatmul.mubr.f32.gmra.mrb[114].mxu1 %v2314_v34  ;;  %vm2283_vm6 = vcmp.ge.f32.partialorder %v2253_v35, 0.0  ;;  %v2299_v37 = vmul.f32 0.01, %v2253_v35  ;;  %15154 = vmatprep.subr.bf16.mxu1 %v15153_v40  ;;  %v2745_v34 = vld [vmem:[#allocation2 + $0x1c8] sm:$0xff] }
 0x526   : > { %v2268_v16 = vadd.f32 %v13044_v13, %v1500_v57  ;;  %v2262_v55 = vpop.f32.mrb[103].mxu0  ;;  %v2316_v51 = vsel %vm2284_vm7, %v2258_v59, %v2300_v28  ;;  %v2742_v59 = vld [vmem:[#allocation2 + $0x1b0] sm:$0xff]  ;;  %15156 = vmatpush3.bf16.msra.mxu1 %v15153_v40  ;;  %15186 = vmatprep.subr.bf16.mxu0 %v15185_v26  ;;  %v2747_v13 = vld [vmem:[#allocation2 + $0x1d8] sm:$0xff]  ;;  %v2918_v22 = vld [vmem:[#allocation2 + $0x228] sm:$0xff] }
 0x527   : > { %v2263_v7 = vadd.f32 %v2262_v55, %v1494_v36  ;;  %v2315_v3 = vsel %vm2283_vm6, %v2253_v35, %v2299_v37  ;;  %15158 = vmatprep.subr.bf16.mxu1 %v15157_v2  ;;  %v15161_v32 = vpack.c.bf16 %v2742_v59, %v2741_v20  ;;  %v2743_v35 = vld [vmem:[#allocation2 + $0x1b8] sm:$0xff]  ;;  %v2746_v28 = vld [vmem:[#allocation2 + $0x1d0] sm:$0xff]  ;;  %v2748_v37 = vld [vmem:[#allocation2 + $0x1e0] sm:$0xff]  ;;  %v15193_v59 = vpack.c.bf16 %v2919_v15, %v2918_v22 }
 0x528   : > { %13095 = vmatprep.mubr.f32.mxu1 %v2315_v3  ;;  %v2302_v33 = vmul.f32 0.01, %v2268_v16  ;;  %vm2286_vm8 = vcmp.ge.f32.partialorder %v2268_v16, 0.0  ;;  %v15165_v57 = vpack.c.bf16 %v2744_v52, %v2743_v35  ;;  %v15169_v36 = vpack.c.bf16 %v2746_v28, %v2745_v34  ;;  %v2749_v55 = vld [vmem:[#allocation2 + $0x1e8] sm:$0xff]  ;;  %v2921_v34 = vld [vmem:[#allocation2 + $0x240] sm:$0xff] }
 0x529   : > { %13096 = vmatmul.mubr.f32.gmra.mrb[116].mxu1 %v2316_v51  ;;  %vm2285_vm1 = vcmp.ge.f32.partialorder %v2263_v7, 0.0  ;;  %v2301_v46 = vmul.f32 0.01, %v2263_v7 }
 0x52a   : > { %v2318_v39 = vsel %vm2286_vm8, %v2268_v16, %v2302_v33  ;;  %15160 = vmatpush3.bf16.msra.mxu1 %v15157_v2  ;;  %v15173_v16 = vpack.c.bf16 %v2748_v37, %v2747_v13 }
 0x52b   : > { %v2317_v30 = vsel %vm2285_vm1, %v2263_v7, %v2301_v46  ;;  %15162 = vmatprep.subr.bf16.mxu1 %v15161_v32  ;;  %v2750_v7 = vld [vmem:[#allocation2 + $0x1f0] sm:$0xff] }
 0x52c   : > { %13098 = vmatprep.mubr.f32.mxu1 %v2317_v30  ;;  %v15177_v3 = vpack.c.bf16 %v2750_v7, %v2749_v55  ;;  %v2916_v30 = vld [vmem:[#allocation2 + $0x218] sm:$0xff]  ;;  %v2922_v7 = vld [vmem:[#allocation2 + $0x248] sm:$0xff] }
 0x52d   : > { %13099 = vmatmul.mubr.f32.gmra.mrb[118].mxu1 %v2318_v39  ;;  %v2917_v39 = vld [vmem:[#allocation2 + $0x220] sm:$0xff] }
 0x52e   : > { %15164 = vmatpush3.bf16.msra.mxu1 %v15161_v32  ;;  %v15189_v27 = vpack.c.bf16 %v2917_v39, %v2916_v30 }
 0x52f   : > { %15166 = vmatprep.subr.bf16.mxu1 %v15165_v57 }
 0x532   : > { %15168 = vmatpush3.bf16.msra.mxu1 %v15165_v57  ;;  %v2920_v57 = vld [vmem:[#allocation2 + $0x238] sm:$0xff] }
 0x533   : > { %15170 = vmatprep.subr.bf16.mxu1 %v15169_v36  ;;  %v15197_v37 = vpack.c.bf16 %v2921_v34, %v2920_v57 }
 0x536   : > { %15172 = vmatpush3.bf16.msra.mxu1 %v15169_v36 }
 0x537   : > { %15174 = vmatprep.subr.bf16.mxu1 %v15173_v16 }
 0x53a   : > { %15176 = vmatpush3.bf16.msra.mxu1 %v15173_v16 }
 0x53b   : > { %15178 = vmatprep.subr.bf16.mxu1 %v15177_v3 }
 0x53e   : > { %15180 = vmatpush3.bf16.msra.mxu1 %v15177_v3  ;;  %v2923_v3 = vld [vmem:[#allocation2 + $0x250] sm:$0xff] }
 0x53f   : > { %v15201_v30 = vpack.c.bf16 %v2923_v3, %v2922_v7 }
 0x5e4   : > { %v13079_v51 = vpop.f32.mrb[104].mxu1 }
 0x5e5   : > { %v2497_v33 = vmul.f32 0.01, %v13079_v51  ;;  %v2401_v46 = vpop.f32.mrb[105].mxu1  ;;  %vm2481_vm11 = vcmp.ge.f32.partialorder %v13079_v51, 0.0 }
 0x5e6   : > { %vm2480_vm9 = vcmp.ge.f32.partialorder %v2401_v46, 0.0  ;;  %v2496_v9 = vmul.f32 0.01, %v2401_v46 }
 0x5e7   : > { %v2513_v61 = vsel %vm2481_vm11, %v13079_v51, %v2497_v33 }
 0x5e8   : > { %v13082_v6 = vpop.f32.mrb[106].mxu1  ;;  %v2512_v47 = vsel %vm2480_vm9, %v2401_v46, %v2496_v9 }
 0x5e9   : > { %v2411_v50 = vpop.f32.mrb[107].mxu1  ;;  %13133 = vmatprep.mubr.f32.mxu0 %v2512_v47  ;;  %v2499_v40 = vmul.f32 0.01, %v13082_v6  ;;  %vm2483_vm13 = vcmp.ge.f32.partialorder %v13082_v6, 0.0  ;;  %v2924_v47 = vld [vmem:[#allocation2 + $0x258] sm:$0xff] }
 0x5ea   : > { %13134 = vmatmul.mubr.f32.vlgmr.msra.gmra.mrb[104].mxu0 %v2513_v61  ;;  %vm2482_vm12 = vcmp.ge.f32.partialorder %v2411_v50, 0.0  ;;  %v2498_v62 = vmul.f32 0.01, %v2411_v50 }
 0x5eb   : > { %15188 = vmatpush3.bf16.msra.mxu0 %v15185_v26  ;;  %v2515_v35 = vsel %vm2483_vm13, %v13082_v6, %v2499_v40 }
 0x5ec   : > { %v13085_v2 = vpop.f32.mrb[108].mxu1  ;;  %v2514_v20 = vsel %vm2482_vm12, %v2411_v50, %v2498_v62  ;;  %15190 = vmatprep.subr.bf16.mxu0 %v15189_v27 }
 0x5ed   : > { %v2421_v32 = vpop.f32.mrb[109].mxu1  ;;  %13136 = vmatprep.mubr.f32.mxu0 %v2514_v20  ;;  %v2501_v52 = vmul.f32 0.01, %v13085_v2  ;;  %vm2485_vm0 = vcmp.ge.f32.partialorder %v13085_v2, 0.0  ;;  %v2926_v20 = vld [vmem:[#allocation2 + $0x268] sm:$0xff] }
 0x5ee   : > { %13137 = vmatmul.mubr.f32.gmra.mrb[106].mxu0 %v2515_v35  ;;  %vm2484_vm14 = vcmp.ge.f32.partialorder %v2421_v32, 0.0  ;;  %v2500_v28 = vmul.f32 0.01, %v2421_v32 }
 0x5ef   : > { %15192 = vmatpush3.bf16.msra.mxu0 %v15189_v27  ;;  %v2517_v16 = vsel %vm2485_vm0, %v13085_v2, %v2501_v52  ;;  %v2925_v27 = vld [vmem:[#allocation2 + $0x260] sm:$0xff] }
 0x5f0   : > { %v13088_v36 = vpop.f32.mrb[110].mxu1  ;;  %v2516_v13 = vsel %vm2484_vm14, %v2421_v32, %v2500_v28  ;;  %15194 = vmatprep.subr.bf16.mxu0 %v15193_v59  ;;  %v15205_v22 = vpack.c.bf16 %v2925_v27, %v2924_v47  ;;  %v3155_v27 = vld [vmem:[#allocation2 + $0x288] sm:$0xff] }
 0x5f1   : > { %v2431_v26 = vpop.f32.mrb[111].mxu1  ;;  %13139 = vmatprep.mubr.f32.mxu0 %v2516_v13  ;;  %v2503_v55 = vmul.f32 0.01, %v13088_v36  ;;  %vm2487_vm2 = vcmp.ge.f32.partialorder %v13088_v36, 0.0 }
 0x5f2   : > { %13140 = vmatmul.mubr.f32.gmra.mrb[108].mxu0 %v2517_v16  ;;  %vm2486_vm15 = vcmp.ge.f32.partialorder %v2431_v26, 0.0  ;;  %v2502_v51 = vmul.f32 0.01, %v2431_v26 }
 0x5f3   : > { %15196 = vmatpush3.bf16.msra.mxu0 %v15193_v59  ;;  %v2519_v9 = vsel %vm2487_vm2, %v13088_v36, %v2503_v55  ;;  %v2927_v59 = vld [vmem:[#allocation2 + $0x270] sm:$0xff] }
 0x5f4   : > { %v13091_v33 = vpop.f32.mrb[112].mxu1  ;;  %v2518_v46 = vsel %vm2486_vm15, %v2431_v26, %v2502_v51  ;;  %15198 = vmatprep.subr.bf16.mxu0 %v15197_v37  ;;  %v15209_v57 = vpack.c.bf16 %v2927_v59, %v2926_v20 }
 0x5f5   : > { %v2441_v39 = vpop.f32.mrb[113].mxu1  ;;  %13142 = vmatprep.mubr.f32.mxu0 %v2518_v46  ;;  %v2505_v6 = vmul.f32 0.01, %v13091_v33  ;;  %vm2489_vm4 = vcmp.ge.f32.partialorder %v13091_v33, 0.0  ;;  %v2751_v46 = vld [vmem:[#allocation2 + $0x1f8] sm:$0xff] }
 0x5f6   : > { %13143 = vmatmul.mubr.f32.gmra.mrb[110].mxu0 %v2519_v9  ;;  %vm2488_vm3 = vcmp.ge.f32.partialorder %v2441_v39, 0.0  ;;  %v2504_v50 = vmul.f32 0.01, %v2441_v39 }
 0x5f7   : > { %15200 = vmatpush3.bf16.msra.mxu0 %v15197_v37  ;;  %v2521_v62 = vsel %vm2489_vm4, %v13091_v33, %v2505_v6  ;;  %v2929_v6 = vld [vmem:[#allocation2 + $0x280] sm:$0xff] }
 0x5f8   : > { %v13094_v61 = vpop.f32.mrb[114].mxu1  ;;  %v2520_v40 = vsel %vm2488_vm3, %v2441_v39, %v2504_v50  ;;  %15202 = vmatprep.subr.bf16.mxu0 %v15201_v30  ;;  %v2928_v39 = vld [vmem:[#allocation2 + $0x278] sm:$0xff] }
 0x5f9   : > { %v2451_v15 = vpop.f32.mrb[115].mxu1  ;;  %13145 = vmatprep.mubr.f32.mxu0 %v2520_v40  ;;  %v2507_v2 = vmul.f32 0.01, %v13094_v61  ;;  %vm2491_vm6 = vcmp.ge.f32.partialorder %v13094_v61, 0.0  ;;  %v15213_v47 = vpack.c.bf16 %v2929_v6, %v2928_v39 }
 0x5fa   : > { %13146 = vmatmul.mubr.f32.gmra.mrb[112].mxu0 %v2521_v62  ;;  %vm2490_vm5 = vcmp.ge.f32.partialorder %v2451_v15, 0.0  ;;  %v2506_v32 = vmul.f32 0.01, %v2451_v15 }
 0x5fb   : > { %15204 = vmatpush3.bf16.msra.mxu0 %v15201_v30  ;;  %v2523_v28 = vsel %vm2491_vm6, %v13094_v61, %v2507_v2  ;;  %v2752_v30 = vld [vmem:[#allocation2 + $0x200] sm:$0xff] }
 0x5fc   : > { %v13097_v35 = vpop.f32.mrb[116].mxu1  ;;  %v2522_v52 = vsel %vm2490_vm5, %v2451_v15, %v2506_v32  ;;  %15206 = vmatprep.subr.bf16.mxu0 %v15205_v22  ;;  %v15181_v9 = vpack.c.bf16 %v2752_v30, %v2751_v46 }
 0x5fd   : > { %v2461_v34 = vpop.f32.mrb[117].mxu1  ;;  %13148 = vmatprep.mubr.f32.mxu0 %v2522_v52  ;;  %v2509_v36 = vmul.f32 0.01, %v13097_v35  ;;  %vm2493_vm1 = vcmp.ge.f32.partialorder %v13097_v35, 0.0 }
 0x5fe   : > { %13149 = vmatmul.mubr.f32.gmra.mrb[114].mxu0 %v2523_v28  ;;  %vm2492_vm7 = vcmp.ge.f32.partialorder %v2461_v34, 0.0  ;;  %v2508_v13 = vmul.f32 0.01, %v2461_v34  ;;  %15182 = vmatprep.subr.bf16.mxu1 %v15181_v9 }
 0x5ff   : > { %15208 = vmatpush3.bf16.msra.mxu0 %v15205_v22  ;;  %v2525_v55 = vsel %vm2493_vm1, %v13097_v35, %v2509_v36  ;;  %15184 = vmatpush3.bf16.msra.mxu1 %v15181_v9 }
 0x600   : > { %v13100_v37 = vpop.f32.mrb[118].mxu1  ;;  %v2524_v26 = vsel %vm2492_vm7, %v2461_v34, %v2508_v13  ;;  %15210 = vmatprep.subr.bf16.mxu0 %v15209_v57  ;;  %13269 = vmatprep.subr.mxu1 %v3155_v27 }
 0x601   : > { %v2471_v16 = vpop.f32.mrb[119].mxu1  ;;  %13151 = vmatprep.mubr.f32.mxu0 %v2524_v26  ;;  %v2511_v7 = vmul.f32 0.01, %v13100_v37  ;;  %vm2495_vm9 = vcmp.ge.f32.partialorder %v13100_v37, 0.0 }
 0x602   : > { %13152 = vmatmul.mubr.f32.gmra.mrb[116].mxu0 %v2525_v55  ;;  %vm2494_vm8 = vcmp.ge.f32.partialorder %v2471_v16, 0.0  ;;  %v2510_v3 = vmul.f32 0.01, %v2471_v16 }
 0x603   : > { %15212 = vmatpush3.bf16.msra.mxu0 %v15209_v57  ;;  %v2527_v33 = vsel %vm2495_vm9, %v13100_v37, %v2511_v7 }
 0x604   : > { %v2526_v51 = vsel %vm2494_vm8, %v2471_v16, %v2510_v3  ;;  %15214 = vmatprep.subr.bf16.mxu0 %v15213_v47 }
 0x605   : > { %13154 = vmatprep.mubr.f32.mxu0 %v2526_v51 }
 0x606   : > { %13155 = vmatmul.mubr.f32.gmra.mrb[118].mxu0 %v2527_v33 }
 0x607   : > { %15216 = vmatpush3.bf16.msra.mxu0 %v15213_v47 }
 0x6bd   : > { %v13135_v50 = vpop.f32.mrb[104].mxu0 }
 0x6be   : > { %v2706_v61 = vmul.f32 0.01, %v13135_v50  ;;  %v2610_v40 = vpop.f32.mrb[105].mxu0  ;;  %vm2690_vm12 = vcmp.ge.f32.partialorder %v13135_v50, 0.0 }
 0x6bf   : > { %vm2689_vm11 = vcmp.ge.f32.partialorder %v2610_v40, 0.0  ;;  %v2705_v22 = vmul.f32 0.01, %v2610_v40 }
 0x6c0   : > { %v2722_v20 = vsel %vm2690_vm12, %v13135_v50, %v2706_v61 }
 0x6c1   : > { %v13138_v15 = vpop.f32.mrb[106].mxu0  ;;  %v2721_v62 = vsel %vm2689_vm11, %v2610_v40, %v2705_v22 }
 0x6c2   : > { %v2620_v2 = vpop.f32.mrb[107].mxu0  ;;  %13189 = vmatprep.mubr.f32.mxu1 %v2721_v62  ;;  %13245 = vmatprep.mubr.f32.mxu0 %v2721_v62  ;;  %v2708_v59 = vmul.f32 0.01, %v13138_v15  ;;  %vm2692_vm14 = vcmp.ge.f32.partialorder %v13138_v15, 0.0 }
 0x6c3   : > { %13190 = vmatmul.mubr.f32.vlgmr.msra.gmra.mrb[120].mxu1 %v2722_v20  ;;  %13246 = vmatmul.mubr.f32.vlgmr.msra.gmra.mrb[120].mxu0 %v2722_v20  ;;  %vm2691_vm13 = vcmp.ge.f32.partialorder %v2620_v2, 0.0  ;;  %v2707_v32 = vmul.f32 0.01, %v2620_v2 }
 0x6c4   : > { %13270 = vmatpush3.msra.mxu1 %v3155_v27  ;;  %v2724_v34 = vsel %vm2692_vm14, %v13138_v15, %v2708_v59 }
 0x6c5   : > { %v13141_v35 = vpop.f32.mrb[108].mxu0  ;;  %v2723_v52 = vsel %vm2691_vm13, %v2620_v2, %v2707_v32 }
 0x6c6   : > { %v2630_v57 = vpop.f32.mrb[109].mxu0  ;;  %13192 = vmatprep.mubr.f32.mxu1 %v2723_v52  ;;  %13248 = vmatprep.mubr.f32.mxu0 %v2723_v52  ;;  %v2710_v28 = vmul.f32 0.01, %v13141_v35  ;;  %vm2694_vm15 = vcmp.ge.f32.partialorder %v13141_v35, 0.0 }
 0x6c7   : > { %13193 = vmatmul.mubr.f32.gmra.mrb[122].mxu1 %v2724_v34  ;;  %13249 = vmatmul.mubr.f32.gmra.mrb[122].mxu0 %v2724_v34  ;;  %vm2693_vm0 = vcmp.ge.f32.partialorder %v2630_v57, 0.0  ;;  %v2709_v36 = vmul.f32 0.01, %v2630_v57 }
 0x6c8   : > { %v2726_v16 = vsel %vm2694_vm15, %v13141_v35, %v2710_v28 }
 0x6c9   : > { %v13144_v13 = vpop.f32.mrb[110].mxu0  ;;  %v2725_v37 = vsel %vm2693_vm0, %v2630_v57, %v2709_v36 }
 0x6ca   : > { %v2640_v26 = vpop.f32.mrb[111].mxu0  ;;  %13195 = vmatprep.mubr.f32.mxu1 %v2725_v37  ;;  %13251 = vmatprep.mubr.f32.mxu0 %v2725_v37  ;;  %v2712_v55 = vmul.f32 0.01, %v13144_v13  ;;  %vm2696_vm3 = vcmp.ge.f32.partialorder %v13144_v13, 0.0  ;;  %v3398_v37 = vld [vmem:[#allocation2 + $0x298] sm:$0xff] }
 0x6cb   : > { %13196 = vmatmul.mubr.f32.gmra.mrb[124].mxu1 %v2726_v16  ;;  %13252 = vmatmul.mubr.f32.gmra.mrb[124].mxu0 %v2726_v16  ;;  %vm2695_vm2 = vcmp.ge.f32.partialorder %v2640_v26, 0.0  ;;  %v2711_v7 = vmul.f32 0.01, %v2640_v26 }
 0x6cc   : > { %v2728_v46 = vsel %vm2696_vm3, %v13144_v13, %v2712_v55  ;;  %v3397_v13 = vld [vmem:[#allocation2 + $0x290] sm:$0xff]  ;;  %v3400_v55 = vld [vmem:[#allocation2 + $0x2a8] sm:$0xff] }
 0x6cd   : > { %v13147_v3 = vpop.f32.mrb[112].mxu0  ;;  %v2727_v51 = vsel %vm2695_vm2, %v2640_v26, %v2711_v7  ;;  %v3399_v26 = vld [vmem:[#allocation2 + $0x2a0] sm:$0xff]  ;;  %v15217_v16 = vpack.c.bf16 %v3398_v37, %v3397_v13 }
 0x6ce   : > { %v2650_v33 = vpop.f32.mrb[113].mxu0  ;;  %13198 = vmatprep.mubr.f32.mxu1 %v2727_v51  ;;  %13254 = vmatprep.mubr.f32.mxu0 %v2727_v51  ;;  %v2714_v30 = vmul.f32 0.01, %v13147_v3  ;;  %vm2698_vm5 = vcmp.ge.f32.partialorder %v13147_v3, 0.0  ;;  %v15221_v7 = vpack.c.bf16 %v3400_v55, %v3399_v26  ;;  %v3402_v51 = vld [vmem:[#allocation2 + $0x2b8] sm:$0xff] }
 0x6cf   : > { %13199 = vmatmul.mubr.f32.gmra.mrb[126].mxu1 %v2728_v46  ;;  %13255 = vmatmul.mubr.f32.gmra.mrb[126].mxu0 %v2728_v46  ;;  %vm2697_vm4 = vcmp.ge.f32.partialorder %v2650_v33, 0.0  ;;  %v2713_v39 = vmul.f32 0.01, %v2650_v33  ;;  %v3403_v46 = vld [vmem:[#allocation2 + $0x2c0] sm:$0xff] }
 0x6d0   : > { %v2730_v27 = vsel %vm2698_vm5, %v13147_v3, %v2714_v30  ;;  %v3401_v3 = vld [vmem:[#allocation2 + $0x2b0] sm:$0xff]  ;;  %15218 = vmatprep.subr.bf16.mxu0 %v15217_v16  ;;  %v3404_v30 = vld [vmem:[#allocation2 + $0x2c8] sm:$0xff] }
 0x6d1   : > { %v13150_v9 = vpop.f32.mrb[114].mxu0  ;;  %v2729_v6 = vsel %vm2697_vm4, %v2650_v33, %v2713_v39  ;;  %15220 = vmatpush3.bf16.msra.mxu0 %v15217_v16  ;;  %v15225_v33 = vpack.c.bf16 %v3402_v51, %v3401_v3  ;;  %v15229_v39 = vpack.c.bf16 %v3404_v30, %v3403_v46 }
 0x6d2   : > { %v2660_v47 = vpop.f32.mrb[115].mxu0  ;;  %13201 = vmatprep.mubr.f32.mxu1 %v2729_v6  ;;  %13257 = vmatprep.mubr.f32.mxu0 %v2729_v6  ;;  %v2716_v50 = vmul.f32 0.01, %v13150_v9  ;;  %vm2700_vm7 = vcmp.ge.f32.partialorder %v13150_v9, 0.0  ;;  %v3406_v6 = vld [vmem:[#allocation2 + $0x2d8] sm:$0xff] }
 0x6d3   : > { %13202 = vmatmul.mubr.f32.gmra.mrb[128].mxu1 %v2730_v27  ;;  %13258 = vmatmul.mubr.f32.gmra.mrb[128].mxu0 %v2730_v27  ;;  %vm2699_vm6 = vcmp.ge.f32.partialorder %v2660_v47, 0.0  ;;  %v2715_v61 = vmul.f32 0.01, %v2660_v47  ;;  %v3407_v27 = vld [vmem:[#allocation2 + $0x2e0] sm:$0xff] }
 0x6d4   : > { %v2732_v62 = vsel %vm2700_vm7, %v13150_v9, %v2716_v50  ;;  %15222 = vmatprep.subr.bf16.mxu0 %v15221_v7  ;;  %v3405_v9 = vld [vmem:[#allocation2 + $0x2d0] sm:$0xff]  ;;  %v3408_v50 = vld [vmem:[#allocation2 + $0x2e8] sm:$0xff] }
 0x6d5   : > { %v13153_v40 = vpop.f32.mrb[116].mxu0  ;;  %v2731_v22 = vsel %vm2699_vm6, %v2660_v47, %v2715_v61  ;;  %15224 = vmatpush3.bf16.msra.mxu0 %v15221_v7  ;;  %v15233_v47 = vpack.c.bf16 %v3406_v6, %v3405_v9  ;;  %v15237_v61 = vpack.c.bf16 %v3408_v50, %v3407_v27 }
 0x6d6   : > { %v2670_v15 = vpop.f32.mrb[117].mxu0  ;;  %13204 = vmatprep.mubr.f32.mxu1 %v2731_v22  ;;  %13260 = vmatprep.mubr.f32.mxu0 %v2731_v22  ;;  %v2718_v2 = vmul.f32 0.01, %v13153_v40  ;;  %vm2702_vm8 = vcmp.ge.f32.partialorder %v13153_v40, 0.0  ;;  %v3410_v22 = vld [vmem:[#allocation2 + $0x2f8] sm:$0xff] }
 0x6d7   : > { %13205 = vmatmul.mubr.f32.gmra.mrb[130].mxu1 %v2732_v62  ;;  %13261 = vmatmul.mubr.f32.gmra.mrb[130].mxu0 %v2732_v62  ;;  %vm2701_vm1 = vcmp.ge.f32.partialorder %v2670_v15, 0.0  ;;  %v2717_v20 = vmul.f32 0.01, %v2670_v15 }
 0x6d8   : > { %v2734_v52 = vsel %vm2702_vm8, %v13153_v40, %v2718_v2  ;;  %15226 = vmatprep.subr.bf16.mxu0 %v15225_v33  ;;  %v3409_v40 = vld [vmem:[#allocation2 + $0x2f0] sm:$0xff] }
 0x6d9   : > { %v13156_v59 = vpop.f32.mrb[118].mxu0  ;;  %v2733_v32 = vsel %vm2701_vm1, %v2670_v15, %v2717_v20  ;;  %15228 = vmatpush3.bf16.msra.mxu0 %v15225_v33  ;;  %v15241_v15 = vpack.c.bf16 %v3410_v22, %v3409_v40 }
 0x6da   : > { %v2680_v35 = vpop.f32.mrb[119].mxu0  ;;  %13207 = vmatprep.mubr.f32.mxu1 %v2733_v32  ;;  %13263 = vmatprep.mubr.f32.mxu0 %v2733_v32  ;;  %v2720_v57 = vmul.f32 0.01, %v13156_v59  ;;  %vm2704_vm11 = vcmp.ge.f32.partialorder %v13156_v59, 0.0 }
 0x6db   : > { %13208 = vmatmul.mubr.f32.gmra.mrb[132].mxu1 %v2734_v52  ;;  %13264 = vmatmul.mubr.f32.gmra.mrb[132].mxu0 %v2734_v52  ;;  %vm2703_vm9 = vcmp.ge.f32.partialorder %v2680_v35, 0.0  ;;  %v2719_v34 = vmul.f32 0.01, %v2680_v35 }
 0x6dc   : > { %v2736_v36 = vsel %vm2704_vm11, %v13156_v59, %v2720_v57  ;;  %15230 = vmatprep.subr.bf16.mxu0 %v15229_v39 }
 0x6dd   : > { %v2735_v28 = vsel %vm2703_vm9, %v2680_v35, %v2719_v34  ;;  %15232 = vmatpush3.bf16.msra.mxu0 %v15229_v39 }
 0x6de   : > { %13210 = vmatprep.mubr.f32.mxu1 %v2735_v28  ;;  %13266 = vmatprep.mubr.f32.mxu0 %v2735_v28 }
 0x6df   : > { %13211 = vmatmul.mubr.f32.gmra.mrb[134].mxu1 %v2736_v36  ;;  %13267 = vmatmul.mubr.f32.gmra.mrb[134].mxu0 %v2736_v36 }
 0x6e0   : > { %15234 = vmatprep.subr.bf16.mxu0 %v15233_v47 }
 0x6e1   : > { %15236 = vmatpush3.bf16.msra.mxu0 %v15233_v47 }
 0x6e2   : > { %15238 = vmatprep.subr.bf16.mxu0 %v15237_v61 }
 0x6e5   : > { %15240 = vmatpush3.bf16.msra.mxu0 %v15237_v61 }
 0x6e6   : > { %15242 = vmatprep.subr.bf16.mxu0 %v15241_v15 }
 0x6e9   : > { %15244 = vmatpush3.bf16.msra.mxu0 %v15241_v15 }
 0x796   : > { %v13191_v62 = vpop.f32.mrb[120].mxu1  ;;  %v17705_v2 = vpop.f32.mrb[120].mxu0 }
 0x797   : > { %16150 = vtanh.f32 %v13191_v62  ;;  %v2819_v20 = vpop.f32.mrb[121].mxu1  ;;  %v17707_v59 = vpop.f32.mrb[121].mxu0 }
 0x798   : > { %16152 = vtanh.f32 %v2819_v20 }
 0x79a   : > { %v13194_v32 = vpop.f32.mrb[122].mxu1  ;;  %v17709_v35 = vpop.f32.mrb[122].mxu0 }
 0x79b   : > { %16154 = vtanh.f32 %v13194_v32  ;;  %v2829_v52 = vpop.f32.mrb[123].mxu1  ;;  %v17711_v57 = vpop.f32.mrb[123].mxu0 }
 0x79c   : > { %16156 = vtanh.f32 %v2829_v52 }
 0x79e   : > { %v13197_v34 = vpop.f32.mrb[124].mxu1  ;;  %v17713_v28 = vpop.f32.mrb[124].mxu0 }
 0x79f   : > { %16158 = vtanh.f32 %v13197_v34  ;;  %v2839_v36 = vpop.f32.mrb[125].mxu1  ;;  %v17715_v13 = vpop.f32.mrb[125].mxu0 }
 0x7a0   : > { %16160 = vtanh.f32 %v2839_v36 }
 0x7a1   : > { %v17717_v37 = vpop.eup %16150 }
 0x7a2   : > { %v17719_v26 = vpop.eup %16152  ;;  %v3093_v16 = vmul.f32 1.442695, %v17717_v37  ;;  %v13200_v55 = vpop.f32.mrb[126].mxu1 }
 0x7a3   : > { %v17722_v7 = vpop.f32.mrb[126].mxu0  ;;  %v3091_v3 = vmul.f32 1.442695, %v17719_v26  ;;  %16162 = vtanh.f32 %v13200_v55  ;;  %v2849_v51 = vpop.f32.mrb[127].mxu1 }
 0x7a4   : > { %v17725_v33 = vpop.f32.mrb[127].mxu0  ;;  %16164 = vpow2.f32 %v3093_v16 }
 0x7a5   : > { %v17727_v46 = vpop.eup %16154  ;;  %16166 = vpow2.f32 %v3091_v3 }
 0x7a6   : > { %v17729_v30 = vpop.eup %16156  ;;  %v3097_v39 = vmul.f32 1.442695, %v17727_v46  ;;  %16168 = vtanh.f32 %v2849_v51  ;;  %v13203_v9 = vpop.f32.mrb[128].mxu1 }
 0x7a7   : > { %v17732_v6 = vpop.f32.mrb[128].mxu0  ;;  %v3095_v47 = vmul.f32 1.442695, %v17729_v30  ;;  %16170 = vtanh.f32 %v13203_v9  ;;  %v2859_v27 = vpop.f32.mrb[129].mxu1 }
 0x7a8   : > { %v17735_v50 = vpop.f32.mrb[129].mxu0  ;;  %16172 = vpow2.f32 %v3097_v39 }
 0x7a9   : > { %v17737_v61 = vpop.eup %16158  ;;  %16174 = vpow2.f32 %v3095_v47 }
 0x7aa   : > { %19632 = vst [vmem:[#allocation109_spill] sm:$0xff] %v17737_v61  ;;  %v17739_v40 = vpop.eup %16160  ;;  %v3101_v22 = vmul.f32 1.442695, %v17737_v61  ;;  %16176 = vtanh.f32 %v2859_v27  ;;  %v13206_v15 = vpop.f32.mrb[130].mxu1 }
 0x7ab   : > { %19633 = vst [vmem:[#allocation110_spill] sm:$0xff] %v17739_v40  ;;  %v17742_v62 = vpop.f32.mrb[130].mxu0  ;;  %v3099_v20 = vmul.f32 1.442695, %v17739_v40  ;;  %16178 = vtanh.f32 %v13206_v15  ;;  %v2869_v32 = vpop.f32.mrb[131].mxu1 }
 0x7ac   : > { %v17745_v52 = vpop.f32.mrb[131].mxu0  ;;  %16180 = vpow2.f32 %v3101_v22 }
 0x7ad   : > { %v17747_v34 = vpop.eup %16162  ;;  %16182 = vpow2.f32 %v3099_v20 }
 0x7ae   : > { %19634 = vst [vmem:[#allocation111_spill] sm:$0xff] %v17747_v34  ;;  %v16165_v36 = vpop.eup %16164  ;;  %v3105_v16 = vmul.f32 1.442695, %v17747_v34  ;;  %16184 = vtanh.f32 %v2869_v32  ;;  %v13209_v55 = vpop.f32.mrb[132].mxu1 }
 0x7af   : > { %v17750_v3 = vpop.f32.mrb[132].mxu0  ;;  %v16167_v51 = vpop.eup %16166  ;;  %v3124_v39 = vmul.f32 %v16165_v36, %v17314_v8  ;;  %16186 = vtanh.f32 %v13209_v55 }
 0x7b0   : > { %v2879_v9 = vpop.f32.mrb[133].mxu1  ;;  %v17753_v47 = vpop.f32.mrb[133].mxu0  ;;  %v3123_v22 = vmul.f32 %v16167_v51, %v17301_v23  ;;  %16188 = vpow2.f32 %v3105_v16 }
 0x7b1   : > { %v17755_v27 = vpop.eup %16168  ;;  %16190 = vtanh.f32 %v2879_v9  ;;  %v17768_v61 = vadd.f32 %v17705_v2, %v3124_v39 }
 0x7b2   : > { %v17758_v15 = vpop.eup %16170  ;;  %v3103_v20 = vmul.f32 1.442695, %v17755_v27  ;;  %v17762_v34 = vadd.f32 %v3123_v22, %v17707_v59  ;;  %v13212_v36 = vpop.f32.mrb[134].mxu1 }
 0x7b3   : > { %19635 = vst [vmem:[#allocation112_spill] sm:$0xff] %v17758_v15  ;;  %v16173_v32 = vpop.eup %16172  ;;  %v3109_v8 = vmul.f32 1.442695, %v17758_v15  ;;  %v17765_v55 = vpop.f32.mrb[134].mxu0 }
 0x7b4   : > { %v16175_v40 = vpop.eup %16174  ;;  %v3126_v23 = vmul.f32 %v16173_v32, %v17330_v42  ;;  %16192 = vpow2.f32 %v3103_v20  ;;  %v2889_v16 = vpop.f32.mrb[135].mxu1  ;;  %13271 = vmatprep.mubr.msk.f32.mxu1 %vm2077_vm10, %v17762_v34 }
 0x7b5   : > { %v17771_v51 = vpop.f32.mrb[135].mxu0  ;;  %v17773_v9 = vpop.eup %16176  ;;  %v3125_v59 = vmul.f32 %v16175_v40, %v17319_v31  ;;  %16194 = vpow2.f32 %v3109_v8  ;;  %13272 = vmatmul.mubr.msk.f32.vlgmr.msra.gmra.mrb[136].mxu1 %vm2077_vm10, %v17768_v61 }
 0x7b6   : > { %v17778_v22 = vpop.eup %16178  ;;  %v3107_v15 = vmul.f32 1.442695, %v17773_v9  ;;  %16196 = vtanh.f32 %v13212_v36  ;;  %v17788_v40 = vadd.f32 %v17709_v35, %v3126_v23 }
 0x7b7   : > { %v16181_v42 = vpop.eup %16180  ;;  %v17784_v2 = vadd.f32 %v3125_v59, %v17711_v57  ;;  %v3113_v39 = vmul.f32 1.442695, %v17778_v22  ;;  %16198 = vtanh.f32 %v2889_v16 }
 0x7b8   : > { %v16183_v31 = vpop.eup %16182  ;;  %v3128_v20 = vmul.f32 %v16181_v42, %v17346_v54  ;;  %16200 = vpow2.f32 %v3107_v15 }
 0x7b9   : > { %v17791_v32 = vpop.eup %16184  ;;  %v3127_v8 = vmul.f32 %v16183_v31, %v17335_v44  ;;  %16202 = vpow2.f32 %v3113_v39  ;;  %13274 = vmatprep.mubr.msk.f32.mxu1 %vm2077_vm10, %v17784_v2 }
 0x7ba   : > { %v17796_v57 = vpop.eup %16186  ;;  %v3111_v36 = vmul.f32 1.442695, %v17791_v32  ;;  %13275 = vmatmul.mubr.msk.f32.gmra.mrb[138].mxu1 %vm2077_vm10, %v17788_v40  ;;  %v17808_v44 = vadd.f32 %v17713_v28, %v3128_v20 }
 0x7bb   : > { %19636 = vst [vmem:[#allocation113_spill] sm:$0xff] %v17796_v57  ;;  %v16189_v35 = vpop.eup %16188  ;;  %v17802_v23 = vadd.f32 %v3127_v8, %v17715_v13  ;;  %v3117_v54 = vmul.f32 1.442695, %v17796_v57 }
 0x7bc   : > { %v17805_v15 = vpop.eup %16190  ;;  %16204 = vpow2.f32 %v3111_v36  ;;  %v3130_v42 = vmul.f32 %v16189_v35, %v17362_v4 }
 0x7bd   : > { %19637 = vst [vmem:[#allocation114_spill] sm:$0xff] %v17805_v15  ;;  %16206 = vpow2.f32 %v3117_v54  ;;  %v3115_v16 = vmul.f32 1.442695, %v17805_v15  ;;  %13277 = vmatprep.mubr.msk.f32.mxu1 %vm2077_vm10, %v17802_v23 }
 0x7be   : > { %v16193_v59 = vpop.eup %16192  ;;  %13278 = vmatmul.mubr.msk.f32.gmra.mrb[140].mxu1 %vm2077_vm10, %v17808_v44  ;;  %v17826_v54 = vadd.f32 %v17722_v7, %v3130_v42 }
 0x7bf   : > { %v16195_v13 = vpop.eup %16194  ;;  %v3129_v39 = vmul.f32 %v16193_v59, %v17351_v56  ;;  %16208 = vpow2.f32 %v3115_v16 }
 0x7c0   : > { %v17817_v31 = vpop.eup %16196  ;;  %v3132_v4 = vmul.f32 %v16195_v13, %v17375_v11 }
 0x7c1   : > { %19638 = vst [vmem:[#allocation115_spill] sm:$0xff] %v17817_v31  ;;  %v17819_v28 = vpop.eup %16198  ;;  %v17822_v20 = vadd.f32 %v3129_v39, %v17725_v33  ;;  %v3121_v8 = vmul.f32 1.442695, %v17817_v31 }
 0x7c2   : > { %19639 = vst [vmem:[#allocation116_spill] sm:$0xff] %v17819_v28  ;;  %v16201_v36 = vpop.eup %16200  ;;  %v3119_v35 = vmul.f32 1.442695, %v17819_v28  ;;  %v17839_v16 = vadd.f32 %v17732_v6, %v3132_v4  ;;  %v3608_v4 = vld [vmem:[#allocation2 + $0x320] sm:$0xff] }
 0x7c3   : > { %v16203_v15 = vpop.eup %16202  ;;  %v3131_v56 = vmul.f32 %v16201_v36, %v17366_v5  ;;  %16210 = vpow2.f32 %v3121_v8  ;;  %13280 = vmatprep.mubr.msk.f32.mxu1 %vm2077_vm10, %v17822_v20  ;;  %v3607_v36 = vld [vmem:[#allocation2 + $0x318] sm:$0xff] }
 0x7c4   : > { %16212 = vpow2.f32 %v3119_v35  ;;  %13281 = vmatmul.mubr.msk.f32.gmra.mrb[142].mxu1 %vm2077_vm10, %v17826_v54  ;;  %v3134_v11 = vmul.f32 %v16203_v15, %v17386_v17 }
 0x7c5   : > { %v17836_v33 = vadd.f32 %v3131_v56, %v17735_v50 }
 0x7c6   : > { %v16205_v7 = vpop.eup %16204  ;;  %v17851_v50 = vadd.f32 %v17742_v62, %v3134_v11 }
 0x7c7   : > { %v16207_v59 = vpop.eup %16206  ;;  %v3133_v5 = vmul.f32 %v16205_v7, %v17379_v12  ;;  %13283 = vmatprep.mubr.msk.f32.mxu1 %vm2077_vm10, %v17836_v33  ;;  %v3610_v7 = vld [vmem:[#allocation2 + $0x330] sm:$0xff] }
 0x7c8   : > { %13284 = vmatmul.mubr.msk.f32.gmra.mrb[144].mxu1 %vm2077_vm10, %v17839_v16  ;;  %v3136_v6 = vmul.f32 %v16207_v59, %v17396_v0  ;;  %v3612_v59 = vld [vmem:[#allocation2 + $0x340] sm:$0xff] }
 0x7c9   : > { %v16209_v42 = vpop.eup %16208  ;;  %v17848_v13 = vadd.f32 %v3133_v5, %v17745_v52  ;;  %v3613_v5 = vld [vmem:[#allocation2 + $0x348] sm:$0xff] }
 0x7ca   : > { %v3135_v17 = vmul.f32 %v16209_v42, %v17390_v18  ;;  %v17863_v52 = vadd.f32 %v17750_v3, %v3136_v6  ;;  %v3412_v3 = vld [vmem:[#allocation2 + $0x308] sm:$0xff]  ;;  %v15261_v42 = vpack.c.bf16 %v3613_v5, %v3612_v59  ;;  %v3614_v6 = vld [vmem:[#allocation2 + $0x350] sm:$0xff] }
 0x7cb   : > { %13286 = vmatprep.mubr.msk.f32.mxu1 %vm2077_vm10, %v17848_v13 }
 0x7cc   : > { %v17858_v12 = vadd.f32 %v3135_v17, %v17753_v47  ;;  %13287 = vmatmul.mubr.msk.f32.gmra.mrb[146].mxu1 %vm2077_vm10, %v17851_v50  ;;  %v3615_v17 = vld [vmem:[#allocation2 + $0x358] sm:$0xff] }
 0x7cd   : > { %v16211_v15 = vpop.eup %16210 }
 0x7ce   : > { %v16213_v39 = vpop.eup %16212  ;;  %v3138_v62 = vmul.f32 %v16211_v15, %v17405_v24  ;;  %13289 = vmatprep.mubr.msk.f32.mxu1 %vm2077_vm10, %v17858_v12  ;;  %v3411_v24 = vld [vmem:[#allocation2 + $0x300] sm:$0xff]  ;;  %v15265_v15 = vpack.c.bf16 %v3615_v17, %v3614_v6 }
 0x7cf   : > { %v3137_v18 = vmul.f32 %v16213_v39, %v17400_v21  ;;  %v15245_v8 = vpack.c.bf16 %v3412_v3, %v3411_v24  ;;  %v3606_v21 = vld [vmem:[#allocation2 + $0x310] sm:$0xff]  ;;  %v3616_v39 = vld [vmem:[#allocation2 + $0x360] sm:$0xff]  ;;  %v3619_v3 = vld [vmem:[#allocation2 + $0x378] sm:$0xff] }
 0x7d0   : > { %13290 = vmatmul.mubr.msk.f32.gmra.mrb[148].mxu1 %vm2077_vm10, %v17863_v52  ;;  %v17875_v47 = vadd.f32 %v17765_v55, %v3138_v62  ;;  %v15249_v35 = vpack.c.bf16 %v3607_v36, %v3606_v21  ;;  %v3611_v55 = vld [vmem:[#allocation2 + $0x338] sm:$0xff]  ;;  %v3617_v62 = vld [vmem:[#allocation2 + $0x368] sm:$0xff]  ;;  %v3618_v24 = vld [vmem:[#allocation2 + $0x370] sm:$0xff]  ;;  %v17883_v21 = vrot.slane %v17651_v53, %v16941_v45 }
 0x7d1   : > { %v17872_v0 = vadd.f32 %v3137_v18, %v17771_v51  ;;  %15246 = vmatprep.subr.bf16.mxu0 %v15245_v8  ;;  %v3609_v51 = vld [vmem:[#allocation2 + $0x328] sm:$0xff]  ;;  %v15257_v11 = vpack.c.bf16 %v3611_v55, %v3610_v7  ;;  %v15269_v18 = vpack.c.bf16 %v3617_v62, %v3616_v39 }
 0x7d2   : > { %15248 = vmatpush3.bf16.msra.mxu0 %v15245_v8  ;;  %v15253_v56 = vpack.c.bf16 %v3609_v51, %v3608_v4  ;;  %15250 = vmatprep.subr.bf16.mxu1 %v15249_v35  ;;  %v15273_v8 = vpack.c.bf16 %v3619_v3, %v3618_v24  ;;  %v1418_v36 = vadd.f32 %v17423_v58, %v17883_v21 }
 0x7d3   : > { %13292 = vmatprep.mubr.msk.f32.mxu1 %vm2077_vm10, %v17872_v0  ;;  %15252 = vmatpush3.bf16.msra.mxu1 %v15249_v35  ;;  %v1412_v4 = vadd.f32 %v17415_v63, %v17883_v21  ;;  %v1430_v55 = vadd.f32 %v17439_v19, %v17883_v21  ;;  %v1424_v59 = vadd.f32 %v17431_v10, %v17883_v21 }
 0x7d4   : > { %13293 = vmatmul.mubr.msk.f32.gmra.mrb[150].mxu1 %vm2077_vm10, %v17875_v47  ;;  %15254 = vmatprep.subr.bf16.mxu1 %v15253_v56  ;;  %v1442_v63 = vadd.f32 %v17455_v29, %v17883_v21  ;;  %v1436_v19 = vadd.f32 %v17447_v25, %v17883_v21  ;;  %v1448_v25 = vadd.f32 %v17463_v38, %v17883_v21 }
 0x7d7   : > { %15256 = vmatpush3.bf16.msra.mxu1 %v15253_v56 }
 0x7d8   : > { %15258 = vmatprep.subr.bf16.mxu1 %v15257_v11 }
 0x7db   : > { %15260 = vmatpush3.bf16.msra.mxu1 %v15257_v11 }
 0x7dc   : > { %15262 = vmatprep.subr.bf16.mxu1 %v15261_v42 }
 0x7df   : > { %15264 = vmatpush3.bf16.msra.mxu1 %v15261_v42 }
 0x7e0   : > { %15266 = vmatprep.subr.bf16.mxu1 %v15265_v15 }
 0x7e3   : > { %15268 = vmatpush3.bf16.msra.mxu1 %v15265_v15 }
 0x7e4   : > { %15270 = vmatprep.subr.bf16.mxu1 %v15269_v18 }
 0x7e7   : > { %15272 = vmatpush3.bf16.msra.mxu1 %v15269_v18 }
 0x7e8   : > { %15274 = vmatprep.subr.bf16.mxu1 %v15273_v8 }
 0x7eb   : > { %15276 = vmatpush3.bf16.msra.mxu1 %v15273_v8 }
 0x888   : > { %v13273_v35 = vpop.f32.mrb[136].mxu1 }
 0x889   : > { %v3276_v51 = vadd.f32 %v13273_v35, %v1418_v36  ;;  %v3270_v56 = vpop.f32.mrb[137].mxu1 }
 0x88a   : > { %v3271_v7 = vadd.f32 %v3270_v56, %v1412_v4 }
 0x88b   : > { %v3366_v11 = vmul.f32 0.01, %v3276_v51  ;;  %vm3350_vm13 = vcmp.ge.f32.partialorder %v3276_v51, 0.0 }
 0x88c   : > { %vm3349_vm12 = vcmp.ge.f32.partialorder %v3271_v7, 0.0  ;;  %v3365_v42 = vmul.f32 0.01, %v3271_v7 }
 0x88d   : > { %v13276_v5 = vpop.f32.mrb[138].mxu1  ;;  %v3382_v39 = vsel %vm3350_vm13, %v3276_v51, %v3366_v11  ;;  %v1454_v51 = vadd.f32 %v17471_v41, %v17883_v21 }
 0x88e   : > { %v3286_v6 = vadd.f32 %v13276_v5, %v1430_v55  ;;  %v3280_v58 = vpop.f32.mrb[139].mxu1  ;;  %v3381_v15 = vsel %vm3349_vm12, %v3271_v7, %v3365_v42  ;;  %v1466_v42 = vadd.f32 %v17487_v60, %v17883_v21  ;;  %v1472_v60 = vadd.f32 %v17495_v1, %v17883_v21 }
 0x88f   : > { %v3281_v17 = vadd.f32 %v3280_v58, %v1424_v59  ;;  %13327 = vmatprep.mubr.f32.mxu0 %v3381_v15  ;;  %v1460_v58 = vadd.f32 %v17479_v49, %v17883_v21 }
 0x890   : > { %v3368_v62 = vmul.f32 0.01, %v3286_v6  ;;  %13328 = vmatmul.mubr.f32.vlgmr.msra.gmra.mrb[136].mxu0 %v3382_v39  ;;  %vm3352_vm0 = vcmp.ge.f32.partialorder %v3286_v6, 0.0 }
 0x891   : > { %v13279_v18 = vpop.f32.mrb[140].mxu1  ;;  %vm3351_vm14 = vcmp.ge.f32.partialorder %v3281_v17, 0.0  ;;  %v3367_v10 = vmul.f32 0.01, %v3281_v17 }
 0x892   : > { %v3296_v24 = vadd.f32 %v13279_v18, %v1442_v63  ;;  %v3290_v3 = vpop.f32.mrb[141].mxu1  ;;  %v3384_v4 = vsel %vm3352_vm0, %v3286_v6, %v3368_v62  ;;  %v1478_v62 = vadd.f32 %v17503_v43, %v17883_v21 }
 0x893   : > { %v3291_v8 = vadd.f32 %v3290_v3, %v1436_v19  ;;  %v3383_v36 = vsel %vm3351_vm14, %v3281_v17, %v3367_v10 }
 0x894   : > { %13330 = vmatprep.mubr.f32.mxu0 %v3383_v36  ;;  %v3370_v35 = vmul.f32 0.01, %v3296_v24  ;;  %vm3354_vm2 = vcmp.ge.f32.partialorder %v3296_v24, 0.0 }
 0x895   : > { %13331 = vmatmul.mubr.f32.gmra.mrb[138].mxu0 %v3384_v4  ;;  %vm3353_vm15 = vcmp.ge.f32.partialorder %v3291_v8, 0.0  ;;  %v3369_v29 = vmul.f32 0.01, %v3291_v8  ;;  %v1490_v4 = vadd.f32 %v17519_v48, %v17883_v21 }
 0x896   : > { %v3386_v59 = vsel %vm3354_vm2, %v3296_v24, %v3370_v35 }
 0x897   : > { %v13282_v56 = vpop.f32.mrb[142].mxu1  ;;  %v3385_v7 = vsel %vm3353_vm15, %v3291_v8, %v3369_v29  ;;  %v1484_v29 = vadd.f32 %v17511_v14, %v17883_v21 }
 0x898   : > { %v3306_v55 = vadd.f32 %v13282_v56, %v1454_v51  ;;  %v3300_v11 = vpop.f32.mrb[143].mxu1  ;;  %13333 = vmatprep.mubr.f32.mxu0 %v3385_v7 }
 0x899   : > { %v3301_v5 = vadd.f32 %v3300_v11, %v1448_v25  ;;  %13334 = vmatmul.mubr.f32.gmra.mrb[140].mxu0 %v3386_v59  ;;  %v19640_v11 = vld [vmem:[#allocation43_spill] sm:$0xff] }
 0x89a   : > { %v3372_v6 = vmul.f32 0.01, %v3306_v55  ;;  %vm3356_vm4 = vcmp.ge.f32.partialorder %v3306_v55, 0.0  ;;  %v1502_v59 = vadd.f32 %v19640_v11, %v17883_v21  ;;  %v3823_v11 = vld [vmem:[#allocation2 + $0x3d0] sm:$0xff] }
 0x89b   : > { %v13285_v17 = vpop.f32.mrb[144].mxu1  ;;  %vm3355_vm3 = vcmp.ge.f32.partialorder %v3301_v5, 0.0  ;;  %v3371_v41 = vmul.f32 0.01, %v3301_v5 }
 0x89c   : > { %v3316_v38 = vadd.f32 %v13285_v17, %v1466_v42  ;;  %v3310_v15 = vpop.f32.mrb[145].mxu1  ;;  %v3388_v19 = vsel %vm3356_vm4, %v3306_v55, %v3372_v6  ;;  %v19641_v42 = vld [vmem:[#allocation40_spill] sm:$0xff] }
 0x89d   : > { %v3311_v63 = vadd.f32 %v3310_v15, %v1460_v58  ;;  %v3387_v39 = vsel %vm3355_vm3, %v3301_v5, %v3371_v41  ;;  %v1496_v6 = vadd.f32 %v19641_v42, %v17883_v21  ;;  %v3620_v21 = vld [vmem:[#allocation2 + $0x380] sm:$0xff]  ;;  %v3826_v42 = vld [vmem:[#allocation2 + $0x3e8] sm:$0xff] }
 0x89e   : > { %13336 = vmatprep.mubr.f32.mxu0 %v3387_v39  ;;  %v3374_v18 = vmul.f32 0.01, %v3316_v38  ;;  %vm3358_vm6 = vcmp.ge.f32.partialorder %v3316_v38, 0.0 }
 0x89f   : > { %v13288_v10 = vpop.f32.mrb[146].mxu1  ;;  %13337 = vmatmul.mubr.f32.gmra.mrb[142].mxu0 %v3388_v19  ;;  %vm3357_vm5 = vcmp.ge.f32.partialorder %v3311_v63, 0.0  ;;  %v3373_v49 = vmul.f32 0.01, %v3311_v63 }
 0x8a0   : > { %v3326_v24 = vadd.f32 %v13288_v10, %v1478_v62  ;;  %v3320_v3 = vpop.f32.mrb[147].mxu1  ;;  %v3390_v43 = vsel %vm3358_vm6, %v3316_v38, %v3374_v18 }
 0x8a1   : > { %v3321_v8 = vadd.f32 %v3320_v3, %v1472_v60  ;;  %v3389_v36 = vsel %vm3357_vm5, %v3311_v63, %v3373_v49  ;;  %v3621_v60 = vld [vmem:[#allocation2 + $0x388] sm:$0xff]  ;;  %v3815_v49 = vld [vmem:[#allocation2 + $0x390] sm:$0xff] }
 0x8a2   : > { %13339 = vmatprep.mubr.f32.mxu0 %v3389_v36  ;;  %v3376_v35 = vmul.f32 0.01, %v3326_v24  ;;  %vm3360_vm1 = vcmp.ge.f32.partialorder %v3326_v24, 0.0  ;;  %v15277_v10 = vpack.c.bf16 %v3621_v60, %v3620_v21  ;;  %v3992_v3 = vld [vmem:[#allocation2 + $0x410] sm:$0xff]  ;;  %v3993_v36 = vld [vmem:[#allocation2 + $0x418] sm:$0xff] }
 0x8a3   : > { %v13291_v51 = vpop.f32.mrb[148].mxu1  ;;  %13340 = vmatmul.mubr.f32.gmra.mrb[144].mxu0 %v3390_v43  ;;  %vm3359_vm7 = vcmp.ge.f32.partialorder %v3321_v8, 0.0  ;;  %v3375_v1 = vmul.f32 0.01, %v3321_v8  ;;  %v3818_v43 = vld [vmem:[#allocation2 + $0x3a8] sm:$0xff] }
 0x8a4   : > { %v3336_v25 = vadd.f32 %v13291_v51, %v1490_v4  ;;  %v3330_v56 = vpop.f32.mrb[149].mxu1  ;;  %v3392_v48 = vsel %vm3360_vm1, %v3326_v24, %v3376_v35  ;;  %15278 = vmatprep.subr.bf16.mxu1 %v15277_v10  ;;  %v3816_v24 = vld [vmem:[#allocation2 + $0x398] sm:$0xff]  ;;  %v3817_v4 = vld [vmem:[#allocation2 + $0x3a0] sm:$0xff]  ;;  %v15313_v35 = vpack.c.bf16 %v3993_v36, %v3992_v3  ;;  %v3819_v51 = vld [vmem:[#allocation2 + $0x3b0] sm:$0xff] }
 0x8a5   : > { %v3331_v7 = vadd.f32 %v3330_v56, %v1484_v29  ;;  %v3391_v55 = vsel %vm3359_vm7, %v3321_v8, %v3375_v1  ;;  %15280 = vmatpush3.bf16.msra.mxu1 %v15277_v10  ;;  %v15281_v8 = vpack.c.bf16 %v3816_v24, %v3815_v49  ;;  %v15285_v29 = vpack.c.bf16 %v3818_v43, %v3817_v4  ;;  %v3820_v1 = vld [vmem:[#allocation2 + $0x3b8] sm:$0xff]  ;;  %v3821_v56 = vld [vmem:[#allocation2 + $0x3c0] sm:$0xff]  ;;  %v3996_v24 = vld [vmem:[#allocation2 + $0x430] sm:$0xff] }
 0x8a6   : > { %13342 = vmatprep.mubr.f32.mxu0 %v3391_v55  ;;  %v3378_v5 = vmul.f32 0.01, %v3336_v25  ;;  %vm3362_vm9 = vcmp.ge.f32.partialorder %v3336_v25, 0.0  ;;  %15314 = vmatprep.subr.bf16.mxu1 %v15313_v35  ;;  %v3997_v3 = vld [vmem:[#allocation2 + $0x438] sm:$0xff] }
 0x8a7   : > { %v13294_v58 = vpop.f32.mrb[150].mxu1  ;;  %13343 = vmatmul.mubr.f32.gmra.mrb[146].mxu0 %v3392_v48  ;;  %vm3361_vm8 = vcmp.ge.f32.partialorder %v3331_v7, 0.0  ;;  %v3377_v14 = vmul.f32 0.01, %v3331_v7  ;;  %15282 = vmatprep.subr.bf16.mxu0 %v15281_v8  ;;  %v15321_v43 = vpack.c.bf16 %v3997_v3, %v3996_v24 }
 0x8a8   : > { %v3346_v17 = vadd.f32 %v13294_v58, %v1502_v59  ;;  %v3340_v41 = vpop.f32.mrb[151].mxu1  ;;  %v3394_v63 = vsel %vm3362_vm9, %v3336_v25, %v3378_v5  ;;  %15284 = vmatpush3.bf16.msra.mxu0 %v15281_v8  ;;  %v15289_v25 = vpack.c.bf16 %v3820_v1, %v3819_v51  ;;  %v3824_v59 = vld [vmem:[#allocation2 + $0x3d8] sm:$0xff]  ;;  %v3825_v5 = vld [vmem:[#allocation2 + $0x3e0] sm:$0xff]  ;;  %v3827_v58 = vld [vmem:[#allocation2 + $0x3f0] sm:$0xff] }
 0x8a9   : > { %v3341_v38 = vadd.f32 %v3340_v41, %v1496_v6  ;;  %v3393_v15 = vsel %vm3361_vm8, %v3331_v7, %v3377_v14  ;;  %15286 = vmatprep.subr.bf16.mxu0 %v15285_v29  ;;  %v3822_v7 = vld [vmem:[#allocation2 + $0x3c8] sm:$0xff]  ;;  %v15297_v48 = vpack.c.bf16 %v3824_v59, %v3823_v11  ;;  %v15301_v6 = vpack.c.bf16 %v3826_v42, %v3825_v5  ;;  %v3828_v14 = vld [vmem:[#allocation2 + $0x3f8] sm:$0xff]  ;;  %v4000_v59 = vld [vmem:[#allocation2 + $0x450] sm:$0xff] }
 0x8aa   : > { %13345 = vmatprep.mubr.f32.mxu0 %v3393_v15  ;;  %v3380_v39 = vmul.f32 0.01, %v3346_v17  ;;  %vm3364_vm12 = vcmp.ge.f32.partialorder %v3346_v17, 0.0  ;;  %v15293_v55 = vpack.c.bf16 %v3822_v7, %v3821_v56  ;;  %v3999_v56 = vld [vmem:[#allocation2 + $0x448] sm:$0xff] }
 0x8ab   : > { %13346 = vmatmul.mubr.f32.gmra.mrb[148].mxu0 %v3394_v63  ;;  %vm3363_vm11 = vcmp.ge.f32.partialorder %v3341_v38, 0.0  ;;  %v3379_v62 = vmul.f32 0.01, %v3341_v38  ;;  %v3994_v63 = vld [vmem:[#allocation2 + $0x420] sm:$0xff] }
 0x8ac   : > { %v3396_v18 = vsel %vm3364_vm12, %v3346_v17, %v3380_v39  ;;  %15288 = vmatpush3.bf16.msra.mxu0 %v15285_v29  ;;  %v15305_v17 = vpack.c.bf16 %v3828_v14, %v3827_v58  ;;  %v3995_v39 = vld [vmem:[#allocation2 + $0x428] sm:$0xff] }
 0x8ad   : > { %v3395_v19 = vsel %vm3363_vm11, %v3341_v38, %v3379_v62  ;;  %15290 = vmatprep.subr.bf16.mxu0 %v15289_v25  ;;  %v15317_v21 = vpack.c.bf16 %v3995_v39, %v3994_v63 }
 0x8ae   : > { %13348 = vmatprep.mubr.f32.mxu0 %v3395_v19 }
 0x8af   : > { %13349 = vmatmul.mubr.f32.gmra.mrb[150].mxu0 %v3396_v18 }
 0x8b0   : > { %15292 = vmatpush3.bf16.msra.mxu0 %v15289_v25  ;;  %v3998_v25 = vld [vmem:[#allocation2 + $0x440] sm:$0xff] }
 0x8b1   : > { %15294 = vmatprep.subr.bf16.mxu0 %v15293_v55  ;;  %v15325_v11 = vpack.c.bf16 %v3999_v56, %v3998_v25 }
 0x8b4   : > { %15296 = vmatpush3.bf16.msra.mxu0 %v15293_v55 }
 0x8b5   : > { %15298 = vmatprep.subr.bf16.mxu0 %v15297_v48 }
 0x8b8   : > { %15300 = vmatpush3.bf16.msra.mxu0 %v15297_v48  ;;  %v4001_v48 = vld [vmem:[#allocation2 + $0x458] sm:$0xff] }
 0x8b9   : > { %15302 = vmatprep.subr.bf16.mxu0 %v15301_v6  ;;  %v15329_v14 = vpack.c.bf16 %v4001_v48, %v4000_v59 }
 0x8bc   : > { %15304 = vmatpush3.bf16.msra.mxu0 %v15301_v6 }
 0x8bd   : > { %15306 = vmatprep.subr.bf16.mxu0 %v15305_v17 }
 0x8c0   : > { %15308 = vmatpush3.bf16.msra.mxu0 %v15305_v17  ;;  %v4002_v17 = vld [vmem:[#allocation2 + $0x460] sm:$0xff] }
 0x963   : > { %v13329_v41 = vpop.f32.mrb[136].mxu0 }
 0x964   : > { %v3575_v38 = vmul.f32 0.01, %v13329_v41  ;;  %v3479_v15 = vpop.f32.mrb[137].mxu0  ;;  %vm3559_vm14 = vcmp.ge.f32.partialorder %v13329_v41, 0.0 }
 0x965   : > { %vm3558_vm13 = vcmp.ge.f32.partialorder %v3479_v15, 0.0  ;;  %v3574_v62 = vmul.f32 0.01, %v3479_v15 }
 0x966   : > { %v3591_v10 = vsel %vm3559_vm14, %v13329_v41, %v3575_v38  ;;  %v4003_v41 = vld [vmem:[#allocation2 + $0x468] sm:$0xff] }
 0x967   : > { %v3590_v18 = vsel %vm3558_vm13, %v3479_v15, %v3574_v62 }
 0x968   : > { %v13332_v19 = vpop.f32.mrb[138].mxu0  ;;  %13383 = vmatprep.mubr.f32.mxu1 %v3590_v18  ;;  %v15333_v18 = vpack.c.bf16 %v4003_v41, %v4002_v17  ;;  %v4007_v41 = vld [vmem:[#allocation2 + $0x488] sm:$0xff] }
 0x969   : > { %v3489_v60 = vpop.f32.mrb[139].mxu0  ;;  %v3577_v49 = vmul.f32 0.01, %v13332_v19  ;;  %13384 = vmatmul.mubr.f32.vlgmr.msra.gmra.mrb[152].mxu1 %v3591_v10  ;;  %vm3561_vm15 = vcmp.ge.f32.partialorder %v13332_v19, 0.0 }
 0x96a   : > { %vm3560_vm0 = vcmp.ge.f32.partialorder %v3489_v60, 0.0  ;;  %v3576_v8 = vmul.f32 0.01, %v3489_v60  ;;  %15316 = vmatpush3.bf16.msra.mxu1 %v15313_v35 }
 0x96b   : > { %15318 = vmatprep.subr.bf16.mxu1 %v15317_v21  ;;  %v3593_v51 = vsel %vm3561_vm15, %v13332_v19, %v3577_v49 }
 0x96c   : > { %v13335_v36 = vpop.f32.mrb[140].mxu0  ;;  %v3592_v4 = vsel %vm3560_vm0, %v3489_v60, %v3576_v8  ;;  %v4005_v60 = vld [vmem:[#allocation2 + $0x478] sm:$0xff] }
 0x96d   : > { %v3499_v29 = vpop.f32.mrb[141].mxu0  ;;  %13386 = vmatprep.mubr.f32.mxu1 %v3592_v4  ;;  %v3579_v1 = vmul.f32 0.01, %v13335_v36  ;;  %vm3563_vm3 = vcmp.ge.f32.partialorder %v13335_v36, 0.0 }
 0x96e   : > { %13387 = vmatmul.mubr.f32.gmra.mrb[154].mxu1 %v3593_v51  ;;  %vm3562_vm2 = vcmp.ge.f32.partialorder %v3499_v29, 0.0  ;;  %v3578_v7 = vmul.f32 0.01, %v3499_v29 }
 0x96f   : > { %15320 = vmatpush3.bf16.msra.mxu1 %v15317_v21  ;;  %v3595_v35 = vsel %vm3563_vm3, %v13335_v36, %v3579_v1  ;;  %v4004_v21 = vld [vmem:[#allocation2 + $0x470] sm:$0xff] }
 0x970   : > { %v3594_v55 = vsel %vm3562_vm2, %v3499_v29, %v3578_v7  ;;  %15322 = vmatprep.subr.bf16.mxu1 %v15321_v43  ;;  %v15337_v4 = vpack.c.bf16 %v4005_v60, %v4004_v21 }
 0x971   : > { %13389 = vmatprep.mubr.f32.mxu1 %v3594_v55 }
 0x972   : > { %v13338_v5 = vpop.f32.mrb[142].mxu0  ;;  %13390 = vmatmul.mubr.f32.gmra.mrb[156].mxu1 %v3595_v35 }
 0x973   : > { %v3509_v42 = vpop.f32.mrb[143].mxu0  ;;  %v3581_v6 = vmul.f32 0.01, %v13338_v5  ;;  %15324 = vmatpush3.bf16.msra.mxu1 %v15321_v43  ;;  %vm3565_vm5 = vcmp.ge.f32.partialorder %v13338_v5, 0.0 }
 0x974   : > { %vm3564_vm4 = vcmp.ge.f32.partialorder %v3509_v42, 0.0  ;;  %v3580_v58 = vmul.f32 0.01, %v3509_v42  ;;  %15326 = vmatprep.subr.bf16.mxu1 %v15325_v11 }
 0x975   : > { %v3597_v39 = vsel %vm3565_vm5, %v13338_v5, %v3581_v6  ;;  %v3829_v6 = vld [vmem:[#allocation2 + $0x400] sm:$0xff] }
 0x976   : > { %v13341_v38 = vpop.f32.mrb[144].mxu0  ;;  %v3596_v15 = vsel %vm3564_vm4, %v3509_v42, %v3580_v58  ;;  %v3830_v58 = vld [vmem:[#allocation2 + $0x408] sm:$0xff] }
 0x977   : > { %v3519_v63 = vpop.f32.mrb[145].mxu0  ;;  %13392 = vmatprep.mubr.f32.mxu1 %v3596_v15  ;;  %v3583_v62 = vmul.f32 0.01, %v13341_v38  ;;  %15328 = vmatpush3.bf16.msra.mxu1 %v15325_v11  ;;  %vm3567_vm7 = vcmp.ge.f32.partialorder %v13341_v38, 0.0  ;;  %v15309_v17 = vpack.c.bf16 %v3830_v58, %v3829_v6 }
 0x978   : > { %13393 = vmatmul.mubr.f32.gmra.mrb[158].mxu1 %v3597_v39  ;;  %vm3566_vm6 = vcmp.ge.f32.partialorder %v3519_v63, 0.0  ;;  %v3582_v19 = vmul.f32 0.01, %v3519_v63  ;;  %15330 = vmatprep.subr.bf16.mxu1 %v15329_v14 }
 0x979   : > { %v3599_v3 = vsel %vm3567_vm7, %v13341_v38, %v3583_v62  ;;  %15310 = vmatprep.subr.bf16.mxu0 %v15309_v17 }
 0x97a   : > { %v13344_v10 = vpop.f32.mrb[146].mxu0  ;;  %v3598_v49 = vsel %vm3566_vm6, %v3519_v63, %v3582_v19  ;;  %15312 = vmatpush3.bf16.msra.mxu0 %v15309_v17 }
 0x97b   : > { %v3529_v24 = vpop.f32.mrb[147].mxu0  ;;  %13395 = vmatprep.mubr.f32.mxu1 %v3598_v49  ;;  %v3585_v8 = vmul.f32 0.01, %v13344_v10  ;;  %15332 = vmatpush3.bf16.msra.mxu1 %v15329_v14  ;;  %vm3569_vm8 = vcmp.ge.f32.partialorder %v13344_v10, 0.0  ;;  %v4006_v14 = vld [vmem:[#allocation2 + $0x480] sm:$0xff] }
 0x97c   : > { %13396 = vmatmul.mubr.f32.gmra.mrb[160].mxu1 %v3599_v3  ;;  %vm3568_vm1 = vcmp.ge.f32.partialorder %v3529_v24, 0.0  ;;  %v3584_v36 = vmul.f32 0.01, %v3529_v24  ;;  %15334 = vmatprep.subr.bf16.mxu1 %v15333_v18  ;;  %v15341_v38 = vpack.c.bf16 %v4007_v41, %v4006_v14 }
 0x97d   : > { %v3601_v1 = vsel %vm3569_vm8, %v13344_v10, %v3585_v8 }
 0x97e   : > { %v13347_v43 = vpop.f32.mrb[148].mxu0  ;;  %v3600_v29 = vsel %vm3568_vm1, %v3529_v24, %v3584_v36 }
 0x97f   : > { %v3539_v51 = vpop.f32.mrb[149].mxu0  ;;  %13398 = vmatprep.mubr.f32.mxu1 %v3600_v29  ;;  %v3587_v25 = vmul.f32 0.01, %v13347_v43  ;;  %15336 = vmatpush3.bf16.msra.mxu1 %v15333_v18  ;;  %vm3571_vm11 = vcmp.ge.f32.partialorder %v13347_v43, 0.0 }
 0x980   : > { %13399 = vmatmul.mubr.f32.gmra.mrb[162].mxu1 %v3601_v1  ;;  %vm3570_vm9 = vcmp.ge.f32.partialorder %v3539_v51, 0.0  ;;  %v3586_v56 = vmul.f32 0.01, %v3539_v51  ;;  %15338 = vmatprep.subr.bf16.mxu1 %v15337_v4 }
 0x981   : > { %v3603_v35 = vsel %vm3571_vm11, %v13347_v43, %v3587_v25 }
 0x982   : > { %v13350_v7 = vpop.f32.mrb[150].mxu0  ;;  %v3602_v55 = vsel %vm3570_vm9, %v3539_v51, %v3586_v56 }
 0x983   : > { %v3549_v11 = vpop.f32.mrb[151].mxu0  ;;  %13401 = vmatprep.mubr.f32.mxu1 %v3602_v55  ;;  %v3589_v59 = vmul.f32 0.01, %v13350_v7  ;;  %15340 = vmatpush3.bf16.msra.mxu1 %v15337_v4  ;;  %vm3573_vm13 = vcmp.ge.f32.partialorder %v13350_v7, 0.0 }
 0x984   : > { %13402 = vmatmul.mubr.f32.gmra.mrb[164].mxu1 %v3603_v35  ;;  %vm3572_vm12 = vcmp.ge.f32.partialorder %v3549_v11, 0.0  ;;  %v3588_v48 = vmul.f32 0.01, %v3549_v11  ;;  %15342 = vmatprep.subr.bf16.mxu1 %v15341_v38 }
 0x985   : > { %v3605_v42 = vsel %vm3573_vm13, %v13350_v7, %v3589_v59 }
 0x986   : > { %v3604_v5 = vsel %vm3572_vm12, %v3549_v11, %v3588_v48 }
 0x987   : > { %13404 = vmatprep.mubr.f32.mxu1 %v3604_v5  ;;  %15344 = vmatpush3.bf16.msra.mxu1 %v15341_v38 }
 0x988   : > { %13405 = vmatmul.mubr.f32.gmra.mrb[166].mxu1 %v3605_v42 }
 0xa3c   : > { %v13385_v15 = vpop.f32.mrb[152].mxu1 }
 0xa3d   : > { %v3784_v63 = vmul.f32 0.01, %v13385_v15  ;;  %v3688_v39 = vpop.f32.mrb[153].mxu1  ;;  %vm3768_vm0 = vcmp.ge.f32.partialorder %v13385_v15, 0.0 }
 0xa3e   : > { %vm3767_vm14 = vcmp.ge.f32.partialorder %v3688_v39, 0.0  ;;  %v3783_v62 = vmul.f32 0.01, %v3688_v39 }
 0xa3f   : > { %v3800_v60 = vsel %vm3768_vm0, %v13385_v15, %v3784_v63 }
 0xa40   : > { %v3799_v18 = vsel %vm3767_vm14, %v3688_v39, %v3783_v62 }
 0xa41   : > { %v13388_v19 = vpop.f32.mrb[154].mxu1  ;;  %13439 = vmatprep.mubr.f32.mxu0 %v3799_v18  ;;  %13495 = vmatprep.mubr.f32.mxu1 %v3799_v18 }
 0xa42   : > { %v3698_v21 = vpop.f32.mrb[155].mxu1  ;;  %v3786_v10 = vmul.f32 0.01, %v13388_v19  ;;  %13440 = vmatmul.mubr.f32.vlgmr.msra.gmra.mrb[152].mxu0 %v3800_v60  ;;  %13496 = vmatmul.mubr.f32.vlgmr.msra.gmra.mrb[168].mxu1 %v3800_v60  ;;  %vm3770_vm2 = vcmp.ge.f32.partialorder %v13388_v19, 0.0 }
 0xa43   : > { %vm3769_vm15 = vcmp.ge.f32.partialorder %v3698_v21, 0.0  ;;  %v3785_v49 = vmul.f32 0.01, %v3698_v21 }
 0xa44   : > { %v3802_v36 = vsel %vm3770_vm2, %v13388_v19, %v3786_v10 }
 0xa45   : > { %v13391_v24 = vpop.f32.mrb[156].mxu1  ;;  %v3801_v3 = vsel %vm3769_vm15, %v3698_v21, %v3785_v49 }
 0xa46   : > { %v3708_v8 = vpop.f32.mrb[157].mxu1  ;;  %13442 = vmatprep.mubr.f32.mxu0 %v3801_v3  ;;  %13498 = vmatprep.mubr.f32.mxu1 %v3801_v3  ;;  %v3788_v4 = vmul.f32 0.01, %v13391_v24  ;;  %vm3772_vm4 = vcmp.ge.f32.partialorder %v13391_v24, 0.0 }
 0xa47   : > { %13443 = vmatmul.mubr.f32.gmra.mrb[154].mxu0 %v3802_v36  ;;  %13499 = vmatmul.mubr.f32.gmra.mrb[170].mxu1 %v3802_v36  ;;  %vm3771_vm3 = vcmp.ge.f32.partialorder %v3708_v8, 0.0  ;;  %v3787_v43 = vmul.f32 0.01, %v3708_v8  ;;  %v4321_v36 = vld [vmem:[#allocation2 + $0x490] sm:$0xff] }
 0xa48   : > { %v3804_v51 = vsel %vm3772_vm4, %v13391_v24, %v3788_v4  ;;  %13519 = vmatprep.subr.mxu0 %v4321_v36  ;;  %v4563_v4 = vld [vmem:[#allocation2 + $0x498] sm:$0xff] }
 0xa49   : > { %v3803_v29 = vsel %vm3771_vm3, %v3708_v8, %v3787_v43  ;;  %13520 = vmatpush3.msra.mxu0 %v4321_v36  ;;  %v4564_v43 = vld [vmem:[#allocation2 + $0x4a0] sm:$0xff] }
 0xa4a   : > { %13445 = vmatprep.mubr.f32.mxu0 %v3803_v29  ;;  %13501 = vmatprep.mubr.f32.mxu1 %v3803_v29  ;;  %v4565_v29 = vld [vmem:[#allocation2 + $0x4a8] sm:$0xff] }
 0xa4b   : > { %v13394_v1 = vpop.f32.mrb[158].mxu1  ;;  %13446 = vmatmul.mubr.f32.gmra.mrb[156].mxu0 %v3804_v51  ;;  %13502 = vmatmul.mubr.f32.gmra.mrb[172].mxu1 %v3804_v51  ;;  %v15345_v51 = vpack.c.bf16 %v4564_v43, %v4563_v4 }
 0xa4c   : > { %v3718_v25 = vpop.f32.mrb[159].mxu1  ;;  %v3790_v56 = vmul.f32 0.01, %v13394_v1  ;;  %vm3774_vm6 = vcmp.ge.f32.partialorder %v13394_v1, 0.0 }
 0xa4d   : > { %vm3773_vm5 = vcmp.ge.f32.partialorder %v3718_v25, 0.0  ;;  %v3789_v7 = vmul.f32 0.01, %v3718_v25  ;;  %15346 = vmatprep.subr.bf16.mxu1 %v15345_v51 }
 0xa4e   : > { %v3806_v59 = vsel %vm3774_vm6, %v13394_v1, %v3790_v56  ;;  %v4566_v1 = vld [vmem:[#allocation2 + $0x4b0] sm:$0xff]  ;;  %v4567_v56 = vld [vmem:[#allocation2 + $0x4b8] sm:$0xff]  ;;  %15348 = vmatpush3.bf16.msra.mxu1 %v15345_v51 }
 0xa4f   : > { %v13397_v55 = vpop.f32.mrb[160].mxu1  ;;  %v3805_v11 = vsel %vm3773_vm5, %v3718_v25, %v3789_v7  ;;  %v15349_v25 = vpack.c.bf16 %v4566_v1, %v4565_v29  ;;  %v4568_v7 = vld [vmem:[#allocation2 + $0x4c0] sm:$0xff] }
 0xa50   : > { %v3728_v35 = vpop.f32.mrb[161].mxu1  ;;  %13448 = vmatprep.mubr.f32.mxu0 %v3805_v11  ;;  %13504 = vmatprep.mubr.f32.mxu1 %v3805_v11  ;;  %v3792_v48 = vmul.f32 0.01, %v13397_v55  ;;  %vm3776_vm1 = vcmp.ge.f32.partialorder %v13397_v55, 0.0  ;;  %v4569_v11 = vld [vmem:[#allocation2 + $0x4c8] sm:$0xff] }
 0xa51   : > { %13449 = vmatmul.mubr.f32.gmra.mrb[158].mxu0 %v3806_v59  ;;  %13505 = vmatmul.mubr.f32.gmra.mrb[174].mxu1 %v3806_v59  ;;  %vm3775_vm7 = vcmp.ge.f32.partialorder %v3728_v35, 0.0  ;;  %v3791_v5 = vmul.f32 0.01, %v3728_v35 }
 0xa52   : > { %v3808_v14 = vsel %vm3776_vm1, %v13397_v55, %v3792_v48  ;;  %15350 = vmatprep.subr.bf16.mxu1 %v15349_v25  ;;  %v15353_v55 = vpack.c.bf16 %v4568_v7, %v4567_v56  ;;  %v4571_v48 = vld [vmem:[#allocation2 + $0x4d8] sm:$0xff] }
 0xa53   : > { %v13400_v42 = vpop.f32.mrb[162].mxu1  ;;  %v3807_v6 = vsel %vm3775_vm7, %v3728_v35, %v3791_v5  ;;  %v4570_v35 = vld [vmem:[#allocation2 + $0x4d0] sm:$0xff]  ;;  %15352 = vmatpush3.bf16.msra.mxu1 %v15349_v25  ;;  %v4572_v5 = vld [vmem:[#allocation2 + $0x4e0] sm:$0xff] }
 0xa54   : > { %v3738_v58 = vpop.f32.mrb[163].mxu1  ;;  %13451 = vmatprep.mubr.f32.mxu0 %v3807_v6  ;;  %13507 = vmatprep.mubr.f32.mxu1 %v3807_v6  ;;  %v3794_v17 = vmul.f32 0.01, %v13400_v42  ;;  %vm3778_vm9 = vcmp.ge.f32.partialorder %v13400_v42, 0.0  ;;  %v15357_v59 = vpack.c.bf16 %v4570_v35, %v4569_v11  ;;  %v4573_v6 = vld [vmem:[#allocation2 + $0x4e8] sm:$0xff] }
 0xa55   : > { %13452 = vmatmul.mubr.f32.gmra.mrb[160].mxu0 %v3808_v14  ;;  %13508 = vmatmul.mubr.f32.gmra.mrb[176].mxu1 %v3808_v14  ;;  %vm3777_vm8 = vcmp.ge.f32.partialorder %v3738_v58, 0.0  ;;  %v3793_v41 = vmul.f32 0.01, %v3738_v58 }
 0xa56   : > { %v3810_v39 = vsel %vm3778_vm9, %v13400_v42, %v3794_v17  ;;  %15354 = vmatprep.subr.bf16.mxu1 %v15353_v55  ;;  %v15361_v42 = vpack.c.bf16 %v4572_v5, %v4571_v48  ;;  %v4575_v17 = vld [vmem:[#allocation2 + $0x4f8] sm:$0xff] }
 0xa57   : > { %v13403_v38 = vpop.f32.mrb[164].mxu1  ;;  %v3809_v15 = vsel %vm3777_vm8, %v3738_v58, %v3793_v41  ;;  %15356 = vmatpush3.bf16.msra.mxu1 %v15353_v55  ;;  %v4574_v58 = vld [vmem:[#allocation2 + $0x4f0] sm:$0xff]  ;;  %v4576_v41 = vld [vmem:[#allocation2 + $0x500] sm:$0xff] }
 0xa58   : > { %v3748_v63 = vpop.f32.mrb[165].mxu1  ;;  %13454 = vmatprep.mubr.f32.mxu0 %v3809_v15  ;;  %13510 = vmatprep.mubr.f32.mxu1 %v3809_v15  ;;  %v3796_v62 = vmul.f32 0.01, %v13403_v38  ;;  %vm3780_vm12 = vcmp.ge.f32.partialorder %v13403_v38, 0.0  ;;  %v15365_v14 = vpack.c.bf16 %v4574_v58, %v4573_v6 }
 0xa59   : > { %13455 = vmatmul.mubr.f32.gmra.mrb[162].mxu0 %v3810_v39  ;;  %13511 = vmatmul.mubr.f32.gmra.mrb[178].mxu1 %v3810_v39  ;;  %vm3779_vm11 = vcmp.ge.f32.partialorder %v3748_v63, 0.0  ;;  %v3795_v19 = vmul.f32 0.01, %v3748_v63 }
 0xa5a   : > { %v3812_v10 = vsel %vm3780_vm12, %v13403_v38, %v3796_v62  ;;  %15358 = vmatprep.subr.bf16.mxu1 %v15357_v59  ;;  %v15369_v38 = vpack.c.bf16 %v4576_v41, %v4575_v17 }
 0xa5b   : > { %v13406_v18 = vpop.f32.mrb[166].mxu1  ;;  %v3811_v21 = vsel %vm3779_vm11, %v3748_v63, %v3795_v19  ;;  %15360 = vmatpush3.bf16.msra.mxu1 %v15357_v59 }
 0xa5c   : > { %v3758_v60 = vpop.f32.mrb[167].mxu1  ;;  %13457 = vmatprep.mubr.f32.mxu0 %v3811_v21  ;;  %13513 = vmatprep.mubr.f32.mxu1 %v3811_v21  ;;  %v3798_v49 = vmul.f32 0.01, %v13406_v18  ;;  %vm3782_vm14 = vcmp.ge.f32.partialorder %v13406_v18, 0.0 }
 0xa5d   : > { %13458 = vmatmul.mubr.f32.gmra.mrb[164].mxu0 %v3812_v10  ;;  %13514 = vmatmul.mubr.f32.gmra.mrb[180].mxu1 %v3812_v10  ;;  %vm3781_vm13 = vcmp.ge.f32.partialorder %v3758_v60, 0.0  ;;  %v3797_v24 = vmul.f32 0.01, %v3758_v60 }
 0xa5e   : > { %v3814_v8 = vsel %vm3782_vm14, %v13406_v18, %v3798_v49  ;;  %15362 = vmatprep.subr.bf16.mxu1 %v15361_v42 }
 0xa5f   : > { %v3813_v3 = vsel %vm3781_vm13, %v3758_v60, %v3797_v24  ;;  %15364 = vmatpush3.bf16.msra.mxu1 %v15361_v42 }
 0xa60   : > { %13460 = vmatprep.mubr.f32.mxu0 %v3813_v3  ;;  %13516 = vmatprep.mubr.f32.mxu1 %v3813_v3 }
 0xa61   : > { %13461 = vmatmul.mubr.f32.gmra.mrb[166].mxu0 %v3814_v8  ;;  %13517 = vmatmul.mubr.f32.gmra.mrb[182].mxu1 %v3814_v8 }
 0xa62   : > { %15366 = vmatprep.subr.bf16.mxu1 %v15365_v14 }
 0xa63   : > { %15368 = vmatpush3.bf16.msra.mxu1 %v15365_v14 }
 0xa64   : > { %15370 = vmatprep.subr.bf16.mxu1 %v15369_v38 }
 0xa67   : > { %15372 = vmatpush3.bf16.msra.mxu1 %v15369_v38 }
 0xb15   : > { %v13441_v15 = vpop.f32.mrb[152].mxu0  ;;  %v17917_v63 = vpop.f32.mrb[168].mxu1 }
 0xb16   : > { %16214 = vtanh.f32 %v13441_v15  ;;  %v3897_v39 = vpop.f32.mrb[153].mxu0  ;;  %v17919_v62 = vpop.f32.mrb[169].mxu1 }
 0xb17   : > { %16216 = vtanh.f32 %v3897_v39 }
 0xb1a   : > { %v13444_v19 = vpop.f32.mrb[154].mxu0  ;;  %v17921_v18 = vpop.f32.mrb[170].mxu1 }
 0xb1b   : > { %16218 = vtanh.f32 %v13444_v19  ;;  %v3907_v21 = vpop.f32.mrb[155].mxu0  ;;  %v17923_v60 = vpop.f32.mrb[171].mxu1 }
 0xb1c   : > { %16220 = vtanh.f32 %v3907_v21  ;;  %v19642_v21 = vld [vmem:[#allocation8_spill] sm:$0xff] }
 0xb1e   : > { %v13447_v10 = vpop.f32.mrb[156].mxu0  ;;  %v17925_v49 = vpop.f32.mrb[172].mxu1 }
 0xb1f   : > { %16222 = vtanh.f32 %v13447_v10  ;;  %v3917_v24 = vpop.f32.mrb[157].mxu0  ;;  %v17927_v3 = vpop.f32.mrb[173].mxu1  ;;  %v19518_v10 = vsub.s32 5, %v19642_v21 }
 0xb20   : > { %16224 = vtanh.f32 %v3917_v24  ;;  %v17929_v8 = vpop.eup %16214 }
 0xb21   : > { %v17931_v36 = vpop.eup %16216  ;;  %v4171_v4 = vmul.f32 1.442695, %v17929_v8 }
 0xb22   : > { %v4169_v43 = vmul.f32 1.442695, %v17931_v36 }
 0xb23   : > { %16226 = vpow2.f32 %v4171_v4  ;;  %v16662_v4 = vld [vmem:[#allocation2 + $0x78] sm:$0xff] }
 0xb24   : > { %v13450_v29 = vpop.f32.mrb[158].mxu0  ;;  %v17935_v51 = vpop.f32.mrb[174].mxu1  ;;  %16228 = vpow2.f32 %v4169_v43  ;;  %v17962_v43 = vrot.slane %v16662_v4, %v16941_v45 }
 0xb25   : > { %v17937_v1 = vpop.eup %16218  ;;  %v3927_v25 = vpop.f32.mrb[159].mxu0  ;;  %16230 = vtanh.f32 %v13450_v29 }
 0xb26   : > { %v17939_v56 = vpop.f32.mrb[175].mxu1  ;;  %v17941_v7 = vpop.eup %16220  ;;  %v4175_v55 = vmul.f32 1.442695, %v17937_v1  ;;  %16232 = vtanh.f32 %v3927_v25 }
 0xb27   : > { %v4173_v11 = vmul.f32 1.442695, %v17941_v7 }
 0xb28   : > { %16234 = vpow2.f32 %v4175_v55  ;;  %v13453_v35 = vpop.f32.mrb[160].mxu0  ;;  %v17945_v59 = vpop.f32.mrb[176].mxu1 }
 0xb29   : > { %v17947_v48 = vpop.eup %16222  ;;  %16236 = vpow2.f32 %v4173_v11  ;;  %v3937_v5 = vpop.f32.mrb[161].mxu0 }
 0xb2a   : > { %v17949_v42 = vpop.f32.mrb[177].mxu1  ;;  %v17951_v6 = vpop.eup %16224  ;;  %v4179_v58 = vmul.f32 1.442695, %v17947_v48  ;;  %16238 = vtanh.f32 %v13453_v35 }
 0xb2b   : > { %v4177_v14 = vmul.f32 1.442695, %v17951_v6  ;;  %16240 = vtanh.f32 %v3937_v5 }
 0xb2c   : > { %16242 = vpow2.f32 %v4179_v58  ;;  %v13456_v17 = vpop.f32.mrb[162].mxu0  ;;  %v17955_v41 = vpop.f32.mrb[178].mxu1  ;;  %v17974_v58 = vrot.slane %v16662_v4, %v19518_v10 }
 0xb2d   : > { %16244 = vpow2.f32 %v4177_v14  ;;  %v3947_v38 = vpop.f32.mrb[163].mxu0  ;;  %v17957_v15 = vpop.f32.mrb[179].mxu1 }
 0xb2e   : > { %v16227_v39 = vpop.eup %16226  ;;  %16246 = vtanh.f32 %v13456_v17 }
 0xb2f   : > { %v16229_v19 = vpop.eup %16228  ;;  %v4202_v24 = vmul.f32 %v16227_v39, %v17768_v61  ;;  %16248 = vtanh.f32 %v3947_v38 }
 0xb30   : > { %v17964_v29 = vpop.eup %16230  ;;  %v4201_v25 = vmul.f32 %v16229_v19, %v17762_v34  ;;  %v13459_v55 = vpop.f32.mrb[164].mxu0 }
 0xb31   : > { %v17967_v11 = vpop.f32.mrb[180].mxu1  ;;  %v17969_v35 = vpop.eup %16232  ;;  %v4218_v5 = vadd.f32 %v17917_v63, %v4202_v24  ;;  %v4183_v61 = vmul.f32 1.442695, %v17964_v29  ;;  %16250 = vtanh.f32 %v13459_v55 }
 0xb32   : > { %v3957_v45 = vpop.f32.mrb[165].mxu0  ;;  %v17977_v14 = vpop.f32.mrb[181].mxu1  ;;  %v4217_v34 = vadd.f32 %v4201_v25, %v17919_v62  ;;  %v4181_v38 = vmul.f32 1.442695, %v17969_v35 }
 0xb33   : > { %v16235_v17 = vpop.eup %16234  ;;  %16252 = vtanh.f32 %v3957_v45  ;;  %v4238_v19 = vadd.f32 %v17962_v43, %v4218_v5 }
 0xb34   : > { %v16237_v39 = vpop.eup %16236  ;;  %v4204_v63 = vmul.f32 %v16235_v17, %v17788_v40  ;;  %16254 = vpow2.f32 %v4183_v61  ;;  %v4237_v4 = vadd.f32 %v17962_v43, %v4217_v34  ;;  %v13462_v10 = vpop.f32.mrb[166].mxu0 }
 0xb35   : > { %v17983_v24 = vpop.eup %16238  ;;  %v4203_v55 = vmul.f32 %v16237_v39, %v17784_v2  ;;  %16256 = vpow2.f32 %v4181_v38  ;;  %v17987_v21 = vpop.f32.mrb[182].mxu1  ;;  %v4258_v25 = vmul.f32 %v17974_v58, %v4238_v19 }
 0xb36   : > { %v17989_v62 = vpop.eup %16240  ;;  %v4220_v45 = vadd.f32 %v17921_v18, %v4204_v63  ;;  %v4187_v5 = vmul.f32 1.442695, %v17983_v24  ;;  %16258 = vtanh.f32 %v13462_v10  ;;  %v3967_v40 = vpop.f32.mrb[167].mxu0  ;;  %v4257_v34 = vmul.f32 %v17974_v58, %v4237_v4 }
 0xb37   : > { %v17994_v61 = vpop.f32.mrb[183].mxu1  ;;  %v16243_v17 = vpop.eup %16242  ;;  %v4219_v2 = vadd.f32 %v4203_v55, %v17923_v60  ;;  %v4185_v38 = vmul.f32 1.442695, %v17989_v62  ;;  %16260 = vtanh.f32 %v3967_v40  ;;  %vm4274_vm0 = vcmp.ge.f32.partialorder %v4258_v25, 0.0 }
 0xb38   : > { %v16245_v39 = vpop.eup %16244  ;;  %v4240_v19 = vadd.f32 %v17962_v43, %v4220_v45  ;;  %v4206_v18 = vmul.f32 %v16243_v17, %v17808_v44  ;;  %16262 = vpow2.f32 %v4187_v5  ;;  %v19643_v10 = vmov 0.9  }
 0xb39   : > { %v18001_v63 = vpop.eup %16246  ;;  %v4290_v28 = vsel %vm4274_vm0, 1.0, %v19643_v10  ;;  %vm4273_vm15 = vcmp.ge.f32.partialorder %v4257_v34, 0.0  ;;  %v4239_v31 = vadd.f32 %v17962_v43, %v4219_v2  ;;  %v4205_v4 = vmul.f32 %v16245_v39, %v17802_v23 }
 0xb3a   : > { %v18006_v60 = vpop.eup %16248  ;;  %v18008_v55 = vmul.f32 %v4290_v28, %v4258_v25  ;;  %v4289_v40 = vsel %vm4273_vm15, 1.0, %v19643_v10  ;;  %v4260_v45 = vmul.f32 %v17974_v58, %v4240_v19  ;;  %v4222_v44 = vadd.f32 %v17925_v49, %v4206_v18 }
 0xb3b   : > { %v18013_v5 = vmul.f32 %v4289_v40, %v4257_v34  ;;  %v4259_v17 = vmul.f32 %v17974_v58, %v4239_v31  ;;  %v4221_v57 = vadd.f32 %v4205_v4, %v17927_v3  ;;  %16264 = vpow2.f32 %v4185_v38  ;;  %v18017_v2 = vpop.eup %16250 }
 0xb3c   : > { %19644 = vst [vmem:[#allocation43_spill] sm:$0xff] %v18017_v2  ;;  %vm4276_vm2 = vcmp.ge.f32.partialorder %v4260_v45, 0.0  ;;  %v4242_v23 = vadd.f32 %v17962_v43, %v4222_v44  ;;  %v4191_v28 = vmul.f32 1.442695, %v18001_v63  ;;  %v4189_v25 = vmul.f32 1.442695, %v18006_v60 }
 0xb3d   : > { %v18022_v39 = vpop.eup %16252  ;;  %v4292_v49 = vsel %vm4276_vm2, 1.0, %v19643_v10  ;;  %vm4275_vm3 = vcmp.ge.f32.partialorder %v4259_v17, 0.0  ;;  %v4241_v34 = vadd.f32 %v17962_v43, %v4221_v57  ;;  %v4195_v31 = vmul.f32 1.442695, %v18017_v2  ;;  %13521 = vmatprep.mubr.msk.f32.mxu0 %vm2077_vm10, %v18013_v5 }
 0xb3e   : > { %v16255_v3 = vpop.eup %16254  ;;  %v18029_v38 = vmul.f32 %v4292_v49, %v4260_v45  ;;  %v4291_v19 = vsel %vm4275_vm3, 1.0, %v19643_v10  ;;  %v4262_v18 = vmul.f32 %v17974_v58, %v4242_v23  ;;  %16266 = vpow2.f32 %v4191_v28  ;;  %13522 = vmatmul.mubr.msk.f32.vlgmr.msra.gmra.mrb[168].mxu0 %vm2077_vm10, %v18008_v55 }
 0xb3f   : > { %v16257_v4 = vpop.eup %16256  ;;  %v18035_v40 = vmul.f32 %v4291_v19, %v4259_v17  ;;  %v4261_v57 = vmul.f32 %v17974_v58, %v4241_v34  ;;  %v4208_v44 = vmul.f32 %v16255_v3, %v17826_v54  ;;  %16268 = vpow2.f32 %v4189_v25 }
 0xb40   : > { %v18039_v2 = vpop.eup %16258  ;;  %vm4278_vm4 = vcmp.ge.f32.partialorder %v4262_v18, 0.0  ;;  %v4207_v45 = vmul.f32 %v16257_v4, %v17822_v20  ;;  %16270 = vpow2.f32 %v4195_v31  ;;  %v4193_v23 = vmul.f32 1.442695, %v18022_v39 }
 0xb41   : > { %19645 = vst [vmem:[#allocation40_spill] sm:$0xff] %v18039_v2  ;;  %v18043_v28 = vpop.eup %16260  ;;  %v4294_v49 = vsel %vm4278_vm4, 1.0, %v19643_v10  ;;  %vm4277_vm5 = vcmp.ge.f32.partialorder %v4261_v57, 0.0  ;;  %v4224_v17 = vadd.f32 %v17935_v51, %v4208_v44  ;;  %v4199_v34 = vmul.f32 1.442695, %v18039_v2  ;;  %13524 = vmatprep.mubr.msk.f32.mxu0 %vm2077_vm10, %v18035_v40 }
 0xb42   : > { %v16263_v54 = vpop.eup %16262  ;;  %v4293_v25 = vsel %vm4277_vm5, 1.0, %v19643_v10  ;;  %v4223_v20 = vadd.f32 %v4207_v45, %v17939_v56  ;;  %16272 = vpow2.f32 %v4193_v23  ;;  %13525 = vmatmul.mubr.msk.f32.gmra.mrb[170].mxu0 %vm2077_vm10, %v18029_v38  ;;  %v18058_v19 = vmul.f32 %v4294_v49, %v4262_v18 }
 0xb43   : > { %v18054_v31 = vmul.f32 %v4293_v25, %v4261_v57  ;;  %v4244_v3 = vadd.f32 %v17962_v43, %v4224_v17  ;;  %v4210_v51 = vmul.f32 %v16263_v54, %v17839_v16  ;;  %16274 = vpow2.f32 %v4199_v34 }
 0xb44   : > { %v4243_v4 = vadd.f32 %v17962_v43, %v4223_v20  ;;  %v4197_v44 = vmul.f32 1.442695, %v18043_v28 }
 0xb45   : > { %v16265_v2 = vpop.eup %16264  ;;  %v4264_v56 = vmul.f32 %v17974_v58, %v4244_v3  ;;  %v4226_v45 = vadd.f32 %v17945_v59, %v4210_v51  ;;  %13527 = vmatprep.mubr.msk.f32.mxu0 %vm2077_vm10, %v18054_v31 }
 0xb46   : > { %v4263_v57 = vmul.f32 %v17974_v58, %v4243_v4  ;;  %v4209_v23 = vmul.f32 %v16265_v2, %v17836_v33  ;;  %16276 = vpow2.f32 %v4197_v44  ;;  %13528 = vmatmul.mubr.msk.f32.gmra.mrb[172].mxu0 %vm2077_vm10, %v18058_v19 }
 0xb47   : > { %vm4280_vm6 = vcmp.ge.f32.partialorder %v4264_v56, 0.0  ;;  %v4246_v16 = vadd.f32 %v17962_v43, %v4226_v45 }
 0xb48   : > { %v16267_v18 = vpop.eup %16266  ;;  %v4296_v49 = vsel %vm4280_vm6, 1.0, %v19643_v10  ;;  %vm4279_vm7 = vcmp.ge.f32.partialorder %v4263_v57, 0.0  ;;  %v4225_v59 = vadd.f32 %v4209_v23, %v17949_v42 }
 0xb49   : > { %v16269_v17 = vpop.eup %16268  ;;  %v4295_v34 = vsel %vm4279_vm7, 1.0, %v19643_v10  ;;  %v4266_v54 = vmul.f32 %v17974_v58, %v4246_v16  ;;  %v4212_v33 = vmul.f32 %v16267_v18, %v17851_v50  ;;  %v18080_v51 = vmul.f32 %v4296_v49, %v4264_v56 }
 0xb4a   : > { %v16271_v2 = vpop.eup %16270  ;;  %v18076_v25 = vmul.f32 %v4295_v34, %v4263_v57  ;;  %v4245_v20 = vadd.f32 %v17962_v43, %v4225_v59  ;;  %v4211_v3 = vmul.f32 %v16269_v17, %v17848_v13 }
 0xb4b   : > { %vm4282_vm1 = vcmp.ge.f32.partialorder %v4266_v54, 0.0  ;;  %v4228_v4 = vadd.f32 %v17955_v41, %v4212_v33  ;;  %v4214_v42 = vmul.f32 %v16271_v2, %v17863_v52 }
 0xb4c   : > { %v16273_v44 = vpop.eup %16272  ;;  %v4265_v45 = vmul.f32 %v17974_v58, %v4245_v20  ;;  %v4227_v23 = vadd.f32 %v4211_v3, %v17957_v15  ;;  %13530 = vmatprep.mubr.msk.f32.mxu0 %vm2077_vm10, %v18076_v25  ;;  %v4298_v57 = vsel %vm4282_vm1, 1.0, %v19643_v10 }
 0xb4d   : > { %v16275_v50 = vpop.eup %16274  ;;  %v4248_v13 = vadd.f32 %v17962_v43, %v4228_v4  ;;  %v4230_v56 = vadd.f32 %v17967_v11, %v4214_v42  ;;  %v4213_v16 = vmul.f32 %v16273_v44, %v17858_v12  ;;  %13531 = vmatmul.mubr.msk.f32.gmra.mrb[174].mxu0 %vm2077_vm10, %v18080_v51  ;;  %v18100_v11 = vmul.f32 %v4298_v57, %v4266_v54 }
 0xb4e   : > { %vm4281_vm8 = vcmp.ge.f32.partialorder %v4265_v45, 0.0  ;;  %v4247_v52 = vadd.f32 %v17962_v43, %v4227_v23  ;;  %v4216_v41 = vmul.f32 %v16275_v50, %v17875_v47 }
 0xb4f   : > { %v4297_v15 = vsel %vm4281_vm8, 1.0, %v19643_v10  ;;  %v4268_v18 = vmul.f32 %v17974_v58, %v4248_v13  ;;  %v4250_v49 = vadd.f32 %v17962_v43, %v4230_v56  ;;  %v4229_v59 = vadd.f32 %v4213_v16, %v17977_v14 }
 0xb50   : > { %v16277_v17 = vpop.eup %16276  ;;  %v18102_v12 = vmul.f32 %v4297_v15, %v4265_v45  ;;  %v4267_v34 = vmul.f32 %v17974_v58, %v4247_v52  ;;  %v4232_v33 = vadd.f32 %v17987_v21, %v4216_v41  ;;  %v4578_v41 = vld [vmem:[#allocation2 + $0x510] sm:$0xff] }
 0xb51   : > { %vm4284_vm9 = vcmp.ge.f32.partialorder %v4268_v18, 0.0  ;;  %v4270_v47 = vmul.f32 %v17974_v58, %v4250_v49  ;;  %v4249_v2 = vadd.f32 %v17962_v43, %v4229_v59  ;;  %v4215_v20 = vmul.f32 %v16277_v17, %v17872_v0  ;;  %v4773_v49 = vld [vmem:[#allocation2 + $0x520] sm:$0xff]  ;;  %v4774_v59 = vld [vmem:[#allocation2 + $0x528] sm:$0xff] }
 0xb52   : > { %v4300_v3 = vsel %vm4284_vm9, 1.0, %v19643_v10  ;;  %vm4283_vm11 = vcmp.ge.f32.partialorder %v4267_v34, 0.0  ;;  %v4252_v14 = vadd.f32 %v17962_v43, %v4232_v33  ;;  %13533 = vmatprep.mubr.msk.f32.mxu0 %vm2077_vm10, %v18102_v12 }
 0xb53   : > { %v4299_v54 = vsel %vm4283_vm11, 1.0, %v19643_v10  ;;  %vm4286_vm12 = vcmp.ge.f32.partialorder %v4270_v47, 0.0  ;;  %v4269_v21 = vmul.f32 %v17974_v58, %v4249_v2  ;;  %13534 = vmatmul.mubr.msk.f32.gmra.mrb[176].mxu0 %vm2077_vm10, %v18100_v11  ;;  %v4231_v42 = vadd.f32 %v4215_v20, %v17994_v61  ;;  %v4777_v2 = vld [vmem:[#allocation2 + $0x540] sm:$0xff] }
 0xb54   : > { %v18117_v4 = vmul.f32 %v4299_v54, %v4267_v34  ;;  %v4272_v0 = vmul.f32 %v17974_v58, %v4252_v14  ;;  %v18121_v44 = vmul.f32 %v4300_v3, %v4268_v18  ;;  %v4302_v45 = vsel %vm4286_vm12, 1.0, %v19643_v10  ;;  %v4772_v18 = vld [vmem:[#allocation2 + $0x518] sm:$0xff]  ;;  %v4775_v34 = vld [vmem:[#allocation2 + $0x530] sm:$0xff]  ;;  %v4778_v3 = vld [vmem:[#allocation2 + $0x548] sm:$0xff] }
 0xb55   : > { %vm4285_vm13 = vcmp.ge.f32.partialorder %v4269_v21, 0.0  ;;  %v4251_v50 = vadd.f32 %v17962_v43, %v4231_v42  ;;  %v18133_v13 = vmul.f32 %v4302_v45, %v4270_v47  ;;  %v15377_v17 = vpack.c.bf16 %v4773_v49, %v4772_v18  ;;  %v4776_v47 = vld [vmem:[#allocation2 + $0x538] sm:$0xff]  ;;  %v4779_v14 = vld [vmem:[#allocation2 + $0x550] sm:$0xff]  ;;  %v4782_v45 = vld [vmem:[#allocation2 + $0x568] sm:$0xff] }
 0xb56   : > { %v4301_v23 = vsel %vm4285_vm13, 1.0, %v19643_v10  ;;  %13536 = vmatprep.mubr.msk.f32.mxu0 %vm2077_vm10, %v18117_v4  ;;  %vm4288_vm14 = vcmp.ge.f32.partialorder %v4272_v0, 0.0  ;;  %v15381_v33 = vpack.c.bf16 %v4775_v34, %v4774_v59  ;;  %v15385_v20 = vpack.c.bf16 %v4777_v2, %v4776_v47  ;;  %v19648_v59 = vld [vmem:[#allocation11_spill] sm:$0xff] }
 0xb57   : > { %v18128_v57 = vmul.f32 %v4301_v23, %v4269_v21  ;;  %13537 = vmatmul.mubr.msk.f32.gmra.mrb[178].mxu0 %vm2077_vm10, %v18121_v44  ;;  %v4271_v61 = vmul.f32 %v17974_v58, %v4251_v50  ;;  %v4304_v56 = vsel %vm4288_vm14, 1.0, %v19643_v10  ;;  %v4577_v58 = vld [vmem:[#allocation2 + $0x508] sm:$0xff]  ;;  %15378 = vmatprep.subr.bf16.mxu0 %v15377_v17  ;;  %v15389_v54 = vpack.c.bf16 %v4779_v14, %v4778_v3  ;;  %v4780_v21 = vld [vmem:[#allocation2 + $0x558] sm:$0xff]  ;;  %v4783_v23 = vld [vmem:[#allocation2 + $0x570] sm:$0xff] }
 0xb58   : > { %v18143_v52 = vmul.f32 %v4304_v56, %v4272_v0  ;;  %v15373_v15 = vpack.c.bf16 %v4578_v41, %v4577_v58  ;;  %15380 = vmatpush3.bf16.msra.mxu0 %v15377_v17  ;;  %v4781_v0 = vld [vmem:[#allocation2 + $0x560] sm:$0xff]  ;;  %v15397_v50 = vpack.c.bf16 %v4783_v23, %v4782_v45  ;;  %v19646_v58 = vld [vmem:[#allocation9_spill] sm:$0xff] }
 0xb59   : > { %13539 = vmatprep.mubr.msk.f32.mxu0 %vm2077_vm10, %v18128_v57  ;;  %vm4287_vm0 = vcmp.ge.f32.partialorder %v4271_v61, 0.0  ;;  %15382 = vmatprep.subr.bf16.mxu0 %v15381_v33  ;;  %v15393_v42 = vpack.c.bf16 %v4781_v0, %v4780_v21  ;;  %v4785_v56 = vld [vmem:[#allocation2 + $0x580] sm:$0xff]  ;;  %v18151_v41 = vrot.slane %v17651_v53, %v19646_v58  ;;  %v19650_v21 = vld [vmem:[#allocation15_spill] sm:$0xff] }
 0xb5a   : > { %v4303_v43 = vsel %vm4287_vm0, 1.0, %v19643_v10  ;;  %15374 = vmatprep.subr.bf16.mxu1 %v15373_v15 }
 0xb5b   : > { %13540 = vmatmul.mubr.msk.f32.gmra.mrb[180].mxu0 %vm2077_vm10, %v18133_v13  ;;  %v18141_v16 = vmul.f32 %v4303_v43, %v4271_v61  ;;  %15376 = vmatpush3.bf16.msra.mxu1 %v15373_v15  ;;  %v4784_v61 = vld [vmem:[#allocation2 + $0x578] sm:$0xff]  ;;  %v1571_v17 = vadd.f32 %v19648_v59, %v18151_v41  ;;  %v1583_v0 = vadd.f32 %v19650_v21, %v18151_v41  ;;  %v19652_v59 = vld [vmem:[#allocation19_spill] sm:$0xff] }
 0xb5c   : > { %15384 = vmatpush3.bf16.msra.mxu0 %v15381_v33  ;;  %v15401_v43 = vpack.c.bf16 %v4785_v56, %v4784_v61  ;;  %v19647_v15 = vld [vmem:[#allocation13_spill] sm:$0xff] }
 0xb5d   : > { %13542 = vmatprep.mubr.msk.f32.mxu0 %vm2077_vm10, %v18141_v16  ;;  %15386 = vmatprep.subr.bf16.mxu0 %v15385_v20  ;;  %v1577_v18 = vadd.f32 %v19647_v15, %v18151_v41 }
 0xb5f   : > { %13543 = vmatmul.mubr.msk.f32.gmra.mrb[182].mxu0 %vm2077_vm10, %v18143_v52 }
 0xb60   : > { %15388 = vmatpush3.bf16.msra.mxu0 %v15385_v20  ;;  %v19649_v20 = vld [vmem:[#allocation17_spill] sm:$0xff] }
 0xb61   : > { %15390 = vmatprep.subr.bf16.mxu0 %v15389_v54  ;;  %v1589_v3 = vadd.f32 %v19649_v20, %v18151_v41 }
 0xb64   : > { %15392 = vmatpush3.bf16.msra.mxu0 %v15389_v54 }
 0xb65   : > { %15394 = vmatprep.subr.bf16.mxu0 %v15393_v42 }
 0xb68   : > { %15396 = vmatpush3.bf16.msra.mxu0 %v15393_v42 }
 0xb69   : > { %15398 = vmatprep.subr.bf16.mxu0 %v15397_v50 }
 0xb6c   : > { %15400 = vmatpush3.bf16.msra.mxu0 %v15397_v50 }
 0xb6d   : > { %15402 = vmatprep.subr.bf16.mxu0 %v15401_v43 }
 0xb70   : > { %15404 = vmatpush3.bf16.msra.mxu0 %v15401_v43  ;;  %v19651_v43 = vld [vmem:[#allocation21_spill] sm:$0xff] }
 0xb71   : > { %v1601_v15 = vadd.f32 %v19651_v43, %v18151_v41 }
 0xc11   : > { %v13523_v49 = vpop.f32.mrb[168].mxu0 }
 0xc12   : > { %v4442_v34 = vadd.f32 %v13523_v49, %v1577_v18  ;;  %v4436_v33 = vpop.f32.mrb[169].mxu0 }
 0xc13   : > { %v4437_v47 = vadd.f32 %v4436_v33, %v1571_v17  ;;  %v1595_v17 = vadd.f32 %v19652_v59, %v18151_v41 }
 0xc14   : > { %v4532_v2 = vmul.f32 0.01, %v4442_v34  ;;  %vm4516_vm15 = vcmp.ge.f32.partialorder %v4442_v34, 0.0 }
 0xc15   : > { %v4531_v14 = vmul.f32 0.01, %v4437_v47  ;;  %v13526_v54 = vpop.f32.mrb[170].mxu0  ;;  %vm4515_vm2 = vcmp.ge.f32.partialorder %v4437_v47, 0.0 }
 0xc16   : > { %v4452_v42 = vadd.f32 %v13526_v54, %v1589_v3  ;;  %v4446_v45 = vpop.f32.mrb[171].mxu0  ;;  %v4548_v61 = vsel %vm4516_vm15, %v4442_v34, %v4532_v2  ;;  %v19653_v2 = vld [vmem:[#allocation25_spill] sm:$0xff] }
 0xc17   : > { %v4447_v23 = vadd.f32 %v4446_v45, %v1583_v0  ;;  %v4547_v50 = vsel %vm4515_vm2, %v4437_v47, %v4531_v14  ;;  %v1613_v14 = vadd.f32 %v19653_v2, %v18151_v41 }
 0xc18   : > { %v4534_v56 = vmul.f32 0.01, %v4452_v42  ;;  %13577 = vmatprep.mubr.f32.mxu1 %v4547_v50  ;;  %vm4518_vm4 = vcmp.ge.f32.partialorder %v4452_v42, 0.0  ;;  %v19654_v50 = vld [vmem:[#allocation23_spill] sm:$0xff] }
 0xc19   : > { %v4533_v18 = vmul.f32 0.01, %v4447_v23  ;;  %v13529_v49 = vpop.f32.mrb[172].mxu0  ;;  %13578 = vmatmul.mubr.f32.vlgmr.msra.gmra.mrb[184].mxu1 %v4548_v61  ;;  %vm4517_vm3 = vcmp.ge.f32.partialorder %v4447_v23, 0.0  ;;  %v1607_v61 = vadd.f32 %v19654_v50, %v18151_v41 }
 0xc1a   : > { %v4462_v33 = vadd.f32 %v13529_v49, %v1601_v15  ;;  %v4456_v20 = vpop.f32.mrb[173].mxu0  ;;  %v4550_v34 = vsel %vm4518_vm4, %v4452_v42, %v4534_v56  ;;  %v19655_v56 = vld [vmem:[#allocation29_spill] sm:$0xff] }
 0xc1b   : > { %v4457_v3 = vadd.f32 %v4456_v20, %v1595_v17  ;;  %v4549_v54 = vsel %vm4517_vm3, %v4447_v23, %v4533_v18  ;;  %v1625_v59 = vadd.f32 %v19655_v56, %v18151_v41  ;;  %v19656_v20 = vld [vmem:[#allocation27_spill] sm:$0xff] }
 0xc1c   : > { %v4536_v21 = vmul.f32 0.01, %v4462_v33  ;;  %13580 = vmatprep.mubr.f32.mxu1 %v4549_v54  ;;  %vm4520_vm6 = vcmp.ge.f32.partialorder %v4462_v33, 0.0 }
 0xc1d   : > { %v4535_v47 = vmul.f32 0.01, %v4457_v3  ;;  %13581 = vmatmul.mubr.f32.gmra.mrb[186].mxu1 %v4550_v34  ;;  %vm4519_vm5 = vcmp.ge.f32.partialorder %v4457_v3, 0.0 }
 0xc1e   : > { %v4552_v43 = vsel %vm4520_vm6, %v4462_v33, %v4536_v21 }
 0xc1f   : > { %v4551_v0 = vsel %vm4519_vm5, %v4457_v3, %v4535_v47  ;;  %v1619_v3 = vadd.f32 %v19656_v20, %v18151_v41 }
 0xc20   : > { %v13532_v45 = vpop.f32.mrb[174].mxu0  ;;  %13583 = vmatprep.mubr.f32.mxu1 %v4551_v0 }
 0xc21   : > { %v4472_v15 = vadd.f32 %v13532_v45, %v1613_v14  ;;  %v4466_v49 = vpop.f32.mrb[175].mxu0  ;;  %13584 = vmatmul.mubr.f32.gmra.mrb[188].mxu1 %v4552_v43  ;;  %v19657_v14 = vld [vmem:[#allocation33_spill] sm:$0xff] }
 0xc22   : > { %v4467_v23 = vadd.f32 %v4466_v49, %v1607_v61  ;;  %v1637_v0 = vadd.f32 %v19657_v14, %v18151_v41  ;;  %v19658_v61 = vld [vmem:[#allocation31_spill] sm:$0xff] }
 0xc23   : > { %v4538_v18 = vmul.f32 0.01, %v4472_v15  ;;  %vm4522_vm1 = vcmp.ge.f32.partialorder %v4472_v15, 0.0  ;;  %v1631_v43 = vadd.f32 %v19658_v61, %v18151_v41 }
 0xc24   : > { %v4537_v42 = vmul.f32 0.01, %v4467_v23  ;;  %vm4521_vm7 = vcmp.ge.f32.partialorder %v4467_v23, 0.0 }
 0xc25   : > { %v4554_v33 = vsel %vm4522_vm1, %v4472_v15, %v4538_v18  ;;  %v19659_v15 = vld [vmem:[#allocation37_spill] sm:$0xff] }
 0xc26   : > { %v13535_v17 = vpop.f32.mrb[176].mxu0  ;;  %v4553_v54 = vsel %vm4521_vm7, %v4467_v23, %v4537_v42  ;;  %v1649_v18 = vadd.f32 %v19659_v15, %v18151_v41 }
 0xc27   : > { %v4482_v34 = vadd.f32 %v13535_v17, %v1625_v59  ;;  %v4476_v47 = vpop.f32.mrb[177].mxu0  ;;  %13586 = vmatprep.mubr.f32.mxu1 %v4553_v54  ;;  %v19660_v54 = vld [vmem:[#allocation35_spill] sm:$0xff] }
 0xc28   : > { %v4477_v21 = vadd.f32 %v4476_v47, %v1619_v3  ;;  %13587 = vmatmul.mubr.f32.gmra.mrb[190].mxu1 %v4554_v33  ;;  %v1643_v47 = vadd.f32 %v19660_v54, %v18151_v41 }
 0xc29   : > { %v4540_v2 = vmul.f32 0.01, %v4482_v34  ;;  %vm4524_vm9 = vcmp.ge.f32.partialorder %v4482_v34, 0.0 }
 0xc2a   : > { %v4539_v45 = vmul.f32 0.01, %v4477_v21  ;;  %v13538_v50 = vpop.f32.mrb[178].mxu0  ;;  %vm4523_vm8 = vcmp.ge.f32.partialorder %v4477_v21, 0.0 }
 0xc2b   : > { %v4492_v49 = vadd.f32 %v13538_v50, %v1637_v0  ;;  %v4486_v56 = vpop.f32.mrb[179].mxu0  ;;  %v4556_v17 = vsel %vm4524_vm9, %v4482_v34, %v4540_v2  ;;  %v19662_v2 = vld [vmem:[#allocation39_spill] sm:$0xff] }
 0xc2c   : > { %v4487_v23 = vadd.f32 %v4486_v56, %v1631_v43  ;;  %v4555_v42 = vsel %vm4523_vm8, %v4477_v21, %v4539_v45  ;;  %v19661_v21 = vld [vmem:[#allocation42_spill] sm:$0xff] }
 0xc2d   : > { %v4542_v59 = vmul.f32 0.01, %v4492_v49  ;;  %13589 = vmatprep.mubr.f32.mxu1 %v4555_v42  ;;  %vm4526_vm12 = vcmp.ge.f32.partialorder %v4492_v49, 0.0  ;;  %v1661_v45 = vadd.f32 %v19661_v21, %v18151_v41  ;;  %v1655_v42 = vadd.f32 %v19662_v2, %v18151_v41  ;;  %v4982_v21 = vld [vmem:[#allocation2 + $0x5a0] sm:$0xff]  ;;  %v4985_v2 = vld [vmem:[#allocation2 + $0x5b8] sm:$0xff] }
 0xc2e   : > { %v4541_v20 = vmul.f32 0.01, %v4487_v23  ;;  %v13541_v3 = vpop.f32.mrb[180].mxu0  ;;  %13590 = vmatmul.mubr.f32.gmra.mrb[192].mxu1 %v4556_v17  ;;  %vm4525_vm11 = vcmp.ge.f32.partialorder %v4487_v23, 0.0 }
 0xc2f   : > { %v4502_v33 = vadd.f32 %v13541_v3, %v1649_v18  ;;  %v4496_v14 = vpop.f32.mrb[181].mxu0  ;;  %v4558_v43 = vsel %vm4526_vm12, %v4492_v49, %v4542_v59 }
 0xc30   : > { %v4497_v0 = vadd.f32 %v4496_v14, %v1643_v47  ;;  %v4557_v50 = vsel %vm4525_vm11, %v4487_v23, %v4541_v20  ;;  %v4786_v47 = vld [vmem:[#allocation2 + $0x588] sm:$0xff]  ;;  %v4787_v14 = vld [vmem:[#allocation2 + $0x590] sm:$0xff] }
 0xc31   : > { %v4544_v61 = vmul.f32 0.01, %v4502_v33  ;;  %13592 = vmatprep.mubr.f32.mxu1 %v4557_v50  ;;  %vm4528_vm14 = vcmp.ge.f32.partialorder %v4502_v33, 0.0  ;;  %v15405_v41 = vpack.c.bf16 %v4787_v14, %v4786_v47  ;;  %v4981_v50 = vld [vmem:[#allocation2 + $0x598] sm:$0xff] }
 0xc32   : > { %v4543_v56 = vmul.f32 0.01, %v4497_v0  ;;  %v13544_v34 = vpop.f32.mrb[182].mxu0  ;;  %13593 = vmatmul.mubr.f32.gmra.mrb[194].mxu1 %v4558_v43  ;;  %vm4527_vm13 = vcmp.ge.f32.partialorder %v4497_v0, 0.0  ;;  %v5159_v43 = vld [vmem:[#allocation2 + $0x620] sm:$0xff]  ;;  %v4993_v14 = vld [vmem:[#allocation2 + $0x5f8] sm:$0xff] }
 0xc33   : > { %v4512_v15 = vadd.f32 %v13544_v34, %v1661_v45  ;;  %v4506_v17 = vpop.f32.mrb[183].mxu0  ;;  %v4560_v23 = vsel %vm4528_vm14, %v4502_v33, %v4544_v61  ;;  %15406 = vmatprep.subr.bf16.mxu0 %v15405_v41  ;;  %v5158_v45 = vld [vmem:[#allocation2 + $0x618] sm:$0xff]  ;;  %v4984_v33 = vld [vmem:[#allocation2 + $0x5b0] sm:$0xff] }
 0xc34   : > { %v4507_v18 = vadd.f32 %v4506_v17, %v1655_v42  ;;  %v4559_v3 = vsel %vm4527_vm13, %v4497_v0, %v4543_v56  ;;  %15408 = vmatpush3.bf16.msra.mxu0 %v15405_v41  ;;  %v15409_v0 = vpack.c.bf16 %v4982_v21, %v4981_v50  ;;  %v4983_v56 = vld [vmem:[#allocation2 + $0x5a8] sm:$0xff]  ;;  %v15441_v61 = vpack.c.bf16 %v5159_v43, %v5158_v45  ;;  %v4986_v42 = vld [vmem:[#allocation2 + $0x5c0] sm:$0xff] }
 0xc35   : > { %v4546_v54 = vmul.f32 0.01, %v4512_v15  ;;  %13595 = vmatprep.mubr.f32.mxu1 %v4559_v3  ;;  %vm4530_vm15 = vcmp.ge.f32.partialorder %v4512_v15, 0.0  ;;  %v15413_v34 = vpack.c.bf16 %v4984_v33, %v4983_v56  ;;  %v4987_v17 = vld [vmem:[#allocation2 + $0x5c8] sm:$0xff]  ;;  %v4994_v41 = vld [vmem:[#allocation2 + $0x600] sm:$0xff]  ;;  %v5161_v56 = vld [vmem:[#allocation2 + $0x630] sm:$0xff] }
 0xc36   : > { %v4545_v20 = vmul.f32 0.01, %v4507_v18  ;;  %13596 = vmatmul.mubr.f32.gmra.mrb[196].mxu1 %v4560_v23  ;;  %vm4529_vm0 = vcmp.ge.f32.partialorder %v4507_v18, 0.0  ;;  %15410 = vmatprep.subr.bf16.mxu1 %v15409_v0  ;;  %v4990_v23 = vld [vmem:[#allocation2 + $0x5e0] sm:$0xff]  ;;  %v15433_v50 = vpack.c.bf16 %v4994_v41, %v4993_v14  ;;  %v5160_v43 = vld [vmem:[#allocation2 + $0x628] sm:$0xff] }
 0xc37   : > { %v4562_v59 = vsel %vm4530_vm15, %v4512_v15, %v4546_v54  ;;  %15412 = vmatpush3.bf16.msra.mxu1 %v15409_v0  ;;  %15442 = vmatprep.subr.bf16.mxu0 %v15441_v61  ;;  %v15417_v15 = vpack.c.bf16 %v4986_v42, %v4985_v2  ;;  %v4989_v54 = vld [vmem:[#allocation2 + $0x5d8] sm:$0xff]  ;;  %v15445_v42 = vpack.c.bf16 %v5161_v56, %v5160_v43 }
 0xc38   : > { %v4561_v49 = vsel %vm4529_vm0, %v4507_v18, %v4545_v20  ;;  %15414 = vmatprep.subr.bf16.mxu1 %v15413_v34  ;;  %v4988_v18 = vld [vmem:[#allocation2 + $0x5d0] sm:$0xff]  ;;  %v15425_v20 = vpack.c.bf16 %v4990_v23, %v4989_v54  ;;  %v5163_v54 = vld [vmem:[#allocation2 + $0x640] sm:$0xff]  ;;  %v5166_v56 = vld [vmem:[#allocation2 + $0x658] sm:$0xff] }
 0xc39   : > { %13598 = vmatprep.mubr.f32.mxu1 %v4561_v49  ;;  %v15421_v3 = vpack.c.bf16 %v4988_v18, %v4987_v17  ;;  %v4991_v49 = vld [vmem:[#allocation2 + $0x5e8] sm:$0xff] }
 0xc3a   : > { %13599 = vmatmul.mubr.f32.gmra.mrb[198].mxu1 %v4562_v59  ;;  %v4992_v59 = vld [vmem:[#allocation2 + $0x5f0] sm:$0xff] }
 0xc3b   : > { %15416 = vmatpush3.bf16.msra.mxu1 %v15413_v34  ;;  %v15429_v47 = vpack.c.bf16 %v4992_v59, %v4991_v49 }
 0xc3c   : > { %15418 = vmatprep.subr.bf16.mxu1 %v15417_v15 }
 0xc3f   : > { %15420 = vmatpush3.bf16.msra.mxu1 %v15417_v15 }
 0xc40   : > { %15422 = vmatprep.subr.bf16.mxu1 %v15421_v3 }
 0xc43   : > { %15424 = vmatpush3.bf16.msra.mxu1 %v15421_v3  ;;  %v5162_v3 = vld [vmem:[#allocation2 + $0x638] sm:$0xff] }
 0xc44   : > { %15426 = vmatprep.subr.bf16.mxu1 %v15425_v20  ;;  %v15449_v59 = vpack.c.bf16 %v5163_v54, %v5162_v3  ;;  %v5168_v3 = vld [vmem:[#allocation2 + $0x668] sm:$0xff]  ;;  %v5169_v54 = vld [vmem:[#allocation2 + $0x670] sm:$0xff] }
 0xc47   : > { %15428 = vmatpush3.bf16.msra.mxu1 %v15425_v20 }
 0xc48   : > { %15430 = vmatprep.subr.bf16.mxu1 %v15429_v47 }
 0xc4b   : > { %15432 = vmatpush3.bf16.msra.mxu1 %v15429_v47 }
 0xc4c   : > { %15434 = vmatprep.subr.bf16.mxu1 %v15433_v50 }
 0xc4f   : > { %15436 = vmatpush3.bf16.msra.mxu1 %v15433_v50  ;;  %v5164_v50 = vld [vmem:[#allocation2 + $0x648] sm:$0xff] }
 0xcec   : > { %v13579_v21 = vpop.f32.mrb[184].mxu1 }
 0xced   : > { %v4741_v45 = vmul.f32 0.01, %v13579_v21  ;;  %v4645_v0 = vpop.f32.mrb[185].mxu1  ;;  %vm4725_vm2 = vcmp.ge.f32.partialorder %v13579_v21, 0.0 }
 0xcee   : > { %vm4724_vm3 = vcmp.ge.f32.partialorder %v4645_v0, 0.0  ;;  %v4740_v33 = vmul.f32 0.01, %v4645_v0 }
 0xcef   : > { %v4757_v15 = vsel %vm4725_vm2, %v13579_v21, %v4741_v45  ;;  %v5165_v21 = vld [vmem:[#allocation2 + $0x650] sm:$0xff] }
 0xcf0   : > { %v13582_v34 = vpop.f32.mrb[186].mxu1  ;;  %v4756_v2 = vsel %vm4724_vm3, %v4645_v0, %v4740_v33  ;;  %v15453_v43 = vpack.c.bf16 %v5165_v21, %v5164_v50  ;;  %v5167_v33 = vld [vmem:[#allocation2 + $0x660] sm:$0xff] }
 0xcf1   : > { %v4743_v17 = vmul.f32 0.01, %v13582_v34  ;;  %v4655_v18 = vpop.f32.mrb[187].mxu1  ;;  %13633 = vmatprep.mubr.f32.mxu0 %v4756_v2  ;;  %vm4727_vm4 = vcmp.ge.f32.partialorder %v13582_v34, 0.0 }
 0xcf2   : > { %vm4726_vm5 = vcmp.ge.f32.partialorder %v4655_v18, 0.0  ;;  %v4742_v23 = vmul.f32 0.01, %v4655_v18  ;;  %13634 = vmatmul.mubr.f32.vlgmr.msra.gmra.mrb[184].mxu0 %v4757_v15 }
 0xcf3   : > { %15444 = vmatpush3.bf16.msra.mxu0 %v15441_v61  ;;  %v4759_v41 = vsel %vm4727_vm4, %v13582_v34, %v4743_v17  ;;  %v15457_v34 = vpack.c.bf16 %v5167_v33, %v5166_v56 }
 0xcf4   : > { %v13585_v20 = vpop.f32.mrb[188].mxu1  ;;  %v4758_v49 = vsel %vm4726_vm5, %v4655_v18, %v4742_v23  ;;  %15446 = vmatprep.subr.bf16.mxu0 %v15445_v42 }
 0xcf5   : > { %v4745_v47 = vmul.f32 0.01, %v13585_v20  ;;  %v4665_v14 = vpop.f32.mrb[189].mxu1  ;;  %13636 = vmatprep.mubr.f32.mxu0 %v4758_v49  ;;  %vm4729_vm6 = vcmp.ge.f32.partialorder %v13585_v20, 0.0 }
 0xcf6   : > { %vm4728_vm7 = vcmp.ge.f32.partialorder %v4665_v14, 0.0  ;;  %v4744_v45 = vmul.f32 0.01, %v4665_v14  ;;  %13637 = vmatmul.mubr.f32.gmra.mrb[186].mxu0 %v4759_v41  ;;  %v5171_v41 = vld [vmem:[#allocation2 + $0x680] sm:$0xff] }
 0xcf7   : > { %15448 = vmatpush3.bf16.msra.mxu0 %v15445_v42  ;;  %v4761_v61 = vsel %vm4729_vm6, %v13585_v20, %v4745_v47  ;;  %v15461_v20 = vpack.c.bf16 %v5169_v54, %v5168_v3 }
 0xcf8   : > { %v4760_v0 = vsel %vm4728_vm7, %v4665_v14, %v4744_v45  ;;  %15450 = vmatprep.subr.bf16.mxu0 %v15449_v59 }
 0xcf9   : > { %13639 = vmatprep.mubr.f32.mxu0 %v4760_v0 }
 0xcfa   : > { %13640 = vmatmul.mubr.f32.gmra.mrb[188].mxu0 %v4761_v61 }
 0xcfb   : > { %v13588_v2 = vpop.f32.mrb[190].mxu1  ;;  %15452 = vmatpush3.bf16.msra.mxu0 %v15449_v59  ;;  %v5170_v59 = vld [vmem:[#allocation2 + $0x678] sm:$0xff] }
 0xcfc   : > { %v4747_v15 = vmul.f32 0.01, %v13588_v2  ;;  %v4675_v18 = vpop.f32.mrb[191].mxu1  ;;  %15454 = vmatprep.subr.bf16.mxu0 %v15453_v43  ;;  %vm4731_vm1 = vcmp.ge.f32.partialorder %v13588_v2, 0.0  ;;  %v15465_v0 = vpack.c.bf16 %v5171_v41, %v5170_v59  ;;  %v4995_v41 = vld [vmem:[#allocation2 + $0x608] sm:$0xff] }
 0xcfd   : > { %vm4730_vm8 = vcmp.ge.f32.partialorder %v4675_v18, 0.0  ;;  %v4746_v17 = vmul.f32 0.01, %v4675_v18 }
 0xcfe   : > { %v4763_v23 = vsel %vm4731_vm1, %v13588_v2, %v4747_v15 }
 0xcff   : > { %v4762_v42 = vsel %vm4730_vm8, %v4675_v18, %v4746_v17  ;;  %15456 = vmatpush3.bf16.msra.mxu0 %v15453_v43 }
 0xd00   : > { %13642 = vmatprep.mubr.f32.mxu0 %v4762_v42  ;;  %15458 = vmatprep.subr.bf16.mxu0 %v15457_v34 }
 0xd01   : > { %v13591_v49 = vpop.f32.mrb[192].mxu1  ;;  %13643 = vmatmul.mubr.f32.gmra.mrb[190].mxu0 %v4763_v23 }
 0xd02   : > { %v4749_v47 = vmul.f32 0.01, %v13591_v49  ;;  %v4685_v14 = vpop.f32.mrb[193].mxu1  ;;  %vm4733_vm9 = vcmp.ge.f32.partialorder %v13591_v49, 0.0 }
 0xd03   : > { %vm4732_vm11 = vcmp.ge.f32.partialorder %v4685_v14, 0.0  ;;  %v4748_v50 = vmul.f32 0.01, %v4685_v14  ;;  %15460 = vmatpush3.bf16.msra.mxu0 %v15457_v34 }
 0xd04   : > { %15462 = vmatprep.subr.bf16.mxu0 %v15461_v20  ;;  %v4765_v56 = vsel %vm4733_vm9, %v13591_v49, %v4749_v47 }
 0xd05   : > { %v13594_v21 = vpop.f32.mrb[194].mxu1  ;;  %v4764_v45 = vsel %vm4732_vm11, %v4685_v14, %v4748_v50  ;;  %v4996_v50 = vld [vmem:[#allocation2 + $0x610] sm:$0xff] }
 0xd06   : > { %v4751_v61 = vmul.f32 0.01, %v13594_v21  ;;  %v4695_v43 = vpop.f32.mrb[195].mxu1  ;;  %13645 = vmatprep.mubr.f32.mxu0 %v4764_v45  ;;  %vm4735_vm12 = vcmp.ge.f32.partialorder %v13594_v21, 0.0  ;;  %v15437_v45 = vpack.c.bf16 %v4996_v50, %v4995_v41 }
 0xd07   : > { %vm4734_vm13 = vcmp.ge.f32.partialorder %v4695_v43, 0.0  ;;  %v4750_v33 = vmul.f32 0.01, %v4695_v43  ;;  %13646 = vmatmul.mubr.f32.gmra.mrb[192].mxu0 %v4765_v56 }
 0xd08   : > { %15464 = vmatpush3.bf16.msra.mxu0 %v15461_v20  ;;  %v4767_v34 = vsel %vm4735_vm12, %v13594_v21, %v4751_v61  ;;  %v5172_v21 = vld [vmem:[#allocation2 + $0x688] sm:$0xff]  ;;  %v5173_v61 = vld [vmem:[#allocation2 + $0x690] sm:$0xff]  ;;  %15438 = vmatprep.subr.bf16.mxu1 %v15437_v45 }
 0xd09   : > { %v13597_v2 = vpop.f32.mrb[196].mxu1  ;;  %v4766_v15 = vsel %vm4734_vm13, %v4695_v43, %v4750_v33  ;;  %15466 = vmatprep.subr.bf16.mxu0 %v15465_v0  ;;  %15440 = vmatpush3.bf16.msra.mxu1 %v15437_v45  ;;  %v5399_v43 = vld [vmem:[#allocation2 + $0x698] sm:$0xff] }
 0xd0a   : > { %v4753_v18 = vmul.f32 0.01, %v13597_v2  ;;  %v4705_v17 = vpop.f32.mrb[197].mxu1  ;;  %13648 = vmatprep.mubr.f32.mxu0 %v4766_v15  ;;  %vm4737_vm14 = vcmp.ge.f32.partialorder %v13597_v2, 0.0  ;;  %13769 = vmatprep.subr.mxu1 %v5399_v43 }
 0xd0b   : > { %vm4736_vm0 = vcmp.ge.f32.partialorder %v4705_v17, 0.0  ;;  %v4752_v3 = vmul.f32 0.01, %v4705_v17  ;;  %13649 = vmatmul.mubr.f32.gmra.mrb[194].mxu0 %v4767_v34 }
 0xd0c   : > { %15468 = vmatpush3.bf16.msra.mxu0 %v15465_v0  ;;  %v4769_v47 = vsel %vm4737_vm14, %v13597_v2, %v4753_v18  ;;  %v15469_v0 = vpack.c.bf16 %v5173_v61, %v5172_v21 }
 0xd0d   : > { %v13600_v54 = vpop.f32.mrb[198].mxu1  ;;  %v4768_v42 = vsel %vm4736_vm0, %v4705_v17, %v4752_v3 }
 0xd0e   : > { %v4755_v23 = vmul.f32 0.01, %v13600_v54  ;;  %v4715_v49 = vpop.f32.mrb[199].mxu1  ;;  %13651 = vmatprep.mubr.f32.mxu0 %v4768_v42  ;;  %vm4739_vm15 = vcmp.ge.f32.partialorder %v13600_v54, 0.0  ;;  %15470 = vmatprep.subr.bf16.mxu0 %v15469_v0 }
 0xd0f   : > { %vm4738_vm2 = vcmp.ge.f32.partialorder %v4715_v49, 0.0  ;;  %v4754_v20 = vmul.f32 0.01, %v4715_v49  ;;  %13652 = vmatmul.mubr.f32.gmra.mrb[196].mxu0 %v4769_v47 }
 0xd10   : > { %v4771_v59 = vsel %vm4739_vm15, %v13600_v54, %v4755_v23  ;;  %15472 = vmatpush3.bf16.msra.mxu0 %v15469_v0 }
 0xd11   : > { %v4770_v14 = vsel %vm4738_vm2, %v4715_v49, %v4754_v20 }
 0xd12   : > { %13654 = vmatprep.mubr.f32.mxu0 %v4770_v14 }
 0xd13   : > { %13655 = vmatmul.mubr.f32.gmra.mrb[198].mxu0 %v4771_v59 }
 0xdc5   : > { %v13635_v56 = vpop.f32.mrb[184].mxu0 }
 0xdc6   : > { %v4950_v33 = vmul.f32 0.01, %v13635_v56  ;;  %v4854_v2 = vpop.f32.mrb[185].mxu0  ;;  %vm4934_vm3 = vcmp.ge.f32.partialorder %v13635_v56, 0.0 }
 0xdc7   : > { %vm4933_vm4 = vcmp.ge.f32.partialorder %v4854_v2, 0.0  ;;  %v4949_v15 = vmul.f32 0.01, %v4854_v2 }
 0xdc8   : > { %v4966_v34 = vsel %vm4934_vm3, %v13635_v56, %v4950_v33 }
 0xdc9   : > { %v13638_v18 = vpop.f32.mrb[186].mxu0  ;;  %v4965_v17 = vsel %vm4933_vm4, %v4854_v2, %v4949_v15 }
 0xdca   : > { %v4952_v3 = vmul.f32 0.01, %v13638_v18  ;;  %v4864_v54 = vpop.f32.mrb[187].mxu0  ;;  %13689 = vmatprep.mubr.f32.mxu1 %v4965_v17  ;;  %13745 = vmatprep.mubr.f32.mxu0 %v4965_v17  ;;  %vm4936_vm5 = vcmp.ge.f32.partialorder %v13638_v18, 0.0 }
 0xdcb   : > { %vm4935_vm6 = vcmp.ge.f32.partialorder %v4864_v54, 0.0  ;;  %v4951_v42 = vmul.f32 0.01, %v4864_v54  ;;  %13690 = vmatmul.mubr.f32.vlgmr.msra.gmra.mrb[200].mxu1 %v4966_v34  ;;  %13746 = vmatmul.mubr.f32.vlgmr.msra.gmra.mrb[200].mxu0 %v4966_v34 }
 0xdcc   : > { %13770 = vmatpush3.msra.mxu1 %v5399_v43  ;;  %v4968_v14 = vsel %vm4936_vm5, %v13638_v18, %v4952_v3 }
 0xdcd   : > { %v13641_v23 = vpop.f32.mrb[188].mxu0  ;;  %v4967_v49 = vsel %vm4935_vm6, %v4864_v54, %v4951_v42 }
 0xdce   : > { %v4954_v47 = vmul.f32 0.01, %v13641_v23  ;;  %v4874_v20 = vpop.f32.mrb[189].mxu0  ;;  %13692 = vmatprep.mubr.f32.mxu1 %v4967_v49  ;;  %13748 = vmatprep.mubr.f32.mxu0 %v4967_v49  ;;  %vm4938_vm7 = vcmp.ge.f32.partialorder %v13641_v23, 0.0 }
 0xdcf   : > { %vm4937_vm1 = vcmp.ge.f32.partialorder %v4874_v20, 0.0  ;;  %v4953_v59 = vmul.f32 0.01, %v4874_v20  ;;  %13693 = vmatmul.mubr.f32.gmra.mrb[202].mxu1 %v4968_v14  ;;  %13749 = vmatmul.mubr.f32.gmra.mrb[202].mxu0 %v4968_v14 }
 0xdd0   : > { %v4970_v50 = vsel %vm4938_vm7, %v13641_v23, %v4954_v47 }
 0xdd1   : > { %v4969_v41 = vsel %vm4937_vm1, %v4874_v20, %v4953_v59 }
 0xdd2   : > { %13695 = vmatprep.mubr.f32.mxu1 %v4969_v41  ;;  %13751 = vmatprep.mubr.f32.mxu0 %v4969_v41 }
 0xdd3   : > { %13696 = vmatmul.mubr.f32.gmra.mrb[204].mxu1 %v4970_v50  ;;  %13752 = vmatmul.mubr.f32.gmra.mrb[204].mxu0 %v4970_v50 }
 0xdd4   : > { %v13644_v21 = vpop.f32.mrb[190].mxu0 }
 0xdd5   : > { %v4956_v45 = vmul.f32 0.01, %v13644_v21  ;;  %v4884_v61 = vpop.f32.mrb[191].mxu0  ;;  %vm4940_vm8 = vcmp.ge.f32.partialorder %v13644_v21, 0.0 }
 0xdd6   : > { %vm4939_vm9 = vcmp.ge.f32.partialorder %v4884_v61, 0.0  ;;  %v4955_v0 = vmul.f32 0.01, %v4884_v61 }
 0xdd7   : > { %v4972_v56 = vsel %vm4940_vm8, %v13644_v21, %v4956_v45 }
 0xdd8   : > { %v4971_v43 = vsel %vm4939_vm9, %v4884_v61, %v4955_v0 }
 0xdd9   : > { %13698 = vmatprep.mubr.f32.mxu1 %v4971_v43  ;;  %13754 = vmatprep.mubr.f32.mxu0 %v4971_v43 }
 0xdda   : > { %v13647_v33 = vpop.f32.mrb[192].mxu0  ;;  %13699 = vmatmul.mubr.f32.gmra.mrb[206].mxu1 %v4972_v56  ;;  %13755 = vmatmul.mubr.f32.gmra.mrb[206].mxu0 %v4972_v56 }
 0xddb   : > { %v4958_v2 = vmul.f32 0.01, %v13647_v33  ;;  %v4894_v15 = vpop.f32.mrb[193].mxu0  ;;  %vm4942_vm11 = vcmp.ge.f32.partialorder %v13647_v33, 0.0 }
 0xddc   : > { %vm4941_vm12 = vcmp.ge.f32.partialorder %v4894_v15, 0.0  ;;  %v4957_v18 = vmul.f32 0.01, %v4894_v15 }
 0xddd   : > { %v4974_v42 = vsel %vm4942_vm11, %v13647_v33, %v4958_v2  ;;  %v5641_v2 = vld [vmem:[#allocation2 + $0x6a0] sm:$0xff] }
 0xdde   : > { %v13650_v17 = vpop.f32.mrb[194].mxu0  ;;  %v4973_v34 = vsel %vm4941_vm12, %v4894_v15, %v4957_v18  ;;  %v5642_v15 = vld [vmem:[#allocation2 + $0x6a8] sm:$0xff]  ;;  %v5643_v18 = vld [vmem:[#allocation2 + $0x6b0] sm:$0xff] }
 0xddf   : > { %v4960_v3 = vmul.f32 0.01, %v13650_v17  ;;  %v4904_v54 = vpop.f32.mrb[195].mxu0  ;;  %13701 = vmatprep.mubr.f32.mxu1 %v4973_v34  ;;  %13757 = vmatprep.mubr.f32.mxu0 %v4973_v34  ;;  %vm4944_vm13 = vcmp.ge.f32.partialorder %v13650_v17, 0.0  ;;  %v5644_v34 = vld [vmem:[#allocation2 + $0x6b8] sm:$0xff] }
 0xde0   : > { %vm4943_vm14 = vcmp.ge.f32.partialorder %v4904_v54, 0.0  ;;  %v4959_v23 = vmul.f32 0.01, %v4904_v54  ;;  %13702 = vmatmul.mubr.f32.gmra.mrb[208].mxu1 %v4974_v42  ;;  %13758 = vmatmul.mubr.f32.gmra.mrb[208].mxu0 %v4974_v42  ;;  %v5646_v42 = vld [vmem:[#allocation2 + $0x6c8] sm:$0xff] }
 0xde1   : > { %v4976_v59 = vsel %vm4944_vm13, %v13650_v17, %v4960_v3  ;;  %v15473_v17 = vpack.c.bf16 %v5642_v15, %v5641_v2  ;;  %v15477_v3 = vpack.c.bf16 %v5644_v34, %v5643_v18 }
 0xde2   : > { %v13653_v49 = vpop.f32.mrb[196].mxu0  ;;  %v4975_v47 = vsel %vm4943_vm14, %v4904_v54, %v4959_v23  ;;  %v5645_v54 = vld [vmem:[#allocation2 + $0x6c0] sm:$0xff] }
 0xde3   : > { %v4962_v20 = vmul.f32 0.01, %v13653_v49  ;;  %v4914_v14 = vpop.f32.mrb[197].mxu0  ;;  %13704 = vmatprep.mubr.f32.mxu1 %v4975_v47  ;;  %13760 = vmatprep.mubr.f32.mxu0 %v4975_v47  ;;  %vm4946_vm0 = vcmp.ge.f32.partialorder %v13653_v49, 0.0  ;;  %v15481_v23 = vpack.c.bf16 %v5646_v42, %v5645_v54  ;;  %v5648_v47 = vld [vmem:[#allocation2 + $0x6d8] sm:$0xff] }
 0xde4   : > { %vm4945_vm15 = vcmp.ge.f32.partialorder %v4914_v14, 0.0  ;;  %v4961_v41 = vmul.f32 0.01, %v4914_v14  ;;  %13705 = vmatmul.mubr.f32.gmra.mrb[210].mxu1 %v4976_v59  ;;  %13761 = vmatmul.mubr.f32.gmra.mrb[210].mxu0 %v4976_v59  ;;  %v5650_v59 = vld [vmem:[#allocation2 + $0x6e8] sm:$0xff] }
 0xde5   : > { %v4978_v0 = vsel %vm4946_vm0, %v13653_v49, %v4962_v20  ;;  %15474 = vmatprep.subr.bf16.mxu0 %v15473_v17  ;;  %v5647_v49 = vld [vmem:[#allocation2 + $0x6d0] sm:$0xff] }
 0xde6   : > { %v13656_v50 = vpop.f32.mrb[198].mxu0  ;;  %v4977_v21 = vsel %vm4945_vm15, %v4914_v14, %v4961_v41  ;;  %15476 = vmatpush3.bf16.msra.mxu0 %v15473_v17  ;;  %v15485_v20 = vpack.c.bf16 %v5648_v47, %v5647_v49  ;;  %v5649_v14 = vld [vmem:[#allocation2 + $0x6e0] sm:$0xff]  ;;  %v4154_v47 = vadd.f32 %v17929_v8, %v17717_v37  ;;  %v4155_v37 = vadd.f32 %v17941_v7, %v17729_v30 }
 0xde7   : > { %v4964_v45 = vmul.f32 0.01, %v13656_v50  ;;  %v4924_v61 = vpop.f32.mrb[199].mxu0  ;;  %13707 = vmatprep.mubr.f32.mxu1 %v4977_v21  ;;  %13763 = vmatprep.mubr.f32.mxu0 %v4977_v21  ;;  %vm4948_vm2 = vcmp.ge.f32.partialorder %v13656_v50, 0.0  ;;  %v15489_v41 = vpack.c.bf16 %v5650_v59, %v5649_v14  ;;  %v5652_v21 = vld [vmem:[#allocation2 + $0x6f8] sm:$0xff]  ;;  %v4153_v14 = vadd.f32 %v17931_v36, %v17719_v26  ;;  %v19664_v7 = vld [vmem:[#allocation110_spill] sm:$0xff] }
 0xde8   : > { %vm4947_vm3 = vcmp.ge.f32.partialorder %v4924_v61, 0.0  ;;  %v4963_v43 = vmul.f32 0.01, %v4924_v61  ;;  %13708 = vmatmul.mubr.f32.gmra.mrb[212].mxu1 %v4978_v0  ;;  %13764 = vmatmul.mubr.f32.gmra.mrb[212].mxu0 %v4978_v0  ;;  %v5654_v0 = vld [vmem:[#allocation2 + $0x708] sm:$0xff] }
 0xde9   : > { %v4980_v33 = vsel %vm4948_vm2, %v13656_v50, %v4964_v45  ;;  %15478 = vmatprep.subr.bf16.mxu0 %v15477_v3  ;;  %v5651_v50 = vld [vmem:[#allocation2 + $0x6f0] sm:$0xff] }
 0xdea   : > { %v4979_v56 = vsel %vm4947_vm3, %v4924_v61, %v4963_v43  ;;  %15480 = vmatpush3.bf16.msra.mxu0 %v15477_v3  ;;  %v15493_v45 = vpack.c.bf16 %v5652_v21, %v5651_v50  ;;  %v5653_v61 = vld [vmem:[#allocation2 + $0x700] sm:$0xff] }
 0xdeb   : > { %13710 = vmatprep.mubr.f32.mxu1 %v4979_v56  ;;  %13766 = vmatprep.mubr.f32.mxu0 %v4979_v56  ;;  %v15497_v43 = vpack.c.bf16 %v5654_v0, %v5653_v61  ;;  %v4156_v61 = vadd.f32 %v17937_v1, %v17727_v46  ;;  %v19663_v46 = vld [vmem:[#allocation109_spill] sm:$0xff] }
 0xdec   : > { %13711 = vmatmul.mubr.f32.gmra.mrb[214].mxu1 %v4980_v33  ;;  %13767 = vmatmul.mubr.f32.gmra.mrb[214].mxu0 %v4980_v33  ;;  %v4158_v1 = vadd.f32 %v17947_v48, %v19663_v46 }
 0xded   : > { %15482 = vmatprep.subr.bf16.mxu0 %v15481_v23 }
 0xdee   : > { %15484 = vmatpush3.bf16.msra.mxu0 %v15481_v23 }
 0xdef   : > { %15486 = vmatprep.subr.bf16.mxu0 %v15485_v20 }
 0xdf2   : > { %15488 = vmatpush3.bf16.msra.mxu0 %v15485_v20 }
 0xdf3   : > { %15490 = vmatprep.subr.bf16.mxu0 %v15489_v41 }
 0xdf6   : > { %15492 = vmatpush3.bf16.msra.mxu0 %v15489_v41 }
 0xdf7   : > { %15494 = vmatprep.subr.bf16.mxu0 %v15493_v45 }
 0xdfa   : > { %15496 = vmatpush3.bf16.msra.mxu0 %v15493_v45 }
 0xdfb   : > { %15498 = vmatprep.subr.bf16.mxu0 %v15497_v43 }
 0xdfe   : > { %15500 = vmatpush3.bf16.msra.mxu0 %v15497_v43 }
 0xe9e   : > { %v13691_v56 = vpop.f32.mrb[200].mxu1  ;;  %v18185_v33 = vpop.f32.mrb[200].mxu0 }
 0xe9f   : > { %16278 = vtanh.f32 %v13691_v56  ;;  %v5063_v2 = vpop.f32.mrb[201].mxu1  ;;  %v18187_v15 = vpop.f32.mrb[201].mxu0 }
 0xea0   : > { %16280 = vtanh.f32 %v5063_v2 }
 0xea2   : > { %v13694_v18 = vpop.f32.mrb[202].mxu1  ;;  %v18189_v17 = vpop.f32.mrb[202].mxu0 }
 0xea3   : > { %16282 = vtanh.f32 %v13694_v18  ;;  %v5073_v34 = vpop.f32.mrb[203].mxu1  ;;  %v18191_v3 = vpop.f32.mrb[203].mxu0 }
 0xea4   : > { %16284 = vtanh.f32 %v5073_v34 }
 0xea6   : > { %v13697_v54 = vpop.f32.mrb[204].mxu1  ;;  %v18193_v42 = vpop.f32.mrb[204].mxu0 }
 0xea7   : > { %16286 = vtanh.f32 %v13697_v54  ;;  %v5083_v23 = vpop.f32.mrb[205].mxu1  ;;  %v18195_v49 = vpop.f32.mrb[205].mxu0 }
 0xea8   : > { %16288 = vtanh.f32 %v5083_v23  ;;  %v4157_v23 = vadd.f32 %v17951_v6, %v19664_v7 }
 0xea9   : > { %v16279_v20 = vpop.eup %16278 }
 0xeaa   : > { %v16281_v59 = vpop.eup %16280  ;;  %v18201_v41 = vadd.f32 %v16279_v20, %v4154_v47  ;;  %v5337_v50 = vmul.f32 1.442695, %v16279_v20 }
 0xeab   : > { %v18203_v21 = vadd.f32 %v16281_v59, %v4153_v14  ;;  %v5335_v45 = vmul.f32 1.442695, %v16281_v59 }
 0xeac   : > { %16290 = vpow2.f32 %v5337_v50 }
 0xead   : > { %v16283_v0 = vpop.eup %16282  ;;  %16292 = vpow2.f32 %v5335_v45  ;;  %v13700_v8 = vpop.f32.mrb[206].mxu1 }
 0xeae   : > { %v18209_v43 = vpop.f32.mrb[206].mxu0  ;;  %v16285_v26 = vpop.eup %16284  ;;  %v18211_v36 = vadd.f32 %v16283_v0, %v4156_v61  ;;  %v5341_v56 = vmul.f32 1.442695, %v16283_v0  ;;  %16294 = vtanh.f32 %v13700_v8 }
 0xeaf   : > { %v5093_v2 = vpop.f32.mrb[207].mxu1  ;;  %v18213_v18 = vpop.f32.mrb[207].mxu0  ;;  %v18215_v34 = vadd.f32 %v16285_v26, %v4155_v37  ;;  %v5339_v54 = vmul.f32 1.442695, %v16285_v26  ;;  %v19665_v26 = vld [vmem:[#allocation111_spill] sm:$0xff] }
 0xeb0   : > { %16296 = vtanh.f32 %v5093_v2 }
 0xeb1   : > { %16298 = vpow2.f32 %v5341_v56  ;;  %v16287_v30 = vpop.eup %16286  ;;  %v4160_v56 = vadd.f32 %v17964_v29, %v19665_v26 }
 0xeb2   : > { %16300 = vpow2.f32 %v5339_v54  ;;  %v16289_v47 = vpop.eup %16288  ;;  %v18221_v20 = vadd.f32 %v16287_v30, %v4158_v1  ;;  %v5345_v14 = vmul.f32 1.442695, %v16287_v30  ;;  %v4159_v30 = vadd.f32 %v17969_v35, %v17755_v27 }
 0xeb3   : > { %v18223_v59 = vadd.f32 %v16289_v47, %v4157_v23  ;;  %v5343_v50 = vmul.f32 1.442695, %v16289_v47  ;;  %v13703_v45 = vpop.f32.mrb[208].mxu1  ;;  %v18225_v61 = vpop.f32.mrb[208].mxu0 }
 0xeb4   : > { %16302 = vpow2.f32 %v5345_v14  ;;  %v5103_v0 = vpop.f32.mrb[209].mxu1  ;;  %v18227_v37 = vpop.f32.mrb[209].mxu0 }
 0xeb5   : > { %16304 = vpow2.f32 %v5343_v50 }
 0xeb6   : > { %v16291_v48 = vpop.eup %16290  ;;  %16306 = vtanh.f32 %v13703_v45 }
 0xeb7   : > { %v16293_v8 = vpop.eup %16292  ;;  %v5368_v6 = vmul.f32 %v16291_v48, %v18008_v55  ;;  %16308 = vtanh.f32 %v5103_v0  ;;  %v13706_v2 = vpop.f32.mrb[210].mxu1 }
 0xeb8   : > { %v18232_v54 = vpop.f32.mrb[210].mxu0  ;;  %v16295_v46 = vpop.eup %16294  ;;  %v5367_v1 = vmul.f32 %v16293_v8, %v18013_v5  ;;  %16310 = vtanh.f32 %v13706_v2 }
 0xeb9   : > { %v5113_v7 = vpop.f32.mrb[211].mxu1  ;;  %v18237_v23 = vpop.f32.mrb[211].mxu0  ;;  %v18240_v55 = vadd.f32 %v18185_v33, %v5368_v6  ;;  %v18242_v14 = vadd.f32 %v16295_v46, %v4160_v56  ;;  %v5349_v29 = vmul.f32 1.442695, %v16295_v46  ;;  %v19666_v46 = vld [vmem:[#allocation112_spill] sm:$0xff] }
 0xeba   : > { %v16297_v47 = vpop.eup %16296  ;;  %16312 = vtanh.f32 %v5113_v7  ;;  %v18245_v45 = vadd.f32 %v5367_v1, %v18187_v15  ;;  %v4162_v1 = vadd.f32 %v17983_v24, %v19666_v46 }
 0xebb   : > { %v16299_v50 = vpop.eup %16298  ;;  %v18247_v5 = vadd.f32 %v16297_v47, %v4159_v30  ;;  %v5347_v0 = vmul.f32 1.442695, %v16297_v47  ;;  %16314 = vpow2.f32 %v5349_v29  ;;  %v13709_v48 = vpop.f32.mrb[212].mxu1  ;;  %v4161_v29 = vadd.f32 %v17989_v62, %v17773_v9 }
 0xebc   : > { %v16301_v27 = vpop.eup %16300  ;;  %v5370_v35 = vmul.f32 %v16299_v50, %v18029_v38  ;;  %v18250_v8 = vpop.f32.mrb[212].mxu0  ;;  %13771 = vmatprep.mubr.msk.f32.mxu1 %vm2077_vm10, %v18245_v45 }
 0xebd   : > { %v5369_v33 = vmul.f32 %v16301_v27, %v18035_v40  ;;  %16316 = vpow2.f32 %v5347_v0  ;;  %v5123_v6 = vpop.f32.mrb[213].mxu1  ;;  %v18253_v26 = vpop.f32.mrb[213].mxu0  ;;  %13772 = vmatmul.mubr.msk.f32.vlgmr.msra.gmra.mrb[216].mxu1 %vm2077_vm10, %v18240_v55 }
 0xebe   : > { %v18258_v15 = vadd.f32 %v18189_v17, %v5370_v35  ;;  %16318 = vtanh.f32 %v13709_v48  ;;  %v16303_v38 = vpop.eup %16302  ;;  %v4163_v35 = vadd.f32 %v18006_v60, %v17791_v32  ;;  %v19667_v60 = vld [vmem:[#allocation113_spill] sm:$0xff] }
 0xebf   : > { %v18263_v56 = vadd.f32 %v5369_v33, %v18191_v3  ;;  %16320 = vtanh.f32 %v5123_v6  ;;  %v16305_v40 = vpop.eup %16304  ;;  %v5372_v2 = vmul.f32 %v16303_v38, %v18058_v19  ;;  %v13712_v30 = vpop.f32.mrb[214].mxu1  ;;  %v4164_v3 = vadd.f32 %v18001_v63, %v17778_v22 }
 0xec0   : > { %v18268_v7 = vpop.f32.mrb[214].mxu0  ;;  %v16307_v17 = vpop.eup %16306  ;;  %v5371_v47 = vmul.f32 %v16305_v40, %v18054_v31  ;;  %16322 = vtanh.f32 %v13712_v30 }
 0xec1   : > { %v5133_v50 = vpop.f32.mrb[215].mxu1  ;;  %v18275_v0 = vpop.f32.mrb[215].mxu0  ;;  %13774 = vmatprep.mubr.msk.f32.mxu1 %vm2077_vm10, %v18263_v56  ;;  %v18280_v19 = vadd.f32 %v18193_v42, %v5372_v2  ;;  %v18282_v27 = vadd.f32 %v16307_v17, %v4162_v1  ;;  %v5353_v31 = vmul.f32 1.442695, %v16307_v17  ;;  %v19668_v2 = vld [vmem:[#allocation43_spill] sm:$0xff]  ;;  %v19669_v17 = vld [vmem:[#allocation114_spill] sm:$0xff] }
 0xec2   : > { %v16309_v24 = vpop.eup %16308  ;;  %16324 = vtanh.f32 %v5133_v50  ;;  %13775 = vmatmul.mubr.msk.f32.gmra.mrb[218].mxu1 %vm2077_vm10, %v18258_v15  ;;  %v18287_v22 = vadd.f32 %v5371_v47, %v18195_v49  ;;  %v4166_v46 = vadd.f32 %v19668_v2, %v19667_v60  ;;  %v4165_v47 = vadd.f32 %v18022_v39, %v19669_v17 }
 0xec3   : > { %v16311_v9 = vpop.eup %16310  ;;  %v18289_v62 = vadd.f32 %v16309_v24, %v4161_v29  ;;  %v5351_v63 = vmul.f32 1.442695, %v16309_v24  ;;  %16326 = vpow2.f32 %v5353_v31 }
 0xec4   : > { %v16313_v48 = vpop.eup %16312  ;;  %v18293_v42 = vadd.f32 %v16311_v9, %v4164_v3  ;;  %v5357_v33 = vmul.f32 1.442695, %v16311_v9  ;;  %13777 = vmatprep.mubr.msk.f32.mxu1 %vm2077_vm10, %v18287_v22 }
 0xec5   : > { %16328 = vpow2.f32 %v5351_v63  ;;  %v18295_v6 = vadd.f32 %v16313_v48, %v4163_v35  ;;  %v5355_v38 = vmul.f32 1.442695, %v16313_v48  ;;  %v16315_v49 = vpop.eup %16314  ;;  %v19670_v63 = vld [vmem:[#allocation115_spill] sm:$0xff]  ;;  %v19671_v35 = vld [vmem:[#allocation40_spill] sm:$0xff] }
 0xec6   : > { %16330 = vpow2.f32 %v5357_v33  ;;  %13778 = vmatmul.mubr.msk.f32.gmra.mrb[220].mxu1 %vm2077_vm10, %v18280_v19  ;;  %v5374_v32 = vmul.f32 %v16315_v49, %v18080_v51  ;;  %v4168_v48 = vadd.f32 %v19671_v35, %v19670_v63  ;;  %v19672_v33 = vld [vmem:[#allocation116_spill] sm:$0xff] }
 0xec7   : > { %v16317_v40 = vpop.eup %16316  ;;  %16332 = vpow2.f32 %v5355_v38  ;;  %v4167_v39 = vadd.f32 %v18043_v28, %v19672_v33 }
 0xec8   : > { %v16319_v1 = vpop.eup %16318  ;;  %v5373_v30 = vmul.f32 %v16317_v40, %v18076_v25  ;;  %v18308_v3 = vadd.f32 %v18209_v43, %v5374_v32 }
 0xec9   : > { %v16321_v29 = vpop.eup %16320  ;;  %v18310_v50 = vadd.f32 %v16319_v1, %v4166_v46  ;;  %v5361_v24 = vmul.f32 1.442695, %v16319_v1 }
 0xeca   : > { %v18313_v31 = vadd.f32 %v5373_v30, %v18213_v18  ;;  %v18315_v51 = vadd.f32 %v16321_v29, %v4165_v47  ;;  %v5359_v9 = vmul.f32 1.442695, %v16321_v29  ;;  %v16323_v25 = vpop.eup %16322 }
 0xecb   : > { %16334 = vpow2.f32 %v5361_v24  ;;  %v18321_v43 = vadd.f32 %v16323_v25, %v4168_v48  ;;  %v5365_v49 = vmul.f32 1.442695, %v16323_v25  ;;  %v5852_v48 = vld [vmem:[#allocation2 + $0x730] sm:$0xff] }
 0xecc   : > { %v16325_v38 = vpop.eup %16324  ;;  %16336 = vpow2.f32 %v5359_v9  ;;  %13780 = vmatprep.mubr.msk.f32.mxu1 %vm2077_vm10, %v18313_v31 }
 0xecd   : > { %v18325_v18 = vadd.f32 %v16325_v38, %v4167_v39  ;;  %v5363_v40 = vmul.f32 1.442695, %v16325_v38  ;;  %13781 = vmatmul.mubr.msk.f32.gmra.mrb[222].mxu1 %vm2077_vm10, %v18308_v3  ;;  %v16327_v32 = vpop.eup %16326  ;;  %16338 = vpow2.f32 %v5365_v49  ;;  %v5854_v39 = vld [vmem:[#allocation2 + $0x740] sm:$0xff]  ;;  %v5855_v38 = vld [vmem:[#allocation2 + $0x748] sm:$0xff] }
 0xece   : > { %v5376_v2 = vmul.f32 %v16327_v32, %v18100_v11  ;;  %v15513_v49 = vpack.c.bf16 %v5855_v38, %v5854_v39  ;;  %v5857_v32 = vld [vmem:[#allocation2 + $0x758] sm:$0xff]  ;;  %v19677_v38 = vld [vmem:[#allocation16_spill] sm:$0xff] }
 0xecf   : > { %v16329_v60 = vpop.eup %16328  ;;  %16340 = vpow2.f32 %v5363_v40  ;;  %v5856_v40 = vld [vmem:[#allocation2 + $0x750] sm:$0xff] }
 0xed0   : > { %v16331_v28 = vpop.eup %16330  ;;  %v5375_v46 = vmul.f32 %v16329_v60, %v18102_v12  ;;  %v18332_v30 = vadd.f32 %v18225_v61, %v5376_v2  ;;  %v15517_v60 = vpack.c.bf16 %v5857_v32, %v5856_v40  ;;  %v5858_v2 = vld [vmem:[#allocation2 + $0x760] sm:$0xff] }
 0xed1   : > { %v16333_v1 = vpop.eup %16332  ;;  %v5378_v17 = vmul.f32 %v16331_v28, %v18121_v44  ;;  %v5859_v28 = vld [vmem:[#allocation2 + $0x768] sm:$0xff] }
 0xed2   : > { %v18336_v47 = vadd.f32 %v5375_v46, %v18227_v37  ;;  %v5377_v29 = vmul.f32 %v16333_v1, %v18117_v4  ;;  %v15521_v46 = vpack.c.bf16 %v5859_v28, %v5858_v2  ;;  %v5860_v1 = vld [vmem:[#allocation2 + $0x770] sm:$0xff] }
 0xed3   : > { %v18340_v24 = vadd.f32 %v18232_v54, %v5378_v17  ;;  %v5861_v17 = vld [vmem:[#allocation2 + $0x778] sm:$0xff] }
 0xed4   : > { %v18343_v11 = vadd.f32 %v5377_v29, %v18237_v23  ;;  %13783 = vmatprep.mubr.msk.f32.mxu1 %vm2077_vm10, %v18336_v47  ;;  %v15525_v29 = vpack.c.bf16 %v5861_v17, %v5860_v1  ;;  %v19678_v1 = vld [vmem:[#allocation22_spill] sm:$0xff] }
 0xed5   : > { %v16335_v12 = vpop.eup %16334  ;;  %13784 = vmatmul.mubr.msk.f32.gmra.mrb[224].mxu1 %vm2077_vm10, %v18332_v30 }
 0xed6   : > { %v16337_v61 = vpop.eup %16336  ;;  %v5380_v44 = vmul.f32 %v16335_v12, %v18133_v13  ;;  %13786 = vmatprep.mubr.msk.f32.mxu1 %vm2077_vm10, %v18343_v11  ;;  %v5862_v12 = vld [vmem:[#allocation2 + $0x780] sm:$0xff] }
 0xed7   : > { %v5379_v4 = vmul.f32 %v16337_v61, %v18128_v57  ;;  %v16339_v37 = vpop.eup %16338  ;;  %v5863_v61 = vld [vmem:[#allocation2 + $0x788] sm:$0xff] }
 0xed8   : > { %v18354_v54 = vadd.f32 %v18250_v8, %v5380_v44  ;;  %v5382_v63 = vmul.f32 %v16339_v37, %v18143_v52  ;;  %v5655_v52 = vld [vmem:[#allocation2 + $0x710] sm:$0xff]  ;;  %v15529_v44 = vpack.c.bf16 %v5863_v61, %v5862_v12 }
 0xed9   : > { %v16341_v23 = vpop.eup %16340  ;;  %v18357_v9 = vadd.f32 %v5379_v4, %v18253_v26  ;;  %13787 = vmatmul.mubr.msk.f32.gmra.mrb[226].mxu1 %vm2077_vm10, %v18340_v24  ;;  %v5850_v26 = vld [vmem:[#allocation2 + $0x720] sm:$0xff]  ;;  %v19679_v61 = vld [vmem:[#allocation20_spill] sm:$0xff] }
 0xeda   : > { %v5381_v13 = vmul.f32 %v16341_v23, %v18141_v16  ;;  %v18364_v35 = vadd.f32 %v18268_v7, %v5382_v63  ;;  %v5656_v16 = vld [vmem:[#allocation2 + $0x718] sm:$0xff]  ;;  %v5851_v7 = vld [vmem:[#allocation2 + $0x728] sm:$0xff]  ;;  %v19673_v4 = vld [vmem:[#allocation10_spill] sm:$0xff] }
 0xedb   : > { %13789 = vmatprep.mubr.msk.f32.mxu1 %vm2077_vm10, %v18357_v9  ;;  %v15501_v8 = vpack.c.bf16 %v5656_v16, %v5655_v52  ;;  %v15505_v25 = vpack.c.bf16 %v5851_v7, %v5850_v26  ;;  %v18379_v37 = vrot.slane %v17651_v53, %v19673_v4  ;;  %v19674_v23 = vld [vmem:[#allocation14_spill] sm:$0xff]  ;;  %v19675_v52 = vld [vmem:[#allocation12_spill] sm:$0xff] }
 0xedc   : > { %v18369_v57 = vadd.f32 %v5381_v13, %v18275_v0  ;;  %v5853_v0 = vld [vmem:[#allocation2 + $0x738] sm:$0xff] }
 0xedd   : > { %13790 = vmatmul.mubr.msk.f32.gmra.mrb[228].mxu1 %vm2077_vm10, %v18354_v54  ;;  %15502 = vmatprep.subr.bf16.mxu0 %v15501_v8  ;;  %v15509_v33 = vpack.c.bf16 %v5853_v0, %v5852_v48  ;;  %v1579_v63 = vadd.f32 %v19674_v23, %v18379_v37  ;;  %v1573_v16 = vadd.f32 %v19675_v52, %v18379_v37 }
 0xede   : > { %13792 = vmatprep.mubr.msk.f32.mxu1 %vm2077_vm10, %v18369_v57  ;;  %15504 = vmatpush3.bf16.msra.mxu0 %v15501_v8  ;;  %v1603_v17 = vadd.f32 %v19678_v1, %v18379_v37 }
 0xedf   : > { %15506 = vmatprep.subr.bf16.mxu1 %v15505_v25 }
 0xee0   : > { %15508 = vmatpush3.bf16.msra.mxu1 %v15505_v25  ;;  %v19676_v25 = vld [vmem:[#allocation18_spill] sm:$0xff] }
 0xee1   : > { %13793 = vmatmul.mubr.msk.f32.gmra.mrb[230].mxu1 %vm2077_vm10, %v18364_v35  ;;  %15510 = vmatprep.subr.bf16.mxu1 %v15509_v33  ;;  %v1591_v0 = vadd.f32 %v19676_v25, %v18379_v37 }
 0xee4   : > { %15512 = vmatpush3.bf16.msra.mxu1 %v15509_v33 }
 0xee5   : > { %15514 = vmatprep.subr.bf16.mxu1 %v15513_v49 }
 0xee8   : > { %15516 = vmatpush3.bf16.msra.mxu1 %v15513_v49  ;;  %v1585_v49 = vadd.f32 %v19677_v38, %v18379_v37 }
 0xee9   : > { %15518 = vmatprep.subr.bf16.mxu1 %v15517_v60 }
 0xeec   : > { %15520 = vmatpush3.bf16.msra.mxu1 %v15517_v60 }
 0xeed   : > { %15522 = vmatprep.subr.bf16.mxu1 %v15521_v46 }
 0xef0   : > { %15524 = vmatpush3.bf16.msra.mxu1 %v15521_v46 }
 0xef1   : > { %15526 = vmatprep.subr.bf16.mxu1 %v15525_v29 }
 0xef4   : > { %15528 = vmatpush3.bf16.msra.mxu1 %v15525_v29 }
 0xef5   : > { %15530 = vmatprep.subr.bf16.mxu1 %v15529_v44 }
 0xef8   : > { %15532 = vmatpush3.bf16.msra.mxu1 %v15529_v44  ;;  %v1597_v44 = vadd.f32 %v19679_v61, %v18379_v37 }
 0xf90   : > { %v13773_v13 = vpop.f32.mrb[216].mxu1 }
 0xf91   : > { %v5520_v8 = vadd.f32 %v13773_v13, %v1579_v63  ;;  %v5514_v26 = vpop.f32.mrb[217].mxu1 }
 0xf92   : > { %v5515_v7 = vadd.f32 %v5514_v26, %v1573_v16 }
 0xf93   : > { %v5610_v48 = vmul.f32 0.01, %v5520_v8  ;;  %vm5594_vm4 = vcmp.ge.f32.partialorder %v5520_v8, 0.0 }
 0xf94   : > { %v5609_v33 = vmul.f32 0.01, %v5515_v7  ;;  %vm5593_vm5 = vcmp.ge.f32.partialorder %v5515_v7, 0.0 }
 0xf95   : > { %v13776_v39 = vpop.f32.mrb[218].mxu1  ;;  %v5626_v28 = vsel %vm5594_vm4, %v5520_v8, %v5610_v48 }
 0xf96   : > { %v5530_v40 = vadd.f32 %v13776_v39, %v1591_v0  ;;  %v5524_v32 = vpop.f32.mrb[219].mxu1  ;;  %v5625_v2 = vsel %vm5593_vm5, %v5515_v7, %v5609_v33  ;;  %v19680_v7 = vld [vmem:[#allocation26_spill] sm:$0xff]  ;;  %v19681_v33 = vld [vmem:[#allocation24_spill] sm:$0xff] }
 0xf97   : > { %v5525_v60 = vadd.f32 %v5524_v32, %v1585_v49  ;;  %13827 = vmatprep.mubr.f32.mxu0 %v5625_v2  ;;  %v1615_v48 = vadd.f32 %v19680_v7, %v18379_v37  ;;  %v1609_v39 = vadd.f32 %v19681_v33, %v18379_v37  ;;  %v19685_v7 = vld [vmem:[#allocation32_spill] sm:$0xff] }
 0xf98   : > { %v5612_v46 = vmul.f32 0.01, %v5530_v40  ;;  %13828 = vmatmul.mubr.f32.vlgmr.msra.gmra.mrb[216].mxu0 %v5626_v28  ;;  %vm5596_vm7 = vcmp.ge.f32.partialorder %v5530_v40, 0.0 }
 0xf99   : > { %v5611_v29 = vmul.f32 0.01, %v5525_v60  ;;  %v13779_v12 = vpop.f32.mrb[220].mxu1  ;;  %vm5595_vm6 = vcmp.ge.f32.partialorder %v5525_v60, 0.0 }
 0xf9a   : > { %v5540_v23 = vadd.f32 %v13779_v12, %v1603_v17  ;;  %v5534_v63 = vpop.f32.mrb[221].mxu1  ;;  %v5628_v8 = vsel %vm5596_vm7, %v5530_v40, %v5612_v46  ;;  %v19682_v46 = vld [vmem:[#allocation30_spill] sm:$0xff]  ;;  %v19683_v12 = vld [vmem:[#allocation28_spill] sm:$0xff] }
 0xf9b   : > { %v5535_v13 = vadd.f32 %v5534_v63, %v1597_v44  ;;  %v5627_v52 = vsel %vm5595_vm6, %v5525_v60, %v5611_v29  ;;  %v1627_v1 = vadd.f32 %v19682_v46, %v18379_v37  ;;  %v1621_v61 = vadd.f32 %v19683_v12, %v18379_v37 }
 0xf9c   : > { %v5614_v16 = vmul.f32 0.01, %v5540_v23  ;;  %13830 = vmatprep.mubr.f32.mxu0 %v5627_v52  ;;  %vm5598_vm8 = vcmp.ge.f32.partialorder %v5540_v23, 0.0  ;;  %v19684_v52 = vld [vmem:[#allocation34_spill] sm:$0xff] }
 0xf9d   : > { %v5613_v26 = vmul.f32 0.01, %v5535_v13  ;;  %13831 = vmatmul.mubr.f32.gmra.mrb[218].mxu0 %v5628_v8  ;;  %vm5597_vm1 = vcmp.ge.f32.partialorder %v5535_v13, 0.0 }
 0xf9e   : > { %v5630_v38 = vsel %vm5598_vm8, %v5540_v23, %v5614_v16  ;;  %v1639_v16 = vadd.f32 %v19684_v52, %v18379_v37 }
 0xf9f   : > { %v5629_v25 = vsel %vm5597_vm1, %v5535_v13, %v5613_v26 }
 0xfa0   : > { %v13782_v0 = vpop.f32.mrb[222].mxu1  ;;  %13833 = vmatprep.mubr.f32.mxu0 %v5629_v25 }
 0xfa1   : > { %v5550_v49 = vadd.f32 %v13782_v0, %v1615_v48  ;;  %v5544_v32 = vpop.f32.mrb[223].mxu1  ;;  %13834 = vmatmul.mubr.f32.gmra.mrb[220].mxu0 %v5630_v38  ;;  %v1633_v48 = vadd.f32 %v19685_v7, %v18379_v37 }
 0xfa2   : > { %v5545_v60 = vadd.f32 %v5544_v32, %v1609_v39 }
 0xfa3   : > { %v5616_v2 = vmul.f32 0.01, %v5550_v49  ;;  %vm5600_vm11 = vcmp.ge.f32.partialorder %v5550_v49, 0.0 }
 0xfa4   : > { %v5615_v40 = vmul.f32 0.01, %v5545_v60  ;;  %vm5599_vm9 = vcmp.ge.f32.partialorder %v5545_v60, 0.0 }
 0xfa5   : > { %v5632_v17 = vsel %vm5600_vm11, %v5550_v49, %v5616_v2  ;;  %v19686_v49 = vld [vmem:[#allocation38_spill] sm:$0xff] }
 0xfa6   : > { %v5631_v28 = vsel %vm5599_vm9, %v5545_v60, %v5615_v40  ;;  %v1651_v32 = vadd.f32 %v19686_v49, %v18379_v37 }
 0xfa7   : > { %13836 = vmatprep.mubr.f32.mxu0 %v5631_v28  ;;  %v19687_v28 = vld [vmem:[#allocation36_spill] sm:$0xff] }
 0xfa8   : > { %v13785_v29 = vpop.f32.mrb[224].mxu1  ;;  %13837 = vmatmul.mubr.f32.gmra.mrb[222].mxu0 %v5632_v17  ;;  %v1645_v46 = vadd.f32 %v19687_v28, %v18379_v37  ;;  %v6236_v28 = vld [vmem:[#allocation2 + $0x820] sm:$0xff] }
 0xfa9   : > { %v5560_v44 = vadd.f32 %v13785_v29, %v1627_v1  ;;  %v5554_v23 = vpop.f32.mrb[225].mxu1 }
 0xfaa   : > { %v5555_v63 = vadd.f32 %v5554_v23, %v1621_v61  ;;  %v19688_v23 = vld [vmem:[#allocation44_spill] sm:$0xff] }
 0xfab   : > { %v5618_v13 = vmul.f32 0.01, %v5560_v44  ;;  %vm5602_vm13 = vcmp.ge.f32.partialorder %v5560_v44, 0.0 }
 0xfac   : > { %v5617_v8 = vmul.f32 0.01, %v5555_v63  ;;  %v13788_v26 = vpop.f32.mrb[226].mxu1  ;;  %vm5601_vm12 = vcmp.ge.f32.partialorder %v5555_v63, 0.0 }
 0xfad   : > { %v5570_v25 = vadd.f32 %v13788_v26, %v1639_v16  ;;  %v5564_v0 = vpop.f32.mrb[227].mxu1  ;;  %v5634_v60 = vsel %vm5602_vm13, %v5560_v44, %v5618_v13  ;;  %v19689_v13 = vld [vmem:[#allocation41_spill] sm:$0xff] }
 0xfae   : > { %v5565_v33 = vadd.f32 %v5564_v0, %v1633_v48  ;;  %v5633_v39 = vsel %vm5601_vm12, %v5555_v63, %v5617_v8  ;;  %v1663_v63 = vadd.f32 %v19688_v23, %v18379_v37  ;;  %v1657_v8 = vadd.f32 %v19689_v13, %v18379_v37  ;;  %v6063_v23 = vld [vmem:[#allocation2 + $0x7c0] sm:$0xff] }
 0xfaf   : > { %v5620_v38 = vmul.f32 0.01, %v5570_v25  ;;  %13839 = vmatprep.mubr.f32.mxu0 %v5633_v39  ;;  %vm5604_vm0 = vcmp.ge.f32.partialorder %v5570_v25, 0.0 }
 0xfb0   : > { %v5619_v2 = vmul.f32 0.01, %v5565_v33  ;;  %v13791_v40 = vpop.f32.mrb[228].mxu1  ;;  %13840 = vmatmul.mubr.f32.gmra.mrb[224].mxu0 %v5634_v60  ;;  %vm5603_vm14 = vcmp.ge.f32.partialorder %v5565_v33, 0.0  ;;  %v5865_v60 = vld [vmem:[#allocation2 + $0x798] sm:$0xff] }
 0xfb1   : > { %v5580_v1 = vadd.f32 %v13791_v40, %v1651_v32  ;;  %v5574_v17 = vpop.f32.mrb[229].mxu1  ;;  %v5636_v52 = vsel %vm5604_vm0, %v5570_v25, %v5620_v38  ;;  %v5864_v32 = vld [vmem:[#allocation2 + $0x790] sm:$0xff]  ;;  %v6060_v40 = vld [vmem:[#allocation2 + $0x7a8] sm:$0xff] }
 0xfb2   : > { %v5575_v29 = vadd.f32 %v5574_v17, %v1645_v46  ;;  %v5635_v12 = vsel %vm5603_vm14, %v5565_v33, %v5619_v2  ;;  %v15533_v37 = vpack.c.bf16 %v5865_v60, %v5864_v32  ;;  %v6059_v2 = vld [vmem:[#allocation2 + $0x7a0] sm:$0xff]  ;;  %v6237_v17 = vld [vmem:[#allocation2 + $0x828] sm:$0xff] }
 0xfb3   : > { %v5622_v61 = vmul.f32 0.01, %v5580_v1  ;;  %13842 = vmatprep.mubr.f32.mxu0 %v5635_v12  ;;  %vm5606_vm2 = vcmp.ge.f32.partialorder %v5580_v1, 0.0  ;;  %v15537_v46 = vpack.c.bf16 %v6060_v40, %v6059_v2  ;;  %v15569_v12 = vpack.c.bf16 %v6237_v17, %v6236_v28  ;;  %v6239_v2 = vld [vmem:[#allocation2 + $0x838] sm:$0xff] }
 0xfb4   : > { %v5621_v16 = vmul.f32 0.01, %v5575_v29  ;;  %v13794_v44 = vpop.f32.mrb[230].mxu1  ;;  %13843 = vmatmul.mubr.f32.gmra.mrb[226].mxu0 %v5636_v52  ;;  %vm5605_vm15 = vcmp.ge.f32.partialorder %v5575_v29, 0.0  ;;  %15534 = vmatprep.subr.bf16.mxu1 %v15533_v37 }
 0xfb5   : > { %v5590_v26 = vadd.f32 %v13794_v44, %v1663_v63  ;;  %v5584_v7 = vpop.f32.mrb[231].mxu1  ;;  %v5638_v33 = vsel %vm5606_vm2, %v5580_v1, %v5622_v61  ;;  %15536 = vmatpush3.bf16.msra.mxu1 %v15533_v37  ;;  %v6062_v1 = vld [vmem:[#allocation2 + $0x7b8] sm:$0xff]  ;;  %15538 = vmatprep.subr.bf16.mxu0 %v15537_v46  ;;  %v6064_v63 = vld [vmem:[#allocation2 + $0x7c8] sm:$0xff]  ;;  %v6238_v37 = vld [vmem:[#allocation2 + $0x830] sm:$0xff] }
 0xfb6   : > { %v5585_v48 = vadd.f32 %v5584_v7, %v1657_v8  ;;  %v5637_v0 = vsel %vm5605_vm15, %v5575_v29, %v5621_v16  ;;  %v6061_v29 = vld [vmem:[#allocation2 + $0x7b0] sm:$0xff]  ;;  %15540 = vmatpush3.bf16.msra.mxu0 %v15537_v46  ;;  %15570 = vmatprep.subr.bf16.mxu1 %v15569_v12  ;;  %v15545_v52 = vpack.c.bf16 %v6064_v63, %v6063_v23  ;;  %v6066_v44 = vld [vmem:[#allocation2 + $0x7d8] sm:$0xff]  ;;  %v6067_v8 = vld [vmem:[#allocation2 + $0x7e0] sm:$0xff] }
 0xfb7   : > { %v5624_v39 = vmul.f32 0.01, %v5590_v26  ;;  %13845 = vmatprep.mubr.f32.mxu0 %v5637_v0  ;;  %vm5608_vm4 = vcmp.ge.f32.partialorder %v5590_v26, 0.0  ;;  %v15541_v61 = vpack.c.bf16 %v6062_v1, %v6061_v29  ;;  %v6065_v16 = vld [vmem:[#allocation2 + $0x7d0] sm:$0xff]  ;;  %v6070_v0 = vld [vmem:[#allocation2 + $0x7f8] sm:$0xff]  ;;  %v15573_v17 = vpack.c.bf16 %v6239_v2, %v6238_v37  ;;  %v6240_v23 = vld [vmem:[#allocation2 + $0x840] sm:$0xff] }
 0xfb8   : > { %v5623_v49 = vmul.f32 0.01, %v5585_v48  ;;  %13846 = vmatmul.mubr.f32.gmra.mrb[228].mxu0 %v5638_v33  ;;  %vm5607_vm3 = vcmp.ge.f32.partialorder %v5585_v48, 0.0  ;;  %v15549_v13 = vpack.c.bf16 %v6066_v44, %v6065_v16  ;;  %v6071_v33 = vld [vmem:[#allocation2 + $0x800] sm:$0xff]  ;;  %v6241_v63 = vld [vmem:[#allocation2 + $0x848] sm:$0xff] }
 0xfb9   : > { %v5640_v38 = vsel %vm5608_vm4, %v5590_v26, %v5624_v39  ;;  %15542 = vmatprep.subr.bf16.mxu0 %v15541_v61  ;;  %v6068_v26 = vld [vmem:[#allocation2 + $0x7e8] sm:$0xff] }
 0xfba   : > { %v5639_v25 = vsel %vm5607_vm3, %v5585_v48, %v5623_v49  ;;  %15544 = vmatpush3.bf16.msra.mxu0 %v15541_v61  ;;  %v15553_v7 = vpack.c.bf16 %v6068_v26, %v6067_v8  ;;  %v6069_v48 = vld [vmem:[#allocation2 + $0x7f0] sm:$0xff]  ;;  %v6072_v49 = vld [vmem:[#allocation2 + $0x808] sm:$0xff] }
 0xfbb   : > { %13848 = vmatprep.mubr.f32.mxu0 %v5639_v25  ;;  %15546 = vmatprep.subr.bf16.mxu0 %v15545_v52  ;;  %v15557_v39 = vpack.c.bf16 %v6070_v0, %v6069_v48  ;;  %v15561_v25 = vpack.c.bf16 %v6072_v49, %v6071_v33  ;;  %v6242_v48 = vld [vmem:[#allocation2 + $0x850] sm:$0xff]  ;;  %v6243_v0 = vld [vmem:[#allocation2 + $0x858] sm:$0xff] }
 0xfbc   : > { %13849 = vmatmul.mubr.f32.gmra.mrb[230].mxu0 %v5640_v38  ;;  %v15581_v49 = vpack.c.bf16 %v6243_v0, %v6242_v48 }
 0xfbe   : > { %15548 = vmatpush3.bf16.msra.mxu0 %v15545_v52 }
 0xfbf   : > { %15550 = vmatprep.subr.bf16.mxu0 %v15549_v13 }
 0xfc2   : > { %15552 = vmatpush3.bf16.msra.mxu0 %v15549_v13  ;;  %v15577_v13 = vpack.c.bf16 %v6241_v63, %v6240_v23  ;;  %v6249_v23 = vld [vmem:[#allocation2 + $0x888] sm:$0xff] }
 0xfc3   : > { %15554 = vmatprep.subr.bf16.mxu0 %v15553_v7 }
 0xfc6   : > { %15556 = vmatpush3.bf16.msra.mxu0 %v15553_v7 }
 0xfc7   : > { %15558 = vmatprep.subr.bf16.mxu0 %v15557_v39 }
 0xfca   : > { %15560 = vmatpush3.bf16.msra.mxu0 %v15557_v39 }
 0xfcb   : > { %15562 = vmatprep.subr.bf16.mxu0 %v15561_v25 }
 0xfce   : > { %15564 = vmatpush3.bf16.msra.mxu0 %v15561_v25  ;;  %v6244_v25 = vld [vmem:[#allocation2 + $0x860] sm:$0xff] }
0x106b   : > { %v13829_v38 = vpop.f32.mrb[216].mxu0 }
0x106c   : > { %v5819_v32 = vmul.f32 0.01, %v13829_v38  ;;  %v5723_v60 = vpop.f32.mrb[217].mxu0  ;;  %vm5803_vm5 = vcmp.ge.f32.partialorder %v13829_v38, 0.0 }
0x106d   : > { %vm5802_vm6 = vcmp.ge.f32.partialorder %v5723_v60, 0.0  ;;  %v5818_v40 = vmul.f32 0.01, %v5723_v60 }
0x106e   : > { %v5835_v29 = vsel %vm5803_vm5, %v13829_v38, %v5819_v32  ;;  %v6245_v38 = vld [vmem:[#allocation2 + $0x868] sm:$0xff] }
0x106f   : > { %v5834_v46 = vsel %vm5802_vm6, %v5723_v60, %v5818_v40  ;;  %v15585_v2 = vpack.c.bf16 %v6245_v38, %v6244_v25 }
0x1070   : > { %v13832_v28 = vpop.f32.mrb[218].mxu0  ;;  %13883 = vmatprep.mubr.f32.mxu1 %v5834_v46  ;;  %v6247_v46 = vld [vmem:[#allocation2 + $0x878] sm:$0xff] }
0x1071   : > { %v5821_v1 = vmul.f32 0.01, %v13832_v28  ;;  %v5733_v61 = vpop.f32.mrb[219].mxu0  ;;  %vm5805_vm7 = vcmp.ge.f32.partialorder %v13832_v28, 0.0  ;;  %13884 = vmatmul.mubr.f32.vlgmr.msra.gmra.mrb[232].mxu1 %v5835_v29 }
0x1072   : > { %vm5804_vm1 = vcmp.ge.f32.partialorder %v5733_v61, 0.0  ;;  %v5820_v52 = vmul.f32 0.01, %v5733_v61  ;;  %15572 = vmatpush3.bf16.msra.mxu1 %v15569_v12 }
0x1073   : > { %15574 = vmatprep.subr.bf16.mxu1 %v15573_v17  ;;  %v5837_v7 = vsel %vm5805_vm7, %v13832_v28, %v5821_v1  ;;  %v6246_v28 = vld [vmem:[#allocation2 + $0x870] sm:$0xff] }
0x1074   : > { %v13835_v16 = vpop.f32.mrb[220].mxu0  ;;  %v5836_v44 = vsel %vm5804_vm1, %v5733_v61, %v5820_v52  ;;  %v15589_v1 = vpack.c.bf16 %v6247_v46, %v6246_v28  ;;  %v6248_v61 = vld [vmem:[#allocation2 + $0x880] sm:$0xff] }
0x1075   : > { %v5823_v8 = vmul.f32 0.01, %v13835_v16  ;;  %v5743_v26 = vpop.f32.mrb[221].mxu0  ;;  %13886 = vmatprep.mubr.f32.mxu1 %v5836_v44  ;;  %vm5807_vm8 = vcmp.ge.f32.partialorder %v13835_v16, 0.0  ;;  %v15593_v44 = vpack.c.bf16 %v6249_v23, %v6248_v61  ;;  %v6074_v61 = vld [vmem:[#allocation2 + $0x818] sm:$0xff]  ;;  %v6250_v23 = vld [vmem:[#allocation2 + $0x890] sm:$0xff] }
0x1076   : > { %vm5806_vm9 = vcmp.ge.f32.partialorder %v5743_v26, 0.0  ;;  %v5822_v39 = vmul.f32 0.01, %v5743_v26  ;;  %13887 = vmatmul.mubr.f32.gmra.mrb[234].mxu1 %v5837_v7 }
0x1077   : > { %15576 = vmatpush3.bf16.msra.mxu1 %v15573_v17  ;;  %v5839_v12 = vsel %vm5807_vm8, %v13835_v16, %v5823_v8 }
0x1078   : > { %v5838_v33 = vsel %vm5806_vm9, %v5743_v26, %v5822_v39  ;;  %15578 = vmatprep.subr.bf16.mxu1 %v15577_v13 }
0x1079   : > { %13889 = vmatprep.mubr.f32.mxu1 %v5838_v33 }
0x107a   : > { %13890 = vmatmul.mubr.f32.gmra.mrb[236].mxu1 %v5839_v12 }
0x107b   : > { %v13838_v32 = vpop.f32.mrb[222].mxu0  ;;  %15580 = vmatpush3.bf16.msra.mxu1 %v15577_v13 }
0x107c   : > { %v5825_v60 = vmul.f32 0.01, %v13838_v32  ;;  %v5753_v37 = vpop.f32.mrb[223].mxu0  ;;  %15582 = vmatprep.subr.bf16.mxu1 %v15581_v49  ;;  %vm5809_vm11 = vcmp.ge.f32.partialorder %v13838_v32, 0.0 }
0x107d   : > { %vm5808_vm12 = vcmp.ge.f32.partialorder %v5753_v37, 0.0  ;;  %v5824_v40 = vmul.f32 0.01, %v5753_v37 }
0x107e   : > { %v5841_v29 = vsel %vm5809_vm11, %v13838_v32, %v5825_v60 }
0x107f   : > { %v5840_v17 = vsel %vm5808_vm12, %v5753_v37, %v5824_v40  ;;  %15584 = vmatpush3.bf16.msra.mxu1 %v15581_v49 }
0x1080   : > { %13892 = vmatprep.mubr.f32.mxu1 %v5840_v17  ;;  %15586 = vmatprep.subr.bf16.mxu1 %v15585_v2 }
0x1081   : > { %13893 = vmatmul.mubr.f32.gmra.mrb[238].mxu1 %v5841_v29 }
0x1083   : > { %v13841_v63 = vpop.f32.mrb[224].mxu0  ;;  %15588 = vmatpush3.bf16.msra.mxu1 %v15585_v2 }
0x1084   : > { %v5827_v52 = vmul.f32 0.01, %v13841_v63  ;;  %v5763_v16 = vpop.f32.mrb[225].mxu0  ;;  %15590 = vmatprep.subr.bf16.mxu1 %v15589_v1  ;;  %vm5811_vm13 = vcmp.ge.f32.partialorder %v13841_v63, 0.0 }
0x1085   : > { %vm5810_vm14 = vcmp.ge.f32.partialorder %v5763_v16, 0.0  ;;  %v5826_v13 = vmul.f32 0.01, %v5763_v16 }
0x1086   : > { %v5843_v0 = vsel %vm5811_vm13, %v13841_v63, %v5827_v52  ;;  %v6251_v52 = vld [vmem:[#allocation2 + $0x898] sm:$0xff] }
0x1087   : > { %v13844_v8 = vpop.f32.mrb[226].mxu0  ;;  %v5842_v26 = vsel %vm5810_vm14, %v5763_v16, %v5826_v13  ;;  %15592 = vmatpush3.bf16.msra.mxu1 %v15589_v1  ;;  %v6073_v1 = vld [vmem:[#allocation2 + $0x810] sm:$0xff]  ;;  %v15597_v16 = vpack.c.bf16 %v6251_v52, %v6250_v23 }
0x1088   : > { %v5829_v7 = vmul.f32 0.01, %v13844_v8  ;;  %v5773_v48 = vpop.f32.mrb[227].mxu0  ;;  %13895 = vmatprep.mubr.f32.mxu1 %v5842_v26  ;;  %15594 = vmatprep.subr.bf16.mxu1 %v15593_v44  ;;  %vm5813_vm0 = vcmp.ge.f32.partialorder %v13844_v8, 0.0  ;;  %v15565_v63 = vpack.c.bf16 %v6074_v61, %v6073_v1 }
0x1089   : > { %vm5812_vm15 = vcmp.ge.f32.partialorder %v5773_v48, 0.0  ;;  %v5828_v39 = vmul.f32 0.01, %v5773_v48  ;;  %13896 = vmatmul.mubr.f32.gmra.mrb[240].mxu1 %v5843_v0 }
0x108a   : > { %v5845_v38 = vsel %vm5813_vm0, %v13844_v8, %v5829_v7  ;;  %15566 = vmatprep.subr.bf16.mxu0 %v15565_v63 }
0x108b   : > { %v13847_v33 = vpop.f32.mrb[228].mxu0  ;;  %v5844_v49 = vsel %vm5812_vm15, %v5773_v48, %v5828_v39  ;;  %15596 = vmatpush3.bf16.msra.mxu1 %v15593_v44  ;;  %15568 = vmatpush3.bf16.msra.mxu0 %v15565_v63 }
0x108c   : > { %v5831_v12 = vmul.f32 0.01, %v13847_v33  ;;  %v5783_v25 = vpop.f32.mrb[229].mxu0  ;;  %13898 = vmatprep.mubr.f32.mxu1 %v5844_v49  ;;  %vm5815_vm2 = vcmp.ge.f32.partialorder %v13847_v33, 0.0  ;;  %15598 = vmatprep.subr.bf16.mxu1 %v15597_v16 }
0x108d   : > { %vm5814_vm3 = vcmp.ge.f32.partialorder %v5783_v25, 0.0  ;;  %v5830_v32 = vmul.f32 0.01, %v5783_v25  ;;  %13899 = vmatmul.mubr.f32.gmra.mrb[242].mxu1 %v5845_v38 }
0x108e   : > { %v5847_v28 = vsel %vm5815_vm2, %v13847_v33, %v5831_v12 }
0x108f   : > { %v13850_v60 = vpop.f32.mrb[230].mxu0  ;;  %v5846_v37 = vsel %vm5814_vm3, %v5783_v25, %v5830_v32  ;;  %15600 = vmatpush3.bf16.msra.mxu1 %v15597_v16 }
0x1090   : > { %v5833_v2 = vmul.f32 0.01, %v13850_v60  ;;  %v5793_v40 = vpop.f32.mrb[231].mxu0  ;;  %13901 = vmatprep.mubr.f32.mxu1 %v5846_v37  ;;  %vm5817_vm4 = vcmp.ge.f32.partialorder %v13850_v60, 0.0 }
0x1091   : > { %vm5816_vm5 = vcmp.ge.f32.partialorder %v5793_v40, 0.0  ;;  %v5832_v46 = vmul.f32 0.01, %v5793_v40  ;;  %13902 = vmatmul.mubr.f32.gmra.mrb[244].mxu1 %v5847_v28 }
0x1092   : > { %v5849_v29 = vsel %vm5817_vm4, %v13850_v60, %v5833_v2 }
0x1093   : > { %v5848_v17 = vsel %vm5816_vm5, %v5793_v40, %v5832_v46 }
0x1094   : > { %13904 = vmatprep.mubr.f32.mxu1 %v5848_v17 }
0x1095   : > { %13905 = vmatmul.mubr.f32.gmra.mrb[246].mxu1 %v5849_v29 }
0x1144   : > { %v13885_v44 = vpop.f32.mrb[232].mxu1 }
0x1145   : > { %v6028_v13 = vmul.f32 0.01, %v13885_v44  ;;  %v5932_v8 = vpop.f32.mrb[233].mxu1  ;;  %vm6012_vm6 = vcmp.ge.f32.partialorder %v13885_v44, 0.0 }
0x1146   : > { %vm6011_vm7 = vcmp.ge.f32.partialorder %v5932_v8, 0.0  ;;  %v6027_v26 = vmul.f32 0.01, %v5932_v8 }
0x1147   : > { %v6044_v0 = vsel %vm6012_vm6, %v13885_v44, %v6028_v13 }
0x1148   : > { %v6043_v48 = vsel %vm6011_vm7, %v5932_v8, %v6027_v26 }
0x1149   : > { %v13888_v7 = vpop.f32.mrb[234].mxu1  ;;  %13939 = vmatprep.mubr.f32.mxu0 %v6043_v48  ;;  %13995 = vmatprep.mubr.f32.mxu1 %v6043_v48 }
0x114a   : > { %v6030_v39 = vmul.f32 0.01, %v13888_v7  ;;  %v5942_v33 = vpop.f32.mrb[235].mxu1  ;;  %vm6014_vm1 = vcmp.ge.f32.partialorder %v13888_v7, 0.0  ;;  %13940 = vmatmul.mubr.f32.vlgmr.msra.gmra.mrb[232].mxu0 %v6044_v0  ;;  %13996 = vmatmul.mubr.f32.vlgmr.msra.gmra.mrb[248].mxu1 %v6044_v0 }
0x114b   : > { %vm6013_vm8 = vcmp.ge.f32.partialorder %v5942_v33, 0.0  ;;  %v6029_v49 = vmul.f32 0.01, %v5942_v33 }
0x114c   : > { %v6046_v60 = vsel %vm6014_vm1, %v13888_v7, %v6030_v39 }
0x114d   : > { %v13891_v12 = vpop.f32.mrb[236].mxu1  ;;  %v6045_v25 = vsel %vm6013_vm8, %v5942_v33, %v6029_v49 }
0x114e   : > { %v6032_v38 = vmul.f32 0.01, %v13891_v12  ;;  %v5952_v32 = vpop.f32.mrb[237].mxu1  ;;  %13942 = vmatprep.mubr.f32.mxu0 %v6045_v25  ;;  %13998 = vmatprep.mubr.f32.mxu1 %v6045_v25  ;;  %vm6016_vm9 = vcmp.ge.f32.partialorder %v13891_v12, 0.0 }
0x114f   : > { %vm6015_vm11 = vcmp.ge.f32.partialorder %v5952_v32, 0.0  ;;  %v6031_v37 = vmul.f32 0.01, %v5952_v32  ;;  %13943 = vmatmul.mubr.f32.gmra.mrb[234].mxu0 %v6046_v60  ;;  %13999 = vmatmul.mubr.f32.gmra.mrb[250].mxu1 %v6046_v60 }
0x1150   : > { %v6048_v40 = vsel %vm6016_vm9, %v13891_v12, %v6032_v38 }
0x1151   : > { %v6047_v2 = vsel %vm6015_vm11, %v5952_v32, %v6031_v37 }
0x1152   : > { %13945 = vmatprep.mubr.f32.mxu0 %v6047_v2  ;;  %14001 = vmatprep.mubr.f32.mxu1 %v6047_v2 }
0x1153   : > { %13946 = vmatmul.mubr.f32.gmra.mrb[236].mxu0 %v6048_v40  ;;  %14002 = vmatmul.mubr.f32.gmra.mrb[252].mxu1 %v6048_v40 }
0x1154   : > { %v13894_v28 = vpop.f32.mrb[238].mxu1 }
0x1155   : > { %v6034_v46 = vmul.f32 0.01, %v13894_v28  ;;  %v5962_v17 = vpop.f32.mrb[239].mxu1  ;;  %vm6018_vm12 = vcmp.ge.f32.partialorder %v13894_v28, 0.0 }
0x1156   : > { %vm6017_vm13 = vcmp.ge.f32.partialorder %v5962_v17, 0.0  ;;  %v6033_v29 = vmul.f32 0.01, %v5962_v17 }
0x1157   : > { %v6050_v61 = vsel %vm6018_vm12, %v13894_v28, %v6034_v46 }
0x1158   : > { %v6049_v1 = vsel %vm6017_vm13, %v5962_v17, %v6033_v29  ;;  %v6565_v17 = vld [vmem:[#allocation2 + $0x8a0] sm:$0xff]  ;;  %v6807_v29 = vld [vmem:[#allocation2 + $0x8a8] sm:$0xff] }
0x1159   : > { %13948 = vmatprep.mubr.f32.mxu0 %v6049_v1  ;;  %14004 = vmatprep.mubr.f32.mxu1 %v6049_v1  ;;  %v6808_v1 = vld [vmem:[#allocation2 + $0x8b0] sm:$0xff] }
0x115a   : > { %13949 = vmatmul.mubr.f32.gmra.mrb[238].mxu0 %v6050_v61  ;;  %14005 = vmatmul.mubr.f32.gmra.mrb[254].mxu1 %v6050_v61  ;;  %v6809_v61 = vld [vmem:[#allocation2 + $0x8b8] sm:$0xff] }
0x115b   : > { %14019 = vmatprep.subr.mxu0 %v6565_v17 }
0x115c   : > { %v13897_v23 = vpop.f32.mrb[240].mxu1  ;;  %14020 = vmatpush3.msra.mxu0 %v6565_v17 }
0x115d   : > { %v6036_v63 = vmul.f32 0.01, %v13897_v23  ;;  %v5972_v52 = vpop.f32.mrb[241].mxu1  ;;  %vm6020_vm14 = vcmp.ge.f32.partialorder %v13897_v23, 0.0 }
0x115e   : > { %vm6019_vm0 = vcmp.ge.f32.partialorder %v5972_v52, 0.0  ;;  %v6035_v16 = vmul.f32 0.01, %v5972_v52 }
0x115f   : > { %v6052_v7 = vsel %vm6020_vm14, %v13897_v23, %v6036_v63  ;;  %v15601_v23 = vpack.c.bf16 %v6808_v1, %v6807_v29  ;;  %v6810_v63 = vld [vmem:[#allocation2 + $0x8c0] sm:$0xff] }
0x1160   : > { %v13900_v44 = vpop.f32.mrb[242].mxu1  ;;  %v6051_v13 = vsel %vm6019_vm0, %v5972_v52, %v6035_v16  ;;  %v15605_v52 = vpack.c.bf16 %v6810_v63, %v6809_v61  ;;  %v6811_v16 = vld [vmem:[#allocation2 + $0x8c8] sm:$0xff] }
0x1161   : > { %v6038_v8 = vmul.f32 0.01, %v13900_v44  ;;  %v5982_v26 = vpop.f32.mrb[243].mxu1  ;;  %13951 = vmatprep.mubr.f32.mxu0 %v6051_v13  ;;  %14007 = vmatprep.mubr.f32.mxu1 %v6051_v13  ;;  %vm6022_vm15 = vcmp.ge.f32.partialorder %v13900_v44, 0.0 }
0x1162   : > { %vm6021_vm2 = vcmp.ge.f32.partialorder %v5982_v26, 0.0  ;;  %v6037_v48 = vmul.f32 0.01, %v5982_v26  ;;  %13952 = vmatmul.mubr.f32.gmra.mrb[240].mxu0 %v6052_v7  ;;  %14008 = vmatmul.mubr.f32.gmra.mrb[0].mxu1 %v6052_v7 }
0x1163   : > { %v6054_v12 = vsel %vm6022_vm15, %v13900_v44, %v6038_v8  ;;  %v6812_v44 = vld [vmem:[#allocation2 + $0x8d0] sm:$0xff]  ;;  %15602 = vmatprep.subr.bf16.mxu1 %v15601_v23  ;;  %v6813_v8 = vld [vmem:[#allocation2 + $0x8d8] sm:$0xff] }
0x1164   : > { %v13903_v0 = vpop.f32.mrb[244].mxu1  ;;  %v6053_v39 = vsel %vm6021_vm2, %v5982_v26, %v6037_v48  ;;  %15604 = vmatpush3.bf16.msra.mxu1 %v15601_v23  ;;  %v15609_v13 = vpack.c.bf16 %v6812_v44, %v6811_v16  ;;  %v6814_v26 = vld [vmem:[#allocation2 + $0x8e0] sm:$0xff]  ;;  %v6815_v48 = vld [vmem:[#allocation2 + $0x8e8] sm:$0xff] }
0x1165   : > { %v6040_v33 = vmul.f32 0.01, %v13903_v0  ;;  %v5992_v49 = vpop.f32.mrb[245].mxu1  ;;  %13954 = vmatprep.mubr.f32.mxu0 %v6053_v39  ;;  %14010 = vmatprep.mubr.f32.mxu1 %v6053_v39  ;;  %vm6024_vm3 = vcmp.ge.f32.partialorder %v13903_v0, 0.0  ;;  %v15613_v7 = vpack.c.bf16 %v6814_v26, %v6813_v8 }
0x1166   : > { %vm6023_vm4 = vcmp.ge.f32.partialorder %v5992_v49, 0.0  ;;  %v6039_v25 = vmul.f32 0.01, %v5992_v49  ;;  %13955 = vmatmul.mubr.f32.gmra.mrb[242].mxu0 %v6054_v12  ;;  %14011 = vmatmul.mubr.f32.gmra.mrb[2].mxu1 %v6054_v12 }
0x1167   : > { %v6056_v2 = vsel %vm6024_vm3, %v13903_v0, %v6040_v33  ;;  %15606 = vmatprep.subr.bf16.mxu1 %v15605_v52  ;;  %v6816_v0 = vld [vmem:[#allocation2 + $0x8f0] sm:$0xff]  ;;  %v6817_v33 = vld [vmem:[#allocation2 + $0x8f8] sm:$0xff] }
0x1168   : > { %v13906_v38 = vpop.f32.mrb[246].mxu1  ;;  %v6055_v32 = vsel %vm6023_vm4, %v5992_v49, %v6039_v25  ;;  %15608 = vmatpush3.bf16.msra.mxu1 %v15605_v52  ;;  %v15617_v39 = vpack.c.bf16 %v6816_v0, %v6815_v48  ;;  %v6818_v49 = vld [vmem:[#allocation2 + $0x900] sm:$0xff]  ;;  %v6819_v25 = vld [vmem:[#allocation2 + $0x908] sm:$0xff] }
0x1169   : > { %v6042_v60 = vmul.f32 0.01, %v13906_v38  ;;  %v6002_v37 = vpop.f32.mrb[247].mxu1  ;;  %13957 = vmatprep.mubr.f32.mxu0 %v6055_v32  ;;  %14013 = vmatprep.mubr.f32.mxu1 %v6055_v32  ;;  %vm6026_vm5 = vcmp.ge.f32.partialorder %v13906_v38, 0.0  ;;  %v15621_v12 = vpack.c.bf16 %v6818_v49, %v6817_v33 }
0x116a   : > { %vm6025_vm6 = vcmp.ge.f32.partialorder %v6002_v37, 0.0  ;;  %v6041_v40 = vmul.f32 0.01, %v6002_v37  ;;  %13958 = vmatmul.mubr.f32.gmra.mrb[244].mxu0 %v6056_v2  ;;  %14014 = vmatmul.mubr.f32.gmra.mrb[4].mxu1 %v6056_v2 }
0x116b   : > { %v6058_v46 = vsel %vm6026_vm5, %v13906_v38, %v6042_v60  ;;  %15610 = vmatprep.subr.bf16.mxu1 %v15609_v13  ;;  %v6820_v38 = vld [vmem:[#allocation2 + $0x910] sm:$0xff] }
0x116c   : > { %v6057_v28 = vsel %vm6025_vm6, %v6002_v37, %v6041_v40  ;;  %15612 = vmatpush3.bf16.msra.mxu1 %v15609_v13  ;;  %v15625_v32 = vpack.c.bf16 %v6820_v38, %v6819_v25 }
0x116d   : > { %13960 = vmatprep.mubr.f32.mxu0 %v6057_v28  ;;  %14016 = vmatprep.mubr.f32.mxu1 %v6057_v28 }
0x116e   : > { %13961 = vmatmul.mubr.f32.gmra.mrb[246].mxu0 %v6058_v46  ;;  %14017 = vmatmul.mubr.f32.gmra.mrb[6].mxu1 %v6058_v46 }
0x116f   : > { %15614 = vmatprep.subr.bf16.mxu1 %v15613_v7 }
0x1170   : > { %15616 = vmatpush3.bf16.msra.mxu1 %v15613_v7 }
0x1171   : > { %15618 = vmatprep.subr.bf16.mxu1 %v15617_v39 }
0x1174   : > { %15620 = vmatpush3.bf16.msra.mxu1 %v15617_v39 }
0x1175   : > { %15622 = vmatprep.subr.bf16.mxu1 %v15621_v12 }
0x1178   : > { %15624 = vmatpush3.bf16.msra.mxu1 %v15621_v12 }
0x1179   : > { %15626 = vmatprep.subr.bf16.mxu1 %v15625_v32 }
0x117c   : > { %15628 = vmatpush3.bf16.msra.mxu1 %v15625_v32 }
0x121d   : > { %v13941_v60 = vpop.f32.mrb[232].mxu0  ;;  %v13997_v37 = vpop.f32.mrb[248].mxu1 }
0x121e   : > { %16342 = vtanh.f32 %v13941_v60  ;;  %v6141_v2 = vpop.f32.mrb[233].mxu0  ;;  %v18413_v40 = vpop.f32.mrb[249].mxu1 }
0x121f   : > { %16344 = vtanh.f32 %v6141_v2 }
0x1222   : > { %v13944_v28 = vpop.f32.mrb[234].mxu0  ;;  %v18415_v46 = vpop.f32.mrb[250].mxu1 }
0x1223   : > { %16346 = vtanh.f32 %v13944_v28  ;;  %v6151_v17 = vpop.f32.mrb[235].mxu0  ;;  %v18417_v29 = vpop.f32.mrb[251].mxu1 }
0x1224   : > { %16348 = vtanh.f32 %v6151_v17 }
0x1226   : > { %v13947_v1 = vpop.f32.mrb[236].mxu0  ;;  %v18419_v61 = vpop.f32.mrb[252].mxu1 }
0x1227   : > { %16350 = vtanh.f32 %v13947_v1  ;;  %v6161_v23 = vpop.f32.mrb[237].mxu0  ;;  %v18421_v63 = vpop.f32.mrb[253].mxu1 }
0x1228   : > { %16352 = vtanh.f32 %v6161_v23  ;;  %v16343_v52 = vpop.eup %16342 }
0x1229   : > { %v16345_v16 = vpop.eup %16344  ;;  %v6415_v44 = vmul.f32 1.442695, %v16343_v52  ;;  %v18424_v13 = vadd.f32 %v16343_v52, %v18201_v41 }
0x122a   : > { %v6413_v8 = vmul.f32 1.442695, %v16345_v16  ;;  %v18427_v26 = vadd.f32 %v16345_v16, %v18203_v21 }
0x122b   : > { %16354 = vpow2.f32 %v6415_v44  ;;  %v19690_v44 = vld [vmem:[#allocation8_spill] sm:$0xff] }
0x122c   : > { %16356 = vpow2.f32 %v6413_v8  ;;  %v19525_v8 = vsub.s32 6, %v19690_v44 }
0x122d   : > { %v16347_v7 = vpop.eup %16346  ;;  %v13950_v48 = vpop.f32.mrb[238].mxu0 }
0x122e   : > { %v18429_v0 = vpop.f32.mrb[254].mxu1  ;;  %v16349_v39 = vpop.eup %16348  ;;  %v6419_v33 = vmul.f32 1.442695, %v16347_v7  ;;  %16358 = vtanh.f32 %v13950_v48  ;;  %v18434_v25 = vadd.f32 %v16347_v7, %v18211_v36  ;;  %v16663_v7 = vld [vmem:[#allocation2 + $0x78] sm:$0xff] }
0x122f   : > { %v6171_v49 = vpop.f32.mrb[239].mxu0  ;;  %v18431_v12 = vpop.f32.mrb[255].mxu1  ;;  %v6417_v41 = vmul.f32 1.442695, %v16349_v39  ;;  %v18437_v21 = vadd.f32 %v16349_v39, %v18215_v34  ;;  %v18452_v48 = vrot.slane %v16663_v7, %v19646_v58 }
0x1230   : > { %16360 = vtanh.f32 %v6171_v49 }
0x1231   : > { %16362 = vpow2.f32 %v6419_v33  ;;  %v16351_v38 = vpop.eup %16350 }
0x1232   : > { %16364 = vpow2.f32 %v6417_v41  ;;  %v16353_v32 = vpop.eup %16352  ;;  %v6423_v60 = vmul.f32 1.442695, %v16351_v38  ;;  %v18440_v2 = vadd.f32 %v16351_v38, %v18221_v20  ;;  %v18457_v41 = vrot.slane %v16663_v7, %v19525_v8 }
0x1233   : > { %v6421_v28 = vmul.f32 1.442695, %v16353_v32  ;;  %v18443_v17 = vadd.f32 %v16353_v32, %v18223_v59 }
0x1234   : > { %16366 = vpow2.f32 %v6423_v60 }
0x1235   : > { %16368 = vpow2.f32 %v6421_v28  ;;  %v13953_v36 = vpop.f32.mrb[240].mxu0  ;;  %v18445_v1 = vpop.f32.mrb[0].mxu1 }
0x1236   : > { %v16355_v23 = vpop.eup %16354  ;;  %16370 = vtanh.f32 %v13953_v36  ;;  %v6181_v34 = vpop.f32.mrb[241].mxu0 }
0x1237   : > { %v18447_v52 = vpop.f32.mrb[1].mxu1  ;;  %v16357_v16 = vpop.eup %16356  ;;  %v6446_v20 = vmul.f32 %v16355_v23, %v18240_v55  ;;  %16372 = vtanh.f32 %v6181_v34 }
0x1238   : > { %v16359_v59 = vpop.eup %16358  ;;  %v6445_v39 = vmul.f32 %v16357_v16, %v18245_v45 }
0x1239   : > { %v6462_v49 = vadd.f32 %v13997_v37, %v6446_v20  ;;  %v6427_v38 = vmul.f32 1.442695, %v16359_v59  ;;  %v13956_v32 = vpop.f32.mrb[242].mxu0  ;;  %v18459_v60 = vpop.f32.mrb[2].mxu1  ;;  %v18462_v55 = vadd.f32 %v16359_v59, %v18242_v14 }
0x123a   : > { %v16361_v33 = vpop.eup %16360  ;;  %v6461_v58 = vadd.f32 %v6445_v39, %v18413_v40  ;;  %16374 = vtanh.f32 %v13956_v32  ;;  %v6191_v23 = vpop.f32.mrb[243].mxu0 }
0x123b   : > { %v16363_v28 = vpop.eup %16362  ;;  %v6425_v36 = vmul.f32 1.442695, %v16361_v33  ;;  %v18465_v45 = vpop.f32.mrb[3].mxu1  ;;  %v18468_v37 = vadd.f32 %v16361_v33, %v18247_v5  ;;  %v6482_v16 = vadd.f32 %v18452_v48, %v6462_v49  ;;  %16376 = vpow2.f32 %v6427_v38 }
0x123c   : > { %v16365_v34 = vpop.eup %16364  ;;  %v6448_v20 = vmul.f32 %v16363_v28, %v18258_v15  ;;  %v6481_v14 = vadd.f32 %v18452_v48, %v6461_v58 }
0x123d   : > { %v6447_v7 = vmul.f32 %v16365_v34, %v18263_v56  ;;  %16378 = vpow2.f32 %v6425_v36  ;;  %v6502_v40 = vmul.f32 %v18457_v41, %v6482_v16  ;;  %v13959_v39 = vpop.f32.mrb[244].mxu0  ;;  %v18476_v32 = vpop.f32.mrb[4].mxu1 }
0x123e   : > { %v6464_v59 = vadd.f32 %v18415_v46, %v6448_v20  ;;  %16380 = vtanh.f32 %v6191_v23  ;;  %v16367_v5 = vpop.eup %16366  ;;  %v6501_v33 = vmul.f32 %v18457_v41, %v6481_v14  ;;  %v6201_v15 = vpop.f32.mrb[245].mxu0 }
0x123f   : > { %v6463_v49 = vadd.f32 %v6447_v7, %v18417_v29  ;;  %16382 = vtanh.f32 %v13959_v39  ;;  %v18480_v38 = vpop.f32.mrb[5].mxu1  ;;  %v16369_v28 = vpop.eup %16368  ;;  %vm6518_vm7 = vcmp.ge.f32.partialorder %v6502_v40, 0.0  ;;  %v6450_v58 = vmul.f32 %v16367_v5, %v18280_v19 }
0x1240   : > { %v6484_v56 = vadd.f32 %v18452_v48, %v6464_v59  ;;  %16384 = vtanh.f32 %v6201_v15  ;;  %v16371_v46 = vpop.eup %16370  ;;  %v6534_v36 = vsel %vm6518_vm7, 1.0, %v19643_v10  ;;  %vm6517_vm1 = vcmp.ge.f32.partialorder %v6501_v33, 0.0 }
0x1241   : > { %v6483_v23 = vadd.f32 %v18452_v48, %v6463_v49  ;;  %v6449_v34 = vmul.f32 %v16369_v28, %v18287_v22  ;;  %v16373_v29 = vpop.eup %16372  ;;  %v18487_v16 = vmul.f32 %v6534_v36, %v6502_v40  ;;  %v6533_v20 = vsel %vm6517_vm1, 1.0, %v19643_v10  ;;  %v13962_v59 = vpop.f32.mrb[246].mxu0 }
0x1242   : > { %v6504_v14 = vmul.f32 %v18457_v41, %v6484_v56  ;;  %v6466_v7 = vadd.f32 %v18419_v61, %v6450_v58  ;;  %v18492_v19 = vpop.f32.mrb[6].mxu1  ;;  %v18494_v39 = vmul.f32 %v6533_v20, %v6501_v33  ;;  %v6431_v15 = vmul.f32 1.442695, %v16371_v46  ;;  %v6211_v22 = vpop.f32.mrb[247].mxu0 }
0x1243   : > { %v6503_v5 = vmul.f32 %v18457_v41, %v6483_v23  ;;  %v6465_v49 = vadd.f32 %v6449_v34, %v18421_v63  ;;  %v18498_v28 = vpop.f32.mrb[7].mxu1  ;;  %v6429_v36 = vmul.f32 1.442695, %v16373_v29  ;;  %16386 = vtanh.f32 %v13962_v59 }
0x1244   : > { %vm6520_vm8 = vcmp.ge.f32.partialorder %v6504_v14, 0.0  ;;  %v6486_v40 = vadd.f32 %v18452_v48, %v6466_v7  ;;  %v16375_v56 = vpop.eup %16374  ;;  %16388 = vpow2.f32 %v6431_v15  ;;  %14021 = vmatprep.mubr.msk.f32.mxu0 %vm2077_vm10, %v18494_v39 }
0x1245   : > { %v6536_v61 = vsel %vm6520_vm8, 1.0, %v19643_v10  ;;  %vm6519_vm9 = vcmp.ge.f32.partialorder %v6503_v5, 0.0  ;;  %v6485_v33 = vadd.f32 %v18452_v48, %v6465_v49  ;;  %v16377_v63 = vpop.eup %16376  ;;  %16390 = vpow2.f32 %v6429_v36  ;;  %14022 = vmatmul.mubr.msk.f32.vlgmr.msra.gmra.mrb[248].mxu0 %vm2077_vm10, %v18487_v16 }
0x1246   : > { %v18505_v58 = vmul.f32 %v6536_v61, %v6504_v14  ;;  %v6535_v23 = vsel %vm6519_vm9, 1.0, %v19643_v10  ;;  %v6506_v34 = vmul.f32 %v18457_v41, %v6486_v40  ;;  %v6452_v49 = vmul.f32 %v16377_v63, %v18308_v3 }
0x1247   : > { %v16379_v20 = vpop.eup %16378  ;;  %v18511_v7 = vmul.f32 %v6535_v23, %v6503_v5  ;;  %v6505_v59 = vmul.f32 %v18457_v41, %v6485_v33  ;;  %v6435_v15 = vmul.f32 1.442695, %v16375_v56  ;;  %16392 = vtanh.f32 %v6211_v22 }
0x1248   : > { %v16381_v8 = vpop.eup %16380  ;;  %vm6522_vm11 = vcmp.ge.f32.partialorder %v6506_v34, 0.0  ;;  %v6451_v14 = vmul.f32 %v16379_v20, %v18313_v31  ;;  %v18517_v61 = vadd.f32 %v16373_v29, %v18289_v62  ;;  %v6468_v5 = vadd.f32 %v18429_v0, %v6452_v49 }
0x1249   : > { %v16383_v40 = vpop.eup %16382  ;;  %v6538_v36 = vsel %vm6522_vm11, 1.0, %v19643_v10  ;;  %vm6521_vm12 = vcmp.ge.f32.partialorder %v6505_v59, 0.0  ;;  %16394 = vpow2.f32 %v6435_v15  ;;  %14024 = vmatprep.mubr.msk.f32.mxu0 %vm2077_vm10, %v18511_v7  ;;  %v6433_v22 = vmul.f32 1.442695, %v16381_v8 }
0x124a   : > { %v16385_v3 = vpop.eup %16384  ;;  %v18523_v33 = vmul.f32 %v6538_v36, %v6506_v34  ;;  %v6537_v63 = vsel %vm6521_vm12, 1.0, %v19643_v10  ;;  %v6467_v31 = vadd.f32 %v6451_v14, %v18431_v12  ;;  %14025 = vmatmul.mubr.msk.f32.gmra.mrb[250].mxu0 %vm2077_vm10, %v18505_v58  ;;  %v6488_v29 = vadd.f32 %v18452_v48, %v6468_v5 }
0x124b   : > { %v18529_v62 = vmul.f32 %v6537_v63, %v6505_v59  ;;  %v6439_v0 = vmul.f32 1.442695, %v16383_v40  ;;  %v6437_v23 = vmul.f32 1.442695, %v16385_v3  ;;  %16396 = vpow2.f32 %v6433_v22 }
0x124c   : > { %v6487_v20 = vadd.f32 %v18452_v48, %v6467_v31  ;;  %v18534_v34 = vadd.f32 %v16371_v46, %v18282_v27  ;;  %v18537_v49 = vadd.f32 %v16381_v8, %v18295_v6  ;;  %v6508_v12 = vmul.f32 %v18457_v41, %v6488_v29 }
0x124d   : > { %16398 = vpow2.f32 %v6439_v0  ;;  %14027 = vmatprep.mubr.msk.f32.mxu0 %vm2077_vm10, %v18529_v62  ;;  %v18543_v59 = vadd.f32 %v16375_v56, %v18293_v42  ;;  %v18546_v15 = vadd.f32 %v16385_v3, %v18315_v51  ;;  %v16387_v14 = vpop.eup %16386  ;;  %v18552_v27 = vadd.f32 %v16383_v40, %v18310_v50 }
0x124e   : > { %v6507_v36 = vmul.f32 %v18457_v41, %v6487_v20  ;;  %16400 = vpow2.f32 %v6437_v23  ;;  %14028 = vmatmul.mubr.msk.f32.gmra.mrb[252].mxu0 %vm2077_vm10, %v18523_v33  ;;  %v16389_v6 = vpop.eup %16388  ;;  %vm6524_vm13 = vcmp.ge.f32.partialorder %v6508_v12, 0.0  ;;  %v6443_v8 = vmul.f32 1.442695, %v16387_v14 }
0x124f   : > { %v18555_v46 = vadd.f32 %v16387_v14, %v18321_v43  ;;  %v16391_v42 = vpop.eup %16390  ;;  %v6540_v51 = vsel %vm6524_vm13, 1.0, %v19643_v10  ;;  %v6454_v56 = vmul.f32 %v16389_v6, %v18332_v30 }
0x1250   : > { %vm6523_vm14 = vcmp.ge.f32.partialorder %v6507_v36, 0.0  ;;  %v6453_v3 = vmul.f32 %v16391_v42, %v18336_v47  ;;  %16402 = vpow2.f32 %v6443_v8  ;;  %v18564_v22 = vmul.f32 %v6540_v51, %v6508_v12 }
0x1251   : > { %v6539_v5 = vsel %vm6523_vm14, 1.0, %v19643_v10  ;;  %v16393_v63 = vpop.eup %16392  ;;  %v6470_v40 = vadd.f32 %v18445_v1, %v6454_v56 }
0x1252   : > { %v18561_v50 = vmul.f32 %v6539_v5, %v6507_v36  ;;  %v6469_v43 = vadd.f32 %v6453_v3, %v18447_v52  ;;  %v6441_v29 = vmul.f32 1.442695, %v16393_v63  ;;  %v18568_v0 = vadd.f32 %v16393_v63, %v18325_v18 }
0x1253   : > { %v16395_v31 = vpop.eup %16394  ;;  %v6490_v30 = vadd.f32 %v18452_v48, %v6470_v40 }
0x1254   : > { %v6456_v23 = vmul.f32 %v16395_v31, %v18340_v24  ;;  %14030 = vmatprep.mubr.msk.f32.mxu0 %vm2077_vm10, %v18561_v50  ;;  %v6489_v47 = vadd.f32 %v18452_v48, %v6469_v43  ;;  %16404 = vpow2.f32 %v6441_v29 }
0x1255   : > { %14031 = vmatmul.mubr.msk.f32.gmra.mrb[254].mxu0 %vm2077_vm10, %v18564_v22  ;;  %v16397_v1 = vpop.eup %16396  ;;  %v6510_v52 = vmul.f32 %v18457_v41, %v6490_v30 }
0x1256   : > { %v6472_v20 = vadd.f32 %v18459_v60, %v6456_v23  ;;  %v6509_v12 = vmul.f32 %v18457_v41, %v6489_v47  ;;  %v6455_v14 = vmul.f32 %v16397_v1, %v18343_v11 }
0x1257   : > { %v16399_v18 = vpop.eup %16398  ;;  %vm6526_vm0 = vcmp.ge.f32.partialorder %v6510_v52, 0.0 }
0x1258   : > { %v16401_v24 = vpop.eup %16400  ;;  %v6492_v36 = vadd.f32 %v18452_v48, %v6472_v20  ;;  %v6458_v6 = vmul.f32 %v16399_v18, %v18354_v54  ;;  %v6542_v8 = vsel %vm6526_vm0, 1.0, %v19643_v10  ;;  %vm6525_vm15 = vcmp.ge.f32.partialorder %v6509_v12, 0.0 }
0x1259   : > { %v6471_v42 = vadd.f32 %v6455_v14, %v18465_v45  ;;  %v6457_v51 = vmul.f32 %v16401_v24, %v18357_v9  ;;  %v6541_v60 = vsel %vm6525_vm15, 1.0, %v19643_v10  ;;  %v18593_v40 = vmul.f32 %v6542_v8, %v6510_v52 }
0x125a   : > { %v6512_v56 = vmul.f32 %v18457_v41, %v6492_v36  ;;  %v6474_v5 = vadd.f32 %v18476_v32, %v6458_v6  ;;  %v16403_v11 = vpop.eup %16402  ;;  %v18589_v3 = vmul.f32 %v6541_v60, %v6509_v12 }
0x125b   : > { %v6491_v63 = vadd.f32 %v18452_v48, %v6471_v42  ;;  %v6473_v54 = vadd.f32 %v6457_v51, %v18480_v38  ;;  %v6460_v9 = vmul.f32 %v16403_v11, %v18364_v35  ;;  %v6821_v51 = vld [vmem:[#allocation2 + $0x918] sm:$0xff] }
0x125c   : > { %vm6528_vm2 = vcmp.ge.f32.partialorder %v6512_v56, 0.0  ;;  %v6494_v45 = vadd.f32 %v18452_v48, %v6474_v5  ;;  %14033 = vmatprep.mubr.msk.f32.mxu0 %vm2077_vm10, %v18589_v3  ;;  %v7017_v5 = vld [vmem:[#allocation2 + $0x930] sm:$0xff]  ;;  %v7018_v11 = vld [vmem:[#allocation2 + $0x938] sm:$0xff] }
0x125d   : > { %v6511_v31 = vmul.f32 %v18457_v41, %v6491_v63  ;;  %v6493_v43 = vadd.f32 %v18452_v48, %v6473_v54  ;;  %v6476_v29 = vadd.f32 %v18492_v19, %v6460_v9  ;;  %14034 = vmatmul.mubr.msk.f32.gmra.mrb[0].mxu0 %vm2077_vm10, %v18593_v40  ;;  %v6544_v30 = vsel %vm6528_vm2, 1.0, %v19643_v10  ;;  %v7019_v54 = vld [vmem:[#allocation2 + $0x940] sm:$0xff]  ;;  %v7020_v9 = vld [vmem:[#allocation2 + $0x948] sm:$0xff] }
0x125e   : > { %v6514_v32 = vmul.f32 %v18457_v41, %v6494_v45  ;;  %v16405_v38 = vpop.eup %16404  ;;  %v18612_v19 = vmul.f32 %v6544_v30, %v6512_v56  ;;  %v7016_v56 = vld [vmem:[#allocation2 + $0x928] sm:$0xff]  ;;  %v15637_v45 = vpack.c.bf16 %v7019_v54, %v7018_v11  ;;  %v19694_v54 = vld [vmem:[#allocation57_spill] sm:$0xff] }
0x125f   : > { %vm6527_vm3 = vcmp.ge.f32.partialorder %v6511_v31, 0.0  ;;  %v6513_v35 = vmul.f32 %v18457_v41, %v6493_v43  ;;  %v6496_v47 = vadd.f32 %v18452_v48, %v6476_v29  ;;  %v6459_v1 = vmul.f32 %v16405_v38, %v18369_v57  ;;  %v7023_v29 = vld [vmem:[#allocation2 + $0x960] sm:$0xff]  ;;  %v7024_v30 = vld [vmem:[#allocation2 + $0x968] sm:$0xff] }
0x1260   : > { %v6543_v23 = vsel %vm6527_vm3, 1.0, %v19643_v10  ;;  %vm6530_vm4 = vcmp.ge.f32.partialorder %v6514_v32, 0.0  ;;  %v15633_v63 = vpack.c.bf16 %v7017_v5, %v7016_v56 }
0x1261   : > { %v18610_v52 = vmul.f32 %v6543_v23, %v6511_v31  ;;  %vm6529_vm5 = vcmp.ge.f32.partialorder %v6513_v35, 0.0  ;;  %v6516_v18 = vmul.f32 %v18457_v41, %v6496_v47  ;;  %v6475_v12 = vadd.f32 %v6459_v1, %v18498_v28  ;;  %v7021_v31 = vld [vmem:[#allocation2 + $0x950] sm:$0xff]  ;;  %v7026_v47 = vld [vmem:[#allocation2 + $0x978] sm:$0xff]  ;;  %v7027_v1 = vld [vmem:[#allocation2 + $0x980] sm:$0xff] }
0x1262   : > { %v6545_v20 = vsel %vm6529_vm5, 1.0, %v19643_v10  ;;  %v6546_v14 = vsel %vm6530_vm4, 1.0, %v19643_v10  ;;  %15634 = vmatprep.subr.bf16.mxu0 %v15633_v63  ;;  %v15641_v43 = vpack.c.bf16 %v7021_v31, %v7020_v9 }
0x1263   : > { %v18618_v24 = vmul.f32 %v6545_v20, %v6513_v35  ;;  %14036 = vmatprep.mubr.msk.f32.mxu0 %vm2077_vm10, %v18610_v52  ;;  %v6495_v57 = vadd.f32 %v18452_v48, %v6475_v12  ;;  %vm6532_vm6 = vcmp.ge.f32.partialorder %v6516_v18, 0.0  ;;  %v18627_v36 = vmul.f32 %v6546_v14, %v6514_v32  ;;  %15636 = vmatpush3.bf16.msra.mxu0 %v15633_v63  ;;  %v7022_v32 = vld [vmem:[#allocation2 + $0x958] sm:$0xff]  ;;  %v7025_v35 = vld [vmem:[#allocation2 + $0x970] sm:$0xff] }
0x1264   : > { %14037 = vmatmul.mubr.msk.f32.gmra.mrb[2].mxu0 %vm2077_vm10, %v18612_v19  ;;  %v6548_v6 = vsel %vm6532_vm6, 1.0, %v19643_v10  ;;  %15638 = vmatprep.subr.bf16.mxu0 %v15637_v45  ;;  %v15645_v38 = vpack.c.bf16 %v7023_v29, %v7022_v32  ;;  %v15649_v23 = vpack.c.bf16 %v7025_v35, %v7024_v30  ;;  %v15653_v20 = vpack.c.bf16 %v7027_v1, %v7026_v47  ;;  %v7029_v12 = vld [vmem:[#allocation2 + $0x990] sm:$0xff]  ;;  %v19696_v1 = vld [vmem:[#allocation65_spill] sm:$0xff] }
0x1265   : > { %14039 = vmatprep.mubr.msk.f32.mxu0 %vm2077_vm10, %v18618_v24  ;;  %v6515_v28 = vmul.f32 %v18457_v41, %v6495_v57  ;;  %v18636_v42 = vmul.f32 %v6548_v6, %v6516_v18  ;;  %v6822_v41 = vld [vmem:[#allocation2 + $0x920] sm:$0xff]  ;;  %v7028_v18 = vld [vmem:[#allocation2 + $0x988] sm:$0xff]  ;;  %v19691_v57 = vsub.s32 4, %v19690_v44  ;;  %v19692_v6 = vld [vmem:[#allocation49_spill] sm:$0xff] }
0x1266   : > { %v15629_v60 = vpack.c.bf16 %v6822_v41, %v6821_v51  ;;  %v15657_v14 = vpack.c.bf16 %v7029_v12, %v7028_v18  ;;  %v19693_v41 = vld [vmem:[#allocation45_spill] sm:$0xff] }
0x1267   : > { %vm6531_vm7 = vcmp.ge.f32.partialorder %v6515_v28, 0.0  ;;  %15640 = vmatpush3.bf16.msra.mxu0 %v15637_v45 }
0x1268   : > { %14040 = vmatmul.mubr.msk.f32.gmra.mrb[4].mxu0 %vm2077_vm10, %v18627_v36  ;;  %v6547_v8 = vsel %vm6531_vm7, 1.0, %v19643_v10  ;;  %15630 = vmatprep.subr.bf16.mxu1 %v15629_v60 }
0x1269   : > { %v18634_v48 = vmul.f32 %v6547_v8, %v6515_v28  ;;  %15632 = vmatpush3.bf16.msra.mxu1 %v15629_v60  ;;  %15642 = vmatprep.subr.bf16.mxu0 %v15641_v43  ;;  %v18645_v28 = vrot.slane %v17651_v53, %v19691_v57 }
0x126b   : > { %14042 = vmatprep.mubr.msk.f32.mxu0 %vm2077_vm10, %v18634_v48  ;;  %15644 = vmatpush3.bf16.msra.mxu0 %v15641_v43  ;;  %v1738_v8 = vadd.f32 %v19692_v6, %v18645_v28  ;;  %v1732_v60 = vadd.f32 %v19693_v41, %v18645_v28  ;;  %v1750_v45 = vadd.f32 %v19694_v54, %v18645_v28  ;;  %v19695_v43 = vld [vmem:[#allocation53_spill] sm:$0xff] }
0x126c   : > { %14043 = vmatmul.mubr.msk.f32.gmra.mrb[6].mxu0 %vm2077_vm10, %v18636_v42  ;;  %15646 = vmatprep.subr.bf16.mxu0 %v15645_v38  ;;  %v1744_v32 = vadd.f32 %v19695_v43, %v18645_v28 }
0x126f   : > { %15648 = vmatpush3.bf16.msra.mxu0 %v15645_v38 }
0x1270   : > { %15650 = vmatprep.subr.bf16.mxu0 %v15649_v23 }
0x1273   : > { %15652 = vmatpush3.bf16.msra.mxu0 %v15649_v23 }
0x1274   : > { %15654 = vmatprep.subr.bf16.mxu0 %v15653_v20 }
0x1277   : > { %15656 = vmatpush3.bf16.msra.mxu0 %v15653_v20  ;;  %v1762_v20 = vadd.f32 %v19696_v1, %v18645_v28  ;;  %v19700_v1 = vld [vmem:[#allocation81_spill] sm:$0xff] }
0x1278   : > { %15658 = vmatprep.subr.bf16.mxu0 %v15657_v14 }
0x127b   : > { %15660 = vmatpush3.bf16.msra.mxu0 %v15657_v14  ;;  %v19697_v14 = vld [vmem:[#allocation61_spill] sm:$0xff] }
0x127c   : > { %v1756_v57 = vadd.f32 %v19697_v14, %v18645_v28 }
0x1318   : > { %v14023_v51 = vpop.f32.mrb[248].mxu0 }
0x1319   : > { %v6686_v56 = vadd.f32 %v14023_v51, %v1738_v8  ;;  %v6680_v5 = vpop.f32.mrb[249].mxu0 }
0x131a   : > { %v6681_v11 = vadd.f32 %v6680_v5, %v1732_v60 }
0x131b   : > { %v6776_v63 = vmul.f32 0.01, %v6686_v56  ;;  %vm6760_vm1 = vcmp.ge.f32.partialorder %v6686_v56, 0.0 }
0x131c   : > { %v6775_v9 = vmul.f32 0.01, %v6681_v11  ;;  %vm6759_vm8 = vcmp.ge.f32.partialorder %v6681_v11, 0.0 }
0x131d   : > { %v14026_v31 = vpop.f32.mrb[250].mxu0  ;;  %v6792_v23 = vsel %vm6760_vm1, %v6686_v56, %v6776_v63 }
0x131e   : > { %v6696_v29 = vadd.f32 %v14026_v31, %v1750_v45  ;;  %v6690_v38 = vpop.f32.mrb[251].mxu0  ;;  %v6791_v35 = vsel %vm6759_vm8, %v6681_v11, %v6775_v9  ;;  %v19698_v11 = vld [vmem:[#allocation73_spill] sm:$0xff] }
0x131f   : > { %v6691_v30 = vadd.f32 %v6690_v38, %v1744_v32  ;;  %14077 = vmatprep.mubr.f32.mxu1 %v6791_v35  ;;  %v1774_v63 = vadd.f32 %v19698_v11, %v18645_v28  ;;  %v19699_v31 = vld [vmem:[#allocation69_spill] sm:$0xff] }
0x1320   : > { %v6778_v47 = vmul.f32 0.01, %v6696_v29  ;;  %vm6762_vm9 = vcmp.ge.f32.partialorder %v6696_v29, 0.0  ;;  %14078 = vmatmul.mubr.f32.vlgmr.msra.gmra.mrb[8].mxu1 %v6792_v23  ;;  %v1768_v43 = vadd.f32 %v19699_v31, %v18645_v28  ;;  %v19703_v11 = vld [vmem:[#allocation85_spill] sm:$0xff] }
0x1321   : > { %v6777_v18 = vmul.f32 0.01, %v6691_v30  ;;  %v14029_v12 = vpop.f32.mrb[252].mxu0  ;;  %vm6761_vm11 = vcmp.ge.f32.partialorder %v6691_v30, 0.0 }
0x1322   : > { %v6706_v6 = vadd.f32 %v14029_v12, %v1762_v20  ;;  %v6700_v8 = vpop.f32.mrb[253].mxu0  ;;  %v6794_v60 = vsel %vm6762_vm9, %v6696_v29, %v6778_v47  ;;  %v1786_v20 = vadd.f32 %v19700_v1, %v18645_v28  ;;  %v19701_v12 = vld [vmem:[#allocation77_spill] sm:$0xff] }
0x1323   : > { %v6701_v51 = vadd.f32 %v6700_v8, %v1756_v57  ;;  %v6793_v41 = vsel %vm6761_vm11, %v6691_v30, %v6777_v18  ;;  %v1780_v14 = vadd.f32 %v19701_v12, %v18645_v28 }
0x1324   : > { %v6780_v5 = vmul.f32 0.01, %v6706_v6  ;;  %14080 = vmatprep.mubr.f32.mxu1 %v6793_v41  ;;  %vm6764_vm12 = vcmp.ge.f32.partialorder %v6706_v6, 0.0 }
0x1325   : > { %v6779_v56 = vmul.f32 0.01, %v6701_v51  ;;  %14081 = vmatmul.mubr.f32.gmra.mrb[10].mxu1 %v6794_v60  ;;  %vm6763_vm13 = vcmp.ge.f32.partialorder %v6701_v51, 0.0  ;;  %v19702_v60 = vld [vmem:[#allocation89_spill] sm:$0xff] }
0x1326   : > { %v6796_v45 = vsel %vm6764_vm12, %v6706_v6, %v6780_v5  ;;  %v1798_v5 = vadd.f32 %v19702_v60, %v18645_v28  ;;  %v19707_v60 = vld [vmem:[#allocation101_spill] sm:$0xff] }
0x1327   : > { %v6795_v54 = vsel %vm6763_vm13, %v6701_v51, %v6779_v56 }
0x1328   : > { %v14032_v9 = vpop.f32.mrb[254].mxu0  ;;  %14083 = vmatprep.mubr.f32.mxu1 %v6795_v54 }
0x1329   : > { %v6716_v32 = vadd.f32 %v14032_v9, %v1774_v63  ;;  %v6710_v38 = vpop.f32.mrb[255].mxu0  ;;  %14084 = vmatmul.mubr.f32.gmra.mrb[12].mxu1 %v6796_v45  ;;  %v1792_v63 = vadd.f32 %v19703_v11, %v18645_v28 }
0x132a   : > { %v6711_v29 = vadd.f32 %v6710_v38, %v1768_v43  ;;  %v19704_v38 = vld [vmem:[#allocation97_spill] sm:$0xff] }
0x132b   : > { %v6782_v30 = vmul.f32 0.01, %v6716_v32  ;;  %vm6766_vm14 = vcmp.ge.f32.partialorder %v6716_v32, 0.0 }
0x132c   : > { %v6781_v35 = vmul.f32 0.01, %v6711_v29  ;;  %vm6765_vm0 = vcmp.ge.f32.partialorder %v6711_v29, 0.0 }
0x132d   : > { %v6798_v47 = vsel %vm6766_vm14, %v6716_v32, %v6782_v30 }
0x132e   : > { %v6797_v23 = vsel %vm6765_vm0, %v6711_v29, %v6781_v35  ;;  %v1810_v29 = vadd.f32 %v19704_v38, %v18645_v28  ;;  %v7030_v38 = vld [vmem:[#allocation2 + $0x998] sm:$0xff] }
0x132f   : > { %14086 = vmatprep.mubr.f32.mxu1 %v6797_v23  ;;  %v19705_v23 = vld [vmem:[#allocation93_spill] sm:$0xff] }
0x1330   : > { %14087 = vmatmul.mubr.f32.gmra.mrb[14].mxu1 %v6798_v47  ;;  %v14035_v18 = vpop.f32.mrb[0].mxu0  ;;  %v1804_v47 = vadd.f32 %v19705_v23, %v18645_v28  ;;  %v7402_v23 = vld [vmem:[#allocation2 + $0xa28] sm:$0xff] }
0x1331   : > { %v6726_v57 = vadd.f32 %v14035_v18, %v1786_v20  ;;  %v6720_v6 = vpop.f32.mrb[1].mxu0 }
0x1332   : > { %v6721_v8 = vadd.f32 %v6720_v6, %v1780_v14 }
0x1333   : > { %v6784_v51 = vmul.f32 0.01, %v6726_v57  ;;  %vm6768_vm15 = vcmp.ge.f32.partialorder %v6726_v57, 0.0 }
0x1334   : > { %v6783_v41 = vmul.f32 0.01, %v6721_v8  ;;  %vm6767_vm2 = vcmp.ge.f32.partialorder %v6721_v8, 0.0 }
0x1335   : > { %v6800_v45 = vsel %vm6768_vm15, %v6726_v57, %v6784_v51 }
0x1336   : > { %v6799_v54 = vsel %vm6767_vm2, %v6721_v8, %v6783_v41  ;;  %v19706_v8 = vld [vmem:[#allocation105_spill] sm:$0xff] }
0x1337   : > { %v14038_v56 = vpop.f32.mrb[2].mxu0  ;;  %14089 = vmatprep.mubr.f32.mxu1 %v6799_v54  ;;  %v1822_v51 = vadd.f32 %v19706_v8, %v18645_v28 }
0x1338   : > { %v6736_v9 = vadd.f32 %v14038_v56, %v1798_v5  ;;  %v6730_v31 = vpop.f32.mrb[3].mxu0  ;;  %14090 = vmatmul.mubr.f32.gmra.mrb[16].mxu1 %v6800_v45  ;;  %v1816_v5 = vadd.f32 %v19707_v60, %v18645_v28  ;;  %v7225_v28 = vld [vmem:[#allocation2 + $0x9a8] sm:$0xff] }
0x1339   : > { %v6731_v43 = vadd.f32 %v6730_v31, %v1792_v63 }
0x133a   : > { %v6786_v32 = vmul.f32 0.01, %v6736_v9  ;;  %vm6770_vm3 = vcmp.ge.f32.partialorder %v6736_v9, 0.0 }
0x133b   : > { %v6785_v30 = vmul.f32 0.01, %v6731_v43  ;;  %v14041_v35 = vpop.f32.mrb[4].mxu0  ;;  %vm6769_vm4 = vcmp.ge.f32.partialorder %v6731_v43, 0.0 }
0x133c   : > { %v6746_v1 = vadd.f32 %v14041_v35, %v1810_v29  ;;  %v6740_v20 = vpop.f32.mrb[5].mxu0  ;;  %v6802_v14 = vsel %vm6770_vm3, %v6736_v9, %v6786_v32  ;;  %v7031_v29 = vld [vmem:[#allocation2 + $0x9a0] sm:$0xff]  ;;  %v7226_v35 = vld [vmem:[#allocation2 + $0x9b0] sm:$0xff] }
0x133d   : > { %v6741_v18 = vadd.f32 %v6740_v20, %v1804_v47  ;;  %v6801_v12 = vsel %vm6769_vm4, %v6731_v43, %v6785_v30  ;;  %v15661_v30 = vpack.c.bf16 %v7031_v29, %v7030_v38  ;;  %v15665_v47 = vpack.c.bf16 %v7226_v35, %v7225_v28  ;;  %v7227_v20 = vld [vmem:[#allocation2 + $0x9b8] sm:$0xff]  ;;  %v7405_v28 = vld [vmem:[#allocation2 + $0xa40] sm:$0xff] }
0x133e   : > { %v6788_v57 = vmul.f32 0.01, %v6746_v1  ;;  %14092 = vmatprep.mubr.f32.mxu1 %v6801_v12  ;;  %vm6772_vm5 = vcmp.ge.f32.partialorder %v6746_v1, 0.0 }
0x133f   : > { %v6787_v6 = vmul.f32 0.01, %v6741_v18  ;;  %14093 = vmatmul.mubr.f32.gmra.mrb[18].mxu1 %v6802_v14  ;;  %vm6771_vm6 = vcmp.ge.f32.partialorder %v6741_v18, 0.0  ;;  %v14044_v41 = vpop.f32.mrb[6].mxu0  ;;  %15662 = vmatprep.subr.bf16.mxu0 %v15661_v30 }
0x1340   : > { %v6756_v56 = vadd.f32 %v14044_v41, %v1822_v51  ;;  %v6750_v11 = vpop.f32.mrb[7].mxu0  ;;  %v6804_v54 = vsel %vm6772_vm5, %v6746_v1, %v6788_v57  ;;  %15664 = vmatpush3.bf16.msra.mxu0 %v15661_v30  ;;  %v7403_v1 = vld [vmem:[#allocation2 + $0xa30] sm:$0xff]  ;;  %v7229_v57 = vld [vmem:[#allocation2 + $0x9c8] sm:$0xff]  ;;  %15666 = vmatprep.subr.bf16.mxu1 %v15665_v47  ;;  %v7231_v51 = vld [vmem:[#allocation2 + $0x9d8] sm:$0xff] }
0x1341   : > { %v6803_v63 = vsel %vm6771_vm6, %v6741_v18, %v6787_v6  ;;  %v6751_v45 = vadd.f32 %v6750_v11, %v1816_v5  ;;  %v7228_v18 = vld [vmem:[#allocation2 + $0x9c0] sm:$0xff]  ;;  %v15697_v12 = vpack.c.bf16 %v7403_v1, %v7402_v23  ;;  %v7230_v6 = vld [vmem:[#allocation2 + $0x9d0] sm:$0xff]  ;;  %15668 = vmatpush3.bf16.msra.mxu1 %v15665_v47  ;;  %v7233_v5 = vld [vmem:[#allocation2 + $0x9e8] sm:$0xff] }
0x1342   : > { %14095 = vmatprep.mubr.f32.mxu1 %v6803_v63  ;;  %v6790_v9 = vmul.f32 0.01, %v6756_v56  ;;  %vm6774_vm7 = vcmp.ge.f32.partialorder %v6756_v56, 0.0  ;;  %v15669_v14 = vpack.c.bf16 %v7228_v18, %v7227_v20  ;;  %v15673_v8 = vpack.c.bf16 %v7230_v6, %v7229_v57  ;;  %v7232_v41 = vld [vmem:[#allocation2 + $0x9e0] sm:$0xff]  ;;  %v7235_v63 = vld [vmem:[#allocation2 + $0x9f8] sm:$0xff]  ;;  %v7406_v57 = vld [vmem:[#allocation2 + $0xa48] sm:$0xff] }
0x1343   : > { %14096 = vmatmul.mubr.f32.gmra.mrb[20].mxu1 %v6804_v54  ;;  %v6789_v31 = vmul.f32 0.01, %v6751_v45  ;;  %vm6773_vm1 = vcmp.ge.f32.partialorder %v6751_v45, 0.0  ;;  %15698 = vmatprep.subr.bf16.mxu0 %v15697_v12  ;;  %v15677_v60 = vpack.c.bf16 %v7232_v41, %v7231_v51  ;;  %v7236_v54 = vld [vmem:[#allocation2 + $0xa00] sm:$0xff]  ;;  %v7404_v30 = vld [vmem:[#allocation2 + $0xa38] sm:$0xff]  ;;  %v7407_v6 = vld [vmem:[#allocation2 + $0xa50] sm:$0xff] }
0x1344   : > { %v6806_v32 = vsel %vm6774_vm7, %v6756_v56, %v6790_v9  ;;  %15670 = vmatprep.subr.bf16.mxu1 %v15669_v14  ;;  %v7234_v56 = vld [vmem:[#allocation2 + $0x9f0] sm:$0xff]  ;;  %v7237_v9 = vld [vmem:[#allocation2 + $0xa08] sm:$0xff]  ;;  %v15701_v1 = vpack.c.bf16 %v7405_v28, %v7404_v30 }
0x1345   : > { %v6805_v43 = vsel %vm6773_vm1, %v6751_v45, %v6789_v31  ;;  %15672 = vmatpush3.bf16.msra.mxu1 %v15669_v14  ;;  %v15681_v11 = vpack.c.bf16 %v7234_v56, %v7233_v5  ;;  %v15685_v45 = vpack.c.bf16 %v7236_v54, %v7235_v63  ;;  %v7238_v31 = vld [vmem:[#allocation2 + $0xa10] sm:$0xff]  ;;  %v7408_v63 = vld [vmem:[#allocation2 + $0xa58] sm:$0xff]  ;;  %v7409_v54 = vld [vmem:[#allocation2 + $0xa60] sm:$0xff] }
0x1346   : > { %14098 = vmatprep.mubr.f32.mxu1 %v6805_v43  ;;  %15674 = vmatprep.subr.bf16.mxu1 %v15673_v8  ;;  %v15689_v43 = vpack.c.bf16 %v7238_v31, %v7237_v9  ;;  %v15709_v31 = vpack.c.bf16 %v7409_v54, %v7408_v63 }
0x1347   : > { %14099 = vmatmul.mubr.f32.gmra.mrb[22].mxu1 %v6806_v32 }
0x1349   : > { %15676 = vmatpush3.bf16.msra.mxu1 %v15673_v8 }
0x134a   : > { %15678 = vmatprep.subr.bf16.mxu1 %v15677_v60 }
0x134d   : > { %15680 = vmatpush3.bf16.msra.mxu1 %v15677_v60  ;;  %v15705_v60 = vpack.c.bf16 %v7407_v6, %v7406_v57  ;;  %v7415_v57 = vld [vmem:[#allocation2 + $0xa90] sm:$0xff] }
0x134e   : > { %15682 = vmatprep.subr.bf16.mxu1 %v15681_v11 }
0x1351   : > { %15684 = vmatpush3.bf16.msra.mxu1 %v15681_v11 }
0x1352   : > { %15686 = vmatprep.subr.bf16.mxu1 %v15685_v45 }
0x1355   : > { %15688 = vmatpush3.bf16.msra.mxu1 %v15685_v45 }
0x1356   : > { %15690 = vmatprep.subr.bf16.mxu1 %v15689_v43 }
0x1359   : > { %15692 = vmatpush3.bf16.msra.mxu1 %v15689_v43 }
0x13f3   : > { %v14079_v32 = vpop.f32.mrb[8].mxu1 }
0x13f4   : > { %v6985_v38 = vmul.f32 0.01, %v14079_v32  ;;  %v6889_v29 = vpop.f32.mrb[9].mxu1  ;;  %vm6969_vm8 = vcmp.ge.f32.partialorder %v14079_v32, 0.0 }
0x13f5   : > { %vm6968_vm9 = vcmp.ge.f32.partialorder %v6889_v29, 0.0  ;;  %v6984_v35 = vmul.f32 0.01, %v6889_v29 }
0x13f6   : > { %v7001_v20 = vsel %vm6969_vm8, %v14079_v32, %v6985_v38  ;;  %v7411_v32 = vld [vmem:[#allocation2 + $0xa70] sm:$0xff] }
0x13f7   : > { %v7000_v47 = vsel %vm6968_vm9, %v6889_v29, %v6984_v35 }
0x13f8   : > { %v14082_v23 = vpop.f32.mrb[10].mxu1  ;;  %14133 = vmatprep.mubr.f32.mxu0 %v7000_v47  ;;  %v7413_v47 = vld [vmem:[#allocation2 + $0xa80] sm:$0xff] }
0x13f9   : > { %v6987_v18 = vmul.f32 0.01, %v14082_v23  ;;  %v6899_v14 = vpop.f32.mrb[11].mxu1  ;;  %vm6971_vm11 = vcmp.ge.f32.partialorder %v14082_v23, 0.0  ;;  %14134 = vmatmul.mubr.f32.vlgmr.msra.gmra.mrb[8].mxu0 %v7001_v20 }
0x13fa   : > { %vm6970_vm12 = vcmp.ge.f32.partialorder %v6899_v14, 0.0  ;;  %v6986_v8 = vmul.f32 0.01, %v6899_v14  ;;  %15700 = vmatpush3.bf16.msra.mxu0 %v15697_v12  ;;  %v7410_v12 = vld [vmem:[#allocation2 + $0xa68] sm:$0xff] }
0x13fb   : > { %15702 = vmatprep.subr.bf16.mxu0 %v15701_v1  ;;  %v7003_v5 = vsel %vm6971_vm11, %v14082_v23, %v6987_v18  ;;  %v15713_v28 = vpack.c.bf16 %v7411_v32, %v7410_v12  ;;  %v7412_v23 = vld [vmem:[#allocation2 + $0xa78] sm:$0xff] }
0x13fc   : > { %v14085_v51 = vpop.f32.mrb[12].mxu1  ;;  %v7002_v41 = vsel %vm6970_vm12, %v6899_v14, %v6986_v8  ;;  %v15717_v18 = vpack.c.bf16 %v7413_v47, %v7412_v23  ;;  %v7414_v14 = vld [vmem:[#allocation2 + $0xa88] sm:$0xff] }
0x13fd   : > { %v6989_v56 = vmul.f32 0.01, %v14085_v51  ;;  %v6909_v11 = vpop.f32.mrb[13].mxu1  ;;  %14136 = vmatprep.mubr.f32.mxu0 %v7002_v41  ;;  %vm6973_vm13 = vcmp.ge.f32.partialorder %v14085_v51, 0.0  ;;  %v15721_v8 = vpack.c.bf16 %v7415_v57, %v7414_v14  ;;  %v7240_v14 = vld [vmem:[#allocation2 + $0xa20] sm:$0xff]  ;;  %v7416_v57 = vld [vmem:[#allocation2 + $0xa98] sm:$0xff] }
0x13fe   : > { %vm6972_vm14 = vcmp.ge.f32.partialorder %v6909_v11, 0.0  ;;  %v6988_v45 = vmul.f32 0.01, %v6909_v11  ;;  %14137 = vmatmul.mubr.f32.gmra.mrb[10].mxu0 %v7003_v5 }
0x13ff   : > { %15704 = vmatpush3.bf16.msra.mxu0 %v15701_v1  ;;  %v7005_v43 = vsel %vm6973_vm13, %v14085_v51, %v6989_v56 }
0x1400   : > { %v7004_v9 = vsel %vm6972_vm14, %v6909_v11, %v6988_v45  ;;  %15706 = vmatprep.subr.bf16.mxu0 %v15705_v60 }
0x1401   : > { %14139 = vmatprep.mubr.f32.mxu0 %v7004_v9 }
0x1402   : > { %14140 = vmatmul.mubr.f32.gmra.mrb[12].mxu0 %v7005_v43 }
0x1403   : > { %v14088_v38 = vpop.f32.mrb[14].mxu1  ;;  %15708 = vmatpush3.bf16.msra.mxu0 %v15705_v60 }
0x1404   : > { %v6991_v29 = vmul.f32 0.01, %v14088_v38  ;;  %v6919_v30 = vpop.f32.mrb[15].mxu1  ;;  %15710 = vmatprep.subr.bf16.mxu0 %v15709_v31  ;;  %vm6975_vm0 = vcmp.ge.f32.partialorder %v14088_v38, 0.0 }
0x1405   : > { %vm6974_vm15 = vcmp.ge.f32.partialorder %v6919_v30, 0.0  ;;  %v6990_v35 = vmul.f32 0.01, %v6919_v30 }
0x1406   : > { %v7007_v20 = vsel %vm6975_vm0, %v14088_v38, %v6991_v29 }
0x1407   : > { %v7006_v1 = vsel %vm6974_vm15, %v6919_v30, %v6990_v35  ;;  %15712 = vmatpush3.bf16.msra.mxu0 %v15709_v31 }
0x1408   : > { %14142 = vmatprep.mubr.f32.mxu0 %v7006_v1  ;;  %15714 = vmatprep.subr.bf16.mxu0 %v15713_v28 }
0x1409   : > { %14143 = vmatmul.mubr.f32.gmra.mrb[14].mxu0 %v7007_v20 }
0x140b   : > { %15716 = vmatpush3.bf16.msra.mxu0 %v15713_v28  ;;  %v14091_v6 = vpop.f32.mrb[16].mxu1 }
0x140c   : > { %15718 = vmatprep.subr.bf16.mxu0 %v15717_v18  ;;  %v6993_v51 = vmul.f32 0.01, %v14091_v6  ;;  %v6929_v41 = vpop.f32.mrb[17].mxu1  ;;  %vm6977_vm2 = vcmp.ge.f32.partialorder %v14091_v6, 0.0 }
0x140d   : > { %vm6976_vm3 = vcmp.ge.f32.partialorder %v6929_v41, 0.0  ;;  %v6992_v60 = vmul.f32 0.01, %v6929_v41 }
0x140e   : > { %v7009_v56 = vsel %vm6977_vm2, %v14091_v6, %v6993_v51 }
0x140f   : > { %15720 = vmatpush3.bf16.msra.mxu0 %v15717_v18  ;;  %v7008_v5 = vsel %vm6976_vm3, %v6929_v41, %v6992_v60  ;;  %v7239_v18 = vld [vmem:[#allocation2 + $0xa18] sm:$0xff]  ;;  %v7643_v41 = vld [vmem:[#allocation2 + $0xaa8] sm:$0xff] }
0x1410   : > { %15722 = vmatprep.subr.bf16.mxu0 %v15721_v8  ;;  %14145 = vmatprep.mubr.f32.mxu0 %v7008_v5  ;;  %v15693_v6 = vpack.c.bf16 %v7240_v14, %v7239_v18 }
0x1411   : > { %14146 = vmatmul.mubr.f32.gmra.mrb[16].mxu0 %v7009_v56 }
0x1412   : > { %v14094_v11 = vpop.f32.mrb[18].mxu1  ;;  %15694 = vmatprep.subr.bf16.mxu1 %v15693_v6 }
0x1413   : > { %v6995_v63 = vmul.f32 0.01, %v14094_v11  ;;  %v6939_v54 = vpop.f32.mrb[19].mxu1  ;;  %15724 = vmatpush3.bf16.msra.mxu0 %v15721_v8  ;;  %vm6979_vm4 = vcmp.ge.f32.partialorder %v14094_v11, 0.0  ;;  %v7417_v8 = vld [vmem:[#allocation2 + $0xaa0] sm:$0xff]  ;;  %15696 = vmatpush3.bf16.msra.mxu1 %v15693_v6 }
0x1414   : > { %vm6978_vm5 = vcmp.ge.f32.partialorder %v6939_v54, 0.0  ;;  %v6994_v45 = vmul.f32 0.01, %v6939_v54  ;;  %v15725_v51 = vpack.c.bf16 %v7417_v8, %v7416_v57  ;;  %14269 = vmatprep.subr.mxu1 %v7643_v41 }
0x1415   : > { %v7011_v43 = vsel %vm6979_vm4, %v14094_v11, %v6995_v63 }
0x1416   : > { %v14097_v9 = vpop.f32.mrb[20].mxu1  ;;  %v7010_v31 = vsel %vm6978_vm5, %v6939_v54, %v6994_v45  ;;  %15726 = vmatprep.subr.bf16.mxu0 %v15725_v51 }
0x1417   : > { %v6997_v12 = vmul.f32 0.01, %v14097_v9  ;;  %v6949_v32 = vpop.f32.mrb[21].mxu1  ;;  %14148 = vmatprep.mubr.f32.mxu0 %v7010_v31  ;;  %vm6981_vm6 = vcmp.ge.f32.partialorder %v14097_v9, 0.0  ;;  %15728 = vmatpush3.bf16.msra.mxu0 %v15725_v51 }
0x1418   : > { %vm6980_vm7 = vcmp.ge.f32.partialorder %v6949_v32, 0.0  ;;  %v6996_v38 = vmul.f32 0.01, %v6949_v32  ;;  %14149 = vmatmul.mubr.f32.gmra.mrb[18].mxu0 %v7011_v43 }
0x1419   : > { %v7013_v30 = vsel %vm6981_vm6, %v14097_v9, %v6997_v12 }
0x141a   : > { %v7012_v29 = vsel %vm6980_vm7, %v6949_v32, %v6996_v38  ;;  %v14100_v28 = vpop.f32.mrb[22].mxu1 }
0x141b   : > { %14151 = vmatprep.mubr.f32.mxu0 %v7012_v29  ;;  %v6999_v35 = vmul.f32 0.01, %v14100_v28  ;;  %v6959_v23 = vpop.f32.mrb[23].mxu1  ;;  %vm6983_vm1 = vcmp.ge.f32.partialorder %v14100_v28, 0.0 }
0x141c   : > { %14152 = vmatmul.mubr.f32.gmra.mrb[20].mxu0 %v7013_v30  ;;  %vm6982_vm8 = vcmp.ge.f32.partialorder %v6959_v23, 0.0  ;;  %v6998_v47 = vmul.f32 0.01, %v6959_v23 }
0x141d   : > { %v7015_v20 = vsel %vm6983_vm1, %v14100_v28, %v6999_v35 }
0x141e   : > { %v7014_v1 = vsel %vm6982_vm8, %v6959_v23, %v6998_v47 }
0x141f   : > { %14154 = vmatprep.mubr.f32.mxu0 %v7014_v1 }
0x1420   : > { %14155 = vmatmul.mubr.f32.gmra.mrb[22].mxu0 %v7015_v20 }
0x14cc   : > { %v14135_v60 = vpop.f32.mrb[8].mxu0 }
0x14cd   : > { %v7194_v5 = vmul.f32 0.01, %v14135_v60  ;;  %v7098_v56 = vpop.f32.mrb[9].mxu0  ;;  %vm7178_vm9 = vcmp.ge.f32.partialorder %v14135_v60, 0.0 }
0x14ce   : > { %vm7177_vm11 = vcmp.ge.f32.partialorder %v7098_v56, 0.0  ;;  %v7193_v11 = vmul.f32 0.01, %v7098_v56 }
0x14cf   : > { %v7210_v45 = vsel %vm7178_vm9, %v14135_v60, %v7194_v5 }
0x14d0   : > { %v7209_v54 = vsel %vm7177_vm11, %v7098_v56, %v7193_v11 }
0x14d1   : > { %v14138_v63 = vpop.f32.mrb[10].mxu0  ;;  %14189 = vmatprep.mubr.f32.mxu1 %v7209_v54  ;;  %14245 = vmatprep.mubr.f32.mxu0 %v7209_v54 }
0x14d2   : > { %v7196_v9 = vmul.f32 0.01, %v14138_v63  ;;  %v7108_v31 = vpop.f32.mrb[11].mxu0  ;;  %vm7180_vm12 = vcmp.ge.f32.partialorder %v14138_v63, 0.0  ;;  %14190 = vmatmul.mubr.f32.vlgmr.msra.gmra.mrb[24].mxu1 %v7210_v45  ;;  %14246 = vmatmul.mubr.f32.vlgmr.msra.gmra.mrb[24].mxu0 %v7210_v45 }
0x14d3   : > { %vm7179_vm13 = vcmp.ge.f32.partialorder %v7108_v31, 0.0  ;;  %v7195_v43 = vmul.f32 0.01, %v7108_v31  ;;  %14270 = vmatpush3.msra.mxu1 %v7643_v41 }
0x14d4   : > { %v7212_v38 = vsel %vm7180_vm12, %v14138_v63, %v7196_v9 }
0x14d5   : > { %v14141_v12 = vpop.f32.mrb[12].mxu0  ;;  %v7211_v32 = vsel %vm7179_vm13, %v7108_v31, %v7195_v43 }
0x14d6   : > { %v7198_v29 = vmul.f32 0.01, %v14141_v12  ;;  %v7118_v30 = vpop.f32.mrb[13].mxu0  ;;  %14192 = vmatprep.mubr.f32.mxu1 %v7211_v32  ;;  %14248 = vmatprep.mubr.f32.mxu0 %v7211_v32  ;;  %vm7182_vm14 = vcmp.ge.f32.partialorder %v14141_v12, 0.0 }
0x14d7   : > { %vm7181_vm0 = vcmp.ge.f32.partialorder %v7118_v30, 0.0  ;;  %v7197_v28 = vmul.f32 0.01, %v7118_v30  ;;  %14193 = vmatmul.mubr.f32.gmra.mrb[26].mxu1 %v7212_v38  ;;  %14249 = vmatmul.mubr.f32.gmra.mrb[26].mxu0 %v7212_v38 }
0x14d8   : > { %v7214_v23 = vsel %vm7182_vm14, %v14141_v12, %v7198_v29 }
0x14d9   : > { %v7213_v35 = vsel %vm7181_vm0, %v7118_v30, %v7197_v28 }
0x14da   : > { %14195 = vmatprep.mubr.f32.mxu1 %v7213_v35  ;;  %14251 = vmatprep.mubr.f32.mxu0 %v7213_v35 }
0x14db   : > { %14196 = vmatmul.mubr.f32.gmra.mrb[28].mxu1 %v7214_v23  ;;  %14252 = vmatmul.mubr.f32.gmra.mrb[28].mxu0 %v7214_v23 }
0x14dc   : > { %v14144_v47 = vpop.f32.mrb[14].mxu0 }
0x14dd   : > { %v7200_v1 = vmul.f32 0.01, %v14144_v47  ;;  %v7128_v20 = vpop.f32.mrb[15].mxu0  ;;  %vm7184_vm15 = vcmp.ge.f32.partialorder %v14144_v47, 0.0 }
0x14de   : > { %vm7183_vm2 = vcmp.ge.f32.partialorder %v7128_v20, 0.0  ;;  %v7199_v18 = vmul.f32 0.01, %v7128_v20 }
0x14df   : > { %v7216_v57 = vsel %vm7184_vm15, %v14144_v47, %v7200_v1 }
0x14e0   : > { %v7215_v14 = vsel %vm7183_vm2, %v7128_v20, %v7199_v18  ;;  %v7885_v20 = vld [vmem:[#allocation2 + $0xab0] sm:$0xff]  ;;  %v7886_v18 = vld [vmem:[#allocation2 + $0xab8] sm:$0xff] }
0x14e1   : > { %14198 = vmatprep.mubr.f32.mxu1 %v7215_v14  ;;  %14254 = vmatprep.mubr.f32.mxu0 %v7215_v14  ;;  %v7887_v14 = vld [vmem:[#allocation2 + $0xac0] sm:$0xff] }
0x14e2   : > { %14199 = vmatmul.mubr.f32.gmra.mrb[30].mxu1 %v7216_v57  ;;  %14255 = vmatmul.mubr.f32.gmra.mrb[30].mxu0 %v7216_v57  ;;  %v15729_v57 = vpack.c.bf16 %v7886_v18, %v7885_v20 }
0x14e4   : > { %v14147_v6 = vpop.f32.mrb[16].mxu0  ;;  %15730 = vmatprep.subr.bf16.mxu0 %v15729_v57 }
0x14e5   : > { %v7202_v8 = vmul.f32 0.01, %v14147_v6  ;;  %v7138_v51 = vpop.f32.mrb[17].mxu0  ;;  %vm7186_vm3 = vcmp.ge.f32.partialorder %v14147_v6, 0.0  ;;  %15732 = vmatpush3.bf16.msra.mxu0 %v15729_v57 }
0x14e6   : > { %vm7185_vm4 = vcmp.ge.f32.partialorder %v7138_v51, 0.0  ;;  %v7201_v41 = vmul.f32 0.01, %v7138_v51 }
0x14e7   : > { %v7218_v5 = vsel %vm7186_vm3, %v14147_v6, %v7202_v8  ;;  %v7888_v6 = vld [vmem:[#allocation2 + $0xac8] sm:$0xff] }
0x14e8   : > { %v7217_v60 = vsel %vm7185_vm4, %v7138_v51, %v7201_v41  ;;  %v15733_v8 = vpack.c.bf16 %v7888_v6, %v7887_v14  ;;  %v7889_v51 = vld [vmem:[#allocation2 + $0xad0] sm:$0xff]  ;;  %v7890_v41 = vld [vmem:[#allocation2 + $0xad8] sm:$0xff] }
0x14e9   : > { %14201 = vmatprep.mubr.f32.mxu1 %v7217_v60  ;;  %14257 = vmatprep.mubr.f32.mxu0 %v7217_v60  ;;  %v15737_v60 = vpack.c.bf16 %v7890_v41, %v7889_v51 }
0x14ea   : > { %14202 = vmatmul.mubr.f32.gmra.mrb[32].mxu1 %v7218_v5  ;;  %14258 = vmatmul.mubr.f32.gmra.mrb[32].mxu0 %v7218_v5  ;;  %v7891_v5 = vld [vmem:[#allocation2 + $0xae0] sm:$0xff] }
0x14eb   : > { %v14150_v56 = vpop.f32.mrb[18].mxu0  ;;  %15734 = vmatprep.subr.bf16.mxu0 %v15733_v8 }
0x14ec   : > { %v7204_v11 = vmul.f32 0.01, %v14150_v56  ;;  %v7148_v63 = vpop.f32.mrb[19].mxu0  ;;  %vm7188_vm5 = vcmp.ge.f32.partialorder %v14150_v56, 0.0  ;;  %15736 = vmatpush3.bf16.msra.mxu0 %v15733_v8 }
0x14ed   : > { %vm7187_vm6 = vcmp.ge.f32.partialorder %v7148_v63, 0.0  ;;  %v7203_v54 = vmul.f32 0.01, %v7148_v63  ;;  %15738 = vmatprep.subr.bf16.mxu0 %v15737_v60 }
0x14ee   : > { %v7220_v31 = vsel %vm7188_vm5, %v14150_v56, %v7204_v11  ;;  %v7892_v56 = vld [vmem:[#allocation2 + $0xae8] sm:$0xff] }
0x14ef   : > { %v14153_v45 = vpop.f32.mrb[20].mxu0  ;;  %v7219_v9 = vsel %vm7187_vm6, %v7148_v63, %v7203_v54  ;;  %v15741_v11 = vpack.c.bf16 %v7892_v56, %v7891_v5  ;;  %v7893_v63 = vld [vmem:[#allocation2 + $0xaf0] sm:$0xff]  ;;  %v7894_v54 = vld [vmem:[#allocation2 + $0xaf8] sm:$0xff] }
0x14f0   : > { %v7206_v43 = vmul.f32 0.01, %v14153_v45  ;;  %v7158_v12 = vpop.f32.mrb[21].mxu0  ;;  %14204 = vmatprep.mubr.f32.mxu1 %v7219_v9  ;;  %14260 = vmatprep.mubr.f32.mxu0 %v7219_v9  ;;  %vm7190_vm7 = vcmp.ge.f32.partialorder %v14153_v45, 0.0  ;;  %v7895_v9 = vld [vmem:[#allocation2 + $0xb00] sm:$0xff] }
0x14f1   : > { %vm7189_vm1 = vcmp.ge.f32.partialorder %v7158_v12, 0.0  ;;  %v7205_v32 = vmul.f32 0.01, %v7158_v12  ;;  %14205 = vmatmul.mubr.f32.gmra.mrb[34].mxu1 %v7220_v31  ;;  %14261 = vmatmul.mubr.f32.gmra.mrb[34].mxu0 %v7220_v31  ;;  %v7896_v31 = vld [vmem:[#allocation2 + $0xb08] sm:$0xff] }
0x14f2   : > { %v7222_v29 = vsel %vm7190_vm7, %v14153_v45, %v7206_v43  ;;  %15740 = vmatpush3.bf16.msra.mxu0 %v15737_v60  ;;  %v15745_v45 = vpack.c.bf16 %v7894_v54, %v7893_v63  ;;  %v15749_v43 = vpack.c.bf16 %v7896_v31, %v7895_v9 }
0x14f3   : > { %v7221_v38 = vsel %vm7189_vm1, %v7158_v12, %v7205_v32  ;;  %v14156_v30 = vpop.f32.mrb[22].mxu0  ;;  %15742 = vmatprep.subr.bf16.mxu0 %v15741_v11  ;;  %v7897_v12 = vld [vmem:[#allocation2 + $0xb10] sm:$0xff]  ;;  %v7898_v32 = vld [vmem:[#allocation2 + $0xb18] sm:$0xff] }
0x14f4   : > { %14207 = vmatprep.mubr.f32.mxu1 %v7221_v38  ;;  %14263 = vmatprep.mubr.f32.mxu0 %v7221_v38  ;;  %v7208_v28 = vmul.f32 0.01, %v14156_v30  ;;  %v7168_v35 = vpop.f32.mrb[23].mxu0  ;;  %vm7192_vm8 = vcmp.ge.f32.partialorder %v14156_v30, 0.0  ;;  %v15753_v38 = vpack.c.bf16 %v7898_v32, %v7897_v12 }
0x14f5   : > { %14208 = vmatmul.mubr.f32.gmra.mrb[36].mxu1 %v7222_v29  ;;  %14264 = vmatmul.mubr.f32.gmra.mrb[36].mxu0 %v7222_v29  ;;  %vm7191_vm9 = vcmp.ge.f32.partialorder %v7168_v35, 0.0  ;;  %v7207_v23 = vmul.f32 0.01, %v7168_v35 }
0x14f6   : > { %v7224_v1 = vsel %vm7192_vm8, %v14156_v30, %v7208_v28  ;;  %15744 = vmatpush3.bf16.msra.mxu0 %v15741_v11 }
0x14f7   : > { %v7223_v47 = vsel %vm7191_vm9, %v7168_v35, %v7207_v23  ;;  %15746 = vmatprep.subr.bf16.mxu0 %v15745_v45 }
0x14f8   : > { %14210 = vmatprep.mubr.f32.mxu1 %v7223_v47  ;;  %14266 = vmatprep.mubr.f32.mxu0 %v7223_v47 }
0x14f9   : > { %14211 = vmatmul.mubr.f32.gmra.mrb[38].mxu1 %v7224_v1  ;;  %14267 = vmatmul.mubr.f32.gmra.mrb[38].mxu0 %v7224_v1 }
0x14fa   : > { %15748 = vmatpush3.bf16.msra.mxu0 %v15745_v45 }
0x14fb   : > { %15750 = vmatprep.subr.bf16.mxu0 %v15749_v43 }
0x14fe   : > { %15752 = vmatpush3.bf16.msra.mxu0 %v15749_v43 }
0x14ff   : > { %15754 = vmatprep.subr.bf16.mxu0 %v15753_v38 }
0x1502   : > { %15756 = vmatpush3.bf16.msra.mxu0 %v15753_v38 }
0x15a5   : > { %v14191_v29 = vpop.f32.mrb[24].mxu1  ;;  %v14247_v30 = vpop.f32.mrb[24].mxu0 }
0x15a6   : > { %16406 = vtanh.f32 %v14191_v29  ;;  %v7307_v28 = vpop.f32.mrb[25].mxu1  ;;  %v7484_v35 = vpop.f32.mrb[25].mxu0 }
0x15a7   : > { %16408 = vtanh.f32 %v7307_v28 }
0x15aa   : > { %v14194_v23 = vpop.f32.mrb[26].mxu1  ;;  %v18679_v47 = vpop.f32.mrb[26].mxu0 }
0x15ab   : > { %16410 = vtanh.f32 %v14194_v23  ;;  %v7317_v1 = vpop.f32.mrb[27].mxu1  ;;  %v18681_v20 = vpop.f32.mrb[27].mxu0 }
0x15ac   : > { %16412 = vtanh.f32 %v7317_v1 }
0x15ae   : > { %v14197_v18 = vpop.f32.mrb[28].mxu1  ;;  %v18683_v14 = vpop.f32.mrb[28].mxu0 }
0x15af   : > { %16414 = vtanh.f32 %v14197_v18  ;;  %v7327_v57 = vpop.f32.mrb[29].mxu1  ;;  %v18685_v6 = vpop.f32.mrb[29].mxu0 }
0x15b0   : > { %16416 = vtanh.f32 %v7327_v57  ;;  %v16407_v8 = vpop.eup %16406 }
0x15b1   : > { %v16409_v51 = vpop.eup %16408  ;;  %v7581_v41 = vmul.f32 1.442695, %v16407_v8  ;;  %v18688_v60 = vadd.f32 %v16407_v8, %v18424_v13 }
0x15b2   : > { %v7579_v5 = vmul.f32 1.442695, %v16409_v51  ;;  %v18691_v56 = vadd.f32 %v16409_v51, %v18427_v26 }
0x15b3   : > { %16418 = vpow2.f32 %v7581_v41 }
0x15b4   : > { %16420 = vpow2.f32 %v7579_v5 }
0x15b5   : > { %v16411_v11 = vpop.eup %16410  ;;  %v14200_v63 = vpop.f32.mrb[30].mxu1 }
0x15b6   : > { %v18693_v54 = vpop.f32.mrb[30].mxu0  ;;  %v16413_v45 = vpop.eup %16412  ;;  %v7585_v9 = vmul.f32 1.442695, %v16411_v11  ;;  %16422 = vtanh.f32 %v14200_v63  ;;  %v18698_v12 = vadd.f32 %v16411_v11, %v18434_v25 }
0x15b7   : > { %v7337_v31 = vpop.f32.mrb[31].mxu1  ;;  %v18695_v43 = vpop.f32.mrb[31].mxu0  ;;  %v7583_v13 = vmul.f32 1.442695, %v16413_v45  ;;  %v18701_v26 = vadd.f32 %v16413_v45, %v18437_v21 }
0x15b8   : > { %16424 = vtanh.f32 %v7337_v31 }
0x15b9   : > { %16426 = vpow2.f32 %v7585_v9  ;;  %v16415_v32 = vpop.eup %16414 }
0x15ba   : > { %16428 = vpow2.f32 %v7583_v13  ;;  %v16417_v38 = vpop.eup %16416  ;;  %v7589_v29 = vmul.f32 1.442695, %v16415_v32  ;;  %v18704_v28 = vadd.f32 %v16415_v32, %v18440_v2 }
0x15bb   : > { %v7587_v23 = vmul.f32 1.442695, %v16417_v38  ;;  %v18707_v1 = vadd.f32 %v16417_v38, %v18443_v17 }
0x15bc   : > { %16430 = vpow2.f32 %v7589_v29 }
0x15bd   : > { %16432 = vpow2.f32 %v7587_v23  ;;  %v16419_v25 = vpop.eup %16418  ;;  %v14203_v18 = vpop.f32.mrb[32].mxu1 }
0x15be   : > { %v18709_v57 = vpop.f32.mrb[32].mxu0  ;;  %v16421_v21 = vpop.eup %16420  ;;  %v7612_v8 = vmul.f32 %v16419_v25, %v18487_v16  ;;  %16434 = vtanh.f32 %v14203_v18 }
0x15bf   : > { %v7347_v51 = vpop.f32.mrb[33].mxu1  ;;  %v18712_v41 = vpop.f32.mrb[33].mxu0  ;;  %v7611_v2 = vmul.f32 %v16421_v21, %v18494_v39 }
0x15c0   : > { %v16423_v5 = vpop.eup %16422  ;;  %16436 = vtanh.f32 %v7347_v51  ;;  %v18715_v17 = vadd.f32 %v14247_v30, %v7612_v8 }
0x15c1   : > { %v7593_v63 = vmul.f32 1.442695, %v16423_v5  ;;  %v18718_v45 = vadd.f32 %v16423_v5, %v18462_v55  ;;  %v18720_v31 = vadd.f32 %v7611_v2, %v7484_v35 }
0x15c2   : > { %v16425_v11 = vpop.eup %16424 }
0x15c3   : > { %v16427_v9 = vpop.eup %16426  ;;  %v7591_v13 = vmul.f32 1.442695, %v16425_v11  ;;  %v18723_v16 = vadd.f32 %v16425_v11, %v18468_v37  ;;  %16438 = vpow2.f32 %v7593_v63  ;;  %14271 = vmatprep.mubr.msk.f32.mxu1 %vm2077_vm10, %v18720_v31 }
0x15c4   : > { %v16429_v32 = vpop.eup %16428  ;;  %v7614_v38 = vmul.f32 %v16427_v9, %v18505_v58  ;;  %v14206_v30 = vpop.f32.mrb[34].mxu1  ;;  %14272 = vmatmul.mubr.msk.f32.vlgmr.msra.gmra.mrb[40].mxu1 %vm2077_vm10, %v18715_v17 }
0x15c5   : > { %v7613_v39 = vmul.f32 %v16429_v32, %v18511_v7  ;;  %16440 = vpow2.f32 %v7591_v13  ;;  %v18727_v29 = vpop.f32.mrb[34].mxu0  ;;  %v7357_v35 = vpop.f32.mrb[35].mxu1 }
0x15c6   : > { %v18732_v55 = vadd.f32 %v18679_v47, %v7614_v38  ;;  %16442 = vtanh.f32 %v14206_v30  ;;  %v18734_v37 = vpop.f32.mrb[35].mxu0  ;;  %v16431_v58 = vpop.eup %16430 }
0x15c7   : > { %v18739_v7 = vadd.f32 %v7613_v39, %v18681_v20  ;;  %16444 = vtanh.f32 %v7357_v35  ;;  %v16433_v23 = vpop.eup %16432  ;;  %v7616_v25 = vmul.f32 %v16431_v58, %v18523_v33 }
0x15c8   : > { %v7615_v18 = vmul.f32 %v16433_v23, %v18529_v62  ;;  %v14209_v21 = vpop.f32.mrb[36].mxu1  ;;  %v18743_v47 = vpop.f32.mrb[36].mxu0 }
0x15c9   : > { %14274 = vmatprep.mubr.msk.f32.mxu1 %vm2077_vm10, %v18739_v7  ;;  %v16435_v8 = vpop.eup %16434  ;;  %v18748_v51 = vadd.f32 %v18683_v14, %v7616_v25  ;;  %16446 = vtanh.f32 %v14209_v21  ;;  %v7367_v5 = vpop.f32.mrb[37].mxu1 }
0x15ca   : > { %v18750_v20 = vpop.f32.mrb[37].mxu0  ;;  %14275 = vmatmul.mubr.msk.f32.gmra.mrb[42].mxu1 %vm2077_vm10, %v18732_v55  ;;  %v16437_v33 = vpop.eup %16436  ;;  %v18755_v62 = vadd.f32 %v7615_v18, %v18685_v6  ;;  %v7597_v2 = vmul.f32 1.442695, %v16435_v8  ;;  %16448 = vtanh.f32 %v7367_v5  ;;  %v18758_v11 = vadd.f32 %v16435_v8, %v18534_v34 }
0x15cb   : > { %v7595_v63 = vmul.f32 1.442695, %v16437_v33  ;;  %v18761_v14 = vadd.f32 %v16437_v33, %v18517_v61 }
0x15cc   : > { %16450 = vpow2.f32 %v7597_v2  ;;  %14277 = vmatprep.mubr.msk.f32.mxu1 %vm2077_vm10, %v18755_v62  ;;  %v14212_v13 = vpop.f32.mrb[38].mxu1  ;;  %v18765_v32 = vpop.f32.mrb[38].mxu0 }
0x15cd   : > { %v16439_v9 = vpop.eup %16438  ;;  %16452 = vpow2.f32 %v7595_v63  ;;  %v7377_v38 = vpop.f32.mrb[39].mxu1 }
0x15ce   : > { %14278 = vmatmul.mubr.msk.f32.gmra.mrb[44].mxu1 %vm2077_vm10, %v18748_v51  ;;  %v7618_v34 = vmul.f32 %v16439_v9, %v18564_v22  ;;  %16454 = vtanh.f32 %v14212_v13  ;;  %v7554_v39 = vpop.f32.mrb[39].mxu0 }
0x15cf   : > { %v16441_v6 = vpop.eup %16440  ;;  %16456 = vtanh.f32 %v7377_v38 }
0x15d0   : > { %v16443_v61 = vpop.eup %16442  ;;  %v7617_v30 = vmul.f32 %v16441_v6, %v18561_v50  ;;  %v18772_v58 = vadd.f32 %v18693_v54, %v7618_v34 }
0x15d1   : > { %v16445_v35 = vpop.eup %16444  ;;  %v7601_v23 = vmul.f32 1.442695, %v16443_v61  ;;  %v18775_v25 = vadd.f32 %v16443_v61, %v18543_v59 }
0x15d2   : > { %v18778_v18 = vadd.f32 %v7617_v30, %v18695_v43  ;;  %v7599_v21 = vmul.f32 1.442695, %v16445_v35  ;;  %v18781_v22 = vadd.f32 %v16445_v35, %v18537_v49 }
0x15d3   : > { %16458 = vpow2.f32 %v7601_v23  ;;  %v16447_v8 = vpop.eup %16446 }
0x15d4   : > { %16460 = vpow2.f32 %v7599_v21  ;;  %14280 = vmatprep.mubr.msk.f32.mxu1 %vm2077_vm10, %v18778_v18  ;;  %v16449_v50 = vpop.eup %16448  ;;  %v7605_v54 = vmul.f32 1.442695, %v16447_v8  ;;  %v18788_v59 = vadd.f32 %v16447_v8, %v18552_v27 }
0x15d5   : > { %14281 = vmatmul.mubr.msk.f32.gmra.mrb[46].mxu1 %vm2077_vm10, %v18772_v58  ;;  %v7603_v43 = vmul.f32 1.442695, %v16449_v50  ;;  %v18791_v5 = vadd.f32 %v16449_v50, %v18546_v15 }
0x15d6   : > { %v16451_v49 = vpop.eup %16450  ;;  %16462 = vpow2.f32 %v7605_v54  ;;  %v8095_v54 = vld [vmem:[#allocation2 + $0xb38] sm:$0xff] }
0x15d7   : > { %v16453_v33 = vpop.eup %16452  ;;  %v7620_v2 = vmul.f32 %v16451_v49, %v18593_v40  ;;  %16464 = vpow2.f32 %v7603_v43  ;;  %v8096_v43 = vld [vmem:[#allocation2 + $0xb40] sm:$0xff] }
0x15d8   : > { %v16455_v63 = vpop.eup %16454  ;;  %v7619_v9 = vmul.f32 %v16453_v33, %v18589_v3  ;;  %v8097_v33 = vld [vmem:[#allocation2 + $0xb48] sm:$0xff] }
0x15d9   : > { %v16457_v13 = vpop.eup %16456  ;;  %v18796_v6 = vadd.f32 %v18709_v57, %v7620_v2  ;;  %v7609_v34 = vmul.f32 1.442695, %v16455_v63  ;;  %v18799_v27 = vadd.f32 %v16455_v63, %v18555_v46  ;;  %v8098_v2 = vld [vmem:[#allocation2 + $0xb50] sm:$0xff] }
0x15da   : > { %v18802_v15 = vadd.f32 %v7619_v9, %v18712_v41  ;;  %v7607_v38 = vmul.f32 1.442695, %v16457_v13  ;;  %v18805_v61 = vadd.f32 %v16457_v13, %v18568_v0  ;;  %v8100_v9 = vld [vmem:[#allocation2 + $0xb60] sm:$0xff]  ;;  %v8101_v13 = vld [vmem:[#allocation2 + $0xb68] sm:$0xff] }
0x15db   : > { %16466 = vpow2.f32 %v7609_v34  ;;  %v15773_v34 = vpack.c.bf16 %v8101_v13, %v8100_v9 }
0x15dc   : > { %16468 = vpow2.f32 %v7607_v38  ;;  %14283 = vmatprep.mubr.msk.f32.mxu1 %vm2077_vm10, %v18802_v15  ;;  %v8102_v38 = vld [vmem:[#allocation2 + $0xb70] sm:$0xff] }
0x15dd   : > { %v16459_v40 = vpop.eup %16458  ;;  %14284 = vmatmul.mubr.msk.f32.gmra.mrb[48].mxu1 %vm2077_vm10, %v18796_v6 }
0x15de   : > { %v16461_v3 = vpop.eup %16460  ;;  %v7622_v57 = vmul.f32 %v16459_v40, %v18612_v19  ;;  %v8103_v40 = vld [vmem:[#allocation2 + $0xb78] sm:$0xff] }
0x15df   : > { %v7621_v46 = vmul.f32 %v16461_v3, %v18610_v52  ;;  %v15777_v3 = vpack.c.bf16 %v8103_v40, %v8102_v38 }
0x15e0   : > { %v18814_v41 = vadd.f32 %v18727_v29, %v7622_v57  ;;  %v16463_v30 = vpop.eup %16462  ;;  %v8104_v57 = vld [vmem:[#allocation2 + $0xb80] sm:$0xff] }
0x15e1   : > { %v18817_v0 = vadd.f32 %v7621_v46, %v18734_v37  ;;  %v16465_v35 = vpop.eup %16464  ;;  %v7624_v23 = vmul.f32 %v16463_v30, %v18627_v36  ;;  %v8105_v46 = vld [vmem:[#allocation2 + $0xb88] sm:$0xff] }
0x15e2   : > { %v7623_v21 = vmul.f32 %v16465_v35, %v18618_v24  ;;  %v15781_v30 = vpack.c.bf16 %v8105_v46, %v8104_v57  ;;  %v8106_v35 = vld [vmem:[#allocation2 + $0xb90] sm:$0xff]  ;;  %v19713_v46 = vld [vmem:[#allocation67_spill] sm:$0xff] }
0x15e3   : > { %14286 = vmatprep.mubr.msk.f32.mxu1 %vm2077_vm10, %v18817_v0  ;;  %v18824_v19 = vadd.f32 %v18743_v47, %v7624_v23  ;;  %v8107_v23 = vld [vmem:[#allocation2 + $0xb98] sm:$0xff] }
0x15e4   : > { %14287 = vmatmul.mubr.msk.f32.gmra.mrb[50].mxu1 %vm2077_vm10, %v18814_v41  ;;  %v18829_v52 = vadd.f32 %v7623_v21, %v18750_v20  ;;  %v7900_v20 = vld [vmem:[#allocation2 + $0xb28] sm:$0xff]  ;;  %v15785_v21 = vpack.c.bf16 %v8107_v23, %v8106_v35 }
0x15e5   : > { %v16467_v29 = vpop.eup %16466 }
0x15e6   : > { %v16469_v37 = vpop.eup %16468  ;;  %v7626_v8 = vmul.f32 %v16467_v29, %v18636_v42  ;;  %14289 = vmatprep.mubr.msk.f32.mxu1 %vm2077_vm10, %v18829_v52  ;;  %v7899_v42 = vld [vmem:[#allocation2 + $0xb20] sm:$0xff]  ;;  %v19708_v29 = vsub.s32 5, %v19690_v44 }
0x15e7   : > { %v7625_v24 = vmul.f32 %v16469_v37, %v18634_v48  ;;  %v15757_v50 = vpack.c.bf16 %v7900_v20, %v7899_v42  ;;  %v8094_v48 = vld [vmem:[#allocation2 + $0xb30] sm:$0xff]  ;;  %v19710_v20 = vld [vmem:[#allocation47_spill] sm:$0xff] }
0x15e8   : > { %14290 = vmatmul.mubr.msk.f32.gmra.mrb[52].mxu1 %vm2077_vm10, %v18824_v19  ;;  %v18838_v36 = vadd.f32 %v18765_v32, %v7626_v8  ;;  %v15761_v49 = vpack.c.bf16 %v8095_v54, %v8094_v48  ;;  %v15765_v32 = vpack.c.bf16 %v8097_v33, %v8096_v43  ;;  %v18849_v37 = vrot.slane %v17651_v53, %v19708_v29  ;;  %v19709_v8 = vld [vmem:[#allocation51_spill] sm:$0xff] }
0x15e9   : > { %v18840_v47 = vadd.f32 %v7625_v24, %v7554_v39  ;;  %15758 = vmatprep.subr.bf16.mxu0 %v15757_v50  ;;  %v8099_v39 = vld [vmem:[#allocation2 + $0xb58] sm:$0xff]  ;;  %v19711_v33 = vld [vmem:[#allocation59_spill] sm:$0xff] }
0x15ea   : > { %15760 = vmatpush3.bf16.msra.mxu0 %v15757_v50  ;;  %15762 = vmatprep.subr.bf16.mxu1 %v15761_v49  ;;  %v15769_v63 = vpack.c.bf16 %v8099_v39, %v8098_v2  ;;  %v1740_v24 = vadd.f32 %v19709_v8, %v18849_v37  ;;  %v1734_v50 = vadd.f32 %v19710_v20, %v18849_v37 }
0x15eb   : > { %14292 = vmatprep.mubr.msk.f32.mxu1 %vm2077_vm10, %v18840_v47  ;;  %15764 = vmatpush3.bf16.msra.mxu1 %v15761_v49 }
0x15ec   : > { %14293 = vmatmul.mubr.msk.f32.gmra.mrb[54].mxu1 %vm2077_vm10, %v18838_v36  ;;  %15766 = vmatprep.subr.bf16.mxu1 %v15765_v32 }
0x15ef   : > { %15768 = vmatpush3.bf16.msra.mxu1 %v15765_v32  ;;  %v1752_v32 = vadd.f32 %v19711_v33, %v18849_v37 }
0x15f0   : > { %15770 = vmatprep.subr.bf16.mxu1 %v15769_v63 }
0x15f3   : > { %15772 = vmatpush3.bf16.msra.mxu1 %v15769_v63  ;;  %v19712_v63 = vld [vmem:[#allocation55_spill] sm:$0xff] }
0x15f4   : > { %15774 = vmatprep.subr.bf16.mxu1 %v15773_v34  ;;  %v1746_v9 = vadd.f32 %v19712_v63, %v18849_v37 }
0x15f7   : > { %15776 = vmatpush3.bf16.msra.mxu1 %v15773_v34 }
0x15f8   : > { %15778 = vmatprep.subr.bf16.mxu1 %v15777_v3 }
0x15fb   : > { %15780 = vmatpush3.bf16.msra.mxu1 %v15777_v3 }
0x15fc   : > { %15782 = vmatprep.subr.bf16.mxu1 %v15781_v30 }
0x15ff   : > { %15784 = vmatpush3.bf16.msra.mxu1 %v15781_v30  ;;  %v1764_v30 = vadd.f32 %v19713_v46, %v18849_v37  ;;  %v19717_v46 = vld [vmem:[#allocation83_spill] sm:$0xff] }
0x1600   : > { %15786 = vmatprep.subr.bf16.mxu1 %v15785_v21 }
0x1603   : > { %15788 = vmatpush3.bf16.msra.mxu1 %v15785_v21  ;;  %v19714_v21 = vld [vmem:[#allocation63_spill] sm:$0xff] }
0x1604   : > { %v1758_v29 = vadd.f32 %v19714_v21, %v18849_v37 }
0x1697   : > { %v14273_v42 = vpop.f32.mrb[40].mxu1 }
0x1698   : > { %v7764_v48 = vadd.f32 %v14273_v42, %v1740_v24  ;;  %v7758_v54 = vpop.f32.mrb[41].mxu1 }
0x1699   : > { %v7759_v43 = vadd.f32 %v7758_v54, %v1734_v50 }
0x169a   : > { %v7854_v49 = vmul.f32 0.01, %v7764_v48  ;;  %vm7838_vm11 = vcmp.ge.f32.partialorder %v7764_v48, 0.0 }
0x169b   : > { %v7853_v2 = vmul.f32 0.01, %v7759_v43  ;;  %vm7837_vm12 = vcmp.ge.f32.partialorder %v7759_v43, 0.0 }
0x169c   : > { %v7870_v3 = vsel %vm7838_vm11, %v7764_v48, %v7854_v49 }
0x169d   : > { %v14276_v39 = vpop.f32.mrb[42].mxu1  ;;  %v7869_v40 = vsel %vm7837_vm12, %v7759_v43, %v7853_v2  ;;  %v19715_v43 = vld [vmem:[#allocation75_spill] sm:$0xff] }
0x169e   : > { %v7774_v13 = vadd.f32 %v14276_v39, %v1752_v32  ;;  %v7768_v34 = vpop.f32.mrb[43].mxu1  ;;  %14327 = vmatprep.mubr.f32.mxu0 %v7869_v40  ;;  %v1776_v49 = vadd.f32 %v19715_v43, %v18849_v37  ;;  %v19716_v39 = vld [vmem:[#allocation71_spill] sm:$0xff] }
0x169f   : > { %v7769_v38 = vadd.f32 %v7768_v34, %v1746_v9  ;;  %14328 = vmatmul.mubr.f32.vlgmr.msra.gmra.mrb[40].mxu0 %v7870_v3  ;;  %v1770_v63 = vadd.f32 %v19716_v39, %v18849_v37  ;;  %v19720_v43 = vld [vmem:[#allocation87_spill] sm:$0xff] }
0x16a0   : > { %v7856_v57 = vmul.f32 0.01, %v7774_v13  ;;  %vm7840_vm13 = vcmp.ge.f32.partialorder %v7774_v13, 0.0 }
0x16a1   : > { %v7855_v35 = vmul.f32 0.01, %v7769_v38  ;;  %v14279_v23 = vpop.f32.mrb[44].mxu1  ;;  %vm7839_vm14 = vcmp.ge.f32.partialorder %v7769_v38, 0.0 }
0x16a2   : > { %v7784_v8 = vadd.f32 %v14279_v23, %v1764_v30  ;;  %v7778_v24 = vpop.f32.mrb[45].mxu1  ;;  %v7872_v50 = vsel %vm7840_vm13, %v7774_v13, %v7856_v57  ;;  %v1788_v30 = vadd.f32 %v19717_v46, %v18849_v37  ;;  %v19718_v23 = vld [vmem:[#allocation79_spill] sm:$0xff] }
0x16a3   : > { %v7779_v42 = vadd.f32 %v7778_v24, %v1758_v29  ;;  %v7871_v20 = vsel %vm7839_vm14, %v7769_v38, %v7855_v35  ;;  %v1782_v21 = vadd.f32 %v19718_v23, %v18849_v37 }
0x16a4   : > { %v7858_v54 = vmul.f32 0.01, %v7784_v8  ;;  %14330 = vmatprep.mubr.f32.mxu0 %v7871_v20  ;;  %vm7842_vm0 = vcmp.ge.f32.partialorder %v7784_v8, 0.0 }
0x16a5   : > { %v7857_v48 = vmul.f32 0.01, %v7779_v42  ;;  %14331 = vmatmul.mubr.f32.gmra.mrb[42].mxu0 %v7872_v50  ;;  %vm7841_vm15 = vcmp.ge.f32.partialorder %v7779_v42, 0.0  ;;  %v19719_v50 = vld [vmem:[#allocation91_spill] sm:$0xff] }
0x16a6   : > { %v7874_v32 = vsel %vm7842_vm0, %v7784_v8, %v7858_v54  ;;  %v1800_v54 = vadd.f32 %v19719_v50, %v18849_v37  ;;  %v19724_v50 = vld [vmem:[#allocation103_spill] sm:$0xff] }
0x16a7   : > { %v7873_v33 = vsel %vm7841_vm15, %v7779_v42, %v7857_v48 }
0x16a8   : > { %v14282_v2 = vpop.f32.mrb[46].mxu1  ;;  %14333 = vmatprep.mubr.f32.mxu0 %v7873_v33 }
0x16a9   : > { %v7794_v9 = vadd.f32 %v14282_v2, %v1776_v49  ;;  %v7788_v34 = vpop.f32.mrb[47].mxu1  ;;  %14334 = vmatmul.mubr.f32.gmra.mrb[44].mxu0 %v7874_v32  ;;  %v1794_v49 = vadd.f32 %v19720_v43, %v18849_v37 }
0x16aa   : > { %v7789_v13 = vadd.f32 %v7788_v34, %v1770_v63  ;;  %v19721_v34 = vld [vmem:[#allocation99_spill] sm:$0xff] }
0x16ab   : > { %v7860_v38 = vmul.f32 0.01, %v7794_v9  ;;  %vm7844_vm2 = vcmp.ge.f32.partialorder %v7794_v9, 0.0 }
0x16ac   : > { %v7859_v40 = vmul.f32 0.01, %v7789_v13  ;;  %vm7843_vm3 = vcmp.ge.f32.partialorder %v7789_v13, 0.0 }
0x16ad   : > { %v7876_v57 = vsel %vm7844_vm2, %v7794_v9, %v7860_v38 }
0x16ae   : > { %v7875_v3 = vsel %vm7843_vm3, %v7789_v13, %v7859_v40  ;;  %v1812_v13 = vadd.f32 %v19721_v34, %v18849_v37  ;;  %v8108_v34 = vld [vmem:[#allocation2 + $0xba0] sm:$0xff] }
0x16af   : > { %14336 = vmatprep.mubr.f32.mxu0 %v7875_v3  ;;  %v19722_v3 = vld [vmem:[#allocation95_spill] sm:$0xff] }
0x16b0   : > { %14337 = vmatmul.mubr.f32.gmra.mrb[46].mxu0 %v7876_v57  ;;  %v14285_v35 = vpop.f32.mrb[48].mxu1  ;;  %v1806_v57 = vadd.f32 %v19722_v3, %v18849_v37  ;;  %v8480_v3 = vld [vmem:[#allocation2 + $0xc30] sm:$0xff] }
0x16b1   : > { %v7804_v29 = vadd.f32 %v14285_v35, %v1788_v30  ;;  %v7798_v8 = vpop.f32.mrb[49].mxu1 }
0x16b2   : > { %v7799_v24 = vadd.f32 %v7798_v8, %v1782_v21 }
0x16b3   : > { %v7862_v42 = vmul.f32 0.01, %v7804_v29  ;;  %vm7846_vm4 = vcmp.ge.f32.partialorder %v7804_v29, 0.0 }
0x16b4   : > { %v7861_v20 = vmul.f32 0.01, %v7799_v24  ;;  %vm7845_vm5 = vcmp.ge.f32.partialorder %v7799_v24, 0.0 }
0x16b5   : > { %v7878_v32 = vsel %vm7846_vm4, %v7804_v29, %v7862_v42 }
0x16b6   : > { %v7877_v33 = vsel %vm7845_vm5, %v7799_v24, %v7861_v20  ;;  %v19723_v24 = vld [vmem:[#allocation107_spill] sm:$0xff] }
0x16b7   : > { %v14288_v48 = vpop.f32.mrb[50].mxu1  ;;  %14339 = vmatprep.mubr.f32.mxu0 %v7877_v33  ;;  %v1824_v42 = vadd.f32 %v19723_v24, %v18849_v37 }
0x16b8   : > { %v7814_v2 = vadd.f32 %v14288_v48, %v1800_v54  ;;  %v7808_v39 = vpop.f32.mrb[51].mxu1  ;;  %14340 = vmatmul.mubr.f32.gmra.mrb[48].mxu0 %v7878_v32  ;;  %v1818_v54 = vadd.f32 %v19724_v50, %v18849_v37  ;;  %v8303_v37 = vld [vmem:[#allocation2 + $0xbb0] sm:$0xff] }
0x16b9   : > { %v7809_v63 = vadd.f32 %v7808_v39, %v1794_v49 }
0x16ba   : > { %v7864_v9 = vmul.f32 0.01, %v7814_v2  ;;  %vm7848_vm6 = vcmp.ge.f32.partialorder %v7814_v2, 0.0 }
0x16bb   : > { %v7863_v38 = vmul.f32 0.01, %v7809_v63  ;;  %v14291_v40 = vpop.f32.mrb[52].mxu1  ;;  %vm7847_vm7 = vcmp.ge.f32.partialorder %v7809_v63, 0.0 }
0x16bc   : > { %v7824_v46 = vadd.f32 %v14291_v40, %v1812_v13  ;;  %v7818_v30 = vpop.f32.mrb[53].mxu1  ;;  %v7880_v21 = vsel %vm7848_vm6, %v7814_v2, %v7864_v9  ;;  %v8109_v13 = vld [vmem:[#allocation2 + $0xba8] sm:$0xff]  ;;  %v8304_v40 = vld [vmem:[#allocation2 + $0xbb8] sm:$0xff] }
0x16bd   : > { %v7819_v35 = vadd.f32 %v7818_v30, %v1806_v57  ;;  %v7879_v23 = vsel %vm7847_vm7, %v7809_v63, %v7863_v38  ;;  %v15789_v38 = vpack.c.bf16 %v8109_v13, %v8108_v34  ;;  %v15793_v57 = vpack.c.bf16 %v8304_v40, %v8303_v37  ;;  %v8305_v30 = vld [vmem:[#allocation2 + $0xbc0] sm:$0xff]  ;;  %v8483_v37 = vld [vmem:[#allocation2 + $0xc48] sm:$0xff] }
0x16be   : > { %v7866_v29 = vmul.f32 0.01, %v7824_v46  ;;  %14342 = vmatprep.mubr.f32.mxu0 %v7879_v23  ;;  %vm7850_vm1 = vcmp.ge.f32.partialorder %v7824_v46, 0.0 }
0x16bf   : > { %v7865_v8 = vmul.f32 0.01, %v7819_v35  ;;  %14343 = vmatmul.mubr.f32.gmra.mrb[50].mxu0 %v7880_v21  ;;  %vm7849_vm8 = vcmp.ge.f32.partialorder %v7819_v35, 0.0  ;;  %v14294_v20 = vpop.f32.mrb[54].mxu1  ;;  %15790 = vmatprep.subr.bf16.mxu1 %v15789_v38 }
0x16c0   : > { %v7834_v48 = vadd.f32 %v14294_v20, %v1824_v42  ;;  %v7828_v43 = vpop.f32.mrb[55].mxu1  ;;  %v7882_v33 = vsel %vm7850_vm1, %v7824_v46, %v7866_v29  ;;  %15792 = vmatpush3.bf16.msra.mxu1 %v15789_v38  ;;  %v8481_v46 = vld [vmem:[#allocation2 + $0xc38] sm:$0xff]  ;;  %v8307_v29 = vld [vmem:[#allocation2 + $0xbd0] sm:$0xff]  ;;  %15794 = vmatprep.subr.bf16.mxu0 %v15793_v57  ;;  %v8309_v42 = vld [vmem:[#allocation2 + $0xbe0] sm:$0xff] }
0x16c1   : > { %v7881_v49 = vsel %vm7849_vm8, %v7819_v35, %v7865_v8  ;;  %v7829_v32 = vadd.f32 %v7828_v43, %v1818_v54  ;;  %v8306_v35 = vld [vmem:[#allocation2 + $0xbc8] sm:$0xff]  ;;  %v15825_v23 = vpack.c.bf16 %v8481_v46, %v8480_v3  ;;  %v8308_v8 = vld [vmem:[#allocation2 + $0xbd8] sm:$0xff]  ;;  %15796 = vmatpush3.bf16.msra.mxu0 %v15793_v57  ;;  %v8311_v54 = vld [vmem:[#allocation2 + $0xbf0] sm:$0xff] }
0x16c2   : > { %14345 = vmatprep.mubr.f32.mxu0 %v7881_v49  ;;  %v7868_v2 = vmul.f32 0.01, %v7834_v48  ;;  %vm7852_vm9 = vcmp.ge.f32.partialorder %v7834_v48, 0.0  ;;  %v15797_v21 = vpack.c.bf16 %v8306_v35, %v8305_v30  ;;  %v15801_v24 = vpack.c.bf16 %v8308_v8, %v8307_v29  ;;  %v8310_v20 = vld [vmem:[#allocation2 + $0xbe8] sm:$0xff]  ;;  %v8313_v49 = vld [vmem:[#allocation2 + $0xc00] sm:$0xff]  ;;  %v8484_v29 = vld [vmem:[#allocation2 + $0xc50] sm:$0xff] }
0x16c3   : > { %14346 = vmatmul.mubr.f32.gmra.mrb[52].mxu0 %v7882_v33  ;;  %v7867_v39 = vmul.f32 0.01, %v7829_v32  ;;  %vm7851_vm11 = vcmp.ge.f32.partialorder %v7829_v32, 0.0  ;;  %15826 = vmatprep.subr.bf16.mxu1 %v15825_v23  ;;  %v15805_v50 = vpack.c.bf16 %v8310_v20, %v8309_v42  ;;  %v8314_v33 = vld [vmem:[#allocation2 + $0xc08] sm:$0xff]  ;;  %v8482_v38 = vld [vmem:[#allocation2 + $0xc40] sm:$0xff]  ;;  %v8485_v8 = vld [vmem:[#allocation2 + $0xc58] sm:$0xff] }
0x16c4   : > { %v7884_v9 = vsel %vm7852_vm9, %v7834_v48, %v7868_v2  ;;  %15798 = vmatprep.subr.bf16.mxu0 %v15797_v21  ;;  %v8312_v48 = vld [vmem:[#allocation2 + $0xbf8] sm:$0xff]  ;;  %v8315_v2 = vld [vmem:[#allocation2 + $0xc10] sm:$0xff]  ;;  %v15829_v46 = vpack.c.bf16 %v8483_v37, %v8482_v38 }
0x16c5   : > { %v7883_v63 = vsel %vm7851_vm11, %v7829_v32, %v7867_v39  ;;  %15800 = vmatpush3.bf16.msra.mxu0 %v15797_v21  ;;  %v15809_v43 = vpack.c.bf16 %v8312_v48, %v8311_v54  ;;  %v15813_v32 = vpack.c.bf16 %v8314_v33, %v8313_v49  ;;  %v8316_v39 = vld [vmem:[#allocation2 + $0xc18] sm:$0xff]  ;;  %v8486_v49 = vld [vmem:[#allocation2 + $0xc60] sm:$0xff]  ;;  %v8487_v33 = vld [vmem:[#allocation2 + $0xc68] sm:$0xff] }
0x16c6   : > { %14348 = vmatprep.mubr.f32.mxu0 %v7883_v63  ;;  %15802 = vmatprep.subr.bf16.mxu0 %v15801_v24  ;;  %v15817_v63 = vpack.c.bf16 %v8316_v39, %v8315_v2  ;;  %v15837_v39 = vpack.c.bf16 %v8487_v33, %v8486_v49 }
0x16c7   : > { %14349 = vmatmul.mubr.f32.gmra.mrb[54].mxu0 %v7884_v9 }
0x16c9   : > { %15804 = vmatpush3.bf16.msra.mxu0 %v15801_v24 }
0x16ca   : > { %15806 = vmatprep.subr.bf16.mxu0 %v15805_v50 }
0x16cd   : > { %15808 = vmatpush3.bf16.msra.mxu0 %v15805_v50  ;;  %v15833_v50 = vpack.c.bf16 %v8485_v8, %v8484_v29  ;;  %v8493_v29 = vld [vmem:[#allocation2 + $0xc98] sm:$0xff] }
0x16ce   : > { %15810 = vmatprep.subr.bf16.mxu0 %v15809_v43 }
0x16d1   : > { %15812 = vmatpush3.bf16.msra.mxu0 %v15809_v43 }
0x16d2   : > { %15814 = vmatprep.subr.bf16.mxu0 %v15813_v32 }
0x16d5   : > { %15816 = vmatpush3.bf16.msra.mxu0 %v15813_v32 }
0x16d6   : > { %15818 = vmatprep.subr.bf16.mxu0 %v15817_v63 }
0x16d9   : > { %15820 = vmatpush3.bf16.msra.mxu0 %v15817_v63 }
0x1772   : > { %v14329_v9 = vpop.f32.mrb[40].mxu0 }
0x1773   : > { %v8063_v34 = vmul.f32 0.01, %v14329_v9  ;;  %v7967_v13 = vpop.f32.mrb[41].mxu0  ;;  %vm8047_vm12 = vcmp.ge.f32.partialorder %v14329_v9, 0.0 }
0x1774   : > { %vm8046_vm13 = vcmp.ge.f32.partialorder %v7967_v13, 0.0  ;;  %v8062_v40 = vmul.f32 0.01, %v7967_v13 }
0x1775   : > { %v8079_v30 = vsel %vm8047_vm12, %v14329_v9, %v8063_v34  ;;  %v8489_v9 = vld [vmem:[#allocation2 + $0xc78] sm:$0xff] }
0x1776   : > { %v8078_v57 = vsel %vm8046_vm13, %v7967_v13, %v8062_v40 }
0x1777   : > { %14383 = vmatprep.mubr.f32.mxu1 %v8078_v57  ;;  %v8491_v57 = vld [vmem:[#allocation2 + $0xc88] sm:$0xff] }
0x1778   : > { %v14332_v3 = vpop.f32.mrb[42].mxu0  ;;  %14384 = vmatmul.mubr.f32.vlgmr.msra.gmra.mrb[56].mxu1 %v8079_v30 }
0x1779   : > { %v8065_v35 = vmul.f32 0.01, %v14332_v3  ;;  %v7977_v21 = vpop.f32.mrb[43].mxu0  ;;  %vm8049_vm14 = vcmp.ge.f32.partialorder %v14332_v3, 0.0  ;;  %15828 = vmatpush3.bf16.msra.mxu1 %v15825_v23  ;;  %v8488_v23 = vld [vmem:[#allocation2 + $0xc70] sm:$0xff] }
0x177a   : > { %vm8048_vm0 = vcmp.ge.f32.partialorder %v7977_v21, 0.0  ;;  %v8064_v24 = vmul.f32 0.01, %v7977_v21  ;;  %15830 = vmatprep.subr.bf16.mxu1 %v15829_v46  ;;  %v15841_v37 = vpack.c.bf16 %v8489_v9, %v8488_v23 }
0x177b   : > { %v8081_v54 = vsel %vm8049_vm14, %v14332_v3, %v8065_v35  ;;  %v8490_v3 = vld [vmem:[#allocation2 + $0xc80] sm:$0xff] }
0x177c   : > { %v14335_v42 = vpop.f32.mrb[44].mxu0  ;;  %v8080_v20 = vsel %vm8048_vm0, %v7977_v21, %v8064_v24  ;;  %v15845_v35 = vpack.c.bf16 %v8491_v57, %v8490_v3  ;;  %v8492_v21 = vld [vmem:[#allocation2 + $0xc90] sm:$0xff] }
0x177d   : > { %v8067_v48 = vmul.f32 0.01, %v14335_v42  ;;  %v7987_v43 = vpop.f32.mrb[45].mxu0  ;;  %14386 = vmatprep.mubr.f32.mxu1 %v8080_v20  ;;  %vm8051_vm15 = vcmp.ge.f32.partialorder %v14335_v42, 0.0  ;;  %15832 = vmatpush3.bf16.msra.mxu1 %v15829_v46  ;;  %v15849_v24 = vpack.c.bf16 %v8493_v29, %v8492_v21  ;;  %v8318_v21 = vld [vmem:[#allocation2 + $0xc28] sm:$0xff]  ;;  %v8494_v29 = vld [vmem:[#allocation2 + $0xca0] sm:$0xff] }
0x177e   : > { %vm8050_vm2 = vcmp.ge.f32.partialorder %v7987_v43, 0.0  ;;  %v8066_v32 = vmul.f32 0.01, %v7987_v43  ;;  %14387 = vmatmul.mubr.f32.gmra.mrb[58].mxu1 %v8081_v54  ;;  %15834 = vmatprep.subr.bf16.mxu1 %v15833_v50 }
0x177f   : > { %v8083_v63 = vsel %vm8051_vm15, %v14335_v42, %v8067_v48 }
0x1780   : > { %v8082_v2 = vsel %vm8050_vm2, %v7987_v43, %v8066_v32 }
0x1781   : > { %14389 = vmatprep.mubr.f32.mxu1 %v8082_v2  ;;  %15836 = vmatpush3.bf16.msra.mxu1 %v15833_v50 }
0x1782   : > { %14390 = vmatmul.mubr.f32.gmra.mrb[60].mxu1 %v8083_v63  ;;  %15838 = vmatprep.subr.bf16.mxu1 %v15837_v39 }
0x1783   : > { %v14338_v34 = vpop.f32.mrb[46].mxu0 }
0x1784   : > { %v8069_v13 = vmul.f32 0.01, %v14338_v34  ;;  %v7997_v38 = vpop.f32.mrb[47].mxu0  ;;  %vm8053_vm3 = vcmp.ge.f32.partialorder %v14338_v34, 0.0 }
0x1785   : > { %vm8052_vm4 = vcmp.ge.f32.partialorder %v7997_v38, 0.0  ;;  %v8068_v40 = vmul.f32 0.01, %v7997_v38  ;;  %15840 = vmatpush3.bf16.msra.mxu1 %v15837_v39 }
0x1786   : > { %v8085_v30 = vsel %vm8053_vm3, %v14338_v34, %v8069_v13  ;;  %15842 = vmatprep.subr.bf16.mxu1 %v15841_v37 }
0x1787   : > { %v8084_v46 = vsel %vm8052_vm4, %v7997_v38, %v8068_v40 }
0x1788   : > { %14392 = vmatprep.mubr.f32.mxu1 %v8084_v46 }
0x1789   : > { %14393 = vmatmul.mubr.f32.gmra.mrb[62].mxu1 %v8085_v30 }
0x178a   : > { %15844 = vmatpush3.bf16.msra.mxu1 %v15841_v37 }
0x178b   : > { %v14341_v8 = vpop.f32.mrb[48].mxu0  ;;  %15846 = vmatprep.subr.bf16.mxu1 %v15845_v35 }
0x178c   : > { %v8071_v42 = vmul.f32 0.01, %v14341_v8  ;;  %v8007_v20 = vpop.f32.mrb[49].mxu0  ;;  %vm8055_vm5 = vcmp.ge.f32.partialorder %v14341_v8, 0.0 }
0x178d   : > { %vm8054_vm6 = vcmp.ge.f32.partialorder %v8007_v20, 0.0  ;;  %v8070_v50 = vmul.f32 0.01, %v8007_v20 }
0x178e   : > { %15848 = vmatpush3.bf16.msra.mxu1 %v15845_v35  ;;  %v8087_v48 = vsel %vm8055_vm5, %v14341_v8, %v8071_v42  ;;  %v8317_v35 = vld [vmem:[#allocation2 + $0xc20] sm:$0xff] }
0x178f   : > { %v8086_v54 = vsel %vm8054_vm6, %v8007_v20, %v8070_v50  ;;  %15850 = vmatprep.subr.bf16.mxu1 %v15849_v24  ;;  %v15821_v8 = vpack.c.bf16 %v8318_v21, %v8317_v35 }
0x1790   : > { %14395 = vmatprep.mubr.f32.mxu1 %v8086_v54 }
0x1791   : > { %14396 = vmatmul.mubr.f32.gmra.mrb[64].mxu1 %v8087_v48  ;;  %15822 = vmatprep.subr.bf16.mxu0 %v15821_v8 }
0x1792   : > { %v14344_v43 = vpop.f32.mrb[50].mxu0  ;;  %15852 = vmatpush3.bf16.msra.mxu1 %v15849_v24  ;;  %v8495_v24 = vld [vmem:[#allocation2 + $0xca8] sm:$0xff]  ;;  %15824 = vmatpush3.bf16.msra.mxu0 %v15821_v8 }
0x1793   : > { %v8073_v49 = vmul.f32 0.01, %v14344_v43  ;;  %v8017_v33 = vpop.f32.mrb[51].mxu0  ;;  %vm8057_vm7 = vcmp.ge.f32.partialorder %v14344_v43, 0.0  ;;  %v15853_v42 = vpack.c.bf16 %v8495_v24, %v8494_v29 }
0x1794   : > { %vm8056_vm1 = vcmp.ge.f32.partialorder %v8017_v33, 0.0  ;;  %v8072_v32 = vmul.f32 0.01, %v8017_v33 }
0x1795   : > { %v8089_v63 = vsel %vm8057_vm7, %v14344_v43, %v8073_v49  ;;  %15854 = vmatprep.subr.bf16.mxu1 %v15853_v42 }
0x1796   : > { %v14347_v2 = vpop.f32.mrb[52].mxu0  ;;  %v8088_v39 = vsel %vm8056_vm1, %v8017_v33, %v8072_v32  ;;  %15856 = vmatpush3.bf16.msra.mxu1 %v15853_v42 }
0x1797   : > { %v8075_v23 = vmul.f32 0.01, %v14347_v2  ;;  %v8027_v9 = vpop.f32.mrb[53].mxu0  ;;  %14398 = vmatprep.mubr.f32.mxu1 %v8088_v39  ;;  %vm8059_vm8 = vcmp.ge.f32.partialorder %v14347_v2, 0.0 }
0x1798   : > { %vm8058_vm9 = vcmp.ge.f32.partialorder %v8027_v9, 0.0  ;;  %v8074_v34 = vmul.f32 0.01, %v8027_v9  ;;  %14399 = vmatmul.mubr.f32.gmra.mrb[66].mxu1 %v8089_v63 }
0x1799   : > { %v8091_v38 = vsel %vm8059_vm8, %v14347_v2, %v8075_v23 }
0x179a   : > { %v8090_v13 = vsel %vm8058_vm9, %v8027_v9, %v8074_v34  ;;  %v14350_v37 = vpop.f32.mrb[54].mxu0 }
0x179b   : > { %14401 = vmatprep.mubr.f32.mxu1 %v8090_v13  ;;  %v8077_v40 = vmul.f32 0.01, %v14350_v37  ;;  %v8037_v3 = vpop.f32.mrb[55].mxu0  ;;  %vm8061_vm11 = vcmp.ge.f32.partialorder %v14350_v37, 0.0 }
0x179c   : > { %14402 = vmatmul.mubr.f32.gmra.mrb[68].mxu1 %v8091_v38  ;;  %vm8060_vm12 = vcmp.ge.f32.partialorder %v8037_v3, 0.0  ;;  %v8076_v57 = vmul.f32 0.01, %v8037_v3 }
0x179d   : > { %v8093_v30 = vsel %vm8061_vm11, %v14350_v37, %v8077_v40 }
0x179e   : > { %v8092_v46 = vsel %vm8060_vm12, %v8037_v3, %v8076_v57 }
0x179f   : > { %14404 = vmatprep.mubr.f32.mxu1 %v8092_v46 }
0x17a0   : > { %14405 = vmatmul.mubr.f32.gmra.mrb[70].mxu1 %v8093_v30 }
0x184b   : > { %v14385_v20 = vpop.f32.mrb[56].mxu1 }
0x184c   : > { %v8272_v50 = vmul.f32 0.01, %v14385_v20  ;;  %v8176_v54 = vpop.f32.mrb[57].mxu1  ;;  %vm8256_vm13 = vcmp.ge.f32.partialorder %v14385_v20, 0.0 }
0x184d   : > { %vm8255_vm14 = vcmp.ge.f32.partialorder %v8176_v54, 0.0  ;;  %v8271_v48 = vmul.f32 0.01, %v8176_v54 }
0x184e   : > { %v8288_v33 = vsel %vm8256_vm13, %v14385_v20, %v8272_v50 }
0x184f   : > { %v8287_v49 = vsel %vm8255_vm14, %v8176_v54, %v8271_v48 }
0x1850   : > { %14439 = vmatprep.mubr.f32.mxu0 %v8287_v49  ;;  %14495 = vmatprep.mubr.f32.mxu1 %v8287_v49 }
0x1851   : > { %v14388_v43 = vpop.f32.mrb[58].mxu1  ;;  %14440 = vmatmul.mubr.f32.vlgmr.msra.gmra.mrb[56].mxu0 %v8288_v33  ;;  %14496 = vmatmul.mubr.f32.vlgmr.msra.gmra.mrb[72].mxu1 %v8288_v33 }
0x1852   : > { %v8274_v32 = vmul.f32 0.01, %v14388_v43  ;;  %v8186_v2 = vpop.f32.mrb[59].mxu1  ;;  %vm8258_vm0 = vcmp.ge.f32.partialorder %v14388_v43, 0.0 }
0x1853   : > { %vm8257_vm15 = vcmp.ge.f32.partialorder %v8186_v2, 0.0  ;;  %v8273_v39 = vmul.f32 0.01, %v8186_v2 }
0x1854   : > { %v8290_v9 = vsel %vm8258_vm0, %v14388_v43, %v8274_v32 }
0x1855   : > { %v14391_v63 = vpop.f32.mrb[60].mxu1  ;;  %v8289_v23 = vsel %vm8257_vm15, %v8186_v2, %v8273_v39 }
0x1856   : > { %v8276_v34 = vmul.f32 0.01, %v14391_v63  ;;  %v8196_v13 = vpop.f32.mrb[61].mxu1  ;;  %14442 = vmatprep.mubr.f32.mxu0 %v8289_v23  ;;  %14498 = vmatprep.mubr.f32.mxu1 %v8289_v23  ;;  %vm8260_vm2 = vcmp.ge.f32.partialorder %v14391_v63, 0.0 }
0x1857   : > { %vm8259_vm3 = vcmp.ge.f32.partialorder %v8196_v13, 0.0  ;;  %v8275_v38 = vmul.f32 0.01, %v8196_v13  ;;  %14443 = vmatmul.mubr.f32.gmra.mrb[58].mxu0 %v8290_v9  ;;  %14499 = vmatmul.mubr.f32.gmra.mrb[74].mxu1 %v8290_v9 }
0x1858   : > { %v8292_v40 = vsel %vm8260_vm2, %v14391_v63, %v8276_v34 }
0x1859   : > { %v8291_v37 = vsel %vm8259_vm3, %v8196_v13, %v8275_v38 }
0x185a   : > { %14445 = vmatprep.mubr.f32.mxu0 %v8291_v37  ;;  %14501 = vmatprep.mubr.f32.mxu1 %v8291_v37 }
0x185b   : > { %14446 = vmatmul.mubr.f32.gmra.mrb[60].mxu0 %v8292_v40  ;;  %14502 = vmatmul.mubr.f32.gmra.mrb[76].mxu1 %v8292_v40 }
0x185c   : > { %v14394_v3 = vpop.f32.mrb[62].mxu1 }
0x185d   : > { %v8278_v57 = vmul.f32 0.01, %v14394_v3  ;;  %v8206_v46 = vpop.f32.mrb[63].mxu1  ;;  %vm8262_vm4 = vcmp.ge.f32.partialorder %v14394_v3, 0.0 }
0x185e   : > { %vm8261_vm5 = vcmp.ge.f32.partialorder %v8206_v46, 0.0  ;;  %v8277_v30 = vmul.f32 0.01, %v8206_v46 }
0x185f   : > { %v8294_v21 = vsel %vm8262_vm4, %v14394_v3, %v8278_v57 }
0x1860   : > { %v8293_v35 = vsel %vm8261_vm5, %v8206_v46, %v8277_v30  ;;  %v8809_v46 = vld [vmem:[#allocation2 + $0xcb0] sm:$0xff]  ;;  %v9051_v30 = vld [vmem:[#allocation2 + $0xcb8] sm:$0xff] }
0x1861   : > { %14448 = vmatprep.mubr.f32.mxu0 %v8293_v35  ;;  %14504 = vmatprep.mubr.f32.mxu1 %v8293_v35  ;;  %v9052_v35 = vld [vmem:[#allocation2 + $0xcc0] sm:$0xff] }
0x1862   : > { %14449 = vmatmul.mubr.f32.gmra.mrb[62].mxu0 %v8294_v21  ;;  %14505 = vmatmul.mubr.f32.gmra.mrb[78].mxu1 %v8294_v21  ;;  %v9053_v21 = vld [vmem:[#allocation2 + $0xcc8] sm:$0xff] }
0x1863   : > { %14519 = vmatprep.subr.mxu0 %v8809_v46 }
0x1864   : > { %v14397_v29 = vpop.f32.mrb[64].mxu1  ;;  %14520 = vmatpush3.msra.mxu0 %v8809_v46 }
0x1865   : > { %v8280_v8 = vmul.f32 0.01, %v14397_v29  ;;  %v8216_v24 = vpop.f32.mrb[65].mxu1  ;;  %vm8264_vm6 = vcmp.ge.f32.partialorder %v14397_v29, 0.0 }
0x1866   : > { %vm8263_vm7 = vcmp.ge.f32.partialorder %v8216_v24, 0.0  ;;  %v8279_v42 = vmul.f32 0.01, %v8216_v24 }
0x1867   : > { %v8296_v50 = vsel %vm8264_vm6, %v14397_v29, %v8280_v8  ;;  %v15857_v29 = vpack.c.bf16 %v9052_v35, %v9051_v30  ;;  %v9054_v8 = vld [vmem:[#allocation2 + $0xcd0] sm:$0xff] }
0x1868   : > { %v8295_v20 = vsel %vm8263_vm7, %v8216_v24, %v8279_v42  ;;  %v15861_v24 = vpack.c.bf16 %v9054_v8, %v9053_v21  ;;  %v9055_v42 = vld [vmem:[#allocation2 + $0xcd8] sm:$0xff] }
0x1869   : > { %14451 = vmatprep.mubr.f32.mxu0 %v8295_v20  ;;  %14507 = vmatprep.mubr.f32.mxu1 %v8295_v20  ;;  %v9056_v20 = vld [vmem:[#allocation2 + $0xce0] sm:$0xff] }
0x186a   : > { %14452 = vmatmul.mubr.f32.gmra.mrb[64].mxu0 %v8296_v50  ;;  %14508 = vmatmul.mubr.f32.gmra.mrb[80].mxu1 %v8296_v50  ;;  %v15865_v50 = vpack.c.bf16 %v9056_v20, %v9055_v42 }
0x186b   : > { %v14400_v54 = vpop.f32.mrb[66].mxu1  ;;  %15858 = vmatprep.subr.bf16.mxu1 %v15857_v29 }
0x186c   : > { %v8282_v48 = vmul.f32 0.01, %v14400_v54  ;;  %v8226_v43 = vpop.f32.mrb[67].mxu1  ;;  %vm8266_vm1 = vcmp.ge.f32.partialorder %v14400_v54, 0.0  ;;  %15860 = vmatpush3.bf16.msra.mxu1 %v15857_v29 }
0x186d   : > { %vm8265_vm8 = vcmp.ge.f32.partialorder %v8226_v43, 0.0  ;;  %v8281_v49 = vmul.f32 0.01, %v8226_v43  ;;  %15862 = vmatprep.subr.bf16.mxu1 %v15861_v24 }
0x186e   : > { %v8298_v2 = vsel %vm8266_vm1, %v14400_v54, %v8282_v48  ;;  %v9057_v54 = vld [vmem:[#allocation2 + $0xce8] sm:$0xff]  ;;  %v9058_v48 = vld [vmem:[#allocation2 + $0xcf0] sm:$0xff] }
0x186f   : > { %v14403_v33 = vpop.f32.mrb[68].mxu1  ;;  %v8297_v32 = vsel %vm8265_vm8, %v8226_v43, %v8281_v49  ;;  %v15869_v43 = vpack.c.bf16 %v9058_v48, %v9057_v54  ;;  %v9059_v49 = vld [vmem:[#allocation2 + $0xcf8] sm:$0xff] }
0x1870   : > { %v8284_v39 = vmul.f32 0.01, %v14403_v33  ;;  %v8236_v63 = vpop.f32.mrb[69].mxu1  ;;  %14454 = vmatprep.mubr.f32.mxu0 %v8297_v32  ;;  %14510 = vmatprep.mubr.f32.mxu1 %v8297_v32  ;;  %vm8268_vm9 = vcmp.ge.f32.partialorder %v14403_v33, 0.0 }
0x1871   : > { %vm8267_vm11 = vcmp.ge.f32.partialorder %v8236_v63, 0.0  ;;  %v8283_v23 = vmul.f32 0.01, %v8236_v63  ;;  %14455 = vmatmul.mubr.f32.gmra.mrb[66].mxu0 %v8298_v2  ;;  %14511 = vmatmul.mubr.f32.gmra.mrb[82].mxu1 %v8298_v2  ;;  %v9061_v2 = vld [vmem:[#allocation2 + $0xd08] sm:$0xff] }
0x1872   : > { %v8300_v34 = vsel %vm8268_vm9, %v14403_v33, %v8284_v39  ;;  %15864 = vmatpush3.bf16.msra.mxu1 %v15861_v24  ;;  %v9060_v33 = vld [vmem:[#allocation2 + $0xd00] sm:$0xff]  ;;  %v9062_v39 = vld [vmem:[#allocation2 + $0xd10] sm:$0xff] }
0x1873   : > { %v8299_v9 = vsel %vm8267_vm11, %v8236_v63, %v8283_v23  ;;  %v14406_v13 = vpop.f32.mrb[70].mxu1  ;;  %15866 = vmatprep.subr.bf16.mxu1 %v15865_v50  ;;  %v15873_v32 = vpack.c.bf16 %v9060_v33, %v9059_v49  ;;  %v15877_v63 = vpack.c.bf16 %v9062_v39, %v9061_v2  ;;  %v9063_v23 = vld [vmem:[#allocation2 + $0xd18] sm:$0xff] }
0x1874   : > { %14457 = vmatprep.mubr.f32.mxu0 %v8299_v9  ;;  %14513 = vmatprep.mubr.f32.mxu1 %v8299_v9  ;;  %v8286_v38 = vmul.f32 0.01, %v14406_v13  ;;  %v8246_v37 = vpop.f32.mrb[71].mxu1  ;;  %vm8270_vm12 = vcmp.ge.f32.partialorder %v14406_v13, 0.0  ;;  %v9064_v9 = vld [vmem:[#allocation2 + $0xd20] sm:$0xff] }
0x1875   : > { %14458 = vmatmul.mubr.f32.gmra.mrb[68].mxu0 %v8300_v34  ;;  %14514 = vmatmul.mubr.f32.gmra.mrb[84].mxu1 %v8300_v34  ;;  %vm8269_vm13 = vcmp.ge.f32.partialorder %v8246_v37, 0.0  ;;  %v8285_v40 = vmul.f32 0.01, %v8246_v37  ;;  %v15881_v34 = vpack.c.bf16 %v9064_v9, %v9063_v23 }
0x1876   : > { %v8302_v57 = vsel %vm8270_vm12, %v14406_v13, %v8286_v38  ;;  %15868 = vmatpush3.bf16.msra.mxu1 %v15865_v50 }
0x1877   : > { %v8301_v3 = vsel %vm8269_vm13, %v8246_v37, %v8285_v40  ;;  %15870 = vmatprep.subr.bf16.mxu1 %v15869_v43 }
0x1878   : > { %14460 = vmatprep.mubr.f32.mxu0 %v8301_v3  ;;  %14516 = vmatprep.mubr.f32.mxu1 %v8301_v3 }
0x1879   : > { %14461 = vmatmul.mubr.f32.gmra.mrb[70].mxu0 %v8302_v57  ;;  %14517 = vmatmul.mubr.f32.gmra.mrb[86].mxu1 %v8302_v57 }
0x187a   : > { %15872 = vmatpush3.bf16.msra.mxu1 %v15869_v43 }
0x187b   : > { %15874 = vmatprep.subr.bf16.mxu1 %v15873_v32 }
0x187e   : > { %15876 = vmatpush3.bf16.msra.mxu1 %v15873_v32 }
0x187f   : > { %15878 = vmatprep.subr.bf16.mxu1 %v15877_v63 }
0x1882   : > { %15880 = vmatpush3.bf16.msra.mxu1 %v15877_v63 }
0x1883   : > { %15882 = vmatprep.subr.bf16.mxu1 %v15881_v34 }
0x1886   : > { %15884 = vmatpush3.bf16.msra.mxu1 %v15881_v34 }
0x1924   : > { %v14441_v13 = vpop.f32.mrb[56].mxu0  ;;  %v14497_v38 = vpop.f32.mrb[72].mxu1 }
0x1925   : > { %16470 = vtanh.f32 %v14441_v13  ;;  %v8385_v37 = vpop.f32.mrb[57].mxu0  ;;  %v18883_v40 = vpop.f32.mrb[73].mxu1 }
0x1926   : > { %16472 = vtanh.f32 %v8385_v37 }
0x192a   : > { %v14444_v3 = vpop.f32.mrb[58].mxu0  ;;  %v18885_v57 = vpop.f32.mrb[74].mxu1 }
0x192b   : > { %16474 = vtanh.f32 %v14444_v3  ;;  %v8395_v46 = vpop.f32.mrb[59].mxu0  ;;  %v18887_v30 = vpop.f32.mrb[75].mxu1 }
0x192c   : > { %16476 = vtanh.f32 %v8395_v46 }
0x192e   : > { %v14447_v35 = vpop.f32.mrb[60].mxu0  ;;  %v18889_v21 = vpop.f32.mrb[76].mxu1 }
0x192f   : > { %16478 = vtanh.f32 %v14447_v35  ;;  %v8405_v29 = vpop.f32.mrb[61].mxu0  ;;  %v18891_v8 = vpop.f32.mrb[77].mxu1 }
0x1930   : > { %16480 = vtanh.f32 %v8405_v29  ;;  %v16471_v24 = vpop.eup %16470 }
0x1931   : > { %v16473_v42 = vpop.eup %16472  ;;  %v8659_v20 = vmul.f32 1.442695, %v16471_v24  ;;  %v18894_v50 = vadd.f32 %v16471_v24, %v18688_v60  ;;  %v1285_v24 = vsub.s32 7, %v19690_v44 }
0x1932   : > { %v8657_v54 = vmul.f32 1.442695, %v16473_v42  ;;  %v18897_v48 = vadd.f32 %v16473_v42, %v18691_v56 }
0x1933   : > { %16482 = vpow2.f32 %v8659_v20  ;;  %v16664_v20 = vld [vmem:[#allocation2 + $0x78] sm:$0xff] }
0x1934   : > { %16484 = vpow2.f32 %v8657_v54  ;;  %v18920_v54 = vrot.slane %v16664_v20, %v19673_v4 }
0x1935   : > { %v16475_v43 = vpop.eup %16474  ;;  %v14450_v49 = vpop.f32.mrb[62].mxu0 }
0x1936   : > { %v18899_v33 = vpop.f32.mrb[78].mxu1  ;;  %v16477_v32 = vpop.eup %16476  ;;  %v8663_v2 = vmul.f32 1.442695, %v16475_v43  ;;  %16486 = vtanh.f32 %v14450_v49  ;;  %v18904_v23 = vadd.f32 %v16475_v43, %v18698_v12 }
0x1937   : > { %v8415_v39 = vpop.f32.mrb[63].mxu0  ;;  %v18901_v63 = vpop.f32.mrb[79].mxu1  ;;  %v8661_v60 = vmul.f32 1.442695, %v16477_v32  ;;  %v18907_v56 = vadd.f32 %v16477_v32, %v18701_v26 }
0x1938   : > { %16488 = vtanh.f32 %v8415_v39  ;;  %v18927_v39 = vrot.slane %v16664_v20, %v1285_v24 }
0x1939   : > { %16490 = vpow2.f32 %v8663_v2  ;;  %v16479_v9 = vpop.eup %16478 }
0x193a   : > { %16492 = vpow2.f32 %v8661_v60  ;;  %v16481_v34 = vpop.eup %16480  ;;  %v8667_v13 = vmul.f32 1.442695, %v16479_v9  ;;  %v18910_v37 = vadd.f32 %v16479_v9, %v18704_v28 }
0x193b   : > { %v8665_v3 = vmul.f32 1.442695, %v16481_v34  ;;  %v18913_v46 = vadd.f32 %v16481_v34, %v18707_v1 }
0x193c   : > { %16494 = vpow2.f32 %v8667_v13 }
0x193d   : > { %16496 = vpow2.f32 %v8665_v3  ;;  %v16483_v12 = vpop.eup %16482  ;;  %v14453_v35 = vpop.f32.mrb[64].mxu0 }
0x193e   : > { %v18915_v29 = vpop.f32.mrb[80].mxu1  ;;  %v16485_v26 = vpop.eup %16484  ;;  %v8690_v42 = vmul.f32 %v16483_v12, %v18715_v17  ;;  %16498 = vtanh.f32 %v14453_v35 }
0x193f   : > { %v8425_v28 = vpop.f32.mrb[65].mxu0  ;;  %v18922_v43 = vpop.f32.mrb[81].mxu1  ;;  %v8689_v49 = vmul.f32 %v16485_v26, %v18720_v31 }
0x1940   : > { %v16487_v1 = vpop.eup %16486  ;;  %16500 = vtanh.f32 %v8425_v28  ;;  %v8706_v2 = vadd.f32 %v14497_v38, %v8690_v42 }
0x1941   : > { %v8671_v60 = vmul.f32 1.442695, %v16487_v1  ;;  %v18930_v17 = vadd.f32 %v16487_v1, %v18718_v45  ;;  %v8705_v9 = vadd.f32 %v8689_v49, %v18883_v40 }
0x1942   : > { %v16489_v32 = vpop.eup %16488  ;;  %v8726_v31 = vadd.f32 %v18920_v54, %v8706_v2 }
0x1943   : > { %v16491_v4 = vpop.eup %16490  ;;  %v8669_v34 = vmul.f32 1.442695, %v16489_v32  ;;  %v18934_v13 = vadd.f32 %v16489_v32, %v18723_v16  ;;  %16502 = vpow2.f32 %v8671_v60  ;;  %v8725_v12 = vadd.f32 %v18920_v54, %v8705_v9 }
0x1944   : > { %v16493_v3 = vpop.eup %16492  ;;  %v8692_v38 = vmul.f32 %v16491_v4, %v18732_v55  ;;  %v14456_v45 = vpop.f32.mrb[66].mxu0  ;;  %v8746_v40 = vmul.f32 %v18927_v39, %v8726_v31 }
0x1945   : > { %v8691_v35 = vmul.f32 %v16493_v3, %v18739_v7  ;;  %16504 = vpow2.f32 %v8669_v34  ;;  %v18940_v26 = vpop.f32.mrb[82].mxu1  ;;  %v8435_v16 = vpop.f32.mrb[67].mxu0  ;;  %v8745_v55 = vmul.f32 %v18927_v39, %v8725_v12 }
0x1946   : > { %v8708_v42 = vadd.f32 %v18885_v57, %v8692_v38  ;;  %16506 = vtanh.f32 %v14456_v45  ;;  %v18944_v20 = vpop.f32.mrb[83].mxu1  ;;  %v16495_v28 = vpop.eup %16494  ;;  %vm8762_vm14 = vcmp.ge.f32.partialorder %v8746_v40, 0.0 }
0x1947   : > { %v8707_v1 = vadd.f32 %v8691_v35, %v18887_v30  ;;  %16508 = vtanh.f32 %v8435_v16  ;;  %v16497_v49 = vpop.eup %16496  ;;  %v8694_v32 = vmul.f32 %v16495_v28, %v18748_v51  ;;  %v8778_v2 = vsel %vm8762_vm14, 1.0, %v19643_v10 }
0x1948   : > { %v8728_v7 = vadd.f32 %v18920_v54, %v8708_v42  ;;  %vm8761_vm0 = vcmp.ge.f32.partialorder %v8745_v55, 0.0  ;;  %v8693_v60 = vmul.f32 %v16497_v49, %v18755_v62  ;;  %v14459_v4 = vpop.f32.mrb[68].mxu0  ;;  %v18953_v9 = vpop.f32.mrb[84].mxu1  ;;  %v18955_v3 = vmul.f32 %v8778_v2, %v8746_v40 }
0x1949   : > { %v8727_v57 = vadd.f32 %v18920_v54, %v8707_v1  ;;  %v16499_v34 = vpop.eup %16498  ;;  %v8777_v30 = vsel %vm8761_vm0, 1.0, %v19643_v10  ;;  %v8710_v38 = vadd.f32 %v18889_v21, %v8694_v32  ;;  %v8445_v51 = vpop.f32.mrb[69].mxu0  ;;  %16510 = vtanh.f32 %v14459_v4 }
0x194a   : > { %v8748_v31 = vmul.f32 %v18927_v39, %v8728_v7  ;;  %v18960_v12 = vpop.f32.mrb[85].mxu1  ;;  %v16501_v35 = vpop.eup %16500  ;;  %v18962_v45 = vmul.f32 %v8777_v30, %v8745_v55  ;;  %v8709_v42 = vadd.f32 %v8693_v60, %v18891_v8  ;;  %v8675_v16 = vmul.f32 1.442695, %v16499_v34 }
0x194b   : > { %v8747_v62 = vmul.f32 %v18927_v39, %v8727_v57  ;;  %v8730_v40 = vadd.f32 %v18920_v54, %v8710_v38  ;;  %v8673_v28 = vmul.f32 1.442695, %v16501_v35 }
0x194c   : > { %vm8764_vm15 = vcmp.ge.f32.partialorder %v8748_v31, 0.0  ;;  %v8729_v21 = vadd.f32 %v18920_v54, %v8709_v42  ;;  %16512 = vpow2.f32 %v8675_v16  ;;  %14521 = vmatprep.mubr.msk.f32.mxu0 %vm2077_vm10, %v18962_v45  ;;  %v14462_v32 = vpop.f32.mrb[70].mxu0  ;;  %v18975_v2 = vpop.f32.mrb[86].mxu1 }
0x194d   : > { %v8780_v1 = vsel %vm8764_vm15, 1.0, %v19643_v10  ;;  %vm8763_vm2 = vcmp.ge.f32.partialorder %v8747_v62, 0.0  ;;  %v16503_v55 = vpop.eup %16502  ;;  %v8750_v7 = vmul.f32 %v18927_v39, %v8730_v40  ;;  %16514 = vpow2.f32 %v8673_v28  ;;  %14522 = vmatmul.mubr.msk.f32.vlgmr.msra.gmra.mrb[72].mxu0 %vm2077_vm10, %v18955_v3  ;;  %v18983_v38 = vpop.f32.mrb[87].mxu1 }
0x194e   : > { %v18971_v49 = vmul.f32 %v8780_v1, %v8748_v31  ;;  %v8779_v8 = vsel %vm8763_vm2, 1.0, %v19643_v10  ;;  %v8749_v4 = vmul.f32 %v18927_v39, %v8729_v21  ;;  %v8696_v30 = vmul.f32 %v16503_v55, %v18772_v58  ;;  %v8455_v31 = vpop.f32.mrb[71].mxu0 }
0x194f   : > { %v16505_v57 = vpop.eup %16504  ;;  %v18979_v60 = vmul.f32 %v8779_v8, %v8747_v62  ;;  %16516 = vtanh.f32 %v8445_v51  ;;  %vm8766_vm3 = vcmp.ge.f32.partialorder %v8750_v7, 0.0  ;;  %v18987_v40 = vadd.f32 %v16501_v35, %v18761_v14 }
0x1950   : > { %v16507_v42 = vpop.eup %16506  ;;  %v8695_v16 = vmul.f32 %v16505_v57, %v18778_v18  ;;  %16518 = vtanh.f32 %v14462_v32  ;;  %v8782_v62 = vsel %vm8766_vm3, 1.0, %v19643_v10  ;;  %vm8765_vm4 = vcmp.ge.f32.partialorder %v8749_v4, 0.0 }
0x1951   : > { %v16509_v28 = vpop.eup %16508  ;;  %v8712_v1 = vadd.f32 %v18899_v33, %v8696_v30  ;;  %v8679_v21 = vmul.f32 1.442695, %v16507_v42  ;;  %14524 = vmatprep.mubr.msk.f32.mxu0 %vm2077_vm10, %v18979_v60  ;;  %v18993_v58 = vmul.f32 %v8782_v62, %v8750_v7  ;;  %v8781_v51 = vsel %vm8765_vm4, 1.0, %v19643_v10 }
0x1952   : > { %v8711_v18 = vadd.f32 %v8695_v16, %v18901_v63  ;;  %v8677_v55 = vmul.f32 1.442695, %v16509_v28  ;;  %14525 = vmatmul.mubr.msk.f32.gmra.mrb[74].mxu0 %vm2077_vm10, %v18971_v49  ;;  %v18999_v14 = vmul.f32 %v8781_v51, %v8749_v4  ;;  %v19003_v33 = vadd.f32 %v16499_v34, %v18758_v11 }
0x1953   : > { %v8732_v35 = vadd.f32 %v18920_v54, %v8712_v1  ;;  %16520 = vpow2.f32 %v8679_v21  ;;  %v19007_v7 = vadd.f32 %v16509_v28, %v18781_v22  ;;  %v19010_v63 = vadd.f32 %v16507_v42, %v18775_v25  ;;  %v16511_v57 = vpop.eup %16510 }
0x1954   : > { %v8731_v8 = vadd.f32 %v18920_v54, %v8711_v18  ;;  %16522 = vpow2.f32 %v8677_v55  ;;  %14527 = vmatprep.mubr.msk.f32.mxu0 %vm2077_vm10, %v18999_v14  ;;  %v8683_v34 = vmul.f32 1.442695, %v16511_v57  ;;  %v19019_v22 = vadd.f32 %v16511_v57, %v18788_v59 }
0x1955   : > { %v8752_v32 = vmul.f32 %v18927_v39, %v8732_v35  ;;  %16524 = vtanh.f32 %v8455_v31 }
0x1956   : > { %v8751_v4 = vmul.f32 %v18927_v39, %v8731_v8  ;;  %14528 = vmatmul.mubr.msk.f32.gmra.mrb[76].mxu0 %vm2077_vm10, %v18993_v58  ;;  %v16513_v11 = vpop.eup %16512  ;;  %16526 = vpow2.f32 %v8683_v34 }
0x1957   : > { %vm8768_vm5 = vcmp.ge.f32.partialorder %v8752_v32, 0.0  ;;  %v16515_v25 = vpop.eup %16514  ;;  %v8698_v31 = vmul.f32 %v16513_v11, %v18796_v6 }
0x1958   : > { %v8784_v30 = vsel %vm8768_vm5, 1.0, %v19643_v10  ;;  %vm8767_vm6 = vcmp.ge.f32.partialorder %v8751_v4, 0.0  ;;  %v8697_v28 = vmul.f32 %v16515_v25, %v18802_v15 }
0x1959   : > { %v16517_v42 = vpop.eup %16516  ;;  %v8783_v16 = vsel %vm8767_vm6, 1.0, %v19643_v10  ;;  %v8714_v21 = vadd.f32 %v18915_v29, %v8698_v31  ;;  %v19031_v18 = vmul.f32 %v8784_v30, %v8752_v32 }
0x195a   : > { %v16519_v62 = vpop.eup %16518  ;;  %v19025_v1 = vmul.f32 %v8783_v16, %v8751_v4  ;;  %v8681_v51 = vmul.f32 1.442695, %v16517_v42  ;;  %v19029_v59 = vadd.f32 %v16517_v42, %v18791_v5  ;;  %v8713_v55 = vadd.f32 %v8697_v28, %v18922_v43 }
0x195b   : > { %v8687_v6 = vmul.f32 1.442695, %v16519_v62  ;;  %v19035_v35 = vadd.f32 %v16519_v62, %v18799_v27  ;;  %v8734_v15 = vadd.f32 %v18920_v54, %v8714_v21 }
0x195c   : > { %16528 = vpow2.f32 %v8681_v51  ;;  %14530 = vmatprep.mubr.msk.f32.mxu0 %vm2077_vm10, %v19025_v1  ;;  %v8733_v29 = vadd.f32 %v18920_v54, %v8713_v55 }
0x195d   : > { %v16521_v8 = vpop.eup %16520  ;;  %16530 = vpow2.f32 %v8687_v6  ;;  %14531 = vmatmul.mubr.msk.f32.gmra.mrb[78].mxu0 %vm2077_vm10, %v19031_v18  ;;  %v8754_v43 = vmul.f32 %v18927_v39, %v8734_v15 }
0x195e   : > { %v16523_v5 = vpop.eup %16522  ;;  %v8700_v32 = vmul.f32 %v16521_v8, %v18814_v41  ;;  %v8753_v57 = vmul.f32 %v18927_v39, %v8733_v29 }
0x195f   : > { %v16525_v27 = vpop.eup %16524  ;;  %v8699_v4 = vmul.f32 %v16523_v5, %v18817_v0  ;;  %vm8770_vm7 = vcmp.ge.f32.partialorder %v8754_v43, 0.0 }
0x1960   : > { %v8716_v11 = vadd.f32 %v18940_v26, %v8700_v32  ;;  %v8685_v34 = vmul.f32 1.442695, %v16525_v27  ;;  %v19049_v25 = vadd.f32 %v16525_v27, %v18805_v61  ;;  %v8786_v30 = vsel %vm8770_vm7, 1.0, %v19643_v10  ;;  %v16527_v16 = vpop.eup %16526 }
0x1961   : > { %vm8769_vm1 = vcmp.ge.f32.partialorder %v8753_v57, 0.0  ;;  %v8715_v31 = vadd.f32 %v8699_v4, %v18944_v20  ;;  %v19058_v26 = vmul.f32 %v8786_v30, %v8754_v43  ;;  %v8702_v62 = vmul.f32 %v16527_v16, %v18824_v19 }
0x1962   : > { %v8785_v42 = vsel %vm8769_vm1, 1.0, %v19643_v10  ;;  %v8736_v41 = vadd.f32 %v18920_v54, %v8716_v11  ;;  %16532 = vpow2.f32 %v8685_v34 }
0x1963   : > { %v19055_v28 = vmul.f32 %v8785_v42, %v8753_v57  ;;  %v8735_v0 = vadd.f32 %v18920_v54, %v8715_v31  ;;  %v8718_v51 = vadd.f32 %v18953_v9, %v8702_v62 }
0x1964   : > { %v8756_v61 = vmul.f32 %v18927_v39, %v8736_v41 }
0x1965   : > { %v8755_v21 = vmul.f32 %v18927_v39, %v8735_v0  ;;  %14533 = vmatprep.mubr.msk.f32.mxu0 %vm2077_vm10, %v19055_v28  ;;  %v8738_v8 = vadd.f32 %v18920_v54, %v8718_v51  ;;  %v9262_v51 = vld [vmem:[#allocation2 + $0xd48] sm:$0xff] }
0x1966   : > { %v16529_v20 = vpop.eup %16528  ;;  %vm8772_vm8 = vcmp.ge.f32.partialorder %v8756_v61, 0.0  ;;  %14534 = vmatmul.mubr.msk.f32.gmra.mrb[80].mxu0 %vm2077_vm10, %v19058_v26 }
0x1967   : > { %v16531_v55 = vpop.eup %16530  ;;  %v8788_v6 = vsel %vm8772_vm8, 1.0, %v19643_v10  ;;  %vm8771_vm9 = vcmp.ge.f32.partialorder %v8755_v21, 0.0  ;;  %v8701_v15 = vmul.f32 %v16529_v20, %v18829_v52  ;;  %v8758_v32 = vmul.f32 %v18927_v39, %v8738_v8  ;;  %v9261_v20 = vld [vmem:[#allocation2 + $0xd40] sm:$0xff] }
0x1968   : > { %v8787_v19 = vsel %vm8771_vm9, 1.0, %v19643_v10  ;;  %v8704_v29 = vmul.f32 %v16531_v55, %v18838_v36  ;;  %v19076_v9 = vmul.f32 %v8788_v6, %v8756_v61 }
0x1969   : > { %v19073_v5 = vmul.f32 %v8787_v19, %v8755_v21  ;;  %v8717_v43 = vadd.f32 %v8701_v15, %v18960_v12  ;;  %vm8774_vm11 = vcmp.ge.f32.partialorder %v8758_v32, 0.0  ;;  %v9260_v21 = vld [vmem:[#allocation2 + $0xd38] sm:$0xff]  ;;  %v9265_v19 = vld [vmem:[#allocation2 + $0xd60] sm:$0xff] }
0x196a   : > { %v8720_v27 = vadd.f32 %v18975_v2, %v8704_v29  ;;  %v8790_v2 = vsel %vm8774_vm11, 1.0, %v19643_v10  ;;  %v15889_v55 = vpack.c.bf16 %v9261_v20, %v9260_v21  ;;  %v9264_v15 = vld [vmem:[#allocation2 + $0xd58] sm:$0xff]  ;;  %v9266_v29 = vld [vmem:[#allocation2 + $0xd68] sm:$0xff] }
0x196b   : > { %v8737_v57 = vadd.f32 %v18920_v54, %v8717_v43  ;;  %14536 = vmatprep.mubr.msk.f32.mxu0 %vm2077_vm10, %v19073_v5  ;;  %v19095_v41 = vmul.f32 %v8790_v2, %v8758_v32  ;;  %v15897_v8 = vpack.c.bf16 %v9265_v19, %v9264_v15  ;;  %v9267_v43 = vld [vmem:[#allocation2 + $0xd70] sm:$0xff]  ;;  %v9273_v2 = vld [vmem:[#allocation2 + $0xda0] sm:$0xff] }
0x196c   : > { %v16533_v52 = vpop.eup %16532  ;;  %v8740_v4 = vadd.f32 %v18920_v54, %v8720_v27  ;;  %14537 = vmatmul.mubr.msk.f32.gmra.mrb[82].mxu0 %vm2077_vm10, %v19076_v9  ;;  %15890 = vmatprep.subr.bf16.mxu0 %v15889_v55  ;;  %v15901_v32 = vpack.c.bf16 %v9267_v43, %v9266_v29  ;;  %v9268_v27 = vld [vmem:[#allocation2 + $0xd78] sm:$0xff]  ;;  %v19729_v19 = vld [vmem:[#allocation54_spill] sm:$0xff] }
0x196d   : > { %v8757_v36 = vmul.f32 %v18927_v39, %v8737_v57  ;;  %v8703_v12 = vmul.f32 %v16533_v52, %v18840_v47  ;;  %15892 = vmatpush3.bf16.msra.mxu0 %v15889_v55  ;;  %v9269_v57 = vld [vmem:[#allocation2 + $0xd80] sm:$0xff] }
0x196e   : > { %v8760_v11 = vmul.f32 %v18927_v39, %v8740_v4  ;;  %v15905_v52 = vpack.c.bf16 %v9269_v57, %v9268_v27  ;;  %v9270_v4 = vld [vmem:[#allocation2 + $0xd88] sm:$0xff]  ;;  %v19728_v55 = vld [vmem:[#allocation58_spill] sm:$0xff] }
0x196f   : > { %vm8773_vm12 = vcmp.ge.f32.partialorder %v8757_v36, 0.0  ;;  %v8719_v34 = vadd.f32 %v8703_v12, %v18983_v38 }
0x1970   : > { %v8789_v30 = vsel %vm8773_vm12, 1.0, %v19643_v10  ;;  %vm8776_vm13 = vcmp.ge.f32.partialorder %v8760_v11, 0.0 }
0x1971   : > { %v19092_v31 = vmul.f32 %v8789_v30, %v8757_v36  ;;  %v8739_v42 = vadd.f32 %v18920_v54, %v8719_v34  ;;  %v8792_v47 = vsel %vm8776_vm13, 1.0, %v19643_v10  ;;  %v9065_v54 = vld [vmem:[#allocation2 + $0xd28] sm:$0xff]  ;;  %v9271_v36 = vld [vmem:[#allocation2 + $0xd90] sm:$0xff]  ;;  %v19725_v30 = vsub.s32 6, %v19690_v44 }
0x1972   : > { %v19106_v61 = vmul.f32 %v8792_v47, %v8760_v11  ;;  %v15909_v12 = vpack.c.bf16 %v9271_v36, %v9270_v4  ;;  %v9272_v11 = vld [vmem:[#allocation2 + $0xd98] sm:$0xff]  ;;  %v19730_v4 = vld [vmem:[#allocation66_spill] sm:$0xff] }
0x1973   : > { %v8759_v16 = vmul.f32 %v18927_v39, %v8739_v42  ;;  %14539 = vmatprep.mubr.msk.f32.mxu0 %vm2077_vm10, %v19092_v31  ;;  %v9066_v39 = vld [vmem:[#allocation2 + $0xd30] sm:$0xff]  ;;  %v15913_v34 = vpack.c.bf16 %v9273_v2, %v9272_v11  ;;  %v19115_v42 = vrot.slane %v17651_v53, %v19725_v30  ;;  %v19731_v2 = vld [vmem:[#allocation62_spill] sm:$0xff] }
0x1974   : > { %14540 = vmatmul.mubr.msk.f32.gmra.mrb[84].mxu0 %vm2077_vm10, %v19095_v41  ;;  %v15885_v62 = vpack.c.bf16 %v9066_v39, %v9065_v54  ;;  %v19727_v54 = vld [vmem:[#allocation46_spill] sm:$0xff] }
0x1975   : > { %vm8775_vm14 = vcmp.ge.f32.partialorder %v8759_v16, 0.0  ;;  %v1893_v39 = vadd.f32 %v19727_v54, %v19115_v42  ;;  %v1923_v36 = vadd.f32 %v19730_v4, %v19115_v42 }
0x1976   : > { %v8791_v38 = vsel %vm8775_vm14, 1.0, %v19643_v10  ;;  %15886 = vmatprep.subr.bf16.mxu1 %v15885_v62  ;;  %v9263_v10 = vld [vmem:[#allocation2 + $0xd50] sm:$0xff] }
0x1977   : > { %v19104_v0 = vmul.f32 %v8791_v38, %v8759_v16  ;;  %15888 = vmatpush3.bf16.msra.mxu1 %v15885_v62  ;;  %v15893_v6 = vpack.c.bf16 %v9263_v10, %v9262_v51  ;;  %v19726_v16 = vld [vmem:[#allocation50_spill] sm:$0xff]  ;;  %v1911_v10 = vadd.f32 %v19728_v55, %v19115_v42 }
0x1978   : > { %v1899_v47 = vadd.f32 %v19726_v16, %v19115_v42 }
0x1979   : > { %14542 = vmatprep.mubr.msk.f32.mxu0 %vm2077_vm10, %v19104_v0  ;;  %15894 = vmatprep.subr.bf16.mxu0 %v15893_v6 }
0x197a   : > { %14543 = vmatmul.mubr.msk.f32.gmra.mrb[86].mxu0 %vm2077_vm10, %v19106_v61 }
0x197b   : > { %15896 = vmatpush3.bf16.msra.mxu0 %v15893_v6 }
0x197c   : > { %15898 = vmatprep.subr.bf16.mxu0 %v15897_v8 }
0x197f   : > { %15900 = vmatpush3.bf16.msra.mxu0 %v15897_v8  ;;  %v1905_v8 = vadd.f32 %v19729_v19, %v19115_v42 }
0x1980   : > { %15902 = vmatprep.subr.bf16.mxu0 %v15901_v32 }
0x1983   : > { %15904 = vmatpush3.bf16.msra.mxu0 %v15901_v32 }
0x1984   : > { %15906 = vmatprep.subr.bf16.mxu0 %v15905_v52 }
0x1987   : > { %15908 = vmatpush3.bf16.msra.mxu0 %v15905_v52 }
0x1988   : > { %15910 = vmatprep.subr.bf16.mxu0 %v15909_v12 }
0x198b   : > { %15912 = vmatpush3.bf16.msra.mxu0 %v15909_v12 }
0x198c   : > { %15914 = vmatprep.subr.bf16.mxu0 %v15913_v34 }
0x198f   : > { %15916 = vmatpush3.bf16.msra.mxu0 %v15913_v34  ;;  %v1917_v34 = vadd.f32 %v19731_v2, %v19115_v42 }
0x1a20   : > { %v14523_v38 = vpop.f32.mrb[72].mxu0 }
0x1a21   : > { %v8930_v62 = vadd.f32 %v14523_v38, %v1899_v47  ;;  %v8924_v21 = vpop.f32.mrb[73].mxu0 }
0x1a22   : > { %v8925_v20 = vadd.f32 %v8924_v21, %v1893_v39  ;;  %v19732_v21 = vld [vmem:[#allocation74_spill] sm:$0xff] }
0x1a23   : > { %v9020_v51 = vmul.f32 0.01, %v8930_v62  ;;  %vm9004_vm0 = vcmp.ge.f32.partialorder %v8930_v62, 0.0 }
0x1a24   : > { %v9019_v6 = vmul.f32 0.01, %v8925_v20  ;;  %vm9003_vm15 = vcmp.ge.f32.partialorder %v8925_v20, 0.0 }
0x1a25   : > { %v14526_v15 = vpop.f32.mrb[74].mxu0  ;;  %v9036_v57 = vsel %vm9004_vm0, %v8930_v62, %v9020_v51 }
0x1a26   : > { %v8940_v29 = vadd.f32 %v14526_v15, %v1911_v10  ;;  %v8934_v43 = vpop.f32.mrb[75].mxu0  ;;  %v9035_v27 = vsel %vm9003_vm15, %v8925_v20, %v9019_v6  ;;  %v1935_v20 = vadd.f32 %v19732_v21, %v19115_v42  ;;  %v19733_v6 = vld [vmem:[#allocation70_spill] sm:$0xff] }
0x1a27   : > { %v8935_v32 = vadd.f32 %v8934_v43, %v1905_v8  ;;  %14577 = vmatprep.mubr.f32.mxu1 %v9035_v27  ;;  %v1929_v15 = vadd.f32 %v19733_v6, %v19115_v42 }
0x1a28   : > { %v9022_v52 = vmul.f32 0.01, %v8940_v29  ;;  %vm9006_vm2 = vcmp.ge.f32.partialorder %v8940_v29, 0.0  ;;  %14578 = vmatmul.mubr.f32.vlgmr.msra.gmra.mrb[88].mxu1 %v9036_v57 }
0x1a29   : > { %v9021_v12 = vmul.f32 0.01, %v8935_v32  ;;  %v14529_v11 = vpop.f32.mrb[76].mxu0  ;;  %vm9005_vm3 = vcmp.ge.f32.partialorder %v8935_v32, 0.0 }
0x1a2a   : > { %v8950_v30 = vadd.f32 %v14529_v11, %v1923_v36  ;;  %v8944_v16 = vpop.f32.mrb[77].mxu0  ;;  %v9038_v54 = vsel %vm9006_vm2, %v8940_v29, %v9022_v52  ;;  %v19734_v52 = vld [vmem:[#allocation82_spill] sm:$0xff] }
0x1a2b   : > { %v8945_v47 = vadd.f32 %v8944_v16, %v1917_v34  ;;  %v9037_v38 = vsel %vm9005_vm3, %v8935_v32, %v9021_v12  ;;  %v1947_v4 = vadd.f32 %v19734_v52, %v19115_v42  ;;  %v19735_v12 = vld [vmem:[#allocation78_spill] sm:$0xff] }
0x1a2c   : > { %v9024_v39 = vmul.f32 0.01, %v8950_v30  ;;  %14580 = vmatprep.mubr.f32.mxu1 %v9037_v38  ;;  %vm9008_vm4 = vcmp.ge.f32.partialorder %v8950_v30, 0.0  ;;  %v1941_v11 = vadd.f32 %v19735_v12, %v19115_v42  ;;  %v19736_v38 = vld [vmem:[#allocation90_spill] sm:$0xff] }
0x1a2d   : > { %v9023_v62 = vmul.f32 0.01, %v8945_v47  ;;  %14581 = vmatmul.mubr.f32.gmra.mrb[90].mxu1 %v9038_v54  ;;  %vm9007_vm5 = vcmp.ge.f32.partialorder %v8945_v47, 0.0  ;;  %v1959_v54 = vadd.f32 %v19736_v38, %v19115_v42 }
0x1a2e   : > { %v9040_v55 = vsel %vm9008_vm4, %v8950_v30, %v9024_v39 }
0x1a2f   : > { %v9039_v51 = vsel %vm9007_vm5, %v8945_v47, %v9023_v62  ;;  %v19737_v62 = vld [vmem:[#allocation86_spill] sm:$0xff] }
0x1a30   : > { %v14532_v10 = vpop.f32.mrb[78].mxu0  ;;  %14583 = vmatprep.mubr.f32.mxu1 %v9039_v51  ;;  %v1953_v21 = vadd.f32 %v19737_v62, %v19115_v42 }
0x1a31   : > { %v8960_v19 = vadd.f32 %v14532_v10, %v1935_v20  ;;  %v8954_v8 = vpop.f32.mrb[79].mxu0  ;;  %14584 = vmatmul.mubr.f32.gmra.mrb[92].mxu1 %v9040_v55 }
0x1a32   : > { %v8955_v29 = vadd.f32 %v8954_v8, %v1929_v15 }
0x1a33   : > { %v9026_v43 = vmul.f32 0.01, %v8960_v19  ;;  %vm9010_vm6 = vcmp.ge.f32.partialorder %v8960_v19, 0.0 }
0x1a34   : > { %v9025_v32 = vmul.f32 0.01, %v8955_v29  ;;  %vm9009_vm7 = vcmp.ge.f32.partialorder %v8955_v29, 0.0 }
0x1a35   : > { %v9042_v57 = vsel %vm9010_vm6, %v8960_v19, %v9026_v43  ;;  %v19738_v43 = vld [vmem:[#allocation98_spill] sm:$0xff] }
0x1a36   : > { %v9041_v27 = vsel %vm9009_vm7, %v8955_v29, %v9025_v32  ;;  %v1971_v32 = vadd.f32 %v19738_v43, %v19115_v42  ;;  %v9646_v43 = vld [vmem:[#allocation2 + $0xe38] sm:$0xff] }
0x1a37   : > { %14586 = vmatprep.mubr.f32.mxu1 %v9041_v27 }
0x1a38   : > { %14587 = vmatmul.mubr.f32.gmra.mrb[94].mxu1 %v9042_v57  ;;  %v19739_v57 = vld [vmem:[#allocation94_spill] sm:$0xff] }
0x1a39   : > { %v14535_v36 = vpop.f32.mrb[80].mxu0  ;;  %v1965_v52 = vadd.f32 %v19739_v57, %v19115_v42  ;;  %v9471_v57 = vld [vmem:[#allocation2 + $0xdc8] sm:$0xff] }
0x1a3a   : > { %v8970_v2 = vadd.f32 %v14535_v36, %v1947_v4  ;;  %v8964_v34 = vpop.f32.mrb[81].mxu0 }
0x1a3b   : > { %v8965_v30 = vadd.f32 %v8964_v34, %v1941_v11  ;;  %v19740_v34 = vld [vmem:[#allocation106_spill] sm:$0xff] }
0x1a3c   : > { %v9028_v16 = vmul.f32 0.01, %v8970_v2  ;;  %vm9012_vm1 = vcmp.ge.f32.partialorder %v8970_v2, 0.0 }
0x1a3d   : > { %v9027_v47 = vmul.f32 0.01, %v8965_v30  ;;  %vm9011_vm8 = vcmp.ge.f32.partialorder %v8965_v30, 0.0 }
0x1a3e   : > { %v9044_v51 = vsel %vm9012_vm1, %v8970_v2, %v9028_v16 }
0x1a3f   : > { %v14538_v39 = vpop.f32.mrb[82].mxu0  ;;  %v9043_v20 = vsel %vm9011_vm8, %v8965_v30, %v9027_v47  ;;  %v1983_v30 = vadd.f32 %v19740_v34, %v19115_v42  ;;  %v19741_v47 = vld [vmem:[#allocation102_spill] sm:$0xff]  ;;  %v9475_v34 = vld [vmem:[#allocation2 + $0xde8] sm:$0xff] }
0x1a40   : > { %v8980_v55 = vadd.f32 %v14538_v39, %v1959_v54  ;;  %v8974_v10 = vpop.f32.mrb[83].mxu0  ;;  %14589 = vmatprep.mubr.f32.mxu1 %v9043_v20  ;;  %v1977_v38 = vadd.f32 %v19741_v47, %v19115_v42  ;;  %v9469_v42 = vld [vmem:[#allocation2 + $0xdb8] sm:$0xff] }
0x1a41   : > { %v8975_v6 = vadd.f32 %v8974_v10, %v1953_v21  ;;  %14590 = vmatmul.mubr.f32.gmra.mrb[96].mxu1 %v9044_v51  ;;  %v9477_v47 = vld [vmem:[#allocation2 + $0xdf8] sm:$0xff] }
0x1a42   : > { %v9030_v15 = vmul.f32 0.01, %v8980_v55  ;;  %vm9014_vm9 = vcmp.ge.f32.partialorder %v8980_v55, 0.0 }
0x1a43   : > { %v9029_v19 = vmul.f32 0.01, %v8975_v6  ;;  %vm9013_vm11 = vcmp.ge.f32.partialorder %v8975_v6, 0.0 }
0x1a44   : > { %v9046_v29 = vsel %vm9014_vm9, %v8980_v55, %v9030_v15  ;;  %v9274_v15 = vld [vmem:[#allocation2 + $0xda8] sm:$0xff] }
0x1a45   : > { %v9045_v8 = vsel %vm9013_vm11, %v8975_v6, %v9029_v19  ;;  %v9275_v19 = vld [vmem:[#allocation2 + $0xdb0] sm:$0xff] }
0x1a46   : > { %14592 = vmatprep.mubr.f32.mxu1 %v9045_v8  ;;  %v15917_v8 = vpack.c.bf16 %v9275_v19, %v9274_v15  ;;  %v9648_v19 = vld [vmem:[#allocation2 + $0xe48] sm:$0xff] }
0x1a47   : > { %v14541_v27 = vpop.f32.mrb[84].mxu0  ;;  %14593 = vmatmul.mubr.f32.gmra.mrb[98].mxu1 %v9046_v29  ;;  %v9470_v29 = vld [vmem:[#allocation2 + $0xdc0] sm:$0xff] }
0x1a48   : > { %v8990_v4 = vadd.f32 %v14541_v27, %v1971_v32  ;;  %v8984_v36 = vpop.f32.mrb[85].mxu0  ;;  %15918 = vmatprep.subr.bf16.mxu0 %v15917_v8  ;;  %v15921_v32 = vpack.c.bf16 %v9470_v29, %v9469_v42  ;;  %v9647_v27 = vld [vmem:[#allocation2 + $0xe40] sm:$0xff] }
0x1a49   : > { %v8985_v12 = vadd.f32 %v8984_v36, %v1965_v52  ;;  %15920 = vmatpush3.bf16.msra.mxu0 %v15917_v8  ;;  %v9472_v52 = vld [vmem:[#allocation2 + $0xdd0] sm:$0xff] }
0x1a4a   : > { %v9032_v11 = vmul.f32 0.01, %v8990_v4  ;;  %vm9016_vm12 = vcmp.ge.f32.partialorder %v8990_v4, 0.0  ;;  %v15925_v36 = vpack.c.bf16 %v9472_v52, %v9471_v57  ;;  %15922 = vmatprep.subr.bf16.mxu1 %v15921_v32  ;;  %v9649_v8 = vld [vmem:[#allocation2 + $0xe50] sm:$0xff] }
0x1a4b   : > { %v9031_v2 = vmul.f32 0.01, %v8985_v12  ;;  %vm9015_vm13 = vcmp.ge.f32.partialorder %v8985_v12, 0.0  ;;  %15924 = vmatpush3.bf16.msra.mxu1 %v15921_v32  ;;  %v15957_v32 = vpack.c.bf16 %v9649_v8, %v9648_v19 }
0x1a4c   : > { %v9048_v39 = vsel %vm9016_vm12, %v8990_v4, %v9032_v11  ;;  %v15953_v4 = vpack.c.bf16 %v9647_v27, %v9646_v43  ;;  %v9474_v11 = vld [vmem:[#allocation2 + $0xde0] sm:$0xff]  ;;  %15926 = vmatprep.subr.bf16.mxu1 %v15925_v36 }
0x1a4d   : > { %v14544_v16 = vpop.f32.mrb[86].mxu0  ;;  %v9047_v54 = vsel %vm9015_vm13, %v8985_v12, %v9031_v2  ;;  %v9473_v12 = vld [vmem:[#allocation2 + $0xdd8] sm:$0xff] }
0x1a4e   : > { %v9000_v62 = vadd.f32 %v14544_v16, %v1983_v30  ;;  %v8994_v21 = vpop.f32.mrb[87].mxu0  ;;  %14595 = vmatprep.mubr.f32.mxu1 %v9047_v54  ;;  %15954 = vmatprep.subr.bf16.mxu0 %v15953_v4  ;;  %v15929_v2 = vpack.c.bf16 %v9474_v11, %v9473_v12  ;;  %v9476_v30 = vld [vmem:[#allocation2 + $0xdf0] sm:$0xff]  ;;  %v9651_v12 = vld [vmem:[#allocation2 + $0xe60] sm:$0xff] }
0x1a4f   : > { %v8995_v20 = vadd.f32 %v8994_v21, %v1977_v38  ;;  %14596 = vmatmul.mubr.f32.gmra.mrb[100].mxu1 %v9048_v39  ;;  %v15933_v16 = vpack.c.bf16 %v9476_v30, %v9475_v34  ;;  %v9478_v38 = vld [vmem:[#allocation2 + $0xe00] sm:$0xff]  ;;  %v9479_v39 = vld [vmem:[#allocation2 + $0xe08] sm:$0xff] }
0x1a50   : > { %v9034_v51 = vmul.f32 0.01, %v9000_v62  ;;  %vm9018_vm14 = vcmp.ge.f32.partialorder %v9000_v62, 0.0  ;;  %15928 = vmatpush3.bf16.msra.mxu1 %v15925_v36  ;;  %v15937_v54 = vpack.c.bf16 %v9478_v38, %v9477_v47  ;;  %v9650_v36 = vld [vmem:[#allocation2 + $0xe58] sm:$0xff] }
0x1a51   : > { %v9033_v55 = vmul.f32 0.01, %v8995_v20  ;;  %vm9017_vm0 = vcmp.ge.f32.partialorder %v8995_v20, 0.0  ;;  %15930 = vmatprep.subr.bf16.mxu1 %v15929_v2  ;;  %v15961_v30 = vpack.c.bf16 %v9651_v12, %v9650_v36 }
0x1a52   : > { %v9050_v6 = vsel %vm9018_vm14, %v9000_v62, %v9034_v51  ;;  %v9480_v62 = vld [vmem:[#allocation2 + $0xe10] sm:$0xff]  ;;  %v9482_v51 = vld [vmem:[#allocation2 + $0xe20] sm:$0xff] }
0x1a53   : > { %v9049_v10 = vsel %vm9017_vm0, %v8995_v20, %v9033_v55  ;;  %v15941_v21 = vpack.c.bf16 %v9480_v62, %v9479_v39  ;;  %v9481_v20 = vld [vmem:[#allocation2 + $0xe18] sm:$0xff]  ;;  %v9653_v39 = vld [vmem:[#allocation2 + $0xe70] sm:$0xff] }
0x1a54   : > { %14598 = vmatprep.mubr.f32.mxu1 %v9049_v10  ;;  %15932 = vmatpush3.bf16.msra.mxu1 %v15929_v2  ;;  %v15945_v55 = vpack.c.bf16 %v9482_v51, %v9481_v20 }
0x1a55   : > { %14599 = vmatmul.mubr.f32.gmra.mrb[102].mxu1 %v9050_v6  ;;  %15934 = vmatprep.subr.bf16.mxu1 %v15933_v16 }
0x1a58   : > { %15936 = vmatpush3.bf16.msra.mxu1 %v15933_v16 }
0x1a59   : > { %15938 = vmatprep.subr.bf16.mxu1 %v15937_v54 }
0x1a5c   : > { %15940 = vmatpush3.bf16.msra.mxu1 %v15937_v54  ;;  %v9652_v54 = vld [vmem:[#allocation2 + $0xe68] sm:$0xff] }
0x1a5d   : > { %15942 = vmatprep.subr.bf16.mxu1 %v15941_v21  ;;  %v15965_v20 = vpack.c.bf16 %v9653_v39, %v9652_v54 }
0x1a60   : > { %15944 = vmatpush3.bf16.msra.mxu1 %v15941_v21 }
0x1a61   : > { %15946 = vmatprep.subr.bf16.mxu1 %v15945_v55 }
0x1a64   : > { %15948 = vmatpush3.bf16.msra.mxu1 %v15945_v55  ;;  %v9655_v55 = vld [vmem:[#allocation2 + $0xe80] sm:$0xff] }
0x1afb   : > { %v14579_v10 = vpop.f32.mrb[88].mxu1 }
0x1afc   : > { %v9229_v6 = vmul.f32 0.01, %v14579_v10  ;;  %v9133_v15 = vpop.f32.mrb[89].mxu1  ;;  %vm9213_vm15 = vcmp.ge.f32.partialorder %v14579_v10, 0.0 }
0x1afd   : > { %vm9212_vm2 = vcmp.ge.f32.partialorder %v9133_v15, 0.0  ;;  %v9228_v42 = vmul.f32 0.01, %v9133_v15 }
0x1afe   : > { %v9245_v27 = vsel %vm9213_vm15, %v14579_v10, %v9229_v6 }
0x1aff   : > { %v9244_v43 = vsel %vm9212_vm2, %v9133_v15, %v9228_v42  ;;  %v9656_v42 = vld [vmem:[#allocation2 + $0xe88] sm:$0xff] }
0x1b00   : > { %v14582_v29 = vpop.f32.mrb[90].mxu1  ;;  %14633 = vmatprep.mubr.f32.mxu0 %v9244_v43 }
0x1b01   : > { %v9231_v57 = vmul.f32 0.01, %v14582_v29  ;;  %v9143_v52 = vpop.f32.mrb[91].mxu1  ;;  %vm9215_vm3 = vcmp.ge.f32.partialorder %v14582_v29, 0.0  ;;  %14634 = vmatmul.mubr.f32.vlgmr.msra.gmra.mrb[88].mxu0 %v9245_v27 }
0x1b02   : > { %vm9214_vm4 = vcmp.ge.f32.partialorder %v9143_v52, 0.0  ;;  %v9230_v11 = vmul.f32 0.01, %v9143_v52  ;;  %15956 = vmatpush3.bf16.msra.mxu0 %v15953_v4  ;;  %v9654_v4 = vld [vmem:[#allocation2 + $0xe78] sm:$0xff] }
0x1b03   : > { %15958 = vmatprep.subr.bf16.mxu0 %v15957_v32  ;;  %v9247_v16 = vsel %vm9215_vm3, %v14582_v29, %v9231_v57  ;;  %v15969_v19 = vpack.c.bf16 %v9655_v55, %v9654_v4  ;;  %v9657_v29 = vld [vmem:[#allocation2 + $0xe90] sm:$0xff]  ;;  %v9658_v57 = vld [vmem:[#allocation2 + $0xe98] sm:$0xff] }
0x1b04   : > { %v14585_v2 = vpop.f32.mrb[92].mxu1  ;;  %v9246_v34 = vsel %vm9214_vm4, %v9143_v52, %v9230_v11  ;;  %v15973_v27 = vpack.c.bf16 %v9657_v29, %v9656_v42  ;;  %v9659_v52 = vld [vmem:[#allocation2 + $0xea0] sm:$0xff] }
0x1b05   : > { %v9233_v47 = vmul.f32 0.01, %v14585_v2  ;;  %v9153_v38 = vpop.f32.mrb[93].mxu1  ;;  %14636 = vmatprep.mubr.f32.mxu0 %v9246_v34  ;;  %vm9217_vm5 = vcmp.ge.f32.partialorder %v14585_v2, 0.0  ;;  %v15977_v12 = vpack.c.bf16 %v9659_v52, %v9658_v57  ;;  %v9660_v57 = vld [vmem:[#allocation2 + $0xea8] sm:$0xff] }
0x1b06   : > { %vm9216_vm6 = vcmp.ge.f32.partialorder %v9153_v38, 0.0  ;;  %v9232_v62 = vmul.f32 0.01, %v9153_v38  ;;  %14637 = vmatmul.mubr.f32.gmra.mrb[90].mxu0 %v9247_v16 }
0x1b07   : > { %15960 = vmatpush3.bf16.msra.mxu0 %v15957_v32  ;;  %v9249_v51 = vsel %vm9217_vm5, %v14585_v2, %v9233_v47 }
0x1b08   : > { %v9248_v21 = vsel %vm9216_vm6, %v9153_v38, %v9232_v62  ;;  %15962 = vmatprep.subr.bf16.mxu0 %v15961_v30 }
0x1b09   : > { %14639 = vmatprep.mubr.f32.mxu0 %v9248_v21 }
0x1b0a   : > { %14640 = vmatmul.mubr.f32.gmra.mrb[92].mxu0 %v9249_v51 }
0x1b0b   : > { %v14588_v10 = vpop.f32.mrb[94].mxu1  ;;  %15964 = vmatpush3.bf16.msra.mxu0 %v15961_v30 }
0x1b0c   : > { %v9235_v6 = vmul.f32 0.01, %v14588_v10  ;;  %v9163_v15 = vpop.f32.mrb[95].mxu1  ;;  %15966 = vmatprep.subr.bf16.mxu0 %v15965_v20  ;;  %vm9219_vm7 = vcmp.ge.f32.partialorder %v14588_v10, 0.0 }
0x1b0d   : > { %vm9218_vm1 = vcmp.ge.f32.partialorder %v9163_v15, 0.0  ;;  %v9234_v8 = vmul.f32 0.01, %v9163_v15 }
0x1b0e   : > { %v9251_v32 = vsel %vm9219_vm7, %v14588_v10, %v9235_v6 }
0x1b0f   : > { %v9250_v43 = vsel %vm9218_vm1, %v9163_v15, %v9234_v8  ;;  %15968 = vmatpush3.bf16.msra.mxu0 %v15965_v20 }
0x1b10   : > { %14642 = vmatprep.mubr.f32.mxu0 %v9250_v43  ;;  %15970 = vmatprep.subr.bf16.mxu0 %v15969_v19 }
0x1b11   : > { %14643 = vmatmul.mubr.f32.gmra.mrb[94].mxu0 %v9251_v32  ;;  %v9483_v32 = vld [vmem:[#allocation2 + $0xe28] sm:$0xff] }
0x1b13   : > { %15972 = vmatpush3.bf16.msra.mxu0 %v15969_v19 }
0x1b14   : > { %v14591_v36 = vpop.f32.mrb[96].mxu1  ;;  %15974 = vmatprep.subr.bf16.mxu0 %v15973_v27 }
0x1b15   : > { %v9237_v11 = vmul.f32 0.01, %v14591_v36  ;;  %v9173_v2 = vpop.f32.mrb[97].mxu1  ;;  %vm9221_vm8 = vcmp.ge.f32.partialorder %v14591_v36, 0.0 }
0x1b16   : > { %vm9220_vm9 = vcmp.ge.f32.partialorder %v9173_v2, 0.0  ;;  %v9236_v34 = vmul.f32 0.01, %v9173_v2 }
0x1b17   : > { %15976 = vmatpush3.bf16.msra.mxu0 %v15973_v27  ;;  %v9253_v16 = vsel %vm9221_vm8, %v14591_v36, %v9237_v11  ;;  %v9484_v27 = vld [vmem:[#allocation2 + $0xe30] sm:$0xff]  ;;  %v9887_v11 = vld [vmem:[#allocation2 + $0xeb8] sm:$0xff] }
0x1b18   : > { %v9252_v30 = vsel %vm9220_vm9, %v9173_v2, %v9236_v34  ;;  %15978 = vmatprep.subr.bf16.mxu0 %v15977_v12  ;;  %v15949_v52 = vpack.c.bf16 %v9484_v27, %v9483_v32  ;;  %v9661_v36 = vld [vmem:[#allocation2 + $0xeb0] sm:$0xff] }
0x1b19   : > { %14645 = vmatprep.mubr.f32.mxu0 %v9252_v30 }
0x1b1a   : > { %v14594_v47 = vpop.f32.mrb[98].mxu1  ;;  %14646 = vmatmul.mubr.f32.gmra.mrb[96].mxu0 %v9253_v16  ;;  %15950 = vmatprep.subr.bf16.mxu1 %v15949_v52 }
0x1b1b   : > { %v9239_v38 = vmul.f32 0.01, %v14594_v47  ;;  %v9183_v54 = vpop.f32.mrb[99].mxu1  ;;  %15980 = vmatpush3.bf16.msra.mxu0 %v15977_v12  ;;  %vm9223_vm11 = vcmp.ge.f32.partialorder %v14594_v47, 0.0  ;;  %v15981_v12 = vpack.c.bf16 %v9661_v36, %v9660_v57  ;;  %15952 = vmatpush3.bf16.msra.mxu1 %v15949_v52 }
0x1b1c   : > { %vm9222_vm12 = vcmp.ge.f32.partialorder %v9183_v54, 0.0  ;;  %v9238_v39 = vmul.f32 0.01, %v9183_v54  ;;  %14769 = vmatprep.subr.mxu1 %v9887_v11 }
0x1b1d   : > { %v9255_v21 = vsel %vm9223_vm11, %v14594_v47, %v9239_v38  ;;  %15982 = vmatprep.subr.bf16.mxu0 %v15981_v12 }
0x1b1e   : > { %v9254_v62 = vsel %vm9222_vm12, %v9183_v54, %v9238_v39 }
0x1b1f   : > { %14648 = vmatprep.mubr.f32.mxu0 %v9254_v62  ;;  %15984 = vmatpush3.bf16.msra.mxu0 %v15981_v12 }
0x1b20   : > { %14649 = vmatmul.mubr.f32.gmra.mrb[98].mxu0 %v9255_v21 }
0x1b22   : > { %v14597_v20 = vpop.f32.mrb[100].mxu1 }
0x1b23   : > { %v9241_v51 = vmul.f32 0.01, %v14597_v20  ;;  %v9193_v4 = vpop.f32.mrb[101].mxu1  ;;  %vm9225_vm13 = vcmp.ge.f32.partialorder %v14597_v20, 0.0 }
0x1b24   : > { %vm9224_vm14 = vcmp.ge.f32.partialorder %v9193_v4, 0.0  ;;  %v9240_v55 = vmul.f32 0.01, %v9193_v4 }
0x1b25   : > { %v9257_v6 = vsel %vm9225_vm13, %v14597_v20, %v9241_v51 }
0x1b26   : > { %v9256_v10 = vsel %vm9224_vm14, %v9193_v4, %v9240_v55 }
0x1b27   : > { %14651 = vmatprep.mubr.f32.mxu0 %v9256_v10 }
0x1b28   : > { %v14600_v15 = vpop.f32.mrb[102].mxu1  ;;  %14652 = vmatmul.mubr.f32.gmra.mrb[100].mxu0 %v9257_v6 }
0x1b29   : > { %v9243_v19 = vmul.f32 0.01, %v14600_v15  ;;  %v9203_v8 = vpop.f32.mrb[103].mxu1  ;;  %vm9227_vm0 = vcmp.ge.f32.partialorder %v14600_v15, 0.0 }
0x1b2a   : > { %vm9226_vm15 = vcmp.ge.f32.partialorder %v9203_v8, 0.0  ;;  %v9242_v42 = vmul.f32 0.01, %v9203_v8 }
0x1b2b   : > { %v9259_v43 = vsel %vm9227_vm0, %v14600_v15, %v9243_v19 }
0x1b2c   : > { %v9258_v29 = vsel %vm9226_vm15, %v9203_v8, %v9242_v42 }
0x1b2d   : > { %14654 = vmatprep.mubr.f32.mxu0 %v9258_v29 }
0x1b2e   : > { %14655 = vmatmul.mubr.f32.gmra.mrb[102].mxu0 %v9259_v43 }
0x1bd4   : > { %v14635_v2 = vpop.f32.mrb[88].mxu0 }
0x1bd5   : > { %v9438_v34 = vmul.f32 0.01, %v14635_v2  ;;  %v9342_v30 = vpop.f32.mrb[89].mxu0  ;;  %vm9422_vm2 = vcmp.ge.f32.partialorder %v14635_v2, 0.0 }
0x1bd6   : > { %vm9421_vm3 = vcmp.ge.f32.partialorder %v9342_v30, 0.0  ;;  %v9437_v16 = vmul.f32 0.01, %v9342_v30 }
0x1bd7   : > { %v9454_v54 = vsel %vm9422_vm2, %v14635_v2, %v9438_v34 }
0x1bd8   : > { %v9453_v38 = vsel %vm9421_vm3, %v9342_v30, %v9437_v16 }
0x1bd9   : > { %v14638_v47 = vpop.f32.mrb[90].mxu0  ;;  %14689 = vmatprep.mubr.f32.mxu1 %v9453_v38  ;;  %14745 = vmatprep.mubr.f32.mxu0 %v9453_v38 }
0x1bda   : > { %v9440_v39 = vmul.f32 0.01, %v14638_v47  ;;  %v9352_v62 = vpop.f32.mrb[91].mxu0  ;;  %vm9424_vm4 = vcmp.ge.f32.partialorder %v14638_v47, 0.0  ;;  %14690 = vmatmul.mubr.f32.vlgmr.msra.gmra.mrb[104].mxu1 %v9454_v54  ;;  %14746 = vmatmul.mubr.f32.vlgmr.msra.gmra.mrb[104].mxu0 %v9454_v54 }
0x1bdb   : > { %vm9423_vm5 = vcmp.ge.f32.partialorder %v9352_v62, 0.0  ;;  %v9439_v21 = vmul.f32 0.01, %v9352_v62  ;;  %14770 = vmatpush3.msra.mxu1 %v9887_v11 }
0x1bdc   : > { %v9456_v4 = vsel %vm9424_vm4, %v14638_v47, %v9440_v39 }
0x1bdd   : > { %v14641_v20 = vpop.f32.mrb[92].mxu0  ;;  %v9455_v51 = vsel %vm9423_vm5, %v9352_v62, %v9439_v21 }
0x1bde   : > { %v9442_v55 = vmul.f32 0.01, %v14641_v20  ;;  %v9362_v10 = vpop.f32.mrb[93].mxu0  ;;  %14692 = vmatprep.mubr.f32.mxu1 %v9455_v51  ;;  %14748 = vmatprep.mubr.f32.mxu0 %v9455_v51  ;;  %vm9426_vm6 = vcmp.ge.f32.partialorder %v14641_v20, 0.0 }
0x1bdf   : > { %vm9425_vm7 = vcmp.ge.f32.partialorder %v9362_v10, 0.0  ;;  %v9441_v6 = vmul.f32 0.01, %v9362_v10  ;;  %14693 = vmatmul.mubr.f32.gmra.mrb[106].mxu1 %v9456_v4  ;;  %14749 = vmatmul.mubr.f32.gmra.mrb[106].mxu0 %v9456_v4 }
0x1be0   : > { %v9458_v19 = vsel %vm9426_vm6, %v14641_v20, %v9442_v55 }
0x1be1   : > { %v9457_v15 = vsel %vm9425_vm7, %v9362_v10, %v9441_v6 }
0x1be2   : > { %14695 = vmatprep.mubr.f32.mxu1 %v9457_v15  ;;  %14751 = vmatprep.mubr.f32.mxu0 %v9457_v15 }
0x1be3   : > { %14696 = vmatmul.mubr.f32.gmra.mrb[108].mxu1 %v9458_v19  ;;  %14752 = vmatmul.mubr.f32.gmra.mrb[108].mxu0 %v9458_v19 }
0x1be4   : > { %v14644_v8 = vpop.f32.mrb[94].mxu0 }
0x1be5   : > { %v9444_v42 = vmul.f32 0.01, %v14644_v8  ;;  %v9372_v29 = vpop.f32.mrb[95].mxu0  ;;  %vm9428_vm1 = vcmp.ge.f32.partialorder %v14644_v8, 0.0 }
0x1be6   : > { %vm9427_vm8 = vcmp.ge.f32.partialorder %v9372_v29, 0.0  ;;  %v9443_v43 = vmul.f32 0.01, %v9372_v29 }
0x1be7   : > { %v9460_v27 = vsel %vm9428_vm1, %v14644_v8, %v9444_v42  ;;  %v10129_v42 = vld [vmem:[#allocation2 + $0xec0] sm:$0xff] }
0x1be8   : > { %v9459_v32 = vsel %vm9427_vm8, %v9372_v29, %v9443_v43  ;;  %v10130_v29 = vld [vmem:[#allocation2 + $0xec8] sm:$0xff]  ;;  %v10131_v43 = vld [vmem:[#allocation2 + $0xed0] sm:$0xff] }
0x1be9   : > { %14698 = vmatprep.mubr.f32.mxu1 %v9459_v32  ;;  %14754 = vmatprep.mubr.f32.mxu0 %v9459_v32  ;;  %v15985_v32 = vpack.c.bf16 %v10130_v29, %v10129_v42 }
0x1bea   : > { %14699 = vmatmul.mubr.f32.gmra.mrb[110].mxu1 %v9460_v27  ;;  %14755 = vmatmul.mubr.f32.gmra.mrb[110].mxu0 %v9460_v27  ;;  %v10132_v27 = vld [vmem:[#allocation2 + $0xed8] sm:$0xff] }
0x1beb   : > { %15986 = vmatprep.subr.bf16.mxu0 %v15985_v32 }
0x1bec   : > { %15988 = vmatpush3.bf16.msra.mxu0 %v15985_v32 }
0x1bed   : > { %v14647_v57 = vpop.f32.mrb[96].mxu0 }
0x1bee   : > { %v9446_v52 = vmul.f32 0.01, %v14647_v57  ;;  %v9382_v36 = vpop.f32.mrb[97].mxu0  ;;  %vm9430_vm9 = vcmp.ge.f32.partialorder %v14647_v57, 0.0 }
0x1bef   : > { %vm9429_vm11 = vcmp.ge.f32.partialorder %v9382_v36, 0.0  ;;  %v9445_v12 = vmul.f32 0.01, %v9382_v36 }
0x1bf0   : > { %v9462_v2 = vsel %vm9430_vm9, %v14647_v57, %v9446_v52  ;;  %v15989_v57 = vpack.c.bf16 %v10132_v27, %v10131_v43  ;;  %v10133_v52 = vld [vmem:[#allocation2 + $0xee0] sm:$0xff] }
0x1bf1   : > { %v9461_v11 = vsel %vm9429_vm11, %v9382_v36, %v9445_v12  ;;  %v10134_v36 = vld [vmem:[#allocation2 + $0xee8] sm:$0xff] }
0x1bf2   : > { %14701 = vmatprep.mubr.f32.mxu1 %v9461_v11  ;;  %14757 = vmatprep.mubr.f32.mxu0 %v9461_v11  ;;  %v15993_v12 = vpack.c.bf16 %v10134_v36, %v10133_v52  ;;  %v10135_v11 = vld [vmem:[#allocation2 + $0xef0] sm:$0xff] }
0x1bf3   : > { %v14650_v34 = vpop.f32.mrb[98].mxu0  ;;  %14702 = vmatmul.mubr.f32.gmra.mrb[112].mxu1 %v9462_v2  ;;  %14758 = vmatmul.mubr.f32.gmra.mrb[112].mxu0 %v9462_v2  ;;  %v10136_v2 = vld [vmem:[#allocation2 + $0xef8] sm:$0xff] }
0x1bf4   : > { %v9448_v30 = vmul.f32 0.01, %v14650_v34  ;;  %v9392_v16 = vpop.f32.mrb[99].mxu0  ;;  %vm9432_vm12 = vcmp.ge.f32.partialorder %v14650_v34, 0.0  ;;  %15990 = vmatprep.subr.bf16.mxu0 %v15989_v57 }
0x1bf5   : > { %vm9431_vm13 = vcmp.ge.f32.partialorder %v9392_v16, 0.0  ;;  %v9447_v47 = vmul.f32 0.01, %v9392_v16  ;;  %15992 = vmatpush3.bf16.msra.mxu0 %v15989_v57 }
0x1bf6   : > { %v9464_v54 = vsel %vm9432_vm12, %v14650_v34, %v9448_v30  ;;  %15994 = vmatprep.subr.bf16.mxu0 %v15993_v12  ;;  %v15997_v34 = vpack.c.bf16 %v10136_v2, %v10135_v11  ;;  %v10137_v30 = vld [vmem:[#allocation2 + $0xf00] sm:$0xff] }
0x1bf7   : > { %v9463_v38 = vsel %vm9431_vm13, %v9392_v16, %v9447_v47  ;;  %v10138_v16 = vld [vmem:[#allocation2 + $0xf08] sm:$0xff] }
0x1bf8   : > { %14704 = vmatprep.mubr.f32.mxu1 %v9463_v38  ;;  %14760 = vmatprep.mubr.f32.mxu0 %v9463_v38  ;;  %v16001_v47 = vpack.c.bf16 %v10138_v16, %v10137_v30  ;;  %v10139_v38 = vld [vmem:[#allocation2 + $0xf10] sm:$0xff] }
0x1bf9   : > { %14705 = vmatmul.mubr.f32.gmra.mrb[114].mxu1 %v9464_v54  ;;  %14761 = vmatmul.mubr.f32.gmra.mrb[114].mxu0 %v9464_v54  ;;  %v10140_v54 = vld [vmem:[#allocation2 + $0xf18] sm:$0xff] }
0x1bfa   : > { %15996 = vmatpush3.bf16.msra.mxu0 %v15993_v12 }
0x1bfb   : > { %v14653_v39 = vpop.f32.mrb[100].mxu0  ;;  %15998 = vmatprep.subr.bf16.mxu0 %v15997_v34 }
0x1bfc   : > { %v9450_v62 = vmul.f32 0.01, %v14653_v39  ;;  %v9402_v21 = vpop.f32.mrb[101].mxu0  ;;  %vm9434_vm14 = vcmp.ge.f32.partialorder %v14653_v39, 0.0 }
0x1bfd   : > { %vm9433_vm0 = vcmp.ge.f32.partialorder %v9402_v21, 0.0  ;;  %v9449_v20 = vmul.f32 0.01, %v9402_v21 }
0x1bfe   : > { %v9466_v4 = vsel %vm9434_vm14, %v14653_v39, %v9450_v62  ;;  %16000 = vmatpush3.bf16.msra.mxu0 %v15997_v34  ;;  %v16005_v39 = vpack.c.bf16 %v10140_v54, %v10139_v38  ;;  %v10141_v62 = vld [vmem:[#allocation2 + $0xf20] sm:$0xff] }
0x1bff   : > { %v9465_v51 = vsel %vm9433_vm0, %v9402_v21, %v9449_v20  ;;  %16002 = vmatprep.subr.bf16.mxu0 %v16001_v47  ;;  %v10142_v21 = vld [vmem:[#allocation2 + $0xf28] sm:$0xff] }
0x1c00   : > { %14707 = vmatprep.mubr.f32.mxu1 %v9465_v51  ;;  %14763 = vmatprep.mubr.f32.mxu0 %v9465_v51  ;;  %v16009_v20 = vpack.c.bf16 %v10142_v21, %v10141_v62 }
0x1c01   : > { %v14656_v55 = vpop.f32.mrb[102].mxu0  ;;  %14708 = vmatmul.mubr.f32.gmra.mrb[116].mxu1 %v9466_v4  ;;  %14764 = vmatmul.mubr.f32.gmra.mrb[116].mxu0 %v9466_v4 }
0x1c02   : > { %v9452_v10 = vmul.f32 0.01, %v14656_v55  ;;  %v9412_v6 = vpop.f32.mrb[103].mxu0  ;;  %vm9436_vm15 = vcmp.ge.f32.partialorder %v14656_v55, 0.0  ;;  %16004 = vmatpush3.bf16.msra.mxu0 %v16001_v47 }
0x1c03   : > { %vm9435_vm2 = vcmp.ge.f32.partialorder %v9412_v6, 0.0  ;;  %v9451_v15 = vmul.f32 0.01, %v9412_v6  ;;  %16006 = vmatprep.subr.bf16.mxu0 %v16005_v39 }
0x1c04   : > { %v9468_v8 = vsel %vm9436_vm15, %v14656_v55, %v9452_v10 }
0x1c05   : > { %v9467_v19 = vsel %vm9435_vm2, %v9412_v6, %v9451_v15 }
0x1c06   : > { %14710 = vmatprep.mubr.f32.mxu1 %v9467_v19  ;;  %14766 = vmatprep.mubr.f32.mxu0 %v9467_v19 }
0x1c07   : > { %14711 = vmatmul.mubr.f32.gmra.mrb[118].mxu1 %v9468_v8  ;;  %14767 = vmatmul.mubr.f32.gmra.mrb[118].mxu0 %v9468_v8 }
0x1c08   : > { %16008 = vmatpush3.bf16.msra.mxu0 %v16005_v39 }
0x1c09   : > { %16010 = vmatprep.subr.bf16.mxu0 %v16009_v20 }
0x1c0c   : > { %16012 = vmatpush3.bf16.msra.mxu0 %v16009_v20 }
0x1cad   : > { %v14691_v51 = vpop.f32.mrb[104].mxu1  ;;  %v14747_v4 = vpop.f32.mrb[104].mxu0 }
0x1cae   : > { %16534 = vtanh.f32 %v14691_v51  ;;  %v9551_v55 = vpop.f32.mrb[105].mxu1  ;;  %v9728_v10 = vpop.f32.mrb[105].mxu0 }
0x1caf   : > { %16536 = vtanh.f32 %v9551_v55 }
0x1cb2   : > { %v14694_v6 = vpop.f32.mrb[106].mxu1  ;;  %v19149_v15 = vpop.f32.mrb[106].mxu0 }
0x1cb3   : > { %16538 = vtanh.f32 %v14694_v6  ;;  %v9561_v19 = vpop.f32.mrb[107].mxu1  ;;  %v19151_v8 = vpop.f32.mrb[107].mxu0 }
0x1cb4   : > { %16540 = vtanh.f32 %v9561_v19 }
0x1cb6   : > { %v14697_v42 = vpop.f32.mrb[108].mxu1  ;;  %v19153_v29 = vpop.f32.mrb[108].mxu0 }
0x1cb7   : > { %16542 = vtanh.f32 %v14697_v42  ;;  %v9571_v43 = vpop.f32.mrb[109].mxu1  ;;  %v19155_v32 = vpop.f32.mrb[109].mxu0 }
0x1cb8   : > { %16544 = vtanh.f32 %v9571_v43  ;;  %v16535_v27 = vpop.eup %16534 }
0x1cb9   : > { %v16537_v57 = vpop.eup %16536  ;;  %v9825_v52 = vmul.f32 1.442695, %v16535_v27  ;;  %v19158_v36 = vadd.f32 %v16535_v27, %v18894_v50 }
0x1cba   : > { %v9823_v12 = vmul.f32 1.442695, %v16537_v57  ;;  %v19161_v11 = vadd.f32 %v16537_v57, %v18897_v48 }
0x1cbb   : > { %16546 = vpow2.f32 %v9825_v52 }
0x1cbc   : > { %16548 = vpow2.f32 %v9823_v12 }
0x1cbd   : > { %v16539_v2 = vpop.eup %16538  ;;  %v14700_v34 = vpop.f32.mrb[110].mxu1 }
0x1cbe   : > { %v19163_v30 = vpop.f32.mrb[110].mxu0  ;;  %v16541_v16 = vpop.eup %16540  ;;  %v9829_v47 = vmul.f32 1.442695, %v16539_v2  ;;  %16550 = vtanh.f32 %v14700_v34  ;;  %v19168_v39 = vadd.f32 %v16539_v2, %v18904_v23 }
0x1cbf   : > { %v9581_v38 = vpop.f32.mrb[111].mxu1  ;;  %v19165_v54 = vpop.f32.mrb[111].mxu0  ;;  %v9827_v50 = vmul.f32 1.442695, %v16541_v16  ;;  %v19171_v48 = vadd.f32 %v16541_v16, %v18907_v56 }
0x1cc0   : > { %16552 = vtanh.f32 %v9581_v38 }
0x1cc1   : > { %16554 = vpow2.f32 %v9829_v47  ;;  %v16543_v62 = vpop.eup %16542 }
0x1cc2   : > { %16556 = vpow2.f32 %v9827_v50  ;;  %v16545_v21 = vpop.eup %16544  ;;  %v9833_v20 = vmul.f32 1.442695, %v16543_v62  ;;  %v19174_v51 = vadd.f32 %v16543_v62, %v18910_v37 }
0x1cc3   : > { %v9831_v55 = vmul.f32 1.442695, %v16545_v21  ;;  %v19177_v6 = vadd.f32 %v16545_v21, %v18913_v46 }
0x1cc4   : > { %16558 = vpow2.f32 %v9833_v20 }
0x1cc5   : > { %16560 = vpow2.f32 %v9831_v55  ;;  %v16547_v23 = vpop.eup %16546 }
0x1cc6   : > { %v14703_v19 = vpop.f32.mrb[112].mxu1  ;;  %v19179_v42 = vpop.f32.mrb[112].mxu0  ;;  %v9856_v43 = vmul.f32 %v16547_v23, %v18955_v3 }
0x1cc7   : > { %v16549_v56 = vpop.eup %16548  ;;  %16562 = vtanh.f32 %v14703_v19  ;;  %v9591_v27 = vpop.f32.mrb[113].mxu1 }
0x1cc8   : > { %v19182_v57 = vpop.f32.mrb[113].mxu0  ;;  %v16551_v52 = vpop.eup %16550  ;;  %v9855_v37 = vmul.f32 %v16549_v56, %v18962_v45  ;;  %16564 = vtanh.f32 %v9591_v27  ;;  %v19185_v46 = vadd.f32 %v14747_v4, %v9856_v43 }
0x1cc9   : > { %v9837_v2 = vmul.f32 1.442695, %v16551_v52  ;;  %v19188_v34 = vadd.f32 %v16551_v52, %v18930_v17 }
0x1cca   : > { %v16553_v12 = vpop.eup %16552  ;;  %v19190_v47 = vadd.f32 %v9855_v37, %v9728_v10 }
0x1ccb   : > { %v16555_v16 = vpop.eup %16554  ;;  %v9835_v38 = vmul.f32 1.442695, %v16553_v12  ;;  %v19193_v3 = vadd.f32 %v16553_v12, %v18934_v13  ;;  %16566 = vpow2.f32 %v9837_v2 }
0x1ccc   : > { %v16557_v50 = vpop.eup %16556  ;;  %v9858_v62 = vmul.f32 %v16555_v16, %v18971_v49  ;;  %v14706_v4 = vpop.f32.mrb[114].mxu1  ;;  %14771 = vmatprep.mubr.msk.f32.mxu1 %vm2077_vm10, %v19190_v47 }
0x1ccd   : > { %v9857_v45 = vmul.f32 %v16557_v50, %v18979_v60  ;;  %16568 = vpow2.f32 %v9835_v38  ;;  %v19197_v21 = vpop.f32.mrb[114].mxu0  ;;  %v9601_v10 = vpop.f32.mrb[115].mxu1  ;;  %14772 = vmatmul.mubr.msk.f32.vlgmr.msra.gmra.mrb[120].mxu1 %vm2077_vm10, %v19185_v46 }
0x1cce   : > { %v19202_v17 = vadd.f32 %v19149_v15, %v9858_v62  ;;  %16570 = vtanh.f32 %v14706_v4  ;;  %v19204_v13 = vpop.f32.mrb[115].mxu0  ;;  %v16559_v49 = vpop.eup %16558 }
0x1ccf   : > { %v19209_v60 = vadd.f32 %v9857_v45, %v19151_v8  ;;  %16572 = vtanh.f32 %v9601_v10  ;;  %v16561_v20 = vpop.eup %16560  ;;  %v9860_v55 = vmul.f32 %v16559_v49, %v18993_v58 }
0x1cd0   : > { %v9859_v23 = vmul.f32 %v16561_v20, %v18999_v14 }
0x1cd1   : > { %14774 = vmatprep.mubr.msk.f32.mxu1 %vm2077_vm10, %v19209_v60  ;;  %v16563_v15 = vpop.eup %16562  ;;  %v19216_v19 = vadd.f32 %v19153_v29, %v9860_v55 }
0x1cd2   : > { %14775 = vmatmul.mubr.msk.f32.gmra.mrb[122].mxu1 %vm2077_vm10, %v19202_v17  ;;  %v16565_v56 = vpop.eup %16564  ;;  %v19221_v8 = vadd.f32 %v9859_v23, %v19155_v32  ;;  %v9841_v43 = vmul.f32 1.442695, %v16563_v15  ;;  %v19224_v27 = vadd.f32 %v16563_v15, %v19003_v33 }
0x1cd3   : > { %v9839_v58 = vmul.f32 1.442695, %v16565_v56  ;;  %v19227_v14 = vadd.f32 %v16565_v56, %v18987_v40 }
0x1cd4   : > { %16574 = vpow2.f32 %v9841_v43  ;;  %v14709_v52 = vpop.f32.mrb[116].mxu1  ;;  %v19229_v37 = vpop.f32.mrb[116].mxu0  ;;  %14777 = vmatprep.mubr.msk.f32.mxu1 %vm2077_vm10, %v19221_v8 }
0x1cd5   : > { %v16567_v29 = vpop.eup %16566  ;;  %16576 = vpow2.f32 %v9839_v58  ;;  %v9611_v12 = vpop.f32.mrb[117].mxu1 }
0x1cd6   : > { %v9788_v32 = vpop.f32.mrb[117].mxu0  ;;  %14778 = vmatmul.mubr.msk.f32.gmra.mrb[124].mxu1 %vm2077_vm10, %v19216_v19  ;;  %v9862_v2 = vmul.f32 %v16567_v29, %v19031_v18  ;;  %16578 = vtanh.f32 %v14709_v52 }
0x1cd7   : > { %v16569_v33 = vpop.eup %16568  ;;  %16580 = vtanh.f32 %v9611_v12 }
0x1cd8   : > { %v16571_v40 = vpop.eup %16570  ;;  %v9861_v16 = vmul.f32 %v16569_v33, %v19025_v1  ;;  %v19238_v50 = vadd.f32 %v19163_v30, %v9862_v2 }
0x1cd9   : > { %v16573_v38 = vpop.eup %16572  ;;  %v9845_v62 = vmul.f32 1.442695, %v16571_v40  ;;  %v19241_v45 = vadd.f32 %v16571_v40, %v19010_v63 }
0x1cda   : > { %v19244_v4 = vadd.f32 %v9861_v16, %v19165_v54  ;;  %v9843_v10 = vmul.f32 1.442695, %v16573_v38  ;;  %v19247_v49 = vadd.f32 %v16573_v38, %v19007_v7  ;;  %v14712_v18 = vpop.f32.mrb[118].mxu1  ;;  %v14768_v20 = vpop.f32.mrb[118].mxu0 }
0x1cdb   : > { %16582 = vpow2.f32 %v9845_v62  ;;  %v9621_v1 = vpop.f32.mrb[119].mxu1  ;;  %v9798_v55 = vpop.f32.mrb[119].mxu0 }
0x1cdc   : > { %16584 = vpow2.f32 %v9843_v10  ;;  %14780 = vmatprep.mubr.msk.f32.mxu1 %vm2077_vm10, %v19244_v4 }
0x1cdd   : > { %16586 = vtanh.f32 %v14712_v18  ;;  %14781 = vmatmul.mubr.msk.f32.gmra.mrb[126].mxu1 %vm2077_vm10, %v19238_v50 }
0x1cde   : > { %16588 = vtanh.f32 %v9621_v1  ;;  %v16575_v63 = vpop.eup %16574 }
0x1cdf   : > { %v16577_v30 = vpop.eup %16576  ;;  %v9864_v54 = vmul.f32 %v16575_v63, %v19058_v26 }
0x1ce0   : > { %v16579_v7 = vpop.eup %16578  ;;  %v9863_v23 = vmul.f32 %v16577_v30, %v19055_v28 }
0x1ce1   : > { %v16581_v15 = vpop.eup %16580  ;;  %v19256_v56 = vadd.f32 %v19179_v42, %v9864_v54  ;;  %v9849_v43 = vmul.f32 1.442695, %v16579_v7  ;;  %v19259_v58 = vadd.f32 %v16579_v7, %v19019_v22  ;;  %v10339_v54 = vld [vmem:[#allocation2 + $0xf48] sm:$0xff]  ;;  %v10340_v7 = vld [vmem:[#allocation2 + $0xf50] sm:$0xff] }
0x1ce2   : > { %v19262_v52 = vadd.f32 %v9863_v23, %v19182_v57  ;;  %v9847_v29 = vmul.f32 1.442695, %v16581_v15  ;;  %v19265_v12 = vadd.f32 %v16581_v15, %v19029_v59  ;;  %v10342_v15 = vld [vmem:[#allocation2 + $0xf60] sm:$0xff] }
0x1ce3   : > { %16590 = vpow2.f32 %v9849_v43 }
0x1ce4   : > { %16592 = vpow2.f32 %v9847_v29  ;;  %14783 = vmatprep.mubr.msk.f32.mxu1 %vm2077_vm10, %v19262_v52  ;;  %v10344_v29 = vld [vmem:[#allocation2 + $0xf70] sm:$0xff] }
0x1ce5   : > { %v16583_v26 = vpop.eup %16582  ;;  %14784 = vmatmul.mubr.msk.f32.gmra.mrb[128].mxu1 %vm2077_vm10, %v19256_v56 }
0x1ce6   : > { %v16585_v28 = vpop.eup %16584  ;;  %v9866_v42 = vmul.f32 %v16583_v26, %v19076_v9  ;;  %v10345_v26 = vld [vmem:[#allocation2 + $0xf78] sm:$0xff] }
0x1ce7   : > { %v16587_v22 = vpop.eup %16586  ;;  %v9865_v57 = vmul.f32 %v16585_v28, %v19073_v5  ;;  %v16029_v28 = vpack.c.bf16 %v10345_v26, %v10344_v29 }
0x1ce8   : > { %v16589_v33 = vpop.eup %16588  ;;  %v19274_v2 = vadd.f32 %v19197_v21, %v9866_v42  ;;  %v9853_v59 = vmul.f32 1.442695, %v16587_v22  ;;  %v19277_v40 = vadd.f32 %v16587_v22, %v19035_v35  ;;  %v10346_v42 = vld [vmem:[#allocation2 + $0xf80] sm:$0xff]  ;;  %v10347_v22 = vld [vmem:[#allocation2 + $0xf88] sm:$0xff] }
0x1ce9   : > { %v19280_v16 = vadd.f32 %v9865_v57, %v19204_v13  ;;  %v9851_v38 = vmul.f32 1.442695, %v16589_v33  ;;  %v19283_v9 = vadd.f32 %v16589_v33, %v19049_v25  ;;  %v16033_v57 = vpack.c.bf16 %v10347_v22, %v10346_v42  ;;  %v10348_v33 = vld [vmem:[#allocation2 + $0xf90] sm:$0xff] }
0x1cea   : > { %16594 = vpow2.f32 %v9853_v59  ;;  %v10349_v59 = vld [vmem:[#allocation2 + $0xf98] sm:$0xff] }
0x1ceb   : > { %16596 = vpow2.f32 %v9851_v38  ;;  %14786 = vmatprep.mubr.msk.f32.mxu1 %vm2077_vm10, %v19280_v16  ;;  %v16037_v38 = vpack.c.bf16 %v10349_v59, %v10348_v33  ;;  %v19747_v33 = vld [vmem:[#allocation64_spill] sm:$0xff] }
0x1cec   : > { %14787 = vmatmul.mubr.msk.f32.gmra.mrb[130].mxu1 %vm2077_vm10, %v19274_v2 }
0x1ced   : > { %v16591_v5 = vpop.eup %16590 }
0x1cee   : > { %v16593_v21 = vpop.eup %16592  ;;  %v9868_v35 = vmul.f32 %v16591_v5, %v19095_v41  ;;  %v10350_v5 = vld [vmem:[#allocation2 + $0xfa0] sm:$0xff] }
0x1cef   : > { %v9867_v62 = vmul.f32 %v16593_v21, %v19092_v31  ;;  %v10351_v21 = vld [vmem:[#allocation2 + $0xfa8] sm:$0xff] }
0x1cf0   : > { %v19292_v13 = vadd.f32 %v19229_v37, %v9868_v35  ;;  %v10143_v37 = vld [vmem:[#allocation2 + $0xf30] sm:$0xff]  ;;  %v16041_v35 = vpack.c.bf16 %v10351_v21, %v10350_v5 }
0x1cf1   : > { %v19294_v10 = vadd.f32 %v9867_v62, %v9788_v32  ;;  %v10144_v32 = vld [vmem:[#allocation2 + $0xf38] sm:$0xff]  ;;  %v19313_v62 = vrot.slane %v17651_v53, %v1285_v24  ;;  %v19745_v53 = vld [vmem:[#allocation56_spill] sm:$0xff] }
0x1cf2   : > { %v16013_v30 = vpack.c.bf16 %v10144_v32, %v10143_v37 }
0x1cf3   : > { %14789 = vmatprep.mubr.msk.f32.mxu1 %vm2077_vm10, %v19294_v10  ;;  %v1907_v24 = vadd.f32 %v19745_v53, %v19313_v62  ;;  %v1919_v59 = vadd.f32 %v19747_v33, %v19313_v62 }
0x1cf4   : > { %v16595_v25 = vpop.eup %16594  ;;  %14790 = vmatmul.mubr.msk.f32.gmra.mrb[132].mxu1 %vm2077_vm10, %v19292_v13  ;;  %16014 = vmatprep.subr.bf16.mxu0 %v16013_v30 }
0x1cf5   : > { %v16597_v18 = vpop.eup %16596  ;;  %v9870_v1 = vmul.f32 %v16595_v25, %v19106_v61  ;;  %16016 = vmatpush3.bf16.msra.mxu0 %v16013_v30  ;;  %v10338_v61 = vld [vmem:[#allocation2 + $0xf40] sm:$0xff]  ;;  %v19742_v25 = vld [vmem:[#allocation52_spill] sm:$0xff] }
0x1cf6   : > { %v9869_v63 = vmul.f32 %v16597_v18, %v19104_v0  ;;  %v16017_v23 = vpack.c.bf16 %v10339_v54, %v10338_v61  ;;  %v10341_v0 = vld [vmem:[#allocation2 + $0xf58] sm:$0xff]  ;;  %v1901_v18 = vadd.f32 %v19742_v25, %v19313_v62 }
0x1cf7   : > { %v19302_v41 = vadd.f32 %v14768_v20, %v9870_v1  ;;  %v16021_v20 = vpack.c.bf16 %v10341_v0, %v10340_v7  ;;  %v19744_v7 = vld [vmem:[#allocation60_spill] sm:$0xff] }
0x1cf8   : > { %v19304_v31 = vadd.f32 %v9869_v63, %v9798_v55  ;;  %v10343_v55 = vld [vmem:[#allocation2 + $0xf68] sm:$0xff]  ;;  %16018 = vmatprep.subr.bf16.mxu1 %v16017_v23  ;;  %v19743_v63 = vld [vmem:[#allocation48_spill] sm:$0xff] }
0x1cf9   : > { %16020 = vmatpush3.bf16.msra.mxu1 %v16017_v23  ;;  %v16025_v43 = vpack.c.bf16 %v10343_v55, %v10342_v15  ;;  %v1895_v37 = vadd.f32 %v19743_v63, %v19313_v62  ;;  %v1913_v23 = vadd.f32 %v19744_v7, %v19313_v62  ;;  %v19748_v63 = vld [vmem:[#allocation76_spill] sm:$0xff] }
0x1cfa   : > { %14792 = vmatprep.mubr.msk.f32.mxu1 %vm2077_vm10, %v19304_v31  ;;  %16022 = vmatprep.subr.bf16.mxu1 %v16021_v20 }
0x1cfb   : > { %14793 = vmatmul.mubr.msk.f32.gmra.mrb[134].mxu1 %vm2077_vm10, %v19302_v41 }
0x1cfd   : > { %16024 = vmatpush3.bf16.msra.mxu1 %v16021_v20 }
0x1cfe   : > { %16026 = vmatprep.subr.bf16.mxu1 %v16025_v43 }
0x1d01   : > { %16028 = vmatpush3.bf16.msra.mxu1 %v16025_v43 }
0x1d02   : > { %16030 = vmatprep.subr.bf16.mxu1 %v16029_v28 }
0x1d05   : > { %16032 = vmatpush3.bf16.msra.mxu1 %v16029_v28  ;;  %v19746_v28 = vld [vmem:[#allocation68_spill] sm:$0xff] }
0x1d06   : > { %16034 = vmatprep.subr.bf16.mxu1 %v16033_v57  ;;  %v1925_v42 = vadd.f32 %v19746_v28, %v19313_v62 }
0x1d09   : > { %16036 = vmatpush3.bf16.msra.mxu1 %v16033_v57 }
0x1d0a   : > { %16038 = vmatprep.subr.bf16.mxu1 %v16037_v38 }
0x1d0d   : > { %16040 = vmatpush3.bf16.msra.mxu1 %v16037_v38 }
0x1d0e   : > { %16042 = vmatprep.subr.bf16.mxu1 %v16041_v35 }
0x1d11   : > { %16044 = vmatpush3.bf16.msra.mxu1 %v16041_v35 }
0x1da0   : > { %v14773_v1 = vpop.f32.mrb[120].mxu1 }
0x1da1   : > { %v10008_v32 = vadd.f32 %v14773_v1, %v1901_v18  ;;  %v10002_v30 = vpop.f32.mrb[121].mxu1 }
0x1da2   : > { %v10003_v61 = vadd.f32 %v10002_v30, %v1895_v37  ;;  %v1937_v37 = vadd.f32 %v19748_v63, %v19313_v62 }
0x1da3   : > { %v10098_v54 = vmul.f32 0.01, %v10008_v32  ;;  %vm10082_vm3 = vcmp.ge.f32.partialorder %v10008_v32, 0.0 }
0x1da4   : > { %v10097_v0 = vmul.f32 0.01, %v10003_v61  ;;  %vm10081_vm4 = vcmp.ge.f32.partialorder %v10003_v61, 0.0 }
0x1da5   : > { %v14776_v44 = vpop.f32.mrb[122].mxu1  ;;  %v10114_v29 = vsel %vm10082_vm3, %v10008_v32, %v10098_v54  ;;  %v19749_v54 = vld [vmem:[#allocation72_spill] sm:$0xff] }
0x1da6   : > { %v10018_v20 = vadd.f32 %v14776_v44, %v1913_v23  ;;  %v10012_v15 = vpop.f32.mrb[123].mxu1  ;;  %v10113_v43 = vsel %vm10081_vm4, %v10003_v61, %v10097_v0  ;;  %v1931_v7 = vadd.f32 %v19749_v54, %v19313_v62 }
0x1da7   : > { %v10013_v55 = vadd.f32 %v10012_v15, %v1907_v24  ;;  %14827 = vmatprep.mubr.f32.mxu0 %v10113_v43 }
0x1da8   : > { %v10100_v26 = vmul.f32 0.01, %v10018_v20  ;;  %vm10084_vm5 = vcmp.ge.f32.partialorder %v10018_v20, 0.0  ;;  %14828 = vmatmul.mubr.f32.vlgmr.msra.gmra.mrb[120].mxu0 %v10114_v29 }
0x1da9   : > { %v10099_v22 = vmul.f32 0.01, %v10013_v55  ;;  %v14779_v57 = vpop.f32.mrb[124].mxu1  ;;  %vm10083_vm6 = vcmp.ge.f32.partialorder %v10013_v55, 0.0 }
0x1daa   : > { %v10028_v38 = vadd.f32 %v14779_v57, %v1925_v42  ;;  %v10022_v5 = vpop.f32.mrb[125].mxu1  ;;  %v10116_v25 = vsel %vm10084_vm5, %v10018_v20, %v10100_v26  ;;  %v19751_v26 = vld [vmem:[#allocation80_spill] sm:$0xff] }
0x1dab   : > { %v10023_v21 = vadd.f32 %v10022_v5, %v1919_v59  ;;  %v10115_v35 = vsel %vm10083_vm6, %v10013_v55, %v10099_v22  ;;  %v19750_v55 = vld [vmem:[#allocation84_spill] sm:$0xff]  ;;  %v1943_v28 = vadd.f32 %v19751_v26, %v19313_v62 }
0x1dac   : > { %v10102_v18 = vmul.f32 0.01, %v10028_v38  ;;  %14830 = vmatprep.mubr.f32.mxu0 %v10115_v35  ;;  %vm10086_vm7 = vcmp.ge.f32.partialorder %v10028_v38, 0.0  ;;  %v1949_v43 = vadd.f32 %v19750_v55, %v19313_v62  ;;  %v19753_v35 = vld [vmem:[#allocation88_spill] sm:$0xff] }
0x1dad   : > { %v10101_v1 = vmul.f32 0.01, %v10023_v21  ;;  %14831 = vmatmul.mubr.f32.gmra.mrb[122].mxu0 %v10116_v25  ;;  %vm10085_vm1 = vcmp.ge.f32.partialorder %v10023_v21, 0.0  ;;  %v1955_v25 = vadd.f32 %v19753_v35, %v19313_v62  ;;  %v19756_v26 = vld [vmem:[#allocation108_spill] sm:$0xff] }
0x1dae   : > { %v10118_v30 = vsel %vm10086_vm7, %v10028_v38, %v10102_v18  ;;  %v19752_v38 = vld [vmem:[#allocation92_spill] sm:$0xff] }
0x1daf   : > { %v10117_v32 = vsel %vm10085_vm1, %v10023_v21, %v10101_v1  ;;  %v1961_v5 = vadd.f32 %v19752_v38, %v19313_v62 }
0x1db0   : > { %v14782_v61 = vpop.f32.mrb[126].mxu1  ;;  %14833 = vmatprep.mubr.f32.mxu0 %v10117_v32 }
0x1db1   : > { %v10038_v23 = vadd.f32 %v14782_v61, %v1937_v37  ;;  %v10032_v0 = vpop.f32.mrb[127].mxu1  ;;  %14834 = vmatmul.mubr.f32.gmra.mrb[124].mxu0 %v10118_v30 }
0x1db2   : > { %v10033_v44 = vadd.f32 %v10032_v0, %v1931_v7 }
0x1db3   : > { %v10104_v53 = vmul.f32 0.01, %v10038_v23  ;;  %vm10088_vm8 = vcmp.ge.f32.partialorder %v10038_v23, 0.0 }
0x1db4   : > { %v10103_v24 = vmul.f32 0.01, %v10033_v44  ;;  %vm10087_vm9 = vcmp.ge.f32.partialorder %v10033_v44, 0.0 }
0x1db5   : > { %v10120_v15 = vsel %vm10088_vm8, %v10038_v23, %v10104_v53  ;;  %v19754_v23 = vld [vmem:[#allocation100_spill] sm:$0xff] }
0x1db6   : > { %v10119_v20 = vsel %vm10087_vm9, %v10033_v44, %v10103_v24  ;;  %v1973_v0 = vadd.f32 %v19754_v23, %v19313_v62  ;;  %v19755_v53 = vld [vmem:[#allocation96_spill] sm:$0xff] }
0x1db7   : > { %14836 = vmatprep.mubr.f32.mxu0 %v10119_v20  ;;  %v1967_v24 = vadd.f32 %v19755_v53, %v19313_v62  ;;  %v10549_v23 = vld [vmem:[#allocation2 + $0xfd0] sm:$0xff] }
0x1db8   : > { %14837 = vmatmul.mubr.f32.gmra.mrb[126].mxu0 %v10120_v15  ;;  %v14785_v29 = vpop.f32.mrb[128].mxu1 }
0x1db9   : > { %v10048_v42 = vadd.f32 %v14785_v29, %v1949_v43  ;;  %v10042_v22 = vpop.f32.mrb[129].mxu1 }
0x1dba   : > { %v10043_v57 = vadd.f32 %v10042_v22, %v1943_v28  ;;  %v1985_v28 = vadd.f32 %v19756_v26, %v19313_v62  ;;  %v19757_v22 = vld [vmem:[#allocation104_spill] sm:$0xff]  ;;  %v10555_v26 = vld [vmem:[#allocation2 + $0x1000] sm:$0xff] }
0x1dbb   : > { %v10106_v33 = vmul.f32 0.01, %v10048_v42  ;;  %vm10090_vm11 = vcmp.ge.f32.partialorder %v10048_v42, 0.0 }
0x1dbc   : > { %v10105_v59 = vmul.f32 0.01, %v10043_v57  ;;  %vm10089_vm12 = vcmp.ge.f32.partialorder %v10043_v57, 0.0 }
0x1dbd   : > { %v10122_v1 = vsel %vm10090_vm11, %v10048_v42, %v10106_v33 }
0x1dbe   : > { %v10121_v18 = vsel %vm10089_vm12, %v10043_v57, %v10105_v59  ;;  %v1979_v57 = vadd.f32 %v19757_v22, %v19313_v62  ;;  %v10547_v62 = vld [vmem:[#allocation2 + $0xfc0] sm:$0xff]  ;;  %v10557_v22 = vld [vmem:[#allocation2 + $0x1010] sm:$0xff] }
0x1dbf   : > { %v14788_v21 = vpop.f32.mrb[130].mxu1  ;;  %14839 = vmatprep.mubr.f32.mxu0 %v10121_v18 }
0x1dc0   : > { %v10058_v63 = vadd.f32 %v14788_v21, %v1961_v5  ;;  %v10052_v37 = vpop.f32.mrb[131].mxu1  ;;  %14840 = vmatmul.mubr.f32.gmra.mrb[128].mxu0 %v10122_v1 }
0x1dc1   : > { %v10053_v32 = vadd.f32 %v10052_v37, %v1955_v25  ;;  %v10353_v37 = vld [vmem:[#allocation2 + $0xfb8] sm:$0xff] }
0x1dc2   : > { %v10108_v30 = vmul.f32 0.01, %v10058_v63  ;;  %vm10092_vm13 = vcmp.ge.f32.partialorder %v10058_v63, 0.0 }
0x1dc3   : > { %v10107_v61 = vmul.f32 0.01, %v10053_v32  ;;  %vm10091_vm14 = vcmp.ge.f32.partialorder %v10053_v32, 0.0 }
0x1dc4   : > { %v10124_v7 = vsel %vm10092_vm13, %v10058_v63, %v10108_v30  ;;  %v10352_v63 = vld [vmem:[#allocation2 + $0xfb0] sm:$0xff]  ;;  %v10548_v30 = vld [vmem:[#allocation2 + $0xfc8] sm:$0xff] }
0x1dc5   : > { %v10123_v54 = vsel %vm10091_vm14, %v10053_v32, %v10107_v61  ;;  %v16045_v32 = vpack.c.bf16 %v10353_v37, %v10352_v63  ;;  %v10724_v61 = vld [vmem:[#allocation2 + $0x1040] sm:$0xff] }
0x1dc6   : > { %14842 = vmatprep.mubr.f32.mxu0 %v10123_v54  ;;  %v16049_v54 = vpack.c.bf16 %v10548_v30, %v10547_v62 }
0x1dc7   : > { %14843 = vmatmul.mubr.f32.gmra.mrb[130].mxu0 %v10124_v7  ;;  %v14791_v44 = vpop.f32.mrb[132].mxu1  ;;  %16046 = vmatprep.subr.bf16.mxu1 %v16045_v32  ;;  %v10725_v7 = vld [vmem:[#allocation2 + $0x1048] sm:$0xff] }
0x1dc8   : > { %v10068_v20 = vadd.f32 %v14791_v44, %v1973_v0  ;;  %v10062_v15 = vpop.f32.mrb[133].mxu1  ;;  %16048 = vmatpush3.bf16.msra.mxu1 %v16045_v32  ;;  %v10550_v0 = vld [vmem:[#allocation2 + $0xfd8] sm:$0xff]  ;;  %v16081_v44 = vpack.c.bf16 %v10725_v7, %v10724_v61  ;;  %16050 = vmatprep.subr.bf16.mxu0 %v16049_v54  ;;  %v10728_v7 = vld [vmem:[#allocation2 + $0x1060] sm:$0xff] }
0x1dc9   : > { %v10063_v55 = vadd.f32 %v10062_v15, %v1967_v24  ;;  %v16053_v53 = vpack.c.bf16 %v10550_v0, %v10549_v23  ;;  %v10551_v24 = vld [vmem:[#allocation2 + $0xfe0] sm:$0xff]  ;;  %16052 = vmatpush3.bf16.msra.mxu0 %v16049_v54  ;;  %v10729_v23 = vld [vmem:[#allocation2 + $0x1068] sm:$0xff] }
0x1dca   : > { %v10110_v43 = vmul.f32 0.01, %v10068_v20  ;;  %vm10094_vm0 = vcmp.ge.f32.partialorder %v10068_v20, 0.0  ;;  %16082 = vmatprep.subr.bf16.mxu1 %v16081_v44 }
0x1dcb   : > { %v10109_v29 = vmul.f32 0.01, %v10063_v55  ;;  %vm10093_vm15 = vcmp.ge.f32.partialorder %v10063_v55, 0.0  ;;  %16054 = vmatprep.subr.bf16.mxu0 %v16053_v53 }
0x1dcc   : > { %v10126_v59 = vsel %vm10094_vm0, %v10068_v20, %v10110_v43  ;;  %v10552_v20 = vld [vmem:[#allocation2 + $0xfe8] sm:$0xff]  ;;  %v10554_v43 = vld [vmem:[#allocation2 + $0xff8] sm:$0xff] }
0x1dcd   : > { %v10125_v33 = vsel %vm10093_vm15, %v10063_v55, %v10109_v29  ;;  %v16057_v15 = vpack.c.bf16 %v10552_v20, %v10551_v24  ;;  %v10553_v55 = vld [vmem:[#allocation2 + $0xff0] sm:$0xff]  ;;  %16056 = vmatpush3.bf16.msra.mxu0 %v16053_v53  ;;  %v16089_v20 = vpack.c.bf16 %v10729_v23, %v10728_v7 }
0x1dce   : > { %v14794_v42 = vpop.f32.mrb[134].mxu1  ;;  %14845 = vmatprep.mubr.f32.mxu0 %v10125_v33  ;;  %v16061_v29 = vpack.c.bf16 %v10554_v43, %v10553_v55 }
0x1dcf   : > { %v10078_v38 = vadd.f32 %v14794_v42, %v1985_v28  ;;  %v10072_v5 = vpop.f32.mrb[135].mxu1  ;;  %14846 = vmatmul.mubr.f32.gmra.mrb[132].mxu0 %v10126_v59  ;;  %16058 = vmatprep.subr.bf16.mxu0 %v16057_v15  ;;  %v10556_v28 = vld [vmem:[#allocation2 + $0x1008] sm:$0xff]  ;;  %v10559_v59 = vld [vmem:[#allocation2 + $0x1020] sm:$0xff] }
0x1dd0   : > { %v10073_v21 = vadd.f32 %v10072_v5, %v1979_v57  ;;  %v16065_v42 = vpack.c.bf16 %v10556_v28, %v10555_v26  ;;  %v10558_v57 = vld [vmem:[#allocation2 + $0x1018] sm:$0xff] }
0x1dd1   : > { %v10112_v35 = vmul.f32 0.01, %v10078_v38  ;;  %vm10096_vm2 = vcmp.ge.f32.partialorder %v10078_v38, 0.0  ;;  %16060 = vmatpush3.bf16.msra.mxu0 %v16057_v15  ;;  %v16069_v33 = vpack.c.bf16 %v10558_v57, %v10557_v22  ;;  %v10731_v26 = vld [vmem:[#allocation2 + $0x1078] sm:$0xff] }
0x1dd2   : > { %v10111_v25 = vmul.f32 0.01, %v10073_v21  ;;  %vm10095_vm3 = vcmp.ge.f32.partialorder %v10073_v21, 0.0  ;;  %16062 = vmatprep.subr.bf16.mxu0 %v16061_v29 }
0x1dd3   : > { %v10128_v1 = vsel %vm10096_vm2, %v10078_v38, %v10112_v35  ;;  %v10560_v38 = vld [vmem:[#allocation2 + $0x1028] sm:$0xff] }
0x1dd4   : > { %v10127_v18 = vsel %vm10095_vm3, %v10073_v21, %v10111_v25  ;;  %v16073_v5 = vpack.c.bf16 %v10560_v38, %v10559_v59 }
0x1dd5   : > { %14848 = vmatprep.mubr.f32.mxu0 %v10127_v18  ;;  %16064 = vmatpush3.bf16.msra.mxu0 %v16061_v29  ;;  %v10726_v18 = vld [vmem:[#allocation2 + $0x1050] sm:$0xff] }
0x1dd6   : > { %14849 = vmatmul.mubr.f32.gmra.mrb[134].mxu0 %v10128_v1  ;;  %16066 = vmatprep.subr.bf16.mxu0 %v16065_v42  ;;  %v10727_v1 = vld [vmem:[#allocation2 + $0x1058] sm:$0xff]  ;;  %v10730_v29 = vld [vmem:[#allocation2 + $0x1070] sm:$0xff] }
0x1dd7   : > { %v16085_v62 = vpack.c.bf16 %v10727_v1, %v10726_v18  ;;  %v16093_v22 = vpack.c.bf16 %v10731_v26, %v10730_v29  ;;  %v10735_v18 = vld [vmem:[#allocation2 + $0x1098] sm:$0xff] }
0x1dd9   : > { %16068 = vmatpush3.bf16.msra.mxu0 %v16065_v42 }
0x1dda   : > { %16070 = vmatprep.subr.bf16.mxu0 %v16069_v33 }
0x1ddd   : > { %16072 = vmatpush3.bf16.msra.mxu0 %v16069_v33  ;;  %v10733_v33 = vld [vmem:[#allocation2 + $0x1088] sm:$0xff] }
0x1dde   : > { %16074 = vmatprep.subr.bf16.mxu0 %v16073_v5 }
0x1de1   : > { %16076 = vmatpush3.bf16.msra.mxu0 %v16073_v5 }
0x1e7b   : > { %v14829_v21 = vpop.f32.mrb[120].mxu0 }
0x1e7c   : > { %v10307_v35 = vmul.f32 0.01, %v14829_v21  ;;  %v10211_v25 = vpop.f32.mrb[121].mxu0  ;;  %vm10291_vm4 = vcmp.ge.f32.partialorder %v14829_v21, 0.0 }
0x1e7d   : > { %vm10290_vm5 = vcmp.ge.f32.partialorder %v10211_v25, 0.0  ;;  %v10306_v63 = vmul.f32 0.01, %v10211_v25 }
0x1e7e   : > { %v10323_v30 = vsel %vm10291_vm4, %v14829_v21, %v10307_v35 }
0x1e7f   : > { %v10322_v32 = vsel %vm10290_vm5, %v10211_v25, %v10306_v63  ;;  %v10734_v25 = vld [vmem:[#allocation2 + $0x1090] sm:$0xff] }
0x1e80   : > { %v14832_v37 = vpop.f32.mrb[122].mxu0  ;;  %14883 = vmatprep.mubr.f32.mxu1 %v10322_v32  ;;  %v10736_v32 = vld [vmem:[#allocation2 + $0x10a0] sm:$0xff] }
0x1e81   : > { %v10309_v61 = vmul.f32 0.01, %v14832_v37  ;;  %v10221_v54 = vpop.f32.mrb[123].mxu0  ;;  %vm10293_vm6 = vcmp.ge.f32.partialorder %v14832_v37, 0.0  ;;  %14884 = vmatmul.mubr.f32.vlgmr.msra.gmra.mrb[136].mxu1 %v10323_v30 }
0x1e82   : > { %vm10292_vm7 = vcmp.ge.f32.partialorder %v10221_v54, 0.0  ;;  %v10308_v0 = vmul.f32 0.01, %v10221_v54  ;;  %16084 = vmatpush3.bf16.msra.mxu1 %v16081_v44  ;;  %v10732_v44 = vld [vmem:[#allocation2 + $0x1080] sm:$0xff] }
0x1e83   : > { %16086 = vmatprep.subr.bf16.mxu1 %v16085_v62  ;;  %v10325_v15 = vsel %vm10293_vm6, %v14832_v37, %v10309_v61  ;;  %v16097_v21 = vpack.c.bf16 %v10733_v33, %v10732_v44  ;;  %v16101_v37 = vpack.c.bf16 %v10735_v18, %v10734_v25  ;;  %v10561_v25 = vld [vmem:[#allocation2 + $0x1030] sm:$0xff]  ;;  %v10562_v18 = vld [vmem:[#allocation2 + $0x1038] sm:$0xff] }
0x1e84   : > { %v14835_v53 = vpop.f32.mrb[124].mxu0  ;;  %v10324_v24 = vsel %vm10292_vm7, %v10221_v54, %v10308_v0 }
0x1e85   : > { %v10311_v55 = vmul.f32 0.01, %v14835_v53  ;;  %v10231_v43 = vpop.f32.mrb[125].mxu0  ;;  %14886 = vmatprep.mubr.f32.mxu1 %v10324_v24  ;;  %vm10295_vm1 = vcmp.ge.f32.partialorder %v14835_v53, 0.0 }
0x1e86   : > { %vm10294_vm8 = vcmp.ge.f32.partialorder %v10231_v43, 0.0  ;;  %v10310_v28 = vmul.f32 0.01, %v10231_v43  ;;  %14887 = vmatmul.mubr.f32.gmra.mrb[138].mxu1 %v10325_v15 }
0x1e87   : > { %16088 = vmatpush3.bf16.msra.mxu1 %v16085_v62  ;;  %v10327_v57 = vsel %vm10295_vm1, %v14835_v53, %v10311_v55  ;;  %v10737_v62 = vld [vmem:[#allocation2 + $0x10a8] sm:$0xff] }
0x1e88   : > { %v10326_v42 = vsel %vm10294_vm8, %v10231_v43, %v10310_v28  ;;  %16090 = vmatprep.subr.bf16.mxu1 %v16089_v20  ;;  %v16105_v61 = vpack.c.bf16 %v10737_v62, %v10736_v32  ;;  %v11029_v62 = vld [vmem:[#allocation2 + $0x10c0] sm:$0xff] }
0x1e89   : > { %14889 = vmatprep.mubr.f32.mxu1 %v10326_v42 }
0x1e8a   : > { %14890 = vmatmul.mubr.f32.gmra.mrb[140].mxu1 %v10327_v57 }
0x1e8b   : > { %v14838_v59 = vpop.f32.mrb[126].mxu0  ;;  %16092 = vmatpush3.bf16.msra.mxu1 %v16089_v20 }
0x1e8c   : > { %v10313_v38 = vmul.f32 0.01, %v14838_v59  ;;  %v10241_v5 = vpop.f32.mrb[127].mxu0  ;;  %16094 = vmatprep.subr.bf16.mxu1 %v16093_v22  ;;  %vm10297_vm9 = vcmp.ge.f32.partialorder %v14838_v59, 0.0 }
0x1e8d   : > { %vm10296_vm11 = vcmp.ge.f32.partialorder %v10241_v5, 0.0  ;;  %v10312_v35 = vmul.f32 0.01, %v10241_v5 }
0x1e8e   : > { %v10329_v63 = vsel %vm10297_vm9, %v14838_v59, %v10313_v38 }
0x1e8f   : > { %v10328_v1 = vsel %vm10296_vm11, %v10241_v5, %v10312_v35  ;;  %16096 = vmatpush3.bf16.msra.mxu1 %v16093_v22 }
0x1e90   : > { %14892 = vmatprep.mubr.f32.mxu1 %v10328_v1  ;;  %16098 = vmatprep.subr.bf16.mxu1 %v16097_v21  ;;  %v10738_v1 = vld [vmem:[#allocation2 + $0x10b0] sm:$0xff] }
0x1e91   : > { %14893 = vmatmul.mubr.f32.gmra.mrb[142].mxu1 %v10329_v63  ;;  %v16077_v63 = vpack.c.bf16 %v10562_v18, %v10561_v25 }
0x1e93   : > { %16100 = vmatpush3.bf16.msra.mxu1 %v16097_v21  ;;  %v14841_v30 = vpop.f32.mrb[128].mxu0  ;;  %16078 = vmatprep.subr.bf16.mxu0 %v16077_v63 }
0x1e94   : > { %16102 = vmatprep.subr.bf16.mxu1 %v16101_v37  ;;  %v10315_v54 = vmul.f32 0.01, %v14841_v30  ;;  %v10251_v7 = vpop.f32.mrb[129].mxu0  ;;  %vm10299_vm12 = vcmp.ge.f32.partialorder %v14841_v30, 0.0  ;;  %16080 = vmatpush3.bf16.msra.mxu0 %v16077_v63 }
0x1e95   : > { %vm10298_vm13 = vcmp.ge.f32.partialorder %v10251_v7, 0.0  ;;  %v10314_v23 = vmul.f32 0.01, %v10251_v7  ;;  %15019 = vmatprep.subr.mxu0 %v11029_v62 }
0x1e96   : > { %v10331_v53 = vsel %vm10299_vm12, %v14841_v30, %v10315_v54 }
0x1e97   : > { %16104 = vmatpush3.bf16.msra.mxu1 %v16101_v37  ;;  %v10330_v0 = vsel %vm10298_vm13, %v10251_v7, %v10314_v23  ;;  %v10739_v37 = vld [vmem:[#allocation2 + $0x10b8] sm:$0xff] }
0x1e98   : > { %16106 = vmatprep.subr.bf16.mxu1 %v16105_v61  ;;  %14895 = vmatprep.mubr.f32.mxu1 %v10330_v0  ;;  %v16109_v32 = vpack.c.bf16 %v10739_v37, %v10738_v1 }
0x1e99   : > { %14896 = vmatmul.mubr.f32.gmra.mrb[144].mxu1 %v10331_v53 }
0x1e9a   : > { %v14844_v24 = vpop.f32.mrb[130].mxu0 }
0x1e9b   : > { %v10317_v20 = vmul.f32 0.01, %v14844_v24  ;;  %v10261_v15 = vpop.f32.mrb[131].mxu0  ;;  %16108 = vmatpush3.bf16.msra.mxu1 %v16105_v61  ;;  %vm10301_vm14 = vcmp.ge.f32.partialorder %v14844_v24, 0.0 }
0x1e9c   : > { %vm10300_vm0 = vcmp.ge.f32.partialorder %v10261_v15, 0.0  ;;  %v10316_v55 = vmul.f32 0.01, %v10261_v15  ;;  %16110 = vmatprep.subr.bf16.mxu1 %v16109_v32 }
0x1e9d   : > { %v10333_v29 = vsel %vm10301_vm14, %v14844_v24, %v10317_v20 }
0x1e9e   : > { %v10332_v43 = vsel %vm10300_vm0, %v10261_v15, %v10316_v55 }
0x1e9f   : > { %14898 = vmatprep.mubr.f32.mxu1 %v10332_v43  ;;  %16112 = vmatpush3.bf16.msra.mxu1 %v16109_v32 }
0x1ea0   : > { %14899 = vmatmul.mubr.f32.gmra.mrb[146].mxu1 %v10333_v29 }
0x1ea2   : > { %v14847_v26 = vpop.f32.mrb[132].mxu0 }
0x1ea3   : > { %v10319_v28 = vmul.f32 0.01, %v14847_v26  ;;  %v10271_v42 = vpop.f32.mrb[133].mxu0  ;;  %vm10303_vm15 = vcmp.ge.f32.partialorder %v14847_v26, 0.0 }
0x1ea4   : > { %vm10302_vm2 = vcmp.ge.f32.partialorder %v10271_v42, 0.0  ;;  %v10318_v22 = vmul.f32 0.01, %v10271_v42 }
0x1ea5   : > { %v10335_v44 = vsel %vm10303_vm15, %v14847_v26, %v10319_v28 }
0x1ea6   : > { %v10334_v57 = vsel %vm10302_vm2, %v10271_v42, %v10318_v22 }
0x1ea7   : > { %14901 = vmatprep.mubr.f32.mxu1 %v10334_v57 }
0x1ea8   : > { %14902 = vmatmul.mubr.f32.gmra.mrb[148].mxu1 %v10335_v44 }
0x1ea9   : > { %v14850_v33 = vpop.f32.mrb[134].mxu0 }
0x1eaa   : > { %v10321_v59 = vmul.f32 0.01, %v14850_v33  ;;  %v10281_v38 = vpop.f32.mrb[135].mxu0  ;;  %vm10305_vm3 = vcmp.ge.f32.partialorder %v14850_v33, 0.0 }
0x1eab   : > { %vm10304_vm4 = vcmp.ge.f32.partialorder %v10281_v38, 0.0  ;;  %v10320_v5 = vmul.f32 0.01, %v10281_v38 }
0x1eac   : > { %v10337_v35 = vsel %vm10305_vm3, %v14850_v33, %v10321_v59 }
0x1ead   : > { %v10336_v21 = vsel %vm10304_vm4, %v10281_v38, %v10320_v5 }
0x1eae   : > { %14904 = vmatprep.mubr.f32.mxu1 %v10336_v21 }
0x1eaf   : > { %14905 = vmatmul.mubr.f32.gmra.mrb[150].mxu1 %v10337_v35 }
0x1f54   : > { %v14885_v30 = vpop.f32.mrb[136].mxu1 }
0x1f55   : > { %v10516_v61 = vmul.f32 0.01, %v14885_v30  ;;  %v10420_v54 = vpop.f32.mrb[137].mxu1  ;;  %vm10500_vm5 = vcmp.ge.f32.partialorder %v14885_v30, 0.0 }
0x1f56   : > { %vm10499_vm6 = vcmp.ge.f32.partialorder %v10420_v54, 0.0  ;;  %v10515_v7 = vmul.f32 0.01, %v10420_v54 }
0x1f57   : > { %v10532_v53 = vsel %vm10500_vm5, %v14885_v30, %v10516_v61 }
0x1f58   : > { %v10531_v0 = vsel %vm10499_vm6, %v10420_v54, %v10515_v7 }
0x1f59   : > { %v14888_v23 = vpop.f32.mrb[138].mxu1  ;;  %14939 = vmatprep.mubr.f32.mxu0 %v10531_v0  ;;  %14995 = vmatprep.mubr.f32.mxu1 %v10531_v0 }
0x1f5a   : > { %v10518_v24 = vmul.f32 0.01, %v14888_v23  ;;  %v10430_v20 = vpop.f32.mrb[139].mxu1  ;;  %vm10502_vm7 = vcmp.ge.f32.partialorder %v14888_v23, 0.0  ;;  %14940 = vmatmul.mubr.f32.vlgmr.msra.gmra.mrb[136].mxu0 %v10532_v53  ;;  %14996 = vmatmul.mubr.f32.vlgmr.msra.gmra.mrb[152].mxu1 %v10532_v53 }
0x1f5b   : > { %vm10501_vm1 = vcmp.ge.f32.partialorder %v10430_v20, 0.0  ;;  %v10517_v15 = vmul.f32 0.01, %v10430_v20  ;;  %15020 = vmatpush3.msra.mxu0 %v11029_v62 }
0x1f5c   : > { %v10534_v29 = vsel %vm10502_vm7, %v14888_v23, %v10518_v24 }
0x1f5d   : > { %v14891_v55 = vpop.f32.mrb[140].mxu1  ;;  %v10533_v43 = vsel %vm10501_vm1, %v10430_v20, %v10517_v15 }
0x1f5e   : > { %v10520_v26 = vmul.f32 0.01, %v14891_v55  ;;  %v10440_v28 = vpop.f32.mrb[141].mxu1  ;;  %14942 = vmatprep.mubr.f32.mxu0 %v10533_v43  ;;  %14998 = vmatprep.mubr.f32.mxu1 %v10533_v43  ;;  %vm10504_vm8 = vcmp.ge.f32.partialorder %v14891_v55, 0.0 }
0x1f5f   : > { %vm10503_vm9 = vcmp.ge.f32.partialorder %v10440_v28, 0.0  ;;  %v10519_v42 = vmul.f32 0.01, %v10440_v28  ;;  %14943 = vmatmul.mubr.f32.gmra.mrb[138].mxu0 %v10534_v29  ;;  %14999 = vmatmul.mubr.f32.gmra.mrb[154].mxu1 %v10534_v29 }
0x1f60   : > { %v10536_v57 = vsel %vm10504_vm8, %v14891_v55, %v10520_v26 }
0x1f61   : > { %v10535_v22 = vsel %vm10503_vm9, %v10440_v28, %v10519_v42 }
0x1f62   : > { %14945 = vmatprep.mubr.f32.mxu0 %v10535_v22  ;;  %15001 = vmatprep.mubr.f32.mxu1 %v10535_v22 }
0x1f63   : > { %14946 = vmatmul.mubr.f32.gmra.mrb[140].mxu0 %v10536_v57  ;;  %15002 = vmatmul.mubr.f32.gmra.mrb[156].mxu1 %v10536_v57 }
0x1f64   : > { %v14894_v44 = vpop.f32.mrb[142].mxu1 }
0x1f65   : > { %v10522_v33 = vmul.f32 0.01, %v14894_v44  ;;  %v10450_v59 = vpop.f32.mrb[143].mxu1  ;;  %vm10506_vm11 = vcmp.ge.f32.partialorder %v14894_v44, 0.0 }
0x1f66   : > { %vm10505_vm12 = vcmp.ge.f32.partialorder %v10450_v59, 0.0  ;;  %v10521_v38 = vmul.f32 0.01, %v10450_v59 }
0x1f67   : > { %v10538_v21 = vsel %vm10506_vm11, %v14894_v44, %v10522_v33 }
0x1f68   : > { %v10537_v5 = vsel %vm10505_vm12, %v10450_v59, %v10521_v38 }
0x1f69   : > { %14948 = vmatprep.mubr.f32.mxu0 %v10537_v5  ;;  %15004 = vmatprep.mubr.f32.mxu1 %v10537_v5 }
0x1f6a   : > { %14949 = vmatmul.mubr.f32.gmra.mrb[142].mxu0 %v10538_v21  ;;  %15005 = vmatmul.mubr.f32.gmra.mrb[158].mxu1 %v10538_v21 }
0x1f6c   : > { %v14897_v35 = vpop.f32.mrb[144].mxu1 }
0x1f6d   : > { %v10524_v25 = vmul.f32 0.01, %v14897_v35  ;;  %v10460_v18 = vpop.f32.mrb[145].mxu1  ;;  %vm10508_vm13 = vcmp.ge.f32.partialorder %v14897_v35, 0.0 }
0x1f6e   : > { %vm10507_vm14 = vcmp.ge.f32.partialorder %v10460_v18, 0.0  ;;  %v10523_v1 = vmul.f32 0.01, %v10460_v18 }
0x1f6f   : > { %v10540_v37 = vsel %vm10508_vm13, %v14897_v35, %v10524_v25 }
0x1f70   : > { %v10539_v63 = vsel %vm10507_vm14, %v10460_v18, %v10523_v1 }
0x1f71   : > { %14951 = vmatprep.mubr.f32.mxu0 %v10539_v63  ;;  %15007 = vmatprep.mubr.f32.mxu1 %v10539_v63 }
0x1f72   : > { %14952 = vmatmul.mubr.f32.gmra.mrb[144].mxu0 %v10540_v37  ;;  %15008 = vmatmul.mubr.f32.gmra.mrb[160].mxu1 %v10540_v37 }
0x1f73   : > { %v14900_v32 = vpop.f32.mrb[146].mxu1 }
0x1f74   : > { %v10526_v62 = vmul.f32 0.01, %v14900_v32  ;;  %v10470_v30 = vpop.f32.mrb[147].mxu1  ;;  %vm10510_vm0 = vcmp.ge.f32.partialorder %v14900_v32, 0.0 }
0x1f75   : > { %vm10509_vm15 = vcmp.ge.f32.partialorder %v10470_v30, 0.0  ;;  %v10525_v61 = vmul.f32 0.01, %v10470_v30 }
0x1f76   : > { %v10542_v7 = vsel %vm10510_vm0, %v14900_v32, %v10526_v62 }
0x1f77   : > { %v10541_v54 = vsel %vm10509_vm15, %v10470_v30, %v10525_v61 }
0x1f78   : > { %14954 = vmatprep.mubr.f32.mxu0 %v10541_v54  ;;  %15010 = vmatprep.mubr.f32.mxu1 %v10541_v54 }
0x1f79   : > { %14955 = vmatmul.mubr.f32.gmra.mrb[146].mxu0 %v10542_v7  ;;  %15011 = vmatmul.mubr.f32.gmra.mrb[162].mxu1 %v10542_v7 }
0x1f7b   : > { %v14903_v23 = vpop.f32.mrb[148].mxu1 }
0x1f7c   : > { %v10528_v0 = vmul.f32 0.01, %v14903_v23  ;;  %v10480_v53 = vpop.f32.mrb[149].mxu1  ;;  %vm10512_vm2 = vcmp.ge.f32.partialorder %v14903_v23, 0.0 }
0x1f7d   : > { %vm10511_vm3 = vcmp.ge.f32.partialorder %v10480_v53, 0.0  ;;  %v10527_v24 = vmul.f32 0.01, %v10480_v53 }
0x1f7e   : > { %v10544_v15 = vsel %vm10512_vm2, %v14903_v23, %v10528_v0 }
0x1f7f   : > { %v10543_v20 = vsel %vm10511_vm3, %v10480_v53, %v10527_v24 }
0x1f80   : > { %14957 = vmatprep.mubr.f32.mxu0 %v10543_v20  ;;  %15013 = vmatprep.mubr.f32.mxu1 %v10543_v20 }
0x1f81   : > { %14958 = vmatmul.mubr.f32.gmra.mrb[148].mxu0 %v10544_v15  ;;  %15014 = vmatmul.mubr.f32.gmra.mrb[164].mxu1 %v10544_v15 }
0x1f82   : > { %v14906_v55 = vpop.f32.mrb[150].mxu1 }
0x1f83   : > { %v10530_v43 = vmul.f32 0.01, %v14906_v55  ;;  %v10490_v29 = vpop.f32.mrb[151].mxu1  ;;  %vm10514_vm4 = vcmp.ge.f32.partialorder %v14906_v55, 0.0 }
0x1f84   : > { %vm10513_vm5 = vcmp.ge.f32.partialorder %v10490_v29, 0.0  ;;  %v10529_v26 = vmul.f32 0.01, %v10490_v29 }
0x1f85   : > { %v10546_v42 = vsel %vm10514_vm4, %v14906_v55, %v10530_v43 }
0x1f86   : > { %v10545_v28 = vsel %vm10513_vm5, %v10490_v29, %v10529_v26 }
0x1f87   : > { %14960 = vmatprep.mubr.f32.mxu0 %v10545_v28  ;;  %15016 = vmatprep.mubr.f32.mxu1 %v10545_v28 }
0x1f88   : > { %14961 = vmatmul.mubr.f32.gmra.mrb[150].mxu0 %v10546_v42  ;;  %15017 = vmatmul.mubr.f32.gmra.mrb[166].mxu1 %v10546_v42 }
0x202d   : > { %v14941_v22 = vpop.f32.mrb[136].mxu0  ;;  %v19347_v57 = vpop.f32.mrb[152].mxu1 }
0x202e   : > { %16598 = vtanh.f32 %v14941_v22  ;;  %v10629_v44 = vpop.f32.mrb[137].mxu0  ;;  %v19349_v33 = vpop.f32.mrb[153].mxu1 }
0x202f   : > { %16600 = vtanh.f32 %v10629_v44 }
0x2032   : > { %v14944_v59 = vpop.f32.mrb[138].mxu0  ;;  %v19351_v38 = vpop.f32.mrb[154].mxu1 }
0x2033   : > { %16602 = vtanh.f32 %v14944_v59  ;;  %v10639_v5 = vpop.f32.mrb[139].mxu0  ;;  %v19353_v21 = vpop.f32.mrb[155].mxu1 }
0x2034   : > { %16604 = vtanh.f32 %v10639_v5 }
0x2036   : > { %v14947_v35 = vpop.f32.mrb[140].mxu0  ;;  %v19355_v25 = vpop.f32.mrb[156].mxu1 }
0x2037   : > { %16606 = vtanh.f32 %v14947_v35  ;;  %v10649_v18 = vpop.f32.mrb[141].mxu0  ;;  %v19357_v1 = vpop.f32.mrb[157].mxu1 }
0x2038   : > { %16608 = vtanh.f32 %v10649_v18  ;;  %v16599_v63 = vpop.eup %16598 }
0x2039   : > { %v16601_v37 = vpop.eup %16600  ;;  %v10903_v32 = vmul.f32 1.442695, %v16599_v63  ;;  %v10886_v62 = vadd.f32 %v16599_v63, %v19158_v36 }
0x203a   : > { %v10901_v30 = vmul.f32 1.442695, %v16601_v37  ;;  %v10885_v61 = vadd.f32 %v16601_v37, %v19161_v11 }
0x203b   : > { %16610 = vpow2.f32 %v10903_v32  ;;  %v10968_v54 = vsel %vm2077_vm10, %v10886_v62, 0.0 }
0x203c   : > { %16612 = vpow2.f32 %v10901_v30  ;;  %10969 = vadd.xlane.f32.xlu0 %v10968_v54  ;;  %v10965_v43 = vsel %vm2077_vm10, %v10885_v61, 0.0 }
0x203d   : > { %v16603_v7 = vpop.eup %16602  ;;  %v14950_v23 = vpop.f32.mrb[142].mxu0 }
0x203e   : > { %v19362_v0 = vpop.f32.mrb[158].mxu1  ;;  %v16605_v53 = vpop.eup %16604  ;;  %v10907_v24 = vmul.f32 1.442695, %v16603_v7  ;;  %16614 = vtanh.f32 %v14950_v23  ;;  %v10888_v36 = vadd.f32 %v16603_v7, %v19168_v39 }
0x203f   : > { %v10659_v20 = vpop.f32.mrb[143].mxu0  ;;  %v19364_v15 = vpop.f32.mrb[159].mxu1  ;;  %v10905_v55 = vmul.f32 1.442695, %v16605_v53  ;;  %v10887_v11 = vadd.f32 %v16605_v53, %v19171_v48 }
0x2040   : > { %16616 = vtanh.f32 %v10659_v20  ;;  %v10974_v29 = vsel %vm2077_vm10, %v10888_v36, 0.0  ;;  %10966 = vadd.xlane.f32.xlu0 %v10965_v43 }
0x2041   : > { %16618 = vpow2.f32 %v10907_v24  ;;  %v16607_v26 = vpop.eup %16606  ;;  %10975 = vadd.xlane.f32.xlu1 %v10974_v29  ;;  %v10971_v59 = vsel %vm2077_vm10, %v10887_v11, 0.0 }
0x2042   : > { %16620 = vpow2.f32 %v10905_v55  ;;  %v16609_v28 = vpop.eup %16608  ;;  %v10911_v42 = vmul.f32 1.442695, %v16607_v26  ;;  %v10890_v22 = vadd.f32 %v16607_v26, %v19174_v51 }
0x2043   : > { %v10909_v44 = vmul.f32 1.442695, %v16609_v28  ;;  %v10889_v39 = vadd.f32 %v16609_v28, %v19177_v6 }
0x2044   : > { %16622 = vpow2.f32 %v10911_v42  ;;  %v10980_v30 = vsel %vm2077_vm10, %v10890_v22, 0.0 }
0x2045   : > { %16624 = vpow2.f32 %v10909_v44  ;;  %10972 = vadd.xlane.f32.xlu1 %v10971_v59  ;;  %v10977_v48 = vsel %vm2077_vm10, %v10889_v39, 0.0  ;;  %v16611_v5 = vpop.eup %16610  ;;  %v14953_v35 = vpop.f32.mrb[144].mxu0 }
0x2046   : > { %v19374_v18 = vpop.f32.mrb[160].mxu1  ;;  %10978 = vadd.xlane.f32.xlu0 %v10977_v48  ;;  %v16613_v63 = vpop.eup %16612  ;;  %v10934_v37 = vmul.f32 %v16611_v5, %v19185_v46  ;;  %16626 = vtanh.f32 %v14953_v35 }
0x2047   : > { %v10669_v51 = vpop.f32.mrb[145].mxu0  ;;  %v19377_v32 = vpop.f32.mrb[161].mxu1  ;;  %v10933_v62 = vmul.f32 %v16613_v63, %v19190_v47 }
0x2048   : > { %v16615_v6 = vpop.eup %16614  ;;  %16628 = vtanh.f32 %v10669_v51  ;;  %v10950_v54 = vadd.f32 %v19347_v57, %v10934_v37 }
0x2049   : > { %v10915_v7 = vmul.f32 1.442695, %v16615_v6  ;;  %10981 = vadd.xlane.f32.xlu1 %v10980_v30  ;;  %v10892_v23 = vadd.f32 %v16615_v6, %v19188_v34  ;;  %v10949_v46 = vadd.f32 %v10933_v62, %v19349_v33 }
0x204a   : > { %v16617_v61 = vpop.eup %16616 }
0x204b   : > { %v16619_v53 = vpop.eup %16618  ;;  %v10913_v24 = vmul.f32 1.442695, %v16617_v61  ;;  %v10891_v20 = vadd.f32 %v16617_v61, %v19193_v3  ;;  %16630 = vpow2.f32 %v10915_v7  ;;  %15021 = vmatprep.mubr.msk.f32.mxu0 %vm2077_vm10, %v10949_v46  ;;  %v10986_v34 = vsel %vm2077_vm10, %v10892_v23, 0.0 }
0x204c   : > { %v16621_v36 = vpop.eup %16620  ;;  %v10936_v55 = vmul.f32 %v16619_v53, %v19202_v17  ;;  %v14956_v11 = vpop.f32.mrb[146].mxu0  ;;  %15022 = vmatmul.mubr.msk.f32.vlgmr.msra.gmra.mrb[152].mxu0 %vm2077_vm10, %v10950_v54 }
0x204d   : > { %v10935_v47 = vmul.f32 %v16621_v36, %v19209_v60  ;;  %16632 = vpow2.f32 %v10913_v24  ;;  %v19387_v43 = vpop.f32.mrb[162].mxu1  ;;  %v10983_v57 = vsel %vm2077_vm10, %v10891_v20, 0.0  ;;  %v10679_v3 = vpop.f32.mrb[147].mxu0  ;;  %10987 = vadd.xlane.f32.xlu1 %v10986_v34 }
0x204e   : > { %v10952_v33 = vadd.f32 %v19351_v38, %v10936_v55  ;;  %16634 = vtanh.f32 %v14956_v11  ;;  %v19393_v29 = vpop.f32.mrb[163].mxu1  ;;  %10984 = vadd.xlane.f32.xlu0 %v10983_v57  ;;  %v16623_v17 = vpop.eup %16622 }
0x204f   : > { %v10951_v60 = vadd.f32 %v10935_v47, %v19353_v21  ;;  %16636 = vtanh.f32 %v10679_v3  ;;  %v16625_v26 = vpop.eup %16624  ;;  %v10938_v28 = vmul.f32 %v16623_v17, %v19216_v19 }
0x2050   : > { %v10937_v42 = vmul.f32 %v16625_v26, %v19221_v8  ;;  %v16627_v38 = vpop.eup %16626 }
0x2051   : > { %15024 = vmatprep.mubr.msk.f32.mxu0 %vm2077_vm10, %v10951_v60  ;;  %v10954_v22 = vadd.f32 %v19355_v25, %v10938_v28  ;;  %v10919_v59 = vmul.f32 1.442695, %v16627_v38  ;;  %v10894_v48 = vadd.f32 %v16627_v38, %v19224_v27 }
0x2052   : > { %v16629_v44 = vpop.eup %16628  ;;  %v10953_v39 = vadd.f32 %v10937_v42, %v19357_v1  ;;  %15025 = vmatmul.mubr.msk.f32.gmra.mrb[154].mxu0 %vm2077_vm10, %v10952_v33 }
0x2053   : > { %v10917_v21 = vmul.f32 1.442695, %v16629_v44  ;;  %v10893_v5 = vadd.f32 %v16629_v44, %v19227_v14  ;;  %16638 = vpow2.f32 %v10919_v59  ;;  %v10992_v19 = vsel %vm2077_vm10, %v10894_v48, 0.0 }
0x2054   : > { %15027 = vmatprep.mubr.msk.f32.mxu0 %vm2077_vm10, %v10953_v39  ;;  %v14959_v35 = vpop.f32.mrb[148].mxu0  ;;  %v19407_v25 = vpop.f32.mrb[164].mxu1  ;;  %10993 = vadd.xlane.f32.xlu1 %v10992_v19 }
0x2055   : > { %v16631_v8 = vpop.eup %16630  ;;  %16640 = vpow2.f32 %v10917_v21  ;;  %v10989_v1 = vsel %vm2077_vm10, %v10893_v5, 0.0  ;;  %v10689_v37 = vpop.f32.mrb[149].mxu0 }
0x2056   : > { %v10940_v27 = vmul.f32 %v16631_v8, %v19238_v50  ;;  %16642 = vtanh.f32 %v14959_v35  ;;  %v19411_v51 = vpop.f32.mrb[165].mxu1  ;;  %10990 = vadd.xlane.f32.xlu0 %v10989_v1  ;;  %15028 = vmatmul.mubr.msk.f32.gmra.mrb[156].mxu0 %vm2077_vm10, %v10954_v22 }
0x2057   : > { %v16633_v63 = vpop.eup %16632  ;;  %16644 = vtanh.f32 %v10689_v37 }
0x2058   : > { %v16635_v14 = vpop.eup %16634  ;;  %v10939_v6 = vmul.f32 %v16633_v63, %v19244_v4  ;;  %v10956_v30 = vadd.f32 %v19362_v0, %v10940_v27 }
0x2059   : > { %v16637_v62 = vpop.eup %16636  ;;  %v10923_v61 = vmul.f32 1.442695, %v16635_v14  ;;  %v10896_v54 = vadd.f32 %v16635_v14, %v19241_v45 }
0x205a   : > { %v10955_v7 = vadd.f32 %v10939_v6, %v19364_v15  ;;  %v10921_v50 = vmul.f32 1.442695, %v16637_v62  ;;  %v10895_v23 = vadd.f32 %v16637_v62, %v19247_v49 }
0x205b   : > { %16646 = vpow2.f32 %v10923_v61  ;;  %v10998_v53 = vsel %vm2077_vm10, %v10896_v54, 0.0  ;;  %v14962_v46 = vpop.f32.mrb[150].mxu0  ;;  %v15018_v24 = vpop.f32.mrb[166].mxu1 }
0x205c   : > { %16648 = vpow2.f32 %v10921_v50  ;;  %v10995_v4 = vsel %vm2077_vm10, %v10895_v23, 0.0  ;;  %10999 = vadd.xlane.f32.xlu1 %v10998_v53  ;;  %15030 = vmatprep.mubr.msk.f32.mxu0 %vm2077_vm10, %v10955_v7  ;;  %v10699_v0 = vpop.f32.mrb[151].mxu0  ;;  %v10876_v20 = vpop.f32.mrb[167].mxu1 }
0x205d   : > { %16650 = vtanh.f32 %v14962_v46  ;;  %10996 = vadd.xlane.f32.xlu0 %v10995_v4  ;;  %15031 = vmatmul.mubr.msk.f32.gmra.mrb[158].mxu0 %vm2077_vm10, %v10956_v30  ;;  %v16639_v45 = vpop.eup %16638 }
0x205e   : > { %16652 = vtanh.f32 %v10699_v0  ;;  %v10942_v15 = vmul.f32 %v16639_v45, %v19256_v56 }
0x205f   : > { %v16641_v49 = vpop.eup %16640 }
0x2060   : > { %v16643_v36 = vpop.eup %16642  ;;  %v10941_v55 = vmul.f32 %v16641_v49, %v19262_v52  ;;  %v10958_v11 = vadd.f32 %v19374_v18, %v10942_v15 }
0x2061   : > { %v16645_v47 = vpop.eup %16644  ;;  %v10927_v57 = vmul.f32 1.442695, %v16643_v36  ;;  %v10898_v34 = vadd.f32 %v16643_v36, %v19259_v58 }
0x2062   : > { %v10957_v33 = vadd.f32 %v10941_v55, %v19377_v32  ;;  %v10925_v3 = vmul.f32 1.442695, %v16645_v47  ;;  %v10897_v17 = vadd.f32 %v16645_v47, %v19265_v12 }
0x2063   : > { %16654 = vpow2.f32 %v10927_v57  ;;  %v11004_v60 = vsel %vm2077_vm10, %v10898_v34, 0.0 }
0x2064   : > { %16656 = vpow2.f32 %v10925_v3  ;;  %v11001_v56 = vsel %vm2077_vm10, %v10897_v17, 0.0  ;;  %11005 = vadd.xlane.f32.xlu1 %v11004_v60  ;;  %15033 = vmatprep.mubr.msk.f32.mxu0 %vm2077_vm10, %v10957_v33 }
0x2065   : > { %v16647_v26 = vpop.eup %16646  ;;  %11002 = vadd.xlane.f32.xlu0 %v11001_v56  ;;  %15034 = vmatmul.mubr.msk.f32.gmra.mrb[160].mxu0 %vm2077_vm10, %v10958_v11 }
0x2066   : > { %v16649_v52 = vpop.eup %16648  ;;  %v10944_v18 = vmul.f32 %v16647_v26, %v19274_v2 }
0x2067   : > { %v16651_v58 = vpop.eup %16650  ;;  %v10943_v32 = vmul.f32 %v16649_v52, %v19280_v16 }
0x2068   : > { %v16653_v12 = vpop.eup %16652  ;;  %v10960_v28 = vadd.f32 %v19387_v43, %v10944_v18  ;;  %v10931_v42 = vmul.f32 1.442695, %v16651_v58  ;;  %v10900_v38 = vadd.f32 %v16651_v58, %v19277_v40 }
0x2069   : > { %v10959_v22 = vadd.f32 %v10943_v32, %v19393_v29  ;;  %v10929_v44 = vmul.f32 1.442695, %v16653_v12  ;;  %v10899_v39 = vadd.f32 %v16653_v12, %v19283_v9 }
0x206a   : > { %16658 = vpow2.f32 %v10931_v42  ;;  %v11010_v2 = vsel %vm2077_vm10, %v10900_v38, 0.0 }
0x206b   : > { %16660 = vpow2.f32 %v10929_v44  ;;  %v11007_v59 = vsel %vm2077_vm10, %v10899_v39, 0.0  ;;  %11011 = vadd.xlane.f32.xlu1 %v11010_v2  ;;  %15036 = vmatprep.mubr.msk.f32.mxu0 %vm2077_vm10, %v10959_v22 }
0x206c   : > { %11008 = vadd.xlane.f32.xlu0 %v11007_v59  ;;  %15037 = vmatmul.mubr.msk.f32.gmra.mrb[162].mxu0 %vm2077_vm10, %v10960_v28 }
0x206d   : > { %v16655_v16 = vpop.eup %16654 }
0x206e   : > { %v16657_v43 = vpop.eup %16656  ;;  %v10946_v40 = vmul.f32 %v16655_v16, %v19292_v13 }
0x206f   : > { %v10945_v29 = vmul.f32 %v16657_v43, %v19294_v10 }
0x2070   : > { %v10962_v9 = vadd.f32 %v19407_v25, %v10946_v40 }
0x2071   : > { %v10961_v48 = vadd.f32 %v10945_v29, %v19411_v51  ;;  %v19453_v51 = vld [vmem:[#allocation2 + $0x10c8] ss:$0 sm:$0xff] }
0x2073   : > { %15039 = vmatprep.mubr.msk.f32.mxu0 %vm2077_vm10, %v10961_v48 }
0x2074   : > { %v16659_v21 = vpop.eup %16658  ;;  %15040 = vmatmul.mubr.msk.f32.gmra.mrb[164].mxu0 %vm2077_vm10, %v10962_v9 }
0x2075   : > { %v16661_v5 = vpop.eup %16660  ;;  %v10948_v19 = vmul.f32 %v16659_v21, %v19302_v41 }
0x2076   : > { %v10947_v8 = vmul.f32 %v16661_v5, %v19304_v31 }
0x2077   : > { %v10964_v35 = vadd.f32 %v15018_v24, %v10948_v19 }
0x2078   : > { %v10963_v1 = vadd.f32 %v10947_v8, %v10876_v20 }
0x207a   : > { %15042 = vmatprep.mubr.msk.f32.mxu0 %vm2077_vm10, %v10963_v1 }
0x207b   : > { %15043 = vmatmul.mubr.msk.f32.gmra.mrb[166].mxu0 %vm2077_vm10, %v10964_v35 }
0x20c9   : > { %v10970_v13 = vpop.xlane.xlu0 %10969 }
0x20ca   : > { %v11014_v27 = vadd.f32 2.9103231, %v10970_v13 }
0x20cc   : > { %v11036_v14 = vmul.f32 %v19453_v51, %v11014_v27 }
0x20cd   : > { %v10967_v25 = vpop.xlane.xlu0 %10966 }
0x20ce   : > { %v10976_v10 = vpop.xlane.xlu1 %10975  ;;  %v11013_v37 = vadd.f32 2.9103231, %v10967_v25 }
0x20cf   : > { %v11016_v41 = vadd.f32 2.9103231, %v10976_v10 }
0x20d0   : > { %v11035_v30 = vmul.f32 %v19453_v51, %v11013_v37 }
0x20d1   : > { %v11038_v53 = vmul.f32 %v19453_v51, %v11016_v41 }
0x20d2   : > { %v10973_v63 = vpop.xlane.xlu1 %10972 }
0x20d3   : > { %v11015_v6 = vadd.f32 2.9103231, %v10973_v63  ;;  %v10979_v61 = vpop.xlane.xlu0 %10978 }
0x20d4   : > { %v11017_v46 = vadd.f32 2.9103231, %v10979_v61 }
0x20d5   : > { %v11037_v4 = vmul.f32 %v19453_v51, %v11015_v6 }
0x20d6   : > { %v10982_v31 = vpop.xlane.xlu1 %10981  ;;  %v11039_v47 = vmul.f32 %v19453_v51, %v11017_v46 }
0x20d7   : > { %v11018_v23 = vadd.f32 2.9103231, %v10982_v31 }
0x20d9   : > { %v11040_v36 = vmul.f32 %v19453_v51, %v11018_v23 }
0x20da   : > { %v10988_v45 = vpop.xlane.xlu1 %10987 }
0x20db   : > { %v10985_v15 = vpop.xlane.xlu0 %10984  ;;  %v11020_v11 = vadd.f32 2.9103231, %v10988_v45 }
0x20dc   : > { %v11019_v33 = vadd.f32 2.9103231, %v10985_v15 }
0x20dd   : > { %v11042_v17 = vmul.f32 %v19453_v51, %v11020_v11 }
0x20de   : > { %v11041_v26 = vmul.f32 %v19453_v51, %v11019_v33 }
0x20e1   : > { %v10994_v56 = vpop.xlane.xlu1 %10993 }
0x20e2   : > { %v11022_v12 = vadd.f32 2.9103231, %v10994_v56 }
0x20e3   : > { %v10991_v58 = vpop.xlane.xlu0 %10990 }
0x20e4   : > { %v11021_v28 = vadd.f32 2.9103231, %v10991_v58  ;;  %v11044_v22 = vmul.f32 %v19453_v51, %v11022_v12 }
0x20e6   : > { %v11043_v39 = vmul.f32 %v19453_v51, %v11021_v28 }
0x20e9   : > { %v11000_v42 = vpop.xlane.xlu1 %10999 }
0x20ea   : > { %v10997_v38 = vpop.xlane.xlu0 %10996  ;;  %v11024_v2 = vadd.f32 2.9103231, %v11000_v42 }
0x20eb   : > { %v11023_v43 = vadd.f32 2.9103231, %v10997_v38 }
0x20ec   : > { %v11046_v29 = vmul.f32 %v19453_v51, %v11024_v2 }
0x20ed   : > { %v11045_v48 = vmul.f32 %v19453_v51, %v11023_v43 }
0x20f1   : > { %v11006_v21 = vpop.xlane.xlu1 %11005 }
0x20f2   : > { %v11003_v8 = vpop.xlane.xlu0 %11002  ;;  %v11026_v1 = vadd.f32 2.9103231, %v11006_v21 }
0x20f3   : > { %v11025_v13 = vadd.f32 2.9103231, %v11003_v8 }
0x20f4   : > { %v11048_v63 = vmul.f32 %v19453_v51, %v11026_v1 }
0x20f5   : > { %v11047_v37 = vmul.f32 %v19453_v51, %v11025_v13 }
0x20f8   : > { %v11012_v10 = vpop.xlane.xlu1 %11011 }
0x20f9   : > { %v11009_v25 = vpop.xlane.xlu0 %11008  ;;  %v11028_v41 = vadd.f32 2.9103231, %v11012_v10 }
0x20fa   : > { %v11027_v31 = vadd.f32 2.9103231, %v11009_v25 }
0x20fc   : > { %v11049_v61 = vmul.f32 %v19453_v51, %v11027_v31 }
0x211f   : > { %v15023_v62 = vpop.f32.mrb[152].mxu0 }
0x2120   : > { %v11171_v54 = vadd.f32 %v15023_v62, %v11036_v14  ;;  %v11165_v7 = vpop.f32.mrb[153].mxu0 }
0x2121   : > { %v11166_v50 = vadd.f32 %v11165_v7, %v11035_v30  ;;  %v11050_v30 = vmul.f32 %v19453_v51, %v11028_v41 }
0x2122   : > { %11245 = vst [vmem:[%s19460_s7 + $0x8] sm:$0xff] %v11171_v54 }
0x2123   : > { %11244 = vst [vmem:[%s19460_s7] sm:$0xff] %v11166_v50 }
0x2125   : > { %v15026_v24 = vpop.f32.mrb[154].mxu0 }
0x2126   : > { %v11181_v0 = vadd.f32 %v15026_v24, %v11038_v53  ;;  %v11175_v20 = vpop.f32.mrb[155].mxu0 }
0x2127   : > { %v11176_v49 = vadd.f32 %v11175_v20, %v11037_v4 }
0x2128   : > { %11247 = vst [vmem:[%s19460_s7 + $0x18] sm:$0xff] %v11181_v0 }
0x2129   : > { %11246 = vst [vmem:[%s19460_s7 + $0x10] sm:$0xff] %v11176_v49  ;;  %v15029_v55 = vpop.f32.mrb[156].mxu0 }
0x212a   : > { %v11191_v57 = vadd.f32 %v15029_v55, %v11040_v36  ;;  %v11185_v34 = vpop.f32.mrb[157].mxu0 }
0x212b   : > { %v11186_v3 = vadd.f32 %v11185_v34, %v11039_v47 }
0x212c   : > { %11249 = vst [vmem:[%s19460_s7 + $0x28] sm:$0xff] %v11191_v57 }
0x212d   : > { %11248 = vst [vmem:[%s19460_s7 + $0x20] sm:$0xff] %v11186_v3 }
0x2130   : > { %v15032_v60 = vpop.f32.mrb[158].mxu0 }
0x2131   : > { %v11201_v52 = vadd.f32 %v15032_v60, %v11042_v17  ;;  %v11195_v18 = vpop.f32.mrb[159].mxu0 }
0x2132   : > { %v11196_v32 = vadd.f32 %v11195_v18, %v11041_v26 }
0x2133   : > { %11251 = vst [vmem:[%s19460_s7 + $0x38] sm:$0xff] %v11201_v52 }
0x2134   : > { %11250 = vst [vmem:[%s19460_s7 + $0x30] sm:$0xff] %v11196_v32 }
0x2138   : > { %v15035_v44 = vpop.f32.mrb[160].mxu0 }
0x2139   : > { %v11211_v59 = vadd.f32 %v15035_v44, %v11044_v22  ;;  %v11205_v16 = vpop.f32.mrb[161].mxu0 }
0x213a   : > { %v11206_v40 = vadd.f32 %v11205_v16, %v11043_v39 }
0x213b   : > { %11253 = vst [vmem:[%s19460_s7 + $0x48] sm:$0xff] %v11211_v59 }
0x213c   : > { %11252 = vst [vmem:[%s19460_s7 + $0x40] sm:$0xff] %v11206_v40 }
0x213f   : > { %v15038_v9 = vpop.f32.mrb[162].mxu0 }
0x2140   : > { %v11221_v5 = vadd.f32 %v15038_v9, %v11046_v29  ;;  %v11215_v19 = vpop.f32.mrb[163].mxu0 }
0x2141   : > { %v11216_v35 = vadd.f32 %v11215_v19, %v11045_v48 }
0x2142   : > { %11255 = vst [vmem:[%s19460_s7 + $0x58] sm:$0xff] %v11221_v5 }
0x2143   : > { %11254 = vst [vmem:[%s19460_s7 + $0x50] sm:$0xff] %v11216_v35 }
0x2147   : > { %v15041_v27 = vpop.f32.mrb[164].mxu0 }
0x2148   : > { %v11231_v14 = vadd.f32 %v15041_v27, %v11048_v63  ;;  %v11225_v6 = vpop.f32.mrb[165].mxu0 }
0x2149   : > { %v11226_v62 = vadd.f32 %v11225_v6, %v11047_v37 }
0x214a   : > { %11257 = vst [vmem:[%s19460_s7 + $0x68] sm:$0xff] %v11231_v14 }
0x214b   : > { %11256 = vst [vmem:[%s19460_s7 + $0x60] sm:$0xff] %v11226_v62 }
0x214e   : > { %v15044_v54 = vpop.f32.mrb[166].mxu0 }
0x214f   : > { %v11241_v7 = vadd.f32 %v15044_v54, %v11050_v30  ;;  %v11235_v50 = vpop.f32.mrb[167].mxu0 }
0x2150   : > { %v11236_v23 = vadd.f32 %v11235_v50, %v11049_v61 }
0x2151   : > { %11259 = vst [vmem:[%s19460_s7 + $0x78] sm:$0xff] %v11241_v7 }
0x2152   : > { %11258 = vst [vmem:[%s19460_s7 + $0x70] sm:$0xff] %v11236_v23 }
0x2153 PF: > { %s16_s15 = sadd.s32 1, %s16735_s15  }
0x2154   : > { %p13_p5 = scmp.ge.s32.totalorder %s16_s15, 4  }
0x2156   :  { %15 = sbr.rel (!%p13_p5) target bundleno = 2 (0x2), region = 79 }
0x215d   :  { %11282 = vsyncpa [#allocation3], 1 }
0x215e   :  { %11284 = vsyncpa [#allocation3 + $0x1], 1 }
0x215f   :  { %11285 = vsyncpa [#allocation5], 1 }

</bundles_post_ra>
